<compile_context>
chip_gen: v6e
topology: v6e:2x2x1
jax: 0.10.0
libtpu: 0.0.40
codegen_flags: <defaults>
</compile_context>

<pallas_src>
import jax
import jax.numpy as jnp
from jax.experimental import pallas as pl
from jax.experimental.pallas import tpu as pltpu


def encoder_kernel(x_ref, w1_ref, w2_ref, o_ref, h1p_ref):
    """x_ref: (N, H+2, W+2, 1) zero-padded input, channels-last, f32.
    w1_ref: (9*1+1, C1) bf16   conv1 weights with bias folded as last K row.
    w2_ref: (9*C1+1, C2) bf16  conv2 weights with bias folded as last K row.
    o_ref:  (N, H-2, W-2, C2)  uncompacted stage-2 output (valid at (4r, 4s)).
    h1p_ref: bf16 VMEM scratch (N, H+4, W+4, C1) holding the zero-padded,
             uncompacted stage-1 result.
    """
    n, hp, wp, _ = x_ref.shape
    h, w = hp - 2, wp - 2                      # conv1 output resolution (16,16)
    c1 = w1_ref.shape[1]
    c2 = w2_ref.shape[1]
    f32 = jnp.float32
    bf16 = jnp.bfloat16

    # ---------------- stage 1: conv1 3x3/pad1 as a single MXU matmul --------
    ones1 = jnp.ones((n, h, w, 1), f32)        # bias column (bias folded in W)
    taps1 = [x_ref[:, dy:dy + h, dx:dx + w, :]
             for dy in range(3) for dx in range(3)]
    p1 = jnp.concatenate(taps1 + [ones1], axis=-1)            # (n,h,w,10)
    p1 = p1.reshape(n * h * w, 9 + 1)                         # layout-preserving
    y1 = jnp.dot(p1.astype(bf16), w1_ref[...],
                 preferred_element_type=f32)                  # (n*h*w, c1)
    y1 = y1.reshape(n, h, w, c1)

    # MaxPool2d(2,2) without compaction: pooled (p,q) sits at (2p,2q).
    # Bias already inside the matmul; ReLU hoisted after the max (monotone).
    m1 = jnp.maximum(y1[:, :h - 1], y1[:, 1:h])               # (n,h-1,w,c1)
    m1 = jnp.maximum(m1[:, :, :w - 1], m1[:, :, 1:w])         # (n,h-1,w-1,c1)
    h1 = jnp.maximum(m1, 0.0)

    # Park stage-1 result in a zero-padded bf16 scratch: pooled (p,q) maps to
    # (2p+2, 2q+2).  bf16 here is lossless relative to the previous revision:
    # the same cast happened right before the stage-2 matmul anyway.
    h1p_ref[...] = jnp.zeros(h1p_ref.shape, h1p_ref.dtype)
    h1p_ref[:, 2:h + 1, 2:w + 1, :] = h1.astype(bf16)

    # ---------------- stage 2: conv2 == dilation-2 conv on the uncompacted
    # grid -> contiguous, even-offset slices only; single MXU matmul. --------
    ones2 = jnp.ones((n, h, w, 1), bf16)
    taps2 = [h1p_ref[:, 2 * dy:2 * dy + h, 2 * dx:2 * dx + w, :]
             for dy in range(3) for dx in range(3)]
    p2 = jnp.concatenate(taps2 + [ones2], axis=-1)            # (n,h,w,9*c1+1) bf16
    p2 = p2.reshape(n * h * w, 9 * c1 + 1)
    y2 = jnp.dot(p2, w2_ref[...],
                 preferred_element_type=f32)                  # (n*h*w, c2)
    y2 = y2.reshape(n, h, w, c2)

    # Second MaxPool2d(2,2): window elements are 2 apart on this grid.
    m2 = jnp.maximum(y2[:, :h - 2], y2[:, 2:h])               # (n,h-2,w,c2)
    m2 = jnp.maximum(m2[:, :, :w - 2], m2[:, :, 2:w])         # (n,h-2,w-2,c2)
    o_ref[...] = jnp.maximum(m2, 0.0)                         # valid at (4r,4s)


def encoder_pallas(xpad_cl, w1aug, w2aug):
    n, hp, wp, _ = xpad_cl.shape
    h, w = hp - 2, wp - 2
    c1 = w1aug.shape[1]
    c2 = w2aug.shape[1]
    return pl.pallas_call(
        encoder_kernel,
        out_shape=jax.ShapeDtypeStruct((n, h - 2, w - 2, c2), jnp.float32),
        grid=(1,),
        in_specs=[
            pl.BlockSpec((n, hp, wp, 1), lambda i: (0, 0, 0, 0)),
            pl.BlockSpec(w1aug.shape, lambda i: (0, 0)),
            pl.BlockSpec(w2aug.shape, lambda i: (0, 0)),
        ],
        out_specs=pl.BlockSpec((n, h - 2, w - 2, c2), lambda i: (0, 0, 0, 0)),
        scratch_shapes=[pltpu.VMEM((n, h + 4, w + 4, c1), jnp.bfloat16)],
        compiler_params=pltpu.CompilerParams(
            dimension_semantics=("arbitrary",)),
    )(xpad_cl, w1aug, w2aug)


def encoder_forward(x, params):
    """x: (N, 1, H, W) NCHW float32 -> (N, 4, H//4, W//4) NCHW float32."""
    n, _, h, w = x.shape
    c1 = params["conv1_w"].shape[0]
    c2 = params["conv2_w"].shape[0]

    # Tiny wrapper-side prep: zero-pad + channels-last for the input,
    # (dy,dx,ci)-major re-layout of the weights with bias folded as an extra
    # K row, cast to bf16 (f32 accumulation happens in the kernel).
    xpad = jnp.pad(x, ((0, 0), (0, 0), (1, 1), (1, 1)))       # (N,1,H+2,W+2)
    xpad = jnp.transpose(xpad, (0, 2, 3, 1))                  # (N,H+2,W+2,1)

    w1 = jnp.transpose(params["conv1_w"], (2, 3, 1, 0)).reshape(9, c1)
    w1 = jnp.concatenate([w1, params["conv1_b"].reshape(1, c1)], axis=0)
    w2 = jnp.transpose(params["conv2_w"], (2, 3, 1, 0)).reshape(9 * c1, c2)
    w2 = jnp.concatenate([w2, params["conv2_b"].reshape(1, c2)], axis=0)

    out_full = encoder_pallas(xpad, w1.astype(jnp.bfloat16),
                              w2.astype(jnp.bfloat16))        # (N,H-2,W-2,C2)

    # Valid outputs live at every 4th grid point of the uncompacted result.
    out = out_full[:, ::4, ::4, :]                            # (N,H//4,W//4,C2)
    return jnp.transpose(out, (0, 3, 1, 2))                   # NCHW


def reference_stage(x, w, b):
    """Pure-JAX f32 reference for conv3x3(pad=1) + ReLU + MaxPool2d(2,2)."""
    y = jax.lax.conv_general_dilated(
        x, w, window_strides=(1, 1), padding=((1, 1), (1, 1)),
        dimension_numbers=("NCHW", "OIHW", "NCHW"))
    y = jnp.maximum(y + b[None, :, None, None], 0.0)
    return jax.lax.reduce_window(y, -jnp.inf, jax.lax.max,
                                 (1, 1, 2, 2), (1, 1, 2, 2), "VALID")


if __name__ == "__main__":
    key = jax.random.PRNGKey(0)
    k1, k2, k3, k4, kx = jax.random.split(key, 5)

    # Deterministic params mimicking PyTorch's U(-1/sqrt(fan_in), +...).
    # TODO(synk): t_conv1 / t_conv2 params are unused in forward, so not materialized.
    params = {
        "conv1_w": jax.random.uniform(k1, (16, 1, 3, 3), jnp.float32, -1.0 / 3, 1.0 / 3),
        "conv1_b": jax.random.uniform(k2, (16,), jnp.float32, -1.0 / 3, 1.0 / 3),
        "conv2_w": jax.random.uniform(k3, (4, 16, 3, 3), jnp.float32, -1.0 / 12, 1.0 / 12),
        "conv2_b": jax.random.uniform(k4, (4,), jnp.float32, -1.0 / 12, 1.0 / 12),
    }

    # Input matches nn.Conv2d(1, 16, ...): single-channel NCHW images.
    x = jax.random.normal(kx, (2, 1, 16, 16), jnp.float32)

    fwd = jax.jit(encoder_forward)
    out = jax.block_until_ready(fwd(x, params))
    assert out.shape == (2, 4, 4, 4), out.shape

    ref = reference_stage(
        reference_stage(x, params["conv1_w"], params["conv1_b"]),
        params["conv2_w"], params["conv2_b"])
    max_err = float(jnp.max(jnp.abs(out - ref)))
    # bf16 matmul inputs with f32 accumulation -> loose-ish tolerance.
    assert jnp.allclose(out, ref, atol=2e-2, rtol=2e-2), max_err

    print("KERNEL_OK")
</pallas_src>

<mosaic_0001>
module attributes {stable_mosaic.version = 11 : i64} {
  func.func @encoder_kernel(%arg0: i32, %arg1: memref<2x18x18x1xf32, #tpu.memory_space<vmem>>, %arg2: memref<10x16xbf16, #tpu.memory_space<vmem>>, %arg3: memref<145x4xbf16, #tpu.memory_space<vmem>>, %arg4: memref<2x14x14x4xf32, #tpu.memory_space<vmem>>, %arg5: memref<2x20x20x16xbf16, #tpu.memory_space<vmem>>) attributes {dimension_semantics = [#tpu.dimension_semantics<arbitrary>], iteration_bounds = array<i64: 1>, scalar_prefetch = 0 : i64, scratch_operands = 1 : i64, tpu.core_type = #tpu.core_type<tc>, window_params = [{pipeline_mode = #tpu.pipeline_mode<synchronous>, transform_indices = @transform_0, window_bounds = array<i64: 2, 18, 18, 1>}, {pipeline_mode = #tpu.pipeline_mode<synchronous>, transform_indices = @transform_1, window_bounds = array<i64: 10, 16>}, {pipeline_mode = #tpu.pipeline_mode<synchronous>, transform_indices = @transform_2, window_bounds = array<i64: 145, 4>}, {pipeline_mode = #tpu.pipeline_mode<synchronous>, transform_indices = @transform_3, window_bounds = array<i64: 2, 14, 14, 4>}]} {
    %cst = arith.constant 1.000000e+00 : f32
    %0 = vector.broadcast %cst : f32 to vector<2x16x16x1xf32>
    %c0 = arith.constant 0 : index
    %c0_0 = arith.constant 0 : index
    %c0_1 = arith.constant 0 : index
    %c0_2 = arith.constant 0 : index
    %1 = vector.load %arg1[%c0, %c0_0, %c0_1, %c0_2] : memref<2x18x18x1xf32, #tpu.memory_space<vmem>>, vector<2x16x16x1xf32>
    %c0_3 = arith.constant 0 : index
    %c0_4 = arith.constant 0 : index
    %c1 = arith.constant 1 : index
    %c0_5 = arith.constant 0 : index
    %2 = vector.load %arg1[%c0_3, %c0_4, %c1, %c0_5] : memref<2x18x18x1xf32, #tpu.memory_space<vmem>>, vector<2x16x16x1xf32>
    %c0_6 = arith.constant 0 : index
    %c0_7 = arith.constant 0 : index
    %c2 = arith.constant 2 : index
    %c0_8 = arith.constant 0 : index
    %3 = vector.load %arg1[%c0_6, %c0_7, %c2, %c0_8] : memref<2x18x18x1xf32, #tpu.memory_space<vmem>>, vector<2x16x16x1xf32>
    %c0_9 = arith.constant 0 : index
    %c1_10 = arith.constant 1 : index
    %c0_11 = arith.constant 0 : index
    %c0_12 = arith.constant 0 : index
    %4 = vector.load %arg1[%c0_9, %c1_10, %c0_11, %c0_12] : memref<2x18x18x1xf32, #tpu.memory_space<vmem>>, vector<2x16x16x1xf32>
    %c0_13 = arith.constant 0 : index
    %c1_14 = arith.constant 1 : index
    %c1_15 = arith.constant 1 : index
    %c0_16 = arith.constant 0 : index
    %5 = vector.load %arg1[%c0_13, %c1_14, %c1_15, %c0_16] : memref<2x18x18x1xf32, #tpu.memory_space<vmem>>, vector<2x16x16x1xf32>
    %c0_17 = arith.constant 0 : index
    %c1_18 = arith.constant 1 : index
    %c2_19 = arith.constant 2 : index
    %c0_20 = arith.constant 0 : index
    %6 = vector.load %arg1[%c0_17, %c1_18, %c2_19, %c0_20] : memref<2x18x18x1xf32, #tpu.memory_space<vmem>>, vector<2x16x16x1xf32>
    %c0_21 = arith.constant 0 : index
    %c2_22 = arith.constant 2 : index
    %c0_23 = arith.constant 0 : index
    %c0_24 = arith.constant 0 : index
    %7 = vector.load %arg1[%c0_21, %c2_22, %c0_23, %c0_24] : memref<2x18x18x1xf32, #tpu.memory_space<vmem>>, vector<2x16x16x1xf32>
    %c0_25 = arith.constant 0 : index
    %c2_26 = arith.constant 2 : index
    %c1_27 = arith.constant 1 : index
    %c0_28 = arith.constant 0 : index
    %8 = vector.load %arg1[%c0_25, %c2_26, %c1_27, %c0_28] : memref<2x18x18x1xf32, #tpu.memory_space<vmem>>, vector<2x16x16x1xf32>
    %c0_29 = arith.constant 0 : index
    %c2_30 = arith.constant 2 : index
    %c2_31 = arith.constant 2 : index
    %c0_32 = arith.constant 0 : index
    %9 = vector.load %arg1[%c0_29, %c2_30, %c2_31, %c0_32] : memref<2x18x18x1xf32, #tpu.memory_space<vmem>>, vector<2x16x16x1xf32>
    %10 = tpu.concatenate %1, %2, %3, %4, %5, %6, %7, %8, %9, %0 in 3 : vector<2x16x16x1xf32>, vector<2x16x16x1xf32>, vector<2x16x16x1xf32>, vector<2x16x16x1xf32>, vector<2x16x16x1xf32>, vector<2x16x16x1xf32>, vector<2x16x16x1xf32>, vector<2x16x16x1xf32>, vector<2x16x16x1xf32>, vector<2x16x16x1xf32> -> vector<2x16x16x10xf32>
    %11 = vector.shape_cast %10 : vector<2x16x16x10xf32> to vector<512x10xf32>
    %12 = arith.truncf %11 : vector<512x10xf32> to vector<512x10xbf16>
    %c0_33 = arith.constant 0 : index
    %c0_34 = arith.constant 0 : index
    %13 = vector.load %arg2[%c0_33, %c0_34] : memref<10x16xbf16, #tpu.memory_space<vmem>>, vector<10x16xbf16>
    %cst_35 = arith.constant dense<0.000000e+00> : vector<512x16xf32>
    %14 = tpu.matmul %12, %13, %cst_35 {dimension_numbers = #tpu.dot_dimension_numbers<[1], [0], [0], [1], [0, 0, 1, 1], [], []>} : vector<512x10xbf16>, vector<10x16xbf16>, vector<512x16xf32> -> vector<512x16xf32>
    %15 = vector.shape_cast %14 : vector<512x16xf32> to vector<2x16x16x16xf32>
    %16 = vector.extract_strided_slice %15 {offsets = [0, 0, 0, 0], sizes = [2, 15, 16, 16], strides = [1, 1, 1, 1]} : vector<2x16x16x16xf32> to vector<2x15x16x16xf32>
    %17 = vector.extract_strided_slice %15 {offsets = [0, 1, 0, 0], sizes = [2, 15, 16, 16], strides = [1, 1, 1, 1]} : vector<2x16x16x16xf32> to vector<2x15x16x16xf32>
    %18 = arith.maximumf %16, %17 : vector<2x15x16x16xf32>
    %19 = vector.extract_strided_slice %18 {offsets = [0, 0, 0, 0], sizes = [2, 15, 15, 16], strides = [1, 1, 1, 1]} : vector<2x15x16x16xf32> to vector<2x15x15x16xf32>
    %20 = vector.extract_strided_slice %18 {offsets = [0, 0, 1, 0], sizes = [2, 15, 15, 16], strides = [1, 1, 1, 1]} : vector<2x15x16x16xf32> to vector<2x15x15x16xf32>
    %21 = arith.maximumf %19, %20 : vector<2x15x15x16xf32>
    %cst_36 = arith.constant 0.000000e+00 : f32
    %22 = vector.broadcast %cst_36 : f32 to vector<2x15x15x16xf32>
    %23 = arith.maximumf %21, %22 : vector<2x15x15x16xf32>
    %cst_37 = arith.constant 0.000000e+00 : bf16
    %24 = vector.broadcast %cst_37 : bf16 to vector<2x20x20x16xbf16>
    %c0_38 = arith.constant 0 : index
    %c0_39 = arith.constant 0 : index
    %c0_40 = arith.constant 0 : index
    %c0_41 = arith.constant 0 : index
    %25 = vector.load %arg5[%c0_38, %c0_39, %c0_40, %c0_41] : memref<2x20x20x16xbf16, #tpu.memory_space<vmem>>, vector<2x20x20x16xbf16>
    tpu.vector_store %arg5[%c0_38, %c0_39, %c0_40, %c0_41], %24 {strides = array<i32>} : memref<2x20x20x16xbf16, #tpu.memory_space<vmem>>, vector<2x20x20x16xbf16>,
    %26 = arith.truncf %23 : vector<2x15x15x16xf32> to vector<2x15x15x16xbf16>
    %c0_42 = arith.constant 0 : index
    %c2_43 = arith.constant 2 : index
    %c2_44 = arith.constant 2 : index
    %c0_45 = arith.constant 0 : index
    %27 = vector.load %arg5[%c0_42, %c2_43, %c2_44, %c0_45] : memref<2x20x20x16xbf16, #tpu.memory_space<vmem>>, vector<2x15x15x16xbf16>
    tpu.vector_store %arg5[%c0_42, %c2_43, %c2_44, %c0_45], %26 {strides = array<i32>} : memref<2x20x20x16xbf16, #tpu.memory_space<vmem>>, vector<2x15x15x16xbf16>,
    %cst_46 = arith.constant 1.000000e+00 : bf16
    %28 = vector.broadcast %cst_46 : bf16 to vector<2x16x16x1xbf16>
    %c0_47 = arith.constant 0 : index
    %c0_48 = arith.constant 0 : index
    %c0_49 = arith.constant 0 : index
    %c0_50 = arith.constant 0 : index
    %29 = vector.load %arg5[%c0_47, %c0_48, %c0_49, %c0_50] : memref<2x20x20x16xbf16, #tpu.memory_space<vmem>>, vector<2x16x16x16xbf16>
    %c0_51 = arith.constant 0 : index
    %c0_52 = arith.constant 0 : index
    %c2_53 = arith.constant 2 : index
    %c0_54 = arith.constant 0 : index
    %30 = vector.load %arg5[%c0_51, %c0_52, %c2_53, %c0_54] : memref<2x20x20x16xbf16, #tpu.memory_space<vmem>>, vector<2x16x16x16xbf16>
    %c0_55 = arith.constant 0 : index
    %c0_56 = arith.constant 0 : index
    %c4 = arith.constant 4 : index
    %c0_57 = arith.constant 0 : index
    %31 = vector.load %arg5[%c0_55, %c0_56, %c4, %c0_57] : memref<2x20x20x16xbf16, #tpu.memory_space<vmem>>, vector<2x16x16x16xbf16>
    %c0_58 = arith.constant 0 : index
    %c2_59 = arith.constant 2 : index
    %c0_60 = arith.constant 0 : index
    %c0_61 = arith.constant 0 : index
    %32 = vector.load %arg5[%c0_58, %c2_59, %c0_60, %c0_61] : memref<2x20x20x16xbf16, #tpu.memory_space<vmem>>, vector<2x16x16x16xbf16>
    %c0_62 = arith.constant 0 : index
    %c2_63 = arith.constant 2 : index
    %c2_64 = arith.constant 2 : index
    %c0_65 = arith.constant 0 : index
    %33 = vector.load %arg5[%c0_62, %c2_63, %c2_64, %c0_65] : memref<2x20x20x16xbf16, #tpu.memory_space<vmem>>, vector<2x16x16x16xbf16>
    %c0_66 = arith.constant 0 : index
    %c2_67 = arith.constant 2 : index
    %c4_68 = arith.constant 4 : index
    %c0_69 = arith.constant 0 : index
    %34 = vector.load %arg5[%c0_66, %c2_67, %c4_68, %c0_69] : memref<2x20x20x16xbf16, #tpu.memory_space<vmem>>, vector<2x16x16x16xbf16>
    %c0_70 = arith.constant 0 : index
    %c4_71 = arith.constant 4 : index
    %c0_72 = arith.constant 0 : index
    %c0_73 = arith.constant 0 : index
    %35 = vector.load %arg5[%c0_70, %c4_71, %c0_72, %c0_73] : memref<2x20x20x16xbf16, #tpu.memory_space<vmem>>, vector<2x16x16x16xbf16>
    %c0_74 = arith.constant 0 : index
    %c4_75 = arith.constant 4 : index
    %c2_76 = arith.constant 2 : index
    %c0_77 = arith.constant 0 : index
    %36 = vector.load %arg5[%c0_74, %c4_75, %c2_76, %c0_77] : memref<2x20x20x16xbf16, #tpu.memory_space<vmem>>, vector<2x16x16x16xbf16>
    %c0_78 = arith.constant 0 : index
    %c4_79 = arith.constant 4 : index
    %c4_80 = arith.constant 4 : index
    %c0_81 = arith.constant 0 : index
    %37 = vector.load %arg5[%c0_78, %c4_79, %c4_80, %c0_81] : memref<2x20x20x16xbf16, #tpu.memory_space<vmem>>, vector<2x16x16x16xbf16>
    %38 = tpu.concatenate %29, %30, %31, %32, %33, %34, %35, %36, %37, %28 in 3 : vector<2x16x16x16xbf16>, vector<2x16x16x16xbf16>, vector<2x16x16x16xbf16>, vector<2x16x16x16xbf16>, vector<2x16x16x16xbf16>, vector<2x16x16x16xbf16>, vector<2x16x16x16xbf16>, vector<2x16x16x16xbf16>, vector<2x16x16x16xbf16>, vector<2x16x16x1xbf16> -> vector<2x16x16x145xbf16>
    %39 = vector.shape_cast %38 : vector<2x16x16x145xbf16> to vector<512x145xbf16>
    %c0_82 = arith.constant 0 : index
    %c0_83 = arith.constant 0 : index
    %40 = vector.load %arg3[%c0_82, %c0_83] : memref<145x4xbf16, #tpu.memory_space<vmem>>, vector<145x4xbf16>
    %cst_84 = arith.constant dense<0.000000e+00> : vector<512x4xf32>
    %41 = tpu.matmul %39, %40, %cst_84 {dimension_numbers = #tpu.dot_dimension_numbers<[1], [0], [0], [1], [0, 0, 1, 1], [], []>} : vector<512x145xbf16>, vector<145x4xbf16>, vector<512x4xf32> -> vector<512x4xf32>
    %42 = vector.shape_cast %41 : vector<512x4xf32> to vector<2x16x16x4xf32>
    %43 = vector.extract_strided_slice %42 {offsets = [0, 0, 0, 0], sizes = [2, 14, 16, 4], strides = [1, 1, 1, 1]} : vector<2x16x16x4xf32> to vector<2x14x16x4xf32>
    %44 = vector.extract_strided_slice %42 {offsets = [0, 2, 0, 0], sizes = [2, 14, 16, 4], strides = [1, 1, 1, 1]} : vector<2x16x16x4xf32> to vector<2x14x16x4xf32>
    %45 = arith.maximumf %43, %44 : vector<2x14x16x4xf32>
    %46 = vector.extract_strided_slice %45 {offsets = [0, 0, 0, 0], sizes = [2, 14, 14, 4], strides = [1, 1, 1, 1]} : vector<2x14x16x4xf32> to vector<2x14x14x4xf32>
    %47 = vector.extract_strided_slice %45 {offsets = [0, 0, 2, 0], sizes = [2, 14, 14, 4], strides = [1, 1, 1, 1]} : vector<2x14x16x4xf32> to vector<2x14x14x4xf32>
    %48 = arith.maximumf %46, %47 : vector<2x14x14x4xf32>
    %cst_85 = arith.constant 0.000000e+00 : f32
    %49 = vector.broadcast %cst_85 : f32 to vector<2x14x14x4xf32>
    %50 = arith.maximumf %48, %49 : vector<2x14x14x4xf32>
    %c0_86 = arith.constant 0 : index
    %c0_87 = arith.constant 0 : index
    %c0_88 = arith.constant 0 : index
    %c0_89 = arith.constant 0 : index
    %51 = vector.load %arg4[%c0_86, %c0_87, %c0_88, %c0_89] : memref<2x14x14x4xf32, #tpu.memory_space<vmem>>, vector<2x14x14x4xf32>
    tpu.vector_store %arg4[%c0_86, %c0_87, %c0_88, %c0_89], %50 {strides = array<i32>} : memref<2x14x14x4xf32, #tpu.memory_space<vmem>>, vector<2x14x14x4xf32>,
    return
  }
  func.func @transform_0(%arg0: i32) -> (i32, i32, i32, i32) {
    %c0_i32 = arith.constant 0 : i32
    %c0_i32_0 = arith.constant 0 : i32
    %c0_i32_1 = arith.constant 0 : i32
    %c0_i32_2 = arith.constant 0 : i32
    %c0_i32_3 = arith.constant 0 : i32
    return %c0_i32, %c0_i32_0, %c0_i32_1, %c0_i32_2 : i32, i32, i32, i32
  }
  func.func @transform_1(%arg0: i32) -> (i32, i32) {
    %c0_i32 = arith.constant 0 : i32
    %c0_i32_0 = arith.constant 0 : i32
    %c0_i32_1 = arith.constant 0 : i32
    return %c0_i32, %c0_i32_0 : i32, i32
  }
  func.func @transform_2(%arg0: i32) -> (i32, i32) {
    %c0_i32 = arith.constant 0 : i32
    %c0_i32_0 = arith.constant 0 : i32
    %c0_i32_1 = arith.constant 0 : i32
    return %c0_i32, %c0_i32_0 : i32, i32
  }
  func.func @transform_3(%arg0: i32) -> (i32, i32, i32, i32) {
    %c0_i32 = arith.constant 0 : i32
    %c0_i32_0 = arith.constant 0 : i32
    %c0_i32_1 = arith.constant 0 : i32
    %c0_i32_2 = arith.constant 0 : i32
    %c0_i32_3 = arith.constant 0 : i32
    return %c0_i32, %c0_i32_0, %c0_i32_1, %c0_i32_2 : i32, i32, i32, i32
  }
}

</mosaic_0001>

<bundles_post_ra>
// kernel: encoder_forward.1
= control target key start
LH: loop header
LB: loop body
LE: loop exit
PB: predicated region body
PF: predicated region fallthrough
CT: control target
= control target key end

     0   :  { %s12409_s28 = smov 1   ;;  %s12410_s26 = smov 2   ;;  %vm2642_vm0 = vcmask 7168   ;;  %vm2707_vm1 = vcmask 15360   ;;  %vm2772_vm2 = vcmask 23552   ;;  %vm3363_vm3 = vcmask 1044480   ;;  %s19081_s0 = inlined_call_operand.vmem [shape: f32[2,18,18,1], index: 0, kind: input, shape index: {}]   ;;  %s19082_s1 = inlined_call_operand.vmem [shape: bf16[10,16], index: 1, kind: input, shape index: {}]   ;;  %s19083_s2 = inlined_call_operand.vmem [shape: bf16[145,4], index: 2, kind: input, shape index: {}]   ;;  %s19084_s3 = inlined_call_operand.vmem [shape: f32[2,14,14,4], index: 3, kind: output, shape index: {}]  }
   0x1   :  { %v84_v0 = vld [vmem:[%s19081_s0 + $0x31] sm:$0xff]  ;;  %v85_v1 = vld [vmem:[%s19081_s0 + $0x39] sm:$0xff]  ;;  %v80_v2 = vld [vmem:[%s19081_s0 + $0x1] sm:$0xff]  ;;  %s12415_s15 = smov 7   ;;  %s12416_s7 = smov 8   ;;  %vm2837_vm4 = vcmask 31744  }
   0x2   :  { %v10633_v3 = vpack.i.bf16 %v85_v1, %v84_v0  ;;  %v81_v4 = vld [vmem:[%s19081_s0 + $0x9] sm:$0xff]  ;;  %v87_v6 = vld [vmem:[%s19081_s0 + $0x51] sm:$0xff]  ;;  %v82_v8 = vld [vmem:[%s19081_s0 + $0x19] sm:$0xff]  ;;  %vm2902_vm5 = vcmask 39936   ;;  %vm2967_vm6 = vcmask 48128   ;;  %vm3032_vm7 = vcmask 56320  }
   0x3   :  { %v86_v5 = vld [vmem:[%s19081_s0 + $0x49] sm:$0xff]  ;;  %v10623_v7 = vpack.i.bf16 %v81_v4, %v80_v2  ;;  %v83_v9 = vld [vmem:[%s19081_s0 + $0x21] sm:$0xff]  ;;  %v90_v12 = vld [vmem:[%s19081_s0 + $0x79] sm:$0xff]  ;;  %vm3097_vm8 = vcmask 64512   ;;  %vm3162_vm9 = vcmask 72704   ;;  %vm3266_vm10 = vcmask 80896  }
   0x4   :  { %10634 = vrot.lane.b32.xlu1 %v10633_v3, %s12409_s28  ;;  %v10638_v10 = vpack.i.bf16 %v87_v6, %v86_v5  ;;  %v10628_v11 = vpack.i.bf16 %v83_v9, %v82_v8  ;;  %v91_v13 = vld [vmem:[%s19081_s0 + $0x81] sm:$0xff]  ;;  %v89_v15 = vld [vmem:[%s19081_s0 + $0x69] sm:$0xff]  ;;  %v95_v19 = vld [vmem:[%s19081_s0 + $0xb1] sm:$0xff]  ;;  %vm4047_vm11 = vcmask 125952   ;;  %vm4050_vm12 = vcmask 123904   ;;  %s12419_s18 = smov 32  }
   0x5   :  { %10624 = vrot.lane.b32.xlu0 %v10623_v7, %s12409_s28  ;;  %v88_v14 = vld [vmem:[%s19081_s0 + $0x61] sm:$0xff]  ;;  %v10648_v16 = vpack.i.bf16 %v91_v13, %v90_v12  ;;  %v94_v18 = vld [vmem:[%s19081_s0 + $0xa9] sm:$0xff]  ;;  %v92_v20 = vld [vmem:[%s19081_s0 + $0x91] sm:$0xff]  ;;  %vm3776_vm13 = vcmask 1046528   ;;  %vm4349_vm14 = vcmask 1040384   ;;  %vm4596_vm15 = vcmask 122880  }
   0x6   :  { %v10643_v17 = vpack.i.bf16 %v89_v15, %v88_v14  ;;  %v93_v21 = vld [vmem:[%s19081_s0 + $0x99] sm:$0xff]  ;;  %v10658_v22 = vpack.i.bf16 %v95_v19, %v94_v18  ;;  %v99_v25 = vld [vmem:[%s19081_s0 + $0xe1] sm:$0xff]  ;;  %v97_v27 = vld [vmem:[%s19081_s0 + $0xc9] sm:$0xff]  ;;  %s12420_s23 = smov 48   ;;  %s12421_s24 = smov 64  }
   0x7   :  { %v10653_v23 = vpack.i.bf16 %v93_v21, %v92_v20  ;;  %v98_v24 = vld [vmem:[%s19081_s0 + $0xd9] sm:$0xff]  ;;  %v96_v26 = vld [vmem:[%s19081_s0 + $0xc1] sm:$0xff]  ;;  %v102_v30 = vld [vmem:[%s19081_s0 + $0x109] sm:$0xff]  ;;  %s12422_s27 = smov 80   ;;  %s12423_s29 = smov 96  }
   0x8   :  { %10639 = vrot.lane.b32.xlu1 %v10638_v10, %s12409_s28  ;;  %v10668_v28 = vpack.i.bf16 %v99_v25, %v98_v24  ;;  %v10663_v29 = vpack.i.bf16 %v97_v27, %v96_v26  ;;  %v103_v31 = vld [vmem:[%s19081_s0 + $0x111] sm:$0xff]  ;;  %v101_v33 = vld [vmem:[%s19081_s0 + $0xf9] sm:$0xff]  ;;  %v107_v37 = vld [vmem:[%s19081_s0 + $0x141] sm:$0xff]  ;;  %s12424_s5 = smov 112  }
   0x9   :  { %10629 = vrot.lane.b32.xlu0 %v10628_v11, %s12409_s28  ;;  %v100_v32 = vld [vmem:[%s19081_s0 + $0xf1] sm:$0xff]  ;;  %v10678_v34 = vpack.i.bf16 %v103_v31, %v102_v30  ;;  %v106_v36 = vld [vmem:[%s19081_s0 + $0x139] sm:$0xff]  ;;  %v104_v38 = vld [vmem:[%s19081_s0 + $0x121] sm:$0xff] }
   0xa   :  { %v10673_v35 = vpack.i.bf16 %v101_v33, %v100_v32  ;;  %v105_v39 = vld [vmem:[%s19081_s0 + $0x129] sm:$0xff]  ;;  %v10688_v40 = vpack.i.bf16 %v107_v37, %v106_v36  ;;  %v111_v43 = vld [vmem:[%s19081_s0 + $0x171] sm:$0xff]  ;;  %v109_v45 = vld [vmem:[%s19081_s0 + $0x159] sm:$0xff] }
   0xb   :  { %v10683_v41 = vpack.i.bf16 %v105_v39, %v104_v38  ;;  %v110_v42 = vld [vmem:[%s19081_s0 + $0x169] sm:$0xff]  ;;  %v108_v44 = vld [vmem:[%s19081_s0 + $0x151] sm:$0xff]  ;;  %v113_v51 = vld [vmem:[%s19081_s0 + $0x1b9] sm:$0xff] }
   0xc   :  { %10649 = vrot.lane.b32.xlu1 %v10648_v16, %s12409_s28  ;;  %v10698_v46 = vpack.i.bf16 %v111_v43, %v110_v42  ;;  %v10693_v47 = vpack.i.bf16 %v109_v45, %v108_v44  ;;  %v114_v48 = vld [vmem:[%s19081_s0 + $0x1c9] sm:$0xff]  ;;  %v115_v49 = vld [vmem:[%s19081_s0 + $0x1d1] sm:$0xff]  ;;  %v118_v54 = vld [vmem:[%s19081_s0 + $0x1f9] sm:$0xff] }
   0xd   :  { %10644 = vrot.lane.b32.xlu0 %v10643_v17, %s12409_s28  ;;  %v112_v50 = vld [vmem:[%s19081_s0 + $0x1b1] sm:$0xff]  ;;  %v10708_v52 = vpack.i.bf16 %v115_v49, %v114_v48  ;;  %v119_v55 = vld [vmem:[%s19081_s0 + $0x201] sm:$0xff]  ;;  %v117_v57 = vld [vmem:[%s19081_s0 + $0x1e9] sm:$0xff] }
   0xe   :  { %v10703_v53 = vpack.i.bf16 %v113_v51, %v112_v50  ;;  %v116_v56 = vld [vmem:[%s19081_s0 + $0x1e1] sm:$0xff]  ;;  %v10718_v58 = vpack.i.bf16 %v119_v55, %v118_v54  ;;  %v122_v60 = vld [vmem:[%s19081_s0 + $0x229] sm:$0xff]  ;;  %v123_v61 = vld [vmem:[%s19081_s0 + $0x231] sm:$0xff] }
   0xf   :  { %v10713_v59 = vpack.i.bf16 %v117_v57, %v116_v56  ;;  %v120_v62 = vld [vmem:[%s19081_s0 + $0x211] sm:$0xff]  ;;  %v121_v63 = vld [vmem:[%s19081_s0 + $0x219] sm:$0xff]  ;;  %v10728_v0 = vpack.i.bf16 %v123_v61, %v122_v60  ;;  %v127_v3 = vld [vmem:[%s19081_s0 + $0x261] sm:$0xff] }
  0x10   :  { %10659 = vrot.lane.b32.xlu1 %v10658_v22, %s12409_s28  ;;  %v10723_v1 = vpack.i.bf16 %v121_v63, %v120_v62  ;;  %v126_v2 = vld [vmem:[%s19081_s0 + $0x259] sm:$0xff]  ;;  %v124_v4 = vld [vmem:[%s19081_s0 + $0x241] sm:$0xff]  ;;  %v125_v5 = vld [vmem:[%s19081_s0 + $0x249] sm:$0xff] }
  0x11   :  { %10654 = vrot.lane.b32.xlu0 %v10653_v23, %s12409_s28  ;;  %v10738_v6 = vpack.i.bf16 %v127_v3, %v126_v2  ;;  %v10733_v7 = vpack.i.bf16 %v125_v5, %v124_v4  ;;  %v130_v8 = vld [vmem:[%s19081_s0 + $0x289] sm:$0xff]  ;;  %v131_v9 = vld [vmem:[%s19081_s0 + $0x291] sm:$0xff]  ;;  %v129_v11 = vld [vmem:[%s19081_s0 + $0x279] sm:$0xff] }
  0x12   :  { %v128_v10 = vld [vmem:[%s19081_s0 + $0x271] sm:$0xff]  ;;  %v10748_v12 = vpack.i.bf16 %v131_v9, %v130_v8  ;;  %v134_v14 = vld [vmem:[%s19081_s0 + $0x2b9] sm:$0xff]  ;;  %v135_v15 = vld [vmem:[%s19081_s0 + $0x2c1] sm:$0xff] }
  0x13   :  { %v10743_v13 = vpack.i.bf16 %v129_v11, %v128_v10  ;;  %v132_v16 = vld [vmem:[%s19081_s0 + $0x2a1] sm:$0xff]  ;;  %v133_v17 = vld [vmem:[%s19081_s0 + $0x2a9] sm:$0xff]  ;;  %v10758_v18 = vpack.i.bf16 %v135_v15, %v134_v14  ;;  %v139_v21 = vld [vmem:[%s19081_s0 + $0x2f1] sm:$0xff] }
  0x14   :  { %10669 = vrot.lane.b32.xlu1 %v10668_v28, %s12409_s28  ;;  %v10753_v19 = vpack.i.bf16 %v133_v17, %v132_v16  ;;  %v138_v20 = vld [vmem:[%s19081_s0 + $0x2e9] sm:$0xff]  ;;  %v136_v22 = vld [vmem:[%s19081_s0 + $0x2d1] sm:$0xff]  ;;  %v137_v23 = vld [vmem:[%s19081_s0 + $0x2d9] sm:$0xff] }
  0x15   :  { %10664 = vrot.lane.b32.xlu0 %v10663_v29, %s12409_s28  ;;  %v10768_v24 = vpack.i.bf16 %v139_v21, %v138_v20  ;;  %v10763_v25 = vpack.i.bf16 %v137_v23, %v136_v22  ;;  %v142_v26 = vld [vmem:[%s19081_s0 + $0x319] sm:$0xff]  ;;  %v143_v27 = vld [vmem:[%s19081_s0 + $0x321] sm:$0xff]  ;;  %v141_v29 = vld [vmem:[%s19081_s0 + $0x309] sm:$0xff] }
  0x16   :  { %v140_v28 = vld [vmem:[%s19081_s0 + $0x301] sm:$0xff]  ;;  %v10778_v30 = vpack.i.bf16 %v143_v27, %v142_v26  ;;  %v150_v38 = vld [vmem:[%s19081_s0 + $0x4a] sm:$0xff]  ;;  %v151_v39 = vld [vmem:[%s19081_s0 + $0x52] sm:$0xff] }
  0x17   :  { %v10773_v31 = vpack.i.bf16 %v141_v29, %v140_v28  ;;  %v146_v32 = vld [vmem:[%s19081_s0 + $0x1a] sm:$0xff]  ;;  %v147_v33 = vld [vmem:[%s19081_s0 + $0x22] sm:$0xff]  ;;  %v10798_v42 = vpack.i.bf16 %v151_v39, %v150_v38  ;;  %v158_v50 = vld [vmem:[%s19081_s0 + $0xaa] sm:$0xff] }
  0x18   :  { %10679 = vrot.lane.b32.xlu1 %v10678_v34, %s12409_s28  ;;  %v144_v34 = vld [vmem:[%s19081_s0 + $0x2] sm:$0xff]  ;;  %v10788_v36 = vpack.i.bf16 %v147_v33, %v146_v32  ;;  %v154_v44 = vld [vmem:[%s19081_s0 + $0x7a] sm:$0xff]  ;;  %v159_v51 = vld [vmem:[%s19081_s0 + $0xb2] sm:$0xff] }
  0x19   :  { %10674 = vrot.lane.b32.xlu0 %v10673_v35, %s12409_s28  ;;  %v145_v35 = vld [vmem:[%s19081_s0 + $0xa] sm:$0xff]  ;;  %v155_v45 = vld [vmem:[%s19081_s0 + $0x82] sm:$0xff]  ;;  %v10818_v54 = vpack.i.bf16 %v159_v51, %v158_v50  ;;  %v162_v56 = vld [vmem:[%s19081_s0 + $0xda] sm:$0xff] }
  0x1a   :  { %v10783_v37 = vpack.i.bf16 %v145_v35, %v144_v34  ;;  %v10808_v48 = vpack.i.bf16 %v155_v45, %v154_v44  ;;  %v163_v57 = vld [vmem:[%s19081_s0 + $0xe2] sm:$0xff]  ;;  %v166_v62 = vld [vmem:[%s19081_s0 + $0x10a] sm:$0xff]  ;;  %v167_v63 = vld [vmem:[%s19081_s0 + $0x112] sm:$0xff] }
  0x1b   :  { %v10828_v60 = vpack.i.bf16 %v163_v57, %v162_v56  ;;  %v10838_v2 = vpack.i.bf16 %v167_v63, %v166_v62  ;;  %v170_v4 = vld [vmem:[%s19081_s0 + $0x13a] sm:$0xff]  ;;  %v171_v5 = vld [vmem:[%s19081_s0 + $0x142] sm:$0xff]  ;;  %v174_v10 = vld [vmem:[%s19081_s0 + $0x16a] sm:$0xff] }
  0x1c   :  { %10689 = vrot.lane.b32.xlu1 %v10688_v40, %s12409_s28  ;;  %v148_v40 = vld [vmem:[%s19081_s0 + $0x32] sm:$0xff]  ;;  %v10848_v8 = vpack.i.bf16 %v171_v5, %v170_v4  ;;  %v178_v16 = vld [vmem:[%s19081_s0 + $0x1ca] sm:$0xff]  ;;  %v182_v22 = vld [vmem:[%s19081_s0 + $0x1fa] sm:$0xff] }
  0x1d   :  { %10684 = vrot.lane.b32.xlu0 %v10683_v41, %s12409_s28  ;;  %v149_v41 = vld [vmem:[%s19081_s0 + $0x3a] sm:$0xff]  ;;  %v175_v11 = vld [vmem:[%s19081_s0 + $0x172] sm:$0xff]  ;;  %v183_v23 = vld [vmem:[%s19081_s0 + $0x202] sm:$0xff] }
  0x1e   :  { %v10793_v43 = vpack.i.bf16 %v149_v41, %v148_v40  ;;  %v10858_v14 = vpack.i.bf16 %v175_v11, %v174_v10  ;;  %v179_v17 = vld [vmem:[%s19081_s0 + $0x1d2] sm:$0xff]  ;;  %v10878_v26 = vpack.i.bf16 %v183_v23, %v182_v22  ;;  %v186_v28 = vld [vmem:[%s19081_s0 + $0x22a] sm:$0xff]  ;;  %v190_v34 = vld [vmem:[%s19081_s0 + $0x25a] sm:$0xff] }
  0x1f   :  { %v10868_v20 = vpack.i.bf16 %v179_v17, %v178_v16  ;;  %v187_v29 = vld [vmem:[%s19081_s0 + $0x232] sm:$0xff]  ;;  %v191_v35 = vld [vmem:[%s19081_s0 + $0x262] sm:$0xff]  ;;  %v194_v40 = vld [vmem:[%s19081_s0 + $0x28a] sm:$0xff] }
  0x20   :  { %10699 = vrot.lane.b32.xlu1 %v10698_v46, %s12409_s28  ;;  %v152_v46 = vld [vmem:[%s19081_s0 + $0x62] sm:$0xff]  ;;  %v10888_v32 = vpack.i.bf16 %v187_v29, %v186_v28  ;;  %v10898_v38 = vpack.i.bf16 %v191_v35, %v190_v34  ;;  %v195_v41 = vld [vmem:[%s19081_s0 + $0x292] sm:$0xff]  ;;  %v201_v56 = vld [vmem:[%s19081_s0 + $0x2da] sm:$0xff] }
  0x21   :  { %10694 = vrot.lane.b32.xlu0 %v10693_v47, %s12409_s28  ;;  %v153_v47 = vld [vmem:[%s19081_s0 + $0x6a] sm:$0xff]  ;;  %v10908_v44 = vpack.i.bf16 %v195_v41, %v194_v40  ;;  %v204_v63 = vld [vmem:[%s19081_s0 + $0x302] sm:$0xff]  ;;  %v29_v22 = vld [vmem:[%s19081_s0 + $0x98] sm:$0xff] }
  0x22   :  { %v10803_v49 = vpack.i.bf16 %v153_v47, %v152_v46  ;;  %v198_v46 = vld [vmem:[%s19081_s0 + $0x2ba] sm:$0xff]  ;;  %v199_v47 = vld [vmem:[%s19081_s0 + $0x2c2] sm:$0xff]  ;;  %v20_v5 = vld [vmem:[%s19081_s0 + $0x30] sm:$0xff] }
  0x23   :  { %v10918_v50 = vpack.i.bf16 %v199_v47, %v198_v46  ;;  %v22_v16 = vld [vmem:[%s19081_s0 + $0x48] sm:$0xff]  ;;  %v23_v17 = vld [vmem:[%s19081_s0 + $0x50] sm:$0xff]  ;;  %v32_v29 = vld [vmem:[%s19081_s0 + $0xc0] sm:$0xff] }
  0x24   :  { %10709 = vrot.lane.b32.xlu1 %v10708_v52, %s12409_s28  ;;  %v156_v52 = vld [vmem:[%s19081_s0 + $0x92] sm:$0xff]  ;;  %v35_v41 = vld [vmem:[%s19081_s0 + $0xe0] sm:$0xff]  ;;  %v41_v46 = vld [vmem:[%s19081_s0 + $0x128] sm:$0xff] }
  0x25   :  { %10704 = vrot.lane.b32.xlu0 %v10703_v53, %s12409_s28  ;;  %v157_v53 = vld [vmem:[%s19081_s0 + $0x9a] sm:$0xff] }
  0x26   :  { %v10813_v55 = vpack.i.bf16 %v157_v53, %v156_v52  ;;  %v202_v52 = vld [vmem:[%s19081_s0 + $0x2ea] sm:$0xff]  ;;  %v203_v53 = vld [vmem:[%s19081_s0 + $0x2f2] sm:$0xff] }
  0x27   :  { %v34_v40 = vld [vmem:[%s19081_s0 + $0xd8] sm:$0xff] }
  0x28   :  { %10719 = vrot.lane.b32.xlu1 %v10718_v58, %s12409_s28  ;;  %v160_v58 = vld [vmem:[%s19081_s0 + $0xc2] sm:$0xff] }
  0x29   :  { %10714 = vrot.lane.b32.xlu0 %v10713_v59, %s12409_s28  ;;  %v161_v59 = vld [vmem:[%s19081_s0 + $0xca] sm:$0xff] }
  0x2a   :  { %v10823_v61 = vpack.i.bf16 %v161_v59, %v160_v58  ;;  %v10928_v58 = vpack.i.bf16 %v203_v53, %v202_v52  ;;  %v44_v53 = vld [vmem:[%s19081_s0 + $0x150] sm:$0xff] }
  0x2c   :  { %10729 = vrot.lane.b32.xlu1 %v10728_v0, %s12409_s28  ;;  %v164_v0 = vld [vmem:[%s19081_s0 + $0xf2] sm:$0xff] }
  0x2d   :  { %10724 = vrot.lane.b32.xlu0 %v10723_v1, %s12409_s28  ;;  %v165_v1 = vld [vmem:[%s19081_s0 + $0xfa] sm:$0xff] }
  0x2e   :  { %v10833_v3 = vpack.i.bf16 %v165_v1, %v164_v0  ;;  %v205_v0 = vld [vmem:[%s19081_s0 + $0x30a] sm:$0xff] }
  0x30   :  { %10739 = vrot.lane.b32.xlu1 %v10738_v6, %s12409_s28  ;;  %v168_v6 = vld [vmem:[%s19081_s0 + $0x122] sm:$0xff] }
  0x31   :  { %10734 = vrot.lane.b32.xlu0 %v10733_v7, %s12409_s28  ;;  %v169_v7 = vld [vmem:[%s19081_s0 + $0x12a] sm:$0xff] }
  0x32   :  { %v10843_v9 = vpack.i.bf16 %v169_v7, %v168_v6  ;;  %v21_v6 = vld [vmem:[%s19081_s0 + $0x38] sm:$0xff] }
  0x33   :  { %v10948_v10 = vpack.i.bf16 %v21_v6, %v20_v5  ;;  %v46_v5 = vld [vmem:[%s19081_s0 + $0x168] sm:$0xff]  ;;  %v47_v6 = vld [vmem:[%s19081_s0 + $0x170] sm:$0xff] }
  0x34   :  { %10749 = vrot.lane.b32.xlu1 %v10748_v12, %s12409_s28  ;;  %v172_v12 = vld [vmem:[%s19081_s0 + $0x152] sm:$0xff] }
  0x35   :  { %10744 = vrot.lane.b32.xlu0 %v10743_v13, %s12409_s28  ;;  %v173_v13 = vld [vmem:[%s19081_s0 + $0x15a] sm:$0xff] }
  0x36   :  { %v10853_v15 = vpack.i.bf16 %v173_v13, %v172_v12  ;;  %v24_v13 = vld [vmem:[%s19081_s0 + $0x60] sm:$0xff] }
  0x38   :  { %10759 = vrot.lane.b32.xlu1 %v10758_v18, %s12409_s28  ;;  %v176_v18 = vld [vmem:[%s19081_s0 + $0x1b2] sm:$0xff] }
  0x39   :  { %10754 = vrot.lane.b32.xlu0 %v10753_v19, %s12409_s28  ;;  %v177_v19 = vld [vmem:[%s19081_s0 + $0x1ba] sm:$0xff] }
  0x3a   :  { %v10863_v21 = vpack.i.bf16 %v177_v19, %v176_v18  ;;  %v10953_v19 = vpack.i.bf16 %v23_v17, %v22_v16  ;;  %v13060_v16 = vld [vmem:[%s19081_s0 + $0x1c8] sm:$0xff]  ;;  %v13065_v17 = vld [vmem:[%s19081_s0 + $0x1d0] sm:$0xff] }
  0x3c   :  { %10769 = vrot.lane.b32.xlu1 %v10768_v24, %s12409_s28  ;;  %v180_v24 = vld [vmem:[%s19081_s0 + $0x1e2] sm:$0xff] }
  0x3d   :  { %10764 = vrot.lane.b32.xlu0 %v10763_v25, %s12409_s28  ;;  %v181_v25 = vld [vmem:[%s19081_s0 + $0x1ea] sm:$0xff] }
  0x3e   :  { %v10873_v27 = vpack.i.bf16 %v181_v25, %v180_v24  ;;  %v26_v24 = vld [vmem:[%s19081_s0 + $0x78] sm:$0xff]  ;;  %v27_v25 = vld [vmem:[%s19081_s0 + $0x80] sm:$0xff] }
  0x40   :  { %10779 = vrot.lane.b32.xlu1 %v10778_v30, %s12409_s28  ;;  %v184_v30 = vld [vmem:[%s19081_s0 + $0x212] sm:$0xff] }
  0x41   :  { %10774 = vrot.lane.b32.xlu0 %v10773_v31, %s12409_s28  ;;  %v185_v31 = vld [vmem:[%s19081_s0 + $0x21a] sm:$0xff] }
  0x42   :  { %v10883_v33 = vpack.i.bf16 %v185_v31, %v184_v30  ;;  %v33_v30 = vld [vmem:[%s19081_s0 + $0xc8] sm:$0xff] }
  0x43   :  { %v10978_v34 = vpack.i.bf16 %v33_v30, %v32_v29 }
  0x44   :  { %10789 = vrot.lane.b32.xlu1 %v10788_v36, %s12410_s26  ;;  %v188_v36 = vld [vmem:[%s19081_s0 + $0x242] sm:$0xff] }
  0x45   :  { %10784 = vrot.lane.b32.xlu0 %v10783_v37, %s12410_s26  ;;  %v189_v37 = vld [vmem:[%s19081_s0 + $0x24a] sm:$0xff] }
  0x46   :  { %v10893_v39 = vpack.i.bf16 %v189_v37, %v188_v36  ;;  %v36_v37 = vld [vmem:[%s19081_s0 + $0xf0] sm:$0xff] }
  0x48   :  { %10799 = vrot.lane.b32.xlu1 %v10798_v42, %s12410_s26  ;;  %v192_v42 = vld [vmem:[%s19081_s0 + $0x272] sm:$0xff] }
  0x49   :  { %10794 = vrot.lane.b32.xlu0 %v10793_v43, %s12410_s26  ;;  %v193_v43 = vld [vmem:[%s19081_s0 + $0x27a] sm:$0xff] }
  0x4a   :  { %v10903_v45 = vpack.i.bf16 %v193_v43, %v192_v42  ;;  %v10983_v43 = vpack.i.bf16 %v35_v41, %v34_v40 }
  0x4c   :  { %10809 = vrot.lane.b32.xlu1 %v10808_v48, %s12410_s26  ;;  %v196_v48 = vld [vmem:[%s19081_s0 + $0x2a2] sm:$0xff] }
  0x4d   :  { %10804 = vrot.lane.b32.xlu0 %v10803_v49, %s12410_s26  ;;  %v197_v49 = vld [vmem:[%s19081_s0 + $0x2aa] sm:$0xff] }
  0x4e   :  { %v10913_v51 = vpack.i.bf16 %v197_v49, %v196_v48  ;;  %v38_v48 = vld [vmem:[%s19081_s0 + $0x108] sm:$0xff]  ;;  %v39_v49 = vld [vmem:[%s19081_s0 + $0x110] sm:$0xff] }
  0x50   :  { %10819 = vrot.lane.b32.xlu1 %v10818_v54, %s12410_s26 }
  0x51   :  { %10814 = vrot.lane.b32.xlu0 %v10813_v55, %s12410_s26  ;;  %v200_v55 = vld [vmem:[%s19081_s0 + $0x2d2] sm:$0xff] }
  0x52   :  { %v10923_v59 = vpack.i.bf16 %v201_v56, %v200_v55  ;;  %v45_v55 = vld [vmem:[%s19081_s0 + $0x158] sm:$0xff] }
  0x54   :  { %10829 = vrot.lane.b32.xlu1 %v10828_v60, %s12410_s26  ;;  %v206_v60 = vld [vmem:[%s19081_s0 + $0x31a] sm:$0xff] }
  0x55   :  { %10824 = vrot.lane.b32.xlu0 %v10823_v61, %s12410_s26  ;;  %v207_v61 = vld [vmem:[%s19081_s0 + $0x322] sm:$0xff] }
  0x58   :  { %10839 = vrot.lane.b32.xlu1 %v10838_v2, %s12410_s26  ;;  %v10938_v2 = vpack.i.bf16 %v207_v61, %v206_v60  ;;  %v11008_v60 = vpack.i.bf16 %v45_v55, %v44_v53  ;;  %v13168_v55 = vld [vmem:[%s19081_s0 + $0x2a0] sm:$0xff] }
  0x59   :  { %10834 = vrot.lane.b32.xlu0 %v10833_v3, %s12410_s26  ;;  %v10933_v3 = vpack.i.bf16 %v205_v0, %v204_v63  ;;  %v9458_v63 = vld [vmem:[%s19081_s0 + $0x180] sm:$0xff]  ;;  %v9459_v0 = vld [vmem:[%s19081_s0 + $0x188] sm:$0xff]  ;;  %19255 = vst [vmem:[#allocation24_spill] sm:$0xff] %v13168_v55 }
  0x5c   :  { %10849 = vrot.lane.b32.xlu1 %v10848_v8, %s12410_s26  ;;  %v18_v8 = vld [vmem:[%s19081_s0 + $0x18] sm:$0xff] }
  0x5d   :  { %10844 = vrot.lane.b32.xlu0 %v10843_v9, %s12410_s26  ;;  %v19_v9 = vld [vmem:[%s19081_s0 + $0x20] sm:$0xff] }
  0x5e   :  { %v10943_v11 = vpack.i.bf16 %v19_v9, %v18_v8  ;;  %v11018_v8 = vpack.i.bf16 %v9459_v0, %v9458_v63  ;;  %v11013_v9 = vpack.i.bf16 %v47_v6, %v46_v5  ;;  %v13198_v6 = vld [vmem:[%s19081_s0 + $0x2d0] sm:$0xff] }
  0x5f   :  { %19261 = vst [vmem:[#allocation30_spill] sm:$0xff] %v13198_v6 }
  0x60   :  { %10859 = vrot.lane.b32.xlu1 %v10858_v14, %s12410_s26  ;;  %v25_v14 = vld [vmem:[%s19081_s0 + $0x68] sm:$0xff] }
  0x61   :  { %10854 = vrot.lane.b32.xlu0 %v10853_v15, %s12410_s26  ;;  %v10958_v18 = vpack.i.bf16 %v25_v14, %v24_v13  ;;  %v13053_v13 = vld [vmem:[%s19081_s0 + $0x1e8] sm:$0xff] }
  0x64   :  { %10869 = vrot.lane.b32.xlu1 %v10868_v20, %s12410_s26 }
  0x65   :  { %10864 = vrot.lane.b32.xlu0 %v10863_v21, %s12410_s26  ;;  %v28_v21 = vld [vmem:[%s19081_s0 + $0x90] sm:$0xff] }
  0x68   :  { %10879 = vrot.lane.b32.xlu1 %v10878_v26, %s12410_s26  ;;  %v10968_v26 = vpack.i.bf16 %v29_v22, %v28_v21  ;;  %v13078_v22 = vld [vmem:[%s19081_s0 + $0x210] sm:$0xff] }
  0x69   :  { %10874 = vrot.lane.b32.xlu0 %v10873_v27, %s12410_s26  ;;  %v10963_v27 = vpack.i.bf16 %v27_v25, %v26_v24  ;;  %v13083_v24 = vld [vmem:[%s19081_s0 + $0x218] sm:$0xff] }
  0x6a   :  { %v11038_v29 = vpack.i.bf16 %v13083_v24, %v13078_v22 }
  0x6c   :  { %10889 = vrot.lane.b32.xlu1 %v10888_v32, %s12410_s26  ;;  %v30_v32 = vld [vmem:[%s19081_s0 + $0xa8] sm:$0xff] }
  0x6d   :  { %10884 = vrot.lane.b32.xlu0 %v10883_v33, %s12410_s26  ;;  %v31_v33 = vld [vmem:[%s19081_s0 + $0xb0] sm:$0xff] }
  0x6e   :  { %v10973_v35 = vpack.i.bf16 %v31_v33, %v30_v32  ;;  %v13108_v33 = vld [vmem:[%s19081_s0 + $0x240] sm:$0xff] }
  0x70   :  { %10899 = vrot.lane.b32.xlu1 %v10898_v38, %s12410_s26  ;;  %v37_v38 = vld [vmem:[%s19081_s0 + $0xf8] sm:$0xff] }
  0x71   :  { %10894 = vrot.lane.b32.xlu0 %v10893_v39, %s12410_s26  ;;  %v10988_v42 = vpack.i.bf16 %v37_v38, %v36_v37  ;;  %v13120_v37 = vld [vmem:[%s19081_s0 + $0x228] sm:$0xff]  ;;  %v13125_v38 = vld [vmem:[%s19081_s0 + $0x230] sm:$0xff] }
  0x72   :  { %v11043_v41 = vpack.i.bf16 %v13125_v38, %v13120_v37 }
  0x74   :  { %10909 = vrot.lane.b32.xlu1 %v10908_v44, %s12410_s26 }
  0x75   :  { %10904 = vrot.lane.b32.xlu0 %v10903_v45, %s12410_s26  ;;  %v40_v45 = vld [vmem:[%s19081_s0 + $0x120] sm:$0xff] }
  0x76   :  { %v12869_v54 = vpop.permute.xlu1 %10634 }
  0x77   :  { %19234 = vst [vmem:[#allocation3_spill] sm:$0xff] %v12869_v54  ;;  %v12877_v57 = vpop.permute.xlu0 %10624  ;;  %v13418_v54 = vld [vmem:[%s19081_s0 + $0x169] sm:$0xff] }
  0x78   :  { %19235 = vst [vmem:[#allocation4_spill] sm:$0xff] %v12877_v57  ;;  %10919 = vrot.lane.b32.xlu1 %v10918_v50, %s12410_s26  ;;  %v10998_v50 = vpack.i.bf16 %v41_v46, %v40_v45  ;;  %v13143_v45 = vld [vmem:[%s19081_s0 + $0x278] sm:$0xff]  ;;  %v13413_v57 = vld [vmem:[%s19081_s0 + $0x189] sm:$0xff] }
  0x79   :  { %10914 = vrot.lane.b32.xlu0 %v10913_v51, %s12410_s26  ;;  %v10993_v51 = vpack.i.bf16 %v39_v49, %v38_v48  ;;  %19252 = vst [vmem:[#allocation21_spill] sm:$0xff] %v13143_v45  ;;  %v13150_v48 = vld [vmem:[%s19081_s0 + $0x258] sm:$0xff]  ;;  %v13155_v49 = vld [vmem:[%s19081_s0 + $0x260] sm:$0xff] }
  0x7a   :  { %v12887_v62 = vpop.permute.xlu1 %10639 }
  0x7b   :  { %19236 = vst [vmem:[#allocation5_spill] sm:$0xff] %v12887_v62  ;;  %v12895_v1 = vpop.permute.xlu0 %10629  ;;  %v13396_v62 = vld [vmem:[%s19081_s0 + $0x139] sm:$0xff] }
  0x7c   :  { %19237 = vst [vmem:[#allocation6_spill] sm:$0xff] %v12895_v1  ;;  %10929 = vrot.lane.b32.xlu1 %v10928_v58, %s12410_s26  ;;  %v42_v58 = vld [vmem:[%s19081_s0 + $0x138] sm:$0xff] }
  0x7d   :  { %10924 = vrot.lane.b32.xlu0 %v10923_v59, %s12410_s26  ;;  %v43_v59 = vld [vmem:[%s19081_s0 + $0x140] sm:$0xff] }
  0x7e   :  { %v12899_v4 = vpop.permute.xlu1 %10649  ;;  %v11003_v61 = vpack.i.bf16 %v43_v59, %v42_v58  ;;  %v13173_v58 = vld [vmem:[%s19081_s0 + $0x2a8] sm:$0xff]  ;;  %v13391_v1 = vld [vmem:[%s19081_s0 + $0x159] sm:$0xff] }
  0x7f   :  { %19238 = vst [vmem:[#allocation7_spill] sm:$0xff] %v12899_v4  ;;  %v12907_v7 = vpop.permute.xlu0 %10644  ;;  %19256 = vst [vmem:[#allocation25_spill] sm:$0xff] %v13173_v58  ;;  %v11068_v63 = vpack.i.bf16 %v13173_v58, %v13168_v55  ;;  %v13386_v4 = vld [vmem:[%s19081_s0 + $0x151] sm:$0xff]  ;;  %v13476_v58 = vld [vmem:[%s19081_s0 + $0x249] sm:$0xff] }
  0x80   :  { %19239 = vst [vmem:[#allocation8_spill] sm:$0xff] %v12907_v7  ;;  %10939 = vrot.lane.b32.xlu1 %v10938_v2, %s12410_s26  ;;  %v13370_v7 = vld [vmem:[%s19081_s0 + $0x129] sm:$0xff] }
  0x81   :  { %10934 = vrot.lane.b32.xlu0 %v10933_v3, %s12410_s26  ;;  %s12411_s26 = smov 3   ;;  %v13481_v55 = vld [vmem:[%s19081_s0 + $0x229] sm:$0xff] }
  0x82   :  { %v12917_v12 = vpop.permute.xlu1 %10659 }
  0x83   :  { %19240 = vst [vmem:[#allocation9_spill] sm:$0xff] %v12917_v12  ;;  %v12925_v15 = vpop.permute.xlu0 %10654 }
  0x84   :  { %19241 = vst [vmem:[#allocation10_spill] sm:$0xff] %v12925_v15  ;;  %10949 = vrot.lane.b32.xlu1 %v10948_v10, %s12411_s26  ;;  %v9499_v15 = vld [vmem:[%s19081_s0 + $0x69] sm:$0xff] }
  0x85   :  { %10944 = vrot.lane.b32.xlu0 %v10943_v11, %s12411_s26  ;;  %v13048_v11 = vld [vmem:[%s19081_s0 + $0x1e0] sm:$0xff] }
  0x86   :  { %v12935_v20 = vpop.permute.xlu1 %10669 }
  0x87   :  { %19242 = vst [vmem:[#allocation11_spill] sm:$0xff] %v12935_v20  ;;  %v12943_v23 = vpop.permute.xlu0 %10664 }
  0x88   :  { %19243 = vst [vmem:[#allocation12_spill] sm:$0xff] %v12943_v23  ;;  %10959 = vrot.lane.b32.xlu1 %v10958_v18, %s12411_s26  ;;  %v11028_v18 = vpack.i.bf16 %v13053_v13, %v13048_v11 }
  0x89   :  { %10954 = vrot.lane.b32.xlu0 %v10953_v19, %s12411_s26  ;;  %v11023_v19 = vpack.i.bf16 %v13065_v17, %v13060_v16 }
  0x8a   :  { %v12953_v28 = vpop.permute.xlu1 %10679 }
  0x8b   :  { %19244 = vst [vmem:[#allocation13_spill] sm:$0xff] %v12953_v28  ;;  %v12961_v31 = vpop.permute.xlu0 %10674  ;;  %v9495_v28 = vld [vmem:[%s19081_s0 + $0x39] sm:$0xff] }
  0x8c   :  { %19245 = vst [vmem:[#allocation14_spill] sm:$0xff] %v12961_v31  ;;  %10969 = vrot.lane.b32.xlu1 %v10968_v26, %s12411_s26  ;;  %v13090_v26 = vld [vmem:[%s19081_s0 + $0x1f8] sm:$0xff] }
  0x8d   :  { %10964 = vrot.lane.b32.xlu0 %v10963_v27, %s12411_s26  ;;  %v13095_v27 = vld [vmem:[%s19081_s0 + $0x200] sm:$0xff] }
  0x8e   :  { %v12971_v36 = vpop.permute.xlu1 %10689  ;;  %v11033_v30 = vpack.i.bf16 %v13095_v27, %v13090_v26 }
  0x8f   :  { %19246 = vst [vmem:[#allocation15_spill] sm:$0xff] %v12971_v36  ;;  %v12979_v39 = vpop.permute.xlu0 %10684 }
  0x90   :  { %19247 = vst [vmem:[#allocation16_spill] sm:$0xff] %v12979_v39  ;;  %10979 = vrot.lane.b32.xlu1 %v10978_v34, %s12411_s26  ;;  %v13113_v34 = vld [vmem:[%s19081_s0 + $0x248] sm:$0xff] }
  0x91   :  { %10974 = vrot.lane.b32.xlu0 %v10973_v35, %s12411_s26  ;;  %v11048_v40 = vpack.i.bf16 %v13113_v34, %v13108_v33 }
  0x92   :  { %v12989_v44 = vpop.permute.xlu1 %10699 }
  0x93   :  { %19248 = vst [vmem:[#allocation17_spill] sm:$0xff] %v12989_v44  ;;  %v12997_v47 = vpop.permute.xlu0 %10694  ;;  %v9491_v44 = vld [vmem:[%s19081_s0 + $0x338] sm:$0xff] }
  0x94   :  { %19249 = vst [vmem:[#allocation18_spill] sm:$0xff] %v12997_v47  ;;  %10989 = vrot.lane.b32.xlu1 %v10988_v42, %s12411_s26  ;;  %v9490_v47 = vld [vmem:[%s19081_s0 + $0x330] sm:$0xff] }
  0x95   :  { %10984 = vrot.lane.b32.xlu0 %v10983_v43, %s12411_s26  ;;  %v13138_v43 = vld [vmem:[%s19081_s0 + $0x270] sm:$0xff]  ;;  %v11098_v31 = vpack.i.bf16 %v9491_v44, %v9490_v47  ;;  %v9493_v44 = vld [vmem:[%s19081_s0 + $0x21] sm:$0xff] }
  0x96   :  { %v13007_v52 = vpop.permute.xlu1 %10709  ;;  %19251 = vst [vmem:[#allocation20_spill] sm:$0xff] %v13138_v43 }
  0x97   :  { %v13015_v56 = vpop.permute.xlu0 %10704 }
  0x98   :  { %10999 = vrot.lane.b32.xlu1 %v10998_v50, %s12411_s26  ;;  %v11058_v50 = vpack.i.bf16 %v13143_v45, %v13138_v43 }
  0x99   :  { %10994 = vrot.lane.b32.xlu0 %v10993_v51, %s12411_s26  ;;  %v11053_v51 = vpack.i.bf16 %v13155_v49, %v13150_v48 }
  0x9a   :  { %v13031_v2 = vpop.permute.xlu1 %10719 }
  0x9b   :  { %v13033_v3 = vpop.permute.xlu0 %10714 }
  0x9c   :  { %11009 = vrot.lane.b32.xlu1 %v11008_v60, %s12411_s26  ;;  %v13180_v60 = vld [vmem:[%s19081_s0 + $0x288] sm:$0xff] }
  0x9d   :  { %11004 = vrot.lane.b32.xlu0 %v11003_v61, %s12411_s26  ;;  %19258 = vst [vmem:[#allocation27_spill] sm:$0xff] %v13180_v60  ;;  %v13185_v61 = vld [vmem:[%s19081_s0 + $0x290] sm:$0xff] }
  0x9e   :  { %v13043_v10 = vpop.permute.xlu1 %10729  ;;  %19259 = vst [vmem:[#allocation28_spill] sm:$0xff] %v13185_v61  ;;  %v11063_v0 = vpack.i.bf16 %v13185_v61, %v13180_v60 }
  0x9f   :  { %v13055_v14 = vpop.permute.xlu0 %10724 }
  0xa0   :  { %11019 = vrot.lane.b32.xlu1 %v11018_v8, %s12411_s26  ;;  %v13203_v8 = vld [vmem:[%s19081_s0 + $0x2d8] sm:$0xff] }
  0xa1   :  { %11014 = vrot.lane.b32.xlu0 %v11013_v9, %s12411_s26  ;;  %19262 = vst [vmem:[#allocation31_spill] sm:$0xff] %v13203_v8 }
  0xa2   :  { %v13073_v21 = vpop.permute.xlu1 %10739 }
  0xa3   :  { %v13085_v25 = vpop.permute.xlu0 %10734 }
  0xa4   :  { %11029 = vrot.lane.b32.xlu1 %v11028_v18, %s12411_s26  ;;  %v13210_v18 = vld [vmem:[%s19081_s0 + $0x2b8] sm:$0xff] }
  0xa5   :  { %11024 = vrot.lane.b32.xlu0 %v11023_v19, %s12411_s26  ;;  %19264 = vst [vmem:[#allocation33_spill] sm:$0xff] %v13210_v18  ;;  %v13215_v19 = vld [vmem:[%s19081_s0 + $0x2c0] sm:$0xff] }
  0xa6   :  { %v13103_v32 = vpop.permute.xlu1 %10749  ;;  %19265 = vst [vmem:[#allocation34_spill] sm:$0xff] %v13215_v19 }
  0xa7   :  { %v13115_v35 = vpop.permute.xlu0 %10744 }
  0xa8   :  { %11039 = vrot.lane.b32.xlu1 %v11038_v29, %s12411_s26  ;;  %v11078_v29 = vpack.i.bf16 %v13203_v8, %v13198_v6  ;;  %v13460_v8 = vld [vmem:[%s19081_s0 + $0x1f9] sm:$0xff]  ;;  %v13465_v6 = vld [vmem:[%s19081_s0 + $0x201] sm:$0xff] }
  0xa9   :  { %11034 = vrot.lane.b32.xlu0 %v11033_v30, %s12411_s26  ;;  %v11073_v30 = vpack.i.bf16 %v13215_v19, %v13210_v18  ;;  %19286 = vst [vmem:[#allocation55_spill] sm:$0xff] %v13460_v8  ;;  %v13492_v19 = vld [vmem:[%s19081_s0 + $0x231] sm:$0xff] }
  0xaa   :  { %v13133_v42 = vpop.permute.xlu1 %10759  ;;  %v13497_v18 = vld [vmem:[%s19081_s0 + $0x271] sm:$0xff] }
  0xab   :  { %19250 = vst [vmem:[#allocation19_spill] sm:$0xff] %v13133_v42  ;;  %v13145_v46 = vpop.permute.xlu0 %10754  ;;  %19287 = vst [vmem:[#allocation56_spill] sm:$0xff] %v13497_v18  ;;  %v13543_v42 = vld [vmem:[%s19081_s0 + $0x289] sm:$0xff] }
  0xac   :  { %19253 = vst [vmem:[#allocation22_spill] sm:$0xff] %v13145_v46  ;;  %11049 = vrot.lane.b32.xlu1 %v11048_v40, %s12411_s26  ;;  %v13538_v46 = vld [vmem:[%s19081_s0 + $0x2a9] sm:$0xff] }
  0xad   :  { %11044 = vrot.lane.b32.xlu0 %v11043_v41, %s12411_s26  ;;  %v13228_v41 = vld [vmem:[%s19081_s0 + $0x300] sm:$0xff] }
  0xae   :  { %v13163_v53 = vpop.permute.xlu1 %10769  ;;  %19267 = vst [vmem:[#allocation36_spill] sm:$0xff] %v13228_v41 }
  0xaf   :  { %19254 = vst [vmem:[#allocation23_spill] sm:$0xff] %v13163_v53  ;;  %v13175_v59 = vpop.permute.xlu0 %10764  ;;  %v49_v53 = vld [vmem:[%s19081_s0 + $0x1b8] sm:$0xff] }
  0xb0   :  { %19257 = vst [vmem:[#allocation26_spill] sm:$0xff] %v13175_v59  ;;  %11059 = vrot.lane.b32.xlu1 %v11058_v50, %s12411_s26  ;;  %v13233_v50 = vld [vmem:[%s19081_s0 + $0x308] sm:$0xff] }
  0xb1   :  { %11054 = vrot.lane.b32.xlu0 %v11053_v51, %s12411_s26  ;;  %19268 = vst [vmem:[#allocation37_spill] sm:$0xff] %v13233_v50  ;;  %v13520_v59 = vld [vmem:[%s19081_s0 + $0x261] sm:$0xff] }
  0xb2   :  { %v13193_v5 = vpop.permute.xlu1 %10779 }
  0xb3   :  { %19260 = vst [vmem:[#allocation29_spill] sm:$0xff] %v13193_v5  ;;  %v13205_v9 = vpop.permute.xlu0 %10774  ;;  %v13455_v5 = vld [vmem:[%s19081_s0 + $0x219] sm:$0xff] }
  0xb4   :  { %19263 = vst [vmem:[#allocation32_spill] sm:$0xff] %v13205_v9  ;;  %11069 = vrot.lane.b32.xlu1 %v11068_v63, %s12411_s26  ;;  %v13240_v63 = vld [vmem:[%s19081_s0 + $0x2e8] sm:$0xff]  ;;  %v13445_v9 = vld [vmem:[%s19081_s0 + $0x1d1] sm:$0xff] }
  0xb5   :  { %11064 = vrot.lane.b32.xlu0 %v11063_v0, %s12411_s26  ;;  %19270 = vst [vmem:[#allocation39_spill] sm:$0xff] %v13240_v63  ;;  %v13245_v0 = vld [vmem:[%s19081_s0 + $0x2f0] sm:$0xff] }
  0xb6   :  { %v13223_v40 = vpop.permute.xlu1 %10789  ;;  %19271 = vst [vmem:[#allocation40_spill] sm:$0xff] %v13245_v0 }
  0xb7   :  { %19266 = vst [vmem:[#allocation35_spill] sm:$0xff] %v13223_v40  ;;  %v13235_v51 = vpop.permute.xlu0 %10784  ;;  %v11088_v40 = vpack.i.bf16 %v13233_v50, %v13228_v41  ;;  %v13423_v50 = vld [vmem:[%s19081_s0 + $0x171] sm:$0xff]  ;;  %v13430_v41 = vld [vmem:[%s19081_s0 + $0x1e1] sm:$0xff] }
  0xb8   :  { %19269 = vst [vmem:[#allocation38_spill] sm:$0xff] %v13235_v51  ;;  %11079 = vrot.lane.b32.xlu1 %v11078_v29, %s12411_s26  ;;  %v11083_v51 = vpack.i.bf16 %v13245_v0, %v13240_v63  ;;  %v13266_v29 = vld [vmem:[%s19081_s0 + $0x318] sm:$0xff]  ;;  %v13471_v63 = vld [vmem:[%s19081_s0 + $0x241] sm:$0xff] }
  0xb9   :  { %11074 = vrot.lane.b32.xlu0 %v11073_v30, %s12411_s26  ;;  %19274 = vst [vmem:[#allocation43_spill] sm:$0xff] %v13266_v29  ;;  %v13271_v30 = vld [vmem:[%s19081_s0 + $0x320] sm:$0xff] }
  0xba   :  { %v13259_v39 = vpop.permute.xlu1 %10799  ;;  %19275 = vst [vmem:[#allocation44_spill] sm:$0xff] %v13271_v30 }
  0xbb   :  { %19272 = vst [vmem:[#allocation41_spill] sm:$0xff] %v13259_v39  ;;  %v13261_v36 = vpop.permute.xlu0 %10794  ;;  %v11093_v39 = vpack.i.bf16 %v13271_v30, %v13266_v29  ;;  %v13435_v30 = vld [vmem:[%s19081_s0 + $0x1e9] sm:$0xff] }
  0xbc   :  { %19273 = vst [vmem:[#allocation42_spill] sm:$0xff] %v13261_v36  ;;  %11089 = vrot.lane.b32.xlu1 %v11088_v40, %s12411_s26  ;;  %v9494_v36 = vld [vmem:[%s19081_s0 + $0x31] sm:$0xff]  ;;  %v9492_v40 = vld [vmem:[%s19081_s0 + $0x19] sm:$0xff]  ;;  %v13440_v29 = vld [vmem:[%s19081_s0 + $0x1c9] sm:$0xff] }
  0xbd   :  { %11084 = vrot.lane.b32.xlu0 %v11083_v51, %s12411_s26  ;;  %v11108_v51 = vpack.i.bf16 %v9495_v28, %v9494_v36  ;;  %v11103_v20 = vpack.i.bf16 %v9493_v44, %v9492_v40  ;;  %v9497_v28 = vld [vmem:[%s19081_s0 + $0x51] sm:$0xff]  ;;  %v9503_v44 = vld [vmem:[%s19081_s0 + $0x99] sm:$0xff] }
  0xbe   :  { %v13283_v23 = vpop.permute.xlu1 %10809  ;;  %v9502_v40 = vld [vmem:[%s19081_s0 + $0x91] sm:$0xff] }
  0xbf   :  { %19276 = vst [vmem:[#allocation45_spill] sm:$0xff] %v13283_v23  ;;  %v13291_v47 = vpop.permute.xlu0 %10804  ;;  %v9498_v23 = vld [vmem:[%s19081_s0 + $0x61] sm:$0xff] }
  0xc0   :  { %19277 = vst [vmem:[#allocation46_spill] sm:$0xff] %v13291_v47  ;;  %11099 = vrot.lane.b32.xlu1 %v11098_v31, %s12411_s26  ;;  %v9496_v47 = vld [vmem:[%s19081_s0 + $0x49] sm:$0xff]  ;;  %v11118_v36 = vpack.i.bf16 %v9499_v15, %v9498_v23  ;;  %v9501_v15 = vld [vmem:[%s19081_s0 + $0x81] sm:$0xff]  ;;  %v11128_v23 = vpack.i.bf16 %v9503_v44, %v9502_v40  ;;  %v9511_v40 = vld [vmem:[%s19081_s0 + $0xf9] sm:$0xff] }
  0xc1   :  { %11094 = vrot.lane.b32.xlu0 %v11093_v39, %s12411_s26  ;;  %s12412_s26 = smov 4   ;;  %v11113_v39 = vpack.i.bf16 %v9497_v28, %v9496_v47  ;;  %v9507_v28 = vld [vmem:[%s19081_s0 + $0xc9] sm:$0xff] }
  0xc2   :  { %v13301_v12 = vpop.permute.xlu1 %10819 }
  0xc3   :  { %19278 = vst [vmem:[#allocation47_spill] sm:$0xff] %v13301_v12  ;;  %v13309_v31 = vpop.permute.xlu0 %10814 }
  0xc4   :  { %19279 = vst [vmem:[#allocation48_spill] sm:$0xff] %v13309_v31  ;;  %11109 = vrot.lane.b32.xlu1 %v11108_v51, %s12412_s26  ;;  %v9500_v31 = vld [vmem:[%s19081_s0 + $0x79] sm:$0xff]  ;;  %v9506_v51 = vld [vmem:[%s19081_s0 + $0xc1] sm:$0xff] }
  0xc5   :  { %11104 = vrot.lane.b32.xlu0 %v11103_v20, %s12412_s26  ;;  %v11123_v47 = vpack.i.bf16 %v9501_v15, %v9500_v31  ;;  %v9510_v31 = vld [vmem:[%s19081_s0 + $0xf1] sm:$0xff]  ;;  %v11138_v44 = vpack.i.bf16 %v9507_v28, %v9506_v51  ;;  %v13357_v15 = vld [vmem:[%s19081_s0 + $0xd9] sm:$0xff] }
  0xc6   :  { %v13319_v12 = vpop.permute.xlu1 %10829  ;;  %v13380_v51 = vld [vmem:[%s19081_s0 + $0x111] sm:$0xff]  ;;  %v11148_v0 = vpack.i.bf16 %v9511_v40, %v9510_v31 }
  0xc7   :  { %19280 = vst [vmem:[#allocation49_spill] sm:$0xff] %v13319_v12  ;;  %v13327_v20 = vpop.permute.xlu0 %10824 }
  0xc8   :  { %19281 = vst [vmem:[#allocation50_spill] sm:$0xff] %v13327_v20  ;;  %11119 = vrot.lane.b32.xlu1 %v11118_v36, %s12412_s26  ;;  %v9504_v20 = vld [vmem:[%s19081_s0 + $0xa9] sm:$0xff]  ;;  %v9505_v36 = vld [vmem:[%s19081_s0 + $0xb1] sm:$0xff] }
  0xc9   :  { %11114 = vrot.lane.b32.xlu0 %v11113_v39, %s12412_s26  ;;  %v11133_v28 = vpack.i.bf16 %v9505_v36, %v9504_v20  ;;  %v13408_v36 = vld [vmem:[%s19081_s0 + $0x181] sm:$0xff] }
  0xca   :  { %v13337_v12 = vpop.permute.xlu1 %10839 }
  0xcb   :  { %19282 = vst [vmem:[#allocation51_spill] sm:$0xff] %v13337_v12  ;;  %v13345_v39 = vpop.permute.xlu0 %10834  ;;  %v13365_v12 = vld [vmem:[%s19081_s0 + $0x121] sm:$0xff] }
  0xcc   :  { %19283 = vst [vmem:[#allocation52_spill] sm:$0xff] %v13345_v39  ;;  %11129 = vrot.lane.b32.xlu1 %v11128_v23, %s12412_s26  ;;  %v9509_v39 = vld [vmem:[%s19081_s0 + $0xe1] sm:$0xff]  ;;  %v13375_v23 = vld [vmem:[%s19081_s0 + $0x109] sm:$0xff]  ;;  %v11158_v40 = vpack.i.bf16 %v13370_v7, %v13365_v12  ;;  %v10712_v7 = vunpack.i.h.bf16 %v13007_v52  ;;  %v10711_v12 = vunpack.i.l.bf16 %v13007_v52 }
  0xcd   :  { %11124 = vrot.lane.b32.xlu0 %v11123_v47, %s12412_s26  ;;  %v13401_v47 = vld [vmem:[%s19081_s0 + $0x141] sm:$0xff]  ;;  %v11143_v31 = vpack.i.bf16 %v9509_v39, %v13357_v15  ;;  %v13502_v39 = vld [vmem:[%s19081_s0 + $0x279] sm:$0xff] }
  0xce   :  { %v13403_v20 = vpop.permute.xlu1 %10849  ;;  %19288 = vst [vmem:[#allocation57_spill] sm:$0xff] %v13502_v39  ;;  %v13525_v52 = vld [vmem:[%s19081_s0 + $0x2a1] sm:$0xff]  ;;  %v2677_v43 = vsel %vm2642_vm0, %v13060_v16, %v10711_v12  ;;  %v2678_v61 = vsel %vm2642_vm0, %v13065_v17, %v10712_v7  ;;  %v10721_v16 = vunpack.i.l.bf16 %v13031_v2  ;;  %v10717_v7 = vunpack.i.h.bf16 %v13033_v3 }
  0xcf   :  { %19284 = vst [vmem:[#allocation53_spill] sm:$0xff] %v13403_v20  ;;  %v13425_v20 = vpop.permute.xlu0 %10844 }
  0xd0   :  { %19285 = vst [vmem:[#allocation54_spill] sm:$0xff] %v13425_v20  ;;  %v13450_v20 = vld [vmem:[%s19081_s0 + $0x211] sm:$0xff]  ;;  %11139 = vrot.lane.b32.xlu1 %v11138_v44, %s12412_s26  ;;  %v11153_v44 = vpack.i.bf16 %v13380_v51, %v13375_v23  ;;  %v11168_v23 = vpack.i.bf16 %v13391_v1, %v13386_v4  ;;  %v10707_v1 = vunpack.i.h.bf16 %v13015_v56  ;;  %v10706_v4 = vunpack.i.l.bf16 %v13015_v56 }
  0xd1   :  { %11134 = vrot.lane.b32.xlu0 %v11133_v28, %s12412_s26  ;;  %v13515_v28 = vld [vmem:[%s19081_s0 + $0x259] sm:$0xff]  ;;  %v13548_v56 = vld [vmem:[%s19081_s0 + $0x291] sm:$0xff] }
  0xd2   :  { %v13506_v15 = vpop.permute.xlu1 %10859  ;;  %19290 = vst [vmem:[#allocation59_spill] sm:$0xff] %v13515_v28  ;;  %v10722_v28 = vunpack.i.h.bf16 %v13031_v2  ;;  %v10731_v2 = vunpack.i.l.bf16 %v13043_v10 }
  0xd3   :  { %19289 = vst [vmem:[#allocation58_spill] sm:$0xff] %v13506_v15  ;;  %v13529_v51 = vpop.permute.xlu0 %10854  ;;  %v48_v15 = vld [vmem:[%s19081_s0 + $0x1b0] sm:$0xff] }
  0xd4   :  { %19291 = vst [vmem:[#allocation60_spill] sm:$0xff] %v13529_v51  ;;  %11149 = vrot.lane.b32.xlu1 %v11148_v0, %s12412_s26  ;;  %v2675_v0 = vsel %vm2642_vm0, %v48_v15, %v10706_v4  ;;  %v2676_v51 = vsel %vm2642_vm0, %v49_v53, %v10707_v1 }
  0xd5   :  { %11144 = vrot.lane.b32.xlu0 %v11143_v31, %s12412_s26  ;;  %v10716_v31 = vunpack.i.l.bf16 %v13033_v3  ;;  %v10727_v3 = vunpack.i.h.bf16 %v13055_v14 }
  0xd6   :  { %v10870_v8 = vpop.permute.xlu1 %10869 }
  0xd7   :  { %v10872_v18 = vunpack.i.h.bf16 %v10870_v8  ;;  %v10871_v39 = vunpack.i.l.bf16 %v10870_v8  ;;  %v10865_v45 = vpop.permute.xlu0 %10864  ;;  %v10732_v8 = vunpack.i.h.bf16 %v13043_v10  ;;  %v2682_v10 = vsel %vm2642_vm0, %v13095_v27, %v10722_v28 }
  0xd8   :  { %v10867_v12 = vunpack.i.h.bf16 %v10865_v45  ;;  %v10866_v17 = vunpack.i.l.bf16 %v10865_v45  ;;  %11159 = vrot.lane.b32.xlu1 %v11158_v40, %s12412_s26  ;;  %v2685_v27 = vsel %vm2642_vm0, %v13120_v37, %v10731_v2  ;;  %v10742_v37 = vunpack.i.h.bf16 %v13073_v21 }
  0xd9   :  { %v13590_v60 = vsel %vm2707_vm1, %v2677_v43, %v10871_v39  ;;  %v13593_v53 = vsel %vm2707_vm1, %v2678_v61, %v10872_v18  ;;  %11154 = vrot.lane.b32.xlu0 %v11153_v44, %s12412_s26  ;;  %v10726_v43 = vunpack.i.l.bf16 %v13055_v14  ;;  %v2681_v44 = vsel %vm2642_vm0, %v13090_v26, %v10721_v16 }
  0xda   :  { %v13599_v45 = vsel %vm2707_vm1, %v2675_v0, %v10866_v17  ;;  %v13602_v40 = vsel %vm2707_vm1, %v2676_v51, %v10867_v12  ;;  %v10880_v15 = vpop.permute.xlu1 %10879  ;;  %v2679_v51 = vsel %vm2642_vm0, %v13048_v11, %v10716_v31  ;;  %v2680_v0 = vsel %vm2642_vm0, %v13053_v13, %v10717_v7 }
  0xdb   :  { %v10882_v39 = vunpack.i.h.bf16 %v10880_v15  ;;  %v10881_v61 = vunpack.i.l.bf16 %v10880_v15  ;;  %v10875_v18 = vpop.permute.xlu0 %10874  ;;  %v19292_v26 = vpack.i.bf16 %v13401_v47, %v13396_v62  ;;  %v2686_v11 = vsel %vm2642_vm0, %v13125_v38, %v10732_v8 }
  0xdc   :  { %v10877_v1 = vunpack.i.h.bf16 %v10875_v18  ;;  %v10876_v4 = vunpack.i.l.bf16 %v10875_v18  ;;  %11169 = vrot.lane.b32.xlu1 %v11168_v23, %s12412_s26  ;;  %v2683_v31 = vsel %vm2642_vm0, %v13078_v22, %v10726_v43  ;;  %v2684_v62 = vsel %vm2642_vm0, %v13083_v24, %v10727_v3 }
  0xdd   :  { %v13616_v14 = vsel %vm2707_vm1, %v2681_v44, %v10881_v61  ;;  %v13619_v12 = vsel %vm2707_vm1, %v2682_v10, %v10882_v39  ;;  %11164 = vrot.lane.b32.xlu0 %v19292_v26, %s12412_s26  ;;  %v10741_v38 = vunpack.i.l.bf16 %v13073_v21  ;;  %v19293_v2 = vpack.i.bf16 %v13413_v57, %v13408_v36 }
  0xde   :  { %v13630_v23 = vsel %vm2707_vm1, %v2679_v51, %v10876_v4  ;;  %v13633_v13 = vsel %vm2707_vm1, %v2680_v0, %v10877_v1  ;;  %v10890_v28 = vpop.permute.xlu1 %10889  ;;  %v10737_v15 = vunpack.i.h.bf16 %v13085_v25  ;;  %v10736_v22 = vunpack.i.l.bf16 %v13085_v25 }
  0xdf   :  { %v10892_v47 = vunpack.i.h.bf16 %v10890_v28  ;;  %v10891_v16 = vunpack.i.l.bf16 %v10890_v28  ;;  %v10885_v17 = vpop.permute.xlu0 %10884  ;;  %v19294_v21 = vpack.i.bf16 %v13423_v50, %v13418_v54  ;;  %v10752_v43 = vunpack.i.h.bf16 %v13103_v32 }
  0xe0   :  { %v10887_v7 = vunpack.i.h.bf16 %v10885_v17  ;;  %v10886_v8 = vunpack.i.l.bf16 %v10885_v17  ;;  %11179 = vrot.lane.b32.xlu1 %v19293_v2, %s12412_s26  ;;  %v10751_v57 = vunpack.i.l.bf16 %v13103_v32  ;;  %v10747_v61 = vunpack.i.h.bf16 %v13115_v35 }
  0xe1   :  { %v13648_v24 = vsel %vm2707_vm1, %v2685_v27, %v10891_v16  ;;  %v13651_v3 = vsel %vm2707_vm1, %v2686_v11, %v10892_v47  ;;  %11174 = vrot.lane.b32.xlu0 %v19294_v21, %s12412_s26  ;;  %v10746_v18 = vunpack.i.l.bf16 %v13115_v35  ;;  %v2689_v54 = vsel %vm2642_vm0, %v13150_v48, %v10741_v38  ;;  %v19297_v27 = vld [vmem:[#allocation27_spill] sm:$0xff]  ;;  %v19300_v47 = vld [vmem:[#allocation21_spill] sm:$0xff] }
  0xe2   :  { %v13660_v36 = vsel %vm2707_vm1, %v2683_v31, %v10886_v8  ;;  %v13663_v25 = vsel %vm2707_vm1, %v2684_v62, %v10887_v7  ;;  %v10900_v39 = vpop.permute.xlu1 %10899  ;;  %v2690_v32 = vsel %vm2642_vm0, %v13155_v49, %v10742_v37  ;;  %v19295_v51 = vpack.i.bf16 %v13435_v30, %v13430_v41  ;;  %v19298_v30 = vld [vmem:[#allocation28_spill] sm:$0xff]  ;;  %v19301_v37 = vld [vmem:[#allocation19_spill] sm:$0xff] }
  0xe3   :  { %v10902_v44 = vunpack.i.h.bf16 %v10900_v39  ;;  %v10901_v10 = vunpack.i.l.bf16 %v10900_v39  ;;  %v10895_v1 = vpop.permute.xlu0 %10894  ;;  %v2687_v0 = vsel %vm2642_vm0, %v13108_v33, %v10736_v22  ;;  %v2688_v35 = vsel %vm2642_vm0, %v13113_v34, %v10737_v15  ;;  %v19299_v31 = vld [vmem:[#allocation20_spill] sm:$0xff]  ;;  %v19303_v22 = vld [vmem:[#allocation22_spill] sm:$0xff] }
  0xe4   :  { %v10897_v50 = vunpack.i.h.bf16 %v10895_v1  ;;  %v10896_v4 = vunpack.i.l.bf16 %v10895_v1  ;;  %11189 = vrot.lane.b32.xlu1 %v19295_v51, %s12412_s26  ;;  %v19296_v49 = vpack.i.bf16 %v13445_v9, %v13440_v29  ;;  %v2693_v41 = vsel %vm2642_vm0, %v19297_v27, %v10751_v57  ;;  %v19309_v27 = vld [vmem:[#allocation34_spill] sm:$0xff] }
  0xe5   :  { %v13680_v26 = vsel %vm2707_vm1, %v2689_v54, %v10901_v10  ;;  %v13683_v48 = vsel %vm2707_vm1, %v2690_v32, %v10902_v44  ;;  %v2694_v33 = vsel %vm2642_vm0, %v19298_v30, %v10752_v43  ;;  %v2691_v62 = vsel %vm2642_vm0, %v19299_v31, %v10746_v18  ;;  %v19306_v44 = vld [vmem:[#allocation23_spill] sm:$0xff]  ;;  %v19307_v32 = vld [vmem:[#allocation26_spill] sm:$0xff]  ;;  %v19311_v31 = vld [vmem:[#allocation24_spill] sm:$0xff] }
  0xe6   :  { %11184 = vrot.lane.b32.xlu0 %v19296_v49, %s12412_s26  ;;  %v13694_v11 = vsel %vm2707_vm1, %v2687_v0, %v10896_v4  ;;  %v13697_v34 = vsel %vm2707_vm1, %v2688_v35, %v10897_v50  ;;  %v10910_v28 = vpop.permute.xlu1 %10909  ;;  %v2692_v9 = vsel %vm2642_vm0, %v19300_v47, %v10747_v61  ;;  %v10762_v38 = vunpack.i.h.bf16 %v19301_v37  ;;  %v19304_v61 = vld [vmem:[#allocation55_spill] sm:$0xff]  ;;  %v19312_v47 = vld [vmem:[#allocation25_spill] sm:$0xff] }
  0xe7   :  { %v10912_v29 = vunpack.i.h.bf16 %v10910_v28  ;;  %v10911_v16 = vunpack.i.l.bf16 %v10910_v28  ;;  %v10905_v17 = vpop.permute.xlu0 %10904  ;;  %v10761_v7 = vunpack.i.l.bf16 %v19301_v37  ;;  %v19302_v15 = vpack.i.bf16 %v13455_v5, %v13450_v20  ;;  %v19314_v37 = vld [vmem:[#allocation39_spill] sm:$0xff] }
  0xe8   :  { %v10907_v8 = vunpack.i.h.bf16 %v10905_v17  ;;  %v10906_v2 = vunpack.i.l.bf16 %v10905_v17  ;;  %v10757_v21 = vunpack.i.h.bf16 %v19303_v22  ;;  %v10756_v43 = vunpack.i.l.bf16 %v19303_v22 }
  0xe9   :  { %11199 = vrot.lane.b32.xlu1 %v19302_v15, %s12412_s26  ;;  %v13712_v57 = vsel %vm2707_vm1, %v2693_v41, %v10911_v16  ;;  %v13715_v39 = vsel %vm2707_vm1, %v2694_v33, %v10912_v29  ;;  %v19305_v18 = vpack.i.bf16 %v13465_v6, %v19304_v61  ;;  %v10772_v10 = vunpack.i.h.bf16 %v19306_v44  ;;  %v19308_v6 = vld [vmem:[#allocation33_spill] sm:$0xff]  ;;  %v19316_v15 = vld [vmem:[#allocation30_spill] sm:$0xff] }
  0xea   :  { %v10771_v5 = vunpack.i.l.bf16 %v19306_v44  ;;  %v13724_v20 = vsel %vm2707_vm1, %v2691_v62, %v10906_v2  ;;  %v13727_v1 = vsel %vm2707_vm1, %v2692_v9, %v10907_v8  ;;  %v10920_v54 = vpop.permute.xlu1 %10919  ;;  %v10767_v50 = vunpack.i.h.bf16 %v19307_v32  ;;  %v19318_v44 = vld [vmem:[#allocation29_spill] sm:$0xff] }
  0xeb   :  { %11194 = vrot.lane.b32.xlu0 %v19305_v18, %s12412_s26  ;;  %v10766_v4 = vunpack.i.l.bf16 %v19307_v32  ;;  %v10922_v51 = vunpack.i.h.bf16 %v10920_v54  ;;  %v10921_v0 = vunpack.i.l.bf16 %v10920_v54  ;;  %v10915_v35 = vpop.permute.xlu0 %10914  ;;  %v2697_v49 = vsel %vm2642_vm0, %v19308_v6, %v10761_v7  ;;  %v9546_v18 = vld [vmem:[%s19081_s0 + $0x2d1] sm:$0xff]  ;;  %v9545_v6 = vld [vmem:[%s19081_s0 + $0x2c1] sm:$0xff] }
  0xec   :  { %v2698_v41 = vsel %vm2642_vm0, %v19309_v27, %v10762_v38  ;;  %v10917_v30 = vunpack.i.h.bf16 %v10915_v35  ;;  %v10916_v33 = vunpack.i.l.bf16 %v10915_v35  ;;  %v19310_v28 = vpack.i.bf16 %v13476_v58, %v13471_v63  ;;  %v19315_v63 = vld [vmem:[#allocation40_spill] sm:$0xff]  ;;  %v9544_v35 = vld [vmem:[%s19081_s0 + $0x2b9] sm:$0xff] }
  0xed   :  { %v2695_v62 = vsel %vm2642_vm0, %v19311_v31, %v10756_v43  ;;  %v2696_v9 = vsel %vm2642_vm0, %v19312_v47, %v10757_v21  ;;  %v13744_v29 = vsel %vm2707_vm1, %v2697_v49, %v10921_v0  ;;  %v13747_v16 = vsel %vm2707_vm1, %v2698_v41, %v10922_v51  ;;  %v19317_v21 = vld [vmem:[#allocation31_spill] sm:$0xff]  ;;  %v19319_v51 = vld [vmem:[#allocation57_spill] sm:$0xff]  ;;  %v19320_v0 = vld [vmem:[#allocation56_spill] sm:$0xff] }
  0xee   :  { %11209 = vrot.lane.b32.xlu1 %v19310_v28, %s12412_s26  ;;  %v19313_v17 = vpack.i.bf16 %v13492_v19, %v13481_v55  ;;  %v2701_v58 = vsel %vm2642_vm0, %v19314_v37, %v10771_v5  ;;  %v2702_v38 = vsel %vm2642_vm0, %v19315_v63, %v10772_v10  ;;  %v13758_v7 = vsel %vm2707_vm1, %v2695_v62, %v10916_v33  ;;  %v10930_v2 = vpop.permute.xlu1 %10929  ;;  %v19322_v49 = vld [vmem:[#allocation32_spill] sm:$0xff]  ;;  %v19323_v28 = vld [vmem:[#allocation59_spill] sm:$0xff] }
  0xef   :  { %v13761_v8 = vsel %vm2707_vm1, %v2696_v9, %v10917_v30  ;;  %v2699_v22 = vsel %vm2642_vm0, %v19316_v15, %v10766_v4  ;;  %v2700_v55 = vsel %vm2642_vm0, %v19317_v21, %v10767_v50  ;;  %v10932_v19 = vunpack.i.h.bf16 %v10930_v2  ;;  %v10925_v61 = vpop.permute.xlu0 %10924  ;;  %v9547_v50 = vld [vmem:[%s19081_s0 + $0x2d9] sm:$0xff]  ;;  %v19326_v21 = vld [vmem:[#allocation44_spill] sm:$0xff] }
  0xf0   :  { %11204 = vrot.lane.b32.xlu0 %v19313_v17, %s12412_s26  ;;  %v10931_v43 = vunpack.i.l.bf16 %v10930_v2  ;;  %v10782_v10 = vunpack.i.h.bf16 %v19318_v44  ;;  %v10781_v5 = vunpack.i.l.bf16 %v19318_v44  ;;  %v10927_v54 = vunpack.i.h.bf16 %v10925_v61  ;;  %v19325_v15 = vld [vmem:[#allocation43_spill] sm:$0xff]  ;;  %v19329_v44 = vld [vmem:[#allocation37_spill] sm:$0xff] }
  0xf1   :  { %v10926_v32 = vunpack.i.l.bf16 %v10925_v61  ;;  %v19321_v4 = vpack.i.bf16 %v19319_v51, %v19320_v0  ;;  %v10777_v27 = vunpack.i.h.bf16 %v19322_v49  ;;  %v10776_v41 = vunpack.i.l.bf16 %v19322_v49  ;;  %v9555_v49 = vld [vmem:[%s19081_s0 + $0x339] sm:$0xff] }
  0xf2   :  { %v13788_v30 = vsel %vm2707_vm1, %v2701_v58, %v10931_v43  ;;  %v13791_v33 = vsel %vm2707_vm1, %v2702_v38, %v10932_v19  ;;  %v19324_v31 = vpack.i.bf16 %v13520_v59, %v19323_v28  ;;  %v13801_v47 = vsel %vm2707_vm1, %v2700_v55, %v10927_v54  ;;  %v10940_v9 = vpop.permute.xlu1 %10939  ;;  %v19328_v55 = vld [vmem:[#allocation36_spill] sm:$0xff] }
  0xf3   :  { %11219 = vrot.lane.b32.xlu1 %v19321_v4, %s12412_s26  ;;  %v13798_v62 = vsel %vm2707_vm1, %v2699_v22, %v10926_v32  ;;  %v10942_v17 = vunpack.i.h.bf16 %v10940_v9  ;;  %v10941_v37 = vunpack.i.l.bf16 %v10940_v9  ;;  %v10935_v63 = vpop.permute.xlu0 %10934  ;;  %v11238_v58 = vpack.i.bf16 %v9547_v50, %v9546_v18  ;;  %v9553_v28 = vld [vmem:[%s19081_s0 + $0x321] sm:$0xff] }
  0xf4   :  { %11214 = vrot.lane.b32.xlu0 %v19324_v31, %s12412_s26  ;;  %v11233_v2 = vpack.i.bf16 %v9545_v6, %v9544_v35  ;;  %v2705_v38 = vsel %vm2642_vm0, %v19325_v15, %v10781_v5  ;;  %v2706_v19 = vsel %vm2642_vm0, %v19326_v21, %v10782_v10  ;;  %v10937_v59 = vunpack.i.h.bf16 %v10935_v63  ;;  %v9554_v6 = vld [vmem:[%s19081_s0 + $0x331] sm:$0xff]  ;;  %v9557_v15 = vld [vmem:[%s19081_s0 + $0x22] sm:$0xff] }
  0xf5   :  { %v10936_v43 = vunpack.i.l.bf16 %v10935_v63  ;;  %v19327_v22 = vpack.i.bf16 %v13538_v46, %v13525_v52  ;;  %v2703_v61 = vsel %vm2642_vm0, %v19328_v55, %v10776_v41  ;;  %v2704_v18 = vsel %vm2642_vm0, %v19329_v44, %v10777_v27  ;;  %v9550_v46 = vld [vmem:[%s19081_s0 + $0x301] sm:$0xff]  ;;  %v9551_v52 = vld [vmem:[%s19081_s0 + $0x309] sm:$0xff]  ;;  %v9552_v41 = vld [vmem:[%s19081_s0 + $0x319] sm:$0xff] }
  0xf6   :  { %v13816_v54 = vsel %vm2707_vm1, %v2705_v38, %v10941_v37  ;;  %v13819_v5 = vsel %vm2707_vm1, %v2706_v19, %v10942_v17  ;;  %v19330_v10 = vpack.i.bf16 %v13548_v56, %v13543_v42  ;;  %v13835_v51 = vsel %vm2707_vm1, %v2704_v18, %v10937_v59  ;;  %v13837_v0 = vpop.permute.xlu1 %10949  ;;  %v9548_v42 = vld [vmem:[%s19081_s0 + $0x2e9] sm:$0xff]  ;;  %v9549_v56 = vld [vmem:[%s19081_s0 + $0x2f1] sm:$0xff]  ;;  %v9559_v63 = vld [vmem:[%s19081_s0 + $0x3a] sm:$0xff] }
  0xf7   :  { %11229 = vrot.lane.b32.xlu1 %v19327_v22, %s12412_s26  ;;  %v13832_v32 = vsel %vm2707_vm1, %v2703_v61, %v10936_v43  ;;  %v13845_v4 = vpop.permute.xlu0 %10944  ;;  %v11248_v50 = vpack.i.bf16 %v9551_v52, %v9550_v46  ;;  %v11243_v35 = vpack.i.bf16 %v9549_v56, %v9548_v42  ;;  %v11258_v9 = vpack.i.bf16 %v9555_v49, %v9554_v6  ;;  %v9558_v37 = vld [vmem:[%s19081_s0 + $0x32] sm:$0xff]  ;;  %v9562_v59 = vld [vmem:[%s19081_s0 + $0x62] sm:$0xff]  ;;  %v9563_v43 = vld [vmem:[%s19081_s0 + $0x6a] sm:$0xff] }
  0xf8   :  { %11224 = vrot.lane.b32.xlu0 %v19330_v10, %s12412_s26  ;;  %v11253_v17 = vpack.i.bf16 %v9553_v28, %v9552_v41  ;;  %v13884_v21 = vpack.i.bf16 %v9559_v63, %v9558_v37  ;;  %v9560_v55 = vld [vmem:[%s19081_s0 + $0x4a] sm:$0xff]  ;;  %v9561_v61 = vld [vmem:[%s19081_s0 + $0x52] sm:$0xff]  ;;  %v13905_v18 = vpack.i.bf16 %v9563_v43, %v9562_v59  ;;  %v9567_v52 = vld [vmem:[%s19081_s0 + $0x9a] sm:$0xff] }
  0xf9   :  { %v13908_v10 = vpack.i.bf16 %v9561_v61, %v9560_v55  ;;  %v9566_v46 = vld [vmem:[%s19081_s0 + $0x92] sm:$0xff]  ;;  %v9564_v56 = vld [vmem:[%s19081_s0 + $0x7a] sm:$0xff]  ;;  %v9570_v41 = vld [vmem:[%s19081_s0 + $0xc2] sm:$0xff] }
  0xfa   :  { %v13855_v27 = vpop.permute.xlu1 %10959  ;;  %v13928_v6 = vpack.i.bf16 %v9567_v52, %v9566_v46  ;;  %v9571_v28 = vld [vmem:[%s19081_s0 + $0xca] sm:$0xff]  ;;  %v9569_v37 = vld [vmem:[%s19081_s0 + $0xb2] sm:$0xff]  ;;  %v9575_v59 = vld [vmem:[%s19081_s0 + $0xfa] sm:$0xff] }
  0xfb   :  { %11239 = vrot.lane.b32.xlu1 %v11238_v58, %s12412_s26  ;;  %v13863_v31 = vpop.permute.xlu0 %10954  ;;  %v9572_v55 = vld [vmem:[%s19081_s0 + $0xda] sm:$0xff]  ;;  %v9573_v61 = vld [vmem:[%s19081_s0 + $0xe2] sm:$0xff] }
  0xfc   :  { %11234 = vrot.lane.b32.xlu0 %v11233_v2, %s12412_s26  ;;  %v9556_v2 = vld [vmem:[%s19081_s0 + $0x1a] sm:$0xff] }
  0xfd   :  { %v11263_v19 = vpack.i.bf16 %v9557_v15, %v9556_v2  ;;  %v13952_v2 = vpack.i.bf16 %v9571_v28, %v9570_v41  ;;  %v9579_v41 = vld [vmem:[%s19081_s0 + $0x12a] sm:$0xff] }
  0xfe   :  { %v13873_v58 = vpop.permute.xlu1 %10969 }
  0xff   :  { %11249 = vrot.lane.b32.xlu1 %v11248_v50, %s12412_s26  ;;  %v13881_v38 = vpop.permute.xlu0 %10964  ;;  %v9565_v50 = vld [vmem:[%s19081_s0 + $0x82] sm:$0xff] }
 0x100   :  { %11244 = vrot.lane.b32.xlu0 %v11243_v35, %s12412_s26  ;;  %v13932_v49 = vpack.i.bf16 %v9565_v50, %v9564_v56  ;;  %v13980_v56 = vpack.i.bf16 %v9573_v61, %v9572_v55  ;;  %v9578_v50 = vld [vmem:[%s19081_s0 + $0x122] sm:$0xff]  ;;  %v9582_v61 = vld [vmem:[%s19081_s0 + $0x152] sm:$0xff] }
 0x102   :  { %v13893_v22 = vpop.permute.xlu1 %10979  ;;  %19338 = vst [vmem:[#allocation23_spill] sm:$0xff] %v13980_v56 }
 0x103   :  { %11259 = vrot.lane.b32.xlu1 %v11258_v9, %s12412_s26  ;;  %v13901_v44 = vpop.permute.xlu0 %10974 }
 0x104   :  { %11254 = vrot.lane.b32.xlu0 %v11253_v17, %s12412_s26  ;;  %s12413_s26 = smov 5   ;;  %v9568_v17 = vld [vmem:[%s19081_s0 + $0xaa] sm:$0xff] }
 0x105   :  { %v13956_v15 = vpack.i.bf16 %v9569_v37, %v9568_v17  ;;  %v9576_v17 = vld [vmem:[%s19081_s0 + $0x10a] sm:$0xff]  ;;  %v9577_v37 = vld [vmem:[%s19081_s0 + $0x112] sm:$0xff] }
 0x106   :  { %v13916_v42 = vpop.permute.xlu1 %10989  ;;  %v14002_v55 = vpack.i.bf16 %v9577_v37, %v9576_v17 }
 0x107   :  { %11269 = vrot.lane.b32.xlu1 %v13884_v21, %s12413_s26  ;;  %19331 = vst [vmem:[#allocation27_spill] sm:$0xff] %v13916_v42  ;;  %v13924_v35 = vpop.permute.xlu0 %10984 }
 0x108   :  { %11264 = vrot.lane.b32.xlu0 %v11263_v19, %s12413_s26  ;;  %19332 = vst [vmem:[#allocation28_spill] sm:$0xff] %v13924_v35  ;;  %v9574_v19 = vld [vmem:[%s19081_s0 + $0xf2] sm:$0xff]  ;;  %19341 = vst [vmem:[#allocation34_spill] sm:$0xff] %v14002_v55 }
 0x109   :  { %v13976_v52 = vpack.i.bf16 %v9575_v59, %v9574_v19  ;;  %v11318_v59 = vpack.i.bf16 %v9579_v41, %v9578_v50  ;;  %v9581_v50 = vld [vmem:[%s19081_s0 + $0x142] sm:$0xff] }
 0x10a   :  { %v13940_v9 = vpop.permute.xlu1 %10999 }
 0x10b   :  { %11279 = vrot.lane.b32.xlu1 %v13905_v18, %s12413_s26  ;;  %19333 = vst [vmem:[#allocation20_spill] sm:$0xff] %v13940_v9  ;;  %v13948_v63 = vpop.permute.xlu0 %10994  ;;  %19337 = vst [vmem:[#allocation55_spill] sm:$0xff] %v13976_v52 }
 0x10c   :  { %11274 = vrot.lane.b32.xlu0 %v13908_v10, %s12413_s26  ;;  %19334 = vst [vmem:[#allocation21_spill] sm:$0xff] %v13948_v63 }
 0x10e   :  { %v13964_v43 = vpop.permute.xlu1 %11009 }
 0x10f   :  { %11289 = vrot.lane.b32.xlu1 %v13928_v6, %s12413_s26  ;;  %19335 = vst [vmem:[#allocation19_spill] sm:$0xff] %v13964_v43  ;;  %v13972_v46 = vpop.permute.xlu0 %11004 }
 0x110   :  { %11284 = vrot.lane.b32.xlu0 %v13932_v49, %s12413_s26  ;;  %19336 = vst [vmem:[#allocation22_spill] sm:$0xff] %v13972_v46 }
 0x112   :  { %v13988_v28 = vpop.permute.xlu1 %11019 }
 0x113   :  { %11299 = vrot.lane.b32.xlu1 %v13952_v2, %s12413_s26  ;;  %19339 = vst [vmem:[#allocation26_spill] sm:$0xff] %v13988_v28  ;;  %v13996_v19 = vpop.permute.xlu0 %11014  ;;  %v9583_v28 = vld [vmem:[%s19081_s0 + $0x15a] sm:$0xff] }
 0x114   :  { %11294 = vrot.lane.b32.xlu0 %v13956_v15, %s12413_s26  ;;  %19340 = vst [vmem:[#allocation33_spill] sm:$0xff] %v13996_v19  ;;  %v9580_v19 = vld [vmem:[%s19081_s0 + $0x13a] sm:$0xff]  ;;  %v11328_v9 = vpack.i.bf16 %v9583_v28, %v9582_v61  ;;  %v9587_v28 = vld [vmem:[%s19081_s0 + $0x18a] sm:$0xff]  ;;  %v9585_v61 = vld [vmem:[%s19081_s0 + $0x172] sm:$0xff] }
 0x115   :  { %v11323_v42 = vpack.i.bf16 %v9581_v50, %v9580_v19  ;;  %v9584_v19 = vld [vmem:[%s19081_s0 + $0x16a] sm:$0xff] }
 0x116   :  { %v11030_v46 = vpop.permute.xlu1 %11029 }
 0x117   :  { %11309 = vrot.lane.b32.xlu1 %v13976_v52, %s12413_s26  ;;  %v11032_v41 = vunpack.i.h.bf16 %v11030_v46  ;;  %v11031_v17 = vunpack.i.l.bf16 %v11030_v46  ;;  %v11025_v37 = vpop.permute.xlu0 %11024  ;;  %v9586_v46 = vld [vmem:[%s19081_s0 + $0x182] sm:$0xff] }
 0x118   :  { %11304 = vrot.lane.b32.xlu0 %v13980_v56, %s12413_s26  ;;  %v11027_v43 = vunpack.i.h.bf16 %v11025_v37  ;;  %v11026_v63 = vunpack.i.l.bf16 %v11025_v37 }
 0x119   :  { %v14019_v52 = vsel %vm2772_vm2, %v13590_v60, %v11031_v17  ;;  %v14023_v35 = vsel %vm2772_vm2, %v13593_v53, %v11032_v41 }
 0x11a   :  { %19342 = vst [vmem:[#allocation24_spill] sm:$0xff] %v14019_v52  ;;  %19343 = vst [vmem:[#allocation25_spill] sm:$0xff] %v14023_v35  ;;  %v14035_v60 = vsel %vm2772_vm2, %v13599_v45, %v11026_v63  ;;  %v14039_v53 = vsel %vm2772_vm2, %v13602_v40, %v11027_v43  ;;  %v11338_v45 = vpack.i.bf16 %v9587_v28, %v9586_v46  ;;  %v9589_v28 = vld [vmem:[%s19081_s0 + $0x1d2] sm:$0xff] }
 0x11b   :  { %11319 = vrot.lane.b32.xlu1 %v11318_v59, %s12413_s26  ;;  %19344 = vst [vmem:[#allocation39_spill] sm:$0xff] %v14035_v60  ;;  %19345 = vst [vmem:[#allocation40_spill] sm:$0xff] %v14039_v53  ;;  %v11040_v59 = vpop.permute.xlu1 %11039  ;;  %v11035_v17 = vpop.permute.xlu0 %11034  ;;  %v11333_v43 = vpack.i.bf16 %v9585_v61, %v9584_v19  ;;  %v19415_v53 = vld [vmem:[#allocation18_spill] sm:$0xff] }
 0x11c   :  { %11314 = vrot.lane.b32.xlu0 %v14002_v55, %s12413_s26  ;;  %v11042_v50 = vunpack.i.h.bf16 %v11040_v59  ;;  %v11041_v41 = vunpack.i.l.bf16 %v11040_v59  ;;  %v11037_v37 = vunpack.i.h.bf16 %v11035_v17  ;;  %v11036_v35 = vunpack.i.l.bf16 %v11035_v17  ;;  %v9590_v59 = vld [vmem:[%s19081_s0 + $0x1e2] sm:$0xff] }
 0x11d   :  { %v19428_v55 = vld [vmem:[#allocation48_spill] sm:$0xff] }
 0x11e   :  { %v14050_v40 = vsel %vm2772_vm2, %v13616_v14, %v11041_v41  ;;  %v14054_v63 = vsel %vm2772_vm2, %v13619_v12, %v11042_v50  ;;  %v14065_v46 = vsel %vm2772_vm2, %v13630_v23, %v11036_v35  ;;  %v14069_v14 = vsel %vm2772_vm2, %v13633_v13, %v11037_v37 }
 0x11f   :  { %11329 = vrot.lane.b32.xlu1 %v11328_v9, %s12413_s26  ;;  %19346 = vst [vmem:[#allocation30_spill] sm:$0xff] %v14050_v40  ;;  %19347 = vst [vmem:[#allocation31_spill] sm:$0xff] %v14054_v63  ;;  %v9591_v9 = vld [vmem:[%s19081_s0 + $0x1ea] sm:$0xff]  ;;  %v11050_v12 = vpop.permute.xlu1 %11049  ;;  %v11045_v50 = vpop.permute.xlu0 %11044  ;;  %v10817_v56 = vunpack.i.h.bf16 %v19428_v55 }
 0x120   :  { %11324 = vrot.lane.b32.xlu0 %v11323_v42, %s12413_s26  ;;  %19348 = vst [vmem:[#allocation29_spill] sm:$0xff] %v14065_v46  ;;  %19349 = vst [vmem:[#allocation57_spill] sm:$0xff] %v14069_v14  ;;  %v9588_v42 = vld [vmem:[%s19081_s0 + $0x1ca] sm:$0xff]  ;;  %v11052_v19 = vunpack.i.h.bf16 %v11050_v12  ;;  %v11051_v61 = vunpack.i.l.bf16 %v11050_v12  ;;  %v11047_v41 = vunpack.i.h.bf16 %v11045_v50  ;;  %v11046_v17 = vunpack.i.l.bf16 %v11045_v50  ;;  %v9594_v12 = vld [vmem:[%s19081_s0 + $0x212] sm:$0xff] }
 0x121   :  { %v11348_v23 = vpack.i.bf16 %v9591_v9, %v9590_v59  ;;  %v11343_v37 = vpack.i.bf16 %v9589_v28, %v9588_v42  ;;  %v9593_v9 = vld [vmem:[%s19081_s0 + $0x202] sm:$0xff] }
 0x122   :  { %v14080_v13 = vsel %vm2772_vm2, %v13648_v24, %v11051_v61  ;;  %v14084_v35 = vsel %vm2772_vm2, %v13651_v3, %v11052_v19  ;;  %v14095_v59 = vsel %vm2772_vm2, %v13660_v36, %v11046_v17  ;;  %v14099_v24 = vsel %vm2772_vm2, %v13663_v25, %v11047_v41  ;;  %v12335_v14 = vld [vmem:[%s19081_s0 + $0x68] sm:$0xff] }
 0x123   :  { %11339 = vrot.lane.b32.xlu1 %v11338_v45, %s12413_s26  ;;  %19350 = vst [vmem:[#allocation56_spill] sm:$0xff] %v14080_v13  ;;  %19351 = vst [vmem:[#allocation32_spill] sm:$0xff] %v14084_v35  ;;  %v9595_v45 = vld [vmem:[%s19081_s0 + $0x21a] sm:$0xff]  ;;  %v11060_v3 = vpop.permute.xlu1 %11059  ;;  %v11055_v19 = vpop.permute.xlu0 %11054 }
 0x124   :  { %11334 = vrot.lane.b32.xlu0 %v11333_v43, %s12413_s26  ;;  %19352 = vst [vmem:[#allocation59_spill] sm:$0xff] %v14095_v59  ;;  %19353 = vst [vmem:[#allocation43_spill] sm:$0xff] %v14099_v24  ;;  %v9592_v43 = vld [vmem:[%s19081_s0 + $0x1fa] sm:$0xff]  ;;  %v11062_v42 = vunpack.i.h.bf16 %v11060_v3  ;;  %v11061_v28 = vunpack.i.l.bf16 %v11060_v3  ;;  %v11057_v61 = vunpack.i.h.bf16 %v11055_v19  ;;  %v11056_v50 = vunpack.i.l.bf16 %v11055_v19  ;;  %v9598_v3 = vld [vmem:[%s19081_s0 + $0x242] sm:$0xff] }
 0x125   :  { %v11358_v36 = vpack.i.bf16 %v9595_v45, %v9594_v12  ;;  %v11353_v17 = vpack.i.bf16 %v9593_v9, %v9592_v43  ;;  %v9597_v45 = vld [vmem:[%s19081_s0 + $0x232] sm:$0xff]  ;;  %v19405_v24 = vld [vmem:[#allocation12_spill] sm:$0xff] }
 0x126   :  { %v14110_v25 = vsel %vm2772_vm2, %v13680_v26, %v11061_v28  ;;  %v14114_v41 = vsel %vm2772_vm2, %v13683_v48, %v11062_v42  ;;  %v14125_v12 = vsel %vm2772_vm2, %v13694_v11, %v11056_v50  ;;  %v14129_v26 = vsel %vm2772_vm2, %v13697_v34, %v11057_v61 }
 0x127   :  { %11349 = vrot.lane.b32.xlu1 %v11348_v23, %s12413_s26  ;;  %19354 = vst [vmem:[#allocation44_spill] sm:$0xff] %v14110_v25  ;;  %19355 = vst [vmem:[#allocation36_spill] sm:$0xff] %v14114_v41  ;;  %v9599_v23 = vld [vmem:[%s19081_s0 + $0x24a] sm:$0xff]  ;;  %v11070_v48 = vpop.permute.xlu1 %11069  ;;  %v11065_v42 = vpop.permute.xlu0 %11064  ;;  %v19403_v41 = vld [vmem:[#allocation10_spill] sm:$0xff]  ;;  %v10666_v59 = vunpack.i.l.bf16 %v19405_v24 }
 0x128   :  { %11344 = vrot.lane.b32.xlu0 %v11343_v37, %s12413_s26  ;;  %19356 = vst [vmem:[#allocation37_spill] sm:$0xff] %v14125_v12  ;;  %19357 = vst [vmem:[#allocation61_spill] sm:$0xff] %v14129_v26  ;;  %v9596_v37 = vld [vmem:[%s19081_s0 + $0x22a] sm:$0xff]  ;;  %v11072_v43 = vunpack.i.h.bf16 %v11070_v48  ;;  %v11071_v9 = vunpack.i.l.bf16 %v11070_v48  ;;  %v11067_v28 = vunpack.i.h.bf16 %v11065_v42  ;;  %v11066_v19 = vunpack.i.l.bf16 %v11065_v42  ;;  %v9602_v48 = vld [vmem:[%s19081_s0 + $0x272] sm:$0xff] }
 0x129   :  { %v11368_v11 = vpack.i.bf16 %v9599_v23, %v9598_v3  ;;  %v11363_v50 = vpack.i.bf16 %v9597_v45, %v9596_v37  ;;  %v9601_v23 = vld [vmem:[%s19081_s0 + $0x262] sm:$0xff]  ;;  %v10657_v25 = vunpack.i.h.bf16 %v19403_v41 }
 0x12a   :  { %v14140_v34 = vsel %vm2772_vm2, %v13712_v57, %v11071_v9  ;;  %v14144_v61 = vsel %vm2772_vm2, %v13715_v39, %v11072_v43  ;;  %v14155_v3 = vsel %vm2772_vm2, %v13724_v20, %v11066_v19  ;;  %v14159_v57 = vsel %vm2772_vm2, %v13727_v1, %v11067_v28 }
 0x12b   :  { %11359 = vrot.lane.b32.xlu1 %v11358_v36, %s12413_s26  ;;  %19358 = vst [vmem:[#allocation62_spill] sm:$0xff] %v14140_v34  ;;  %19359 = vst [vmem:[#allocation63_spill] sm:$0xff] %v14144_v61  ;;  %v9603_v36 = vld [vmem:[%s19081_s0 + $0x27a] sm:$0xff]  ;;  %v11080_v39 = vpop.permute.xlu1 %11079  ;;  %v11075_v43 = vpop.permute.xlu0 %11074 }
 0x12c   :  { %11354 = vrot.lane.b32.xlu0 %v11353_v17, %s12413_s26  ;;  %19360 = vst [vmem:[#allocation64_spill] sm:$0xff] %v14155_v3  ;;  %19361 = vst [vmem:[#allocation65_spill] sm:$0xff] %v14159_v57  ;;  %v9600_v17 = vld [vmem:[%s19081_s0 + $0x25a] sm:$0xff]  ;;  %v11082_v37 = vunpack.i.h.bf16 %v11080_v39  ;;  %v11081_v45 = vunpack.i.l.bf16 %v11080_v39  ;;  %v11077_v9 = vunpack.i.h.bf16 %v11075_v43  ;;  %v11076_v42 = vunpack.i.l.bf16 %v11075_v43  ;;  %v9606_v39 = vld [vmem:[%s19081_s0 + $0x2a2] sm:$0xff] }
 0x12d   :  { %v11378_v20 = vpack.i.bf16 %v9603_v36, %v9602_v48  ;;  %v11373_v19 = vpack.i.bf16 %v9601_v23, %v9600_v17  ;;  %v9605_v36 = vld [vmem:[%s19081_s0 + $0x292] sm:$0xff]  ;;  %v19398_v61 = vld [vmem:[#allocation7_spill] sm:$0xff] }
 0x12e   :  { %v14170_v1 = vsel %vm2772_vm2, %v13744_v29, %v11081_v45  ;;  %v14174_v28 = vsel %vm2772_vm2, %v13747_v16, %v11082_v37  ;;  %v14185_v48 = vsel %vm2772_vm2, %v13758_v7, %v11076_v42  ;;  %v14189_v29 = vsel %vm2772_vm2, %v13761_v8, %v11077_v9 }
 0x12f   :  { %11369 = vrot.lane.b32.xlu1 %v11368_v11, %s12413_s26  ;;  %19362 = vst [vmem:[#allocation66_spill] sm:$0xff] %v14170_v1  ;;  %19363 = vst [vmem:[#allocation67_spill] sm:$0xff] %v14174_v28  ;;  %v9607_v11 = vld [vmem:[%s19081_s0 + $0x2aa] sm:$0xff]  ;;  %v11090_v16 = vpop.permute.xlu1 %11089  ;;  %v11085_v37 = vpop.permute.xlu0 %11084 }
 0x130   :  { %11364 = vrot.lane.b32.xlu0 %v11363_v50, %s12413_s26  ;;  %19364 = vst [vmem:[#allocation68_spill] sm:$0xff] %v14185_v48  ;;  %19365 = vst [vmem:[#allocation69_spill] sm:$0xff] %v14189_v29  ;;  %v9604_v50 = vld [vmem:[%s19081_s0 + $0x28a] sm:$0xff]  ;;  %v11092_v17 = vunpack.i.h.bf16 %v11090_v16  ;;  %v11091_v23 = vunpack.i.l.bf16 %v11090_v16  ;;  %v11087_v45 = vunpack.i.h.bf16 %v11085_v37  ;;  %v11086_v43 = vunpack.i.l.bf16 %v11085_v37  ;;  %v9610_v16 = vld [vmem:[%s19081_s0 + $0x2d2] sm:$0xff] }
 0x131   :  { %v11388_v7 = vpack.i.bf16 %v9607_v11, %v9606_v39  ;;  %v11383_v42 = vpack.i.bf16 %v9605_v36, %v9604_v50  ;;  %v9609_v11 = vld [vmem:[%s19081_s0 + $0x2c2] sm:$0xff] }
 0x132   :  { %v14200_v8 = vsel %vm2772_vm2, %v13788_v30, %v11091_v23  ;;  %v14204_v9 = vsel %vm2772_vm2, %v13791_v33, %v11092_v17  ;;  %v14215_v39 = vsel %vm2772_vm2, %v13798_v62, %v11086_v43  ;;  %v14219_v30 = vsel %vm2772_vm2, %v13801_v47, %v11087_v45  ;;  %v9648_v29 = vld [vmem:[%s19081_s0 + $0x180] sm:$0xff] }
 0x133   :  { %11379 = vrot.lane.b32.xlu1 %v11378_v20, %s12413_s26  ;;  %19366 = vst [vmem:[#allocation70_spill] sm:$0xff] %v14200_v8  ;;  %19367 = vst [vmem:[#allocation71_spill] sm:$0xff] %v14204_v9  ;;  %v9611_v20 = vld [vmem:[%s19081_s0 + $0x2da] sm:$0xff]  ;;  %v11100_v33 = vpop.permute.xlu1 %11099  ;;  %v11095_v17 = vpop.permute.xlu0 %11094 }
 0x134   :  { %11374 = vrot.lane.b32.xlu0 %v11373_v19, %s12413_s26  ;;  %19368 = vst [vmem:[#allocation72_spill] sm:$0xff] %v14215_v39  ;;  %19369 = vst [vmem:[#allocation73_spill] sm:$0xff] %v14219_v30  ;;  %v9608_v19 = vld [vmem:[%s19081_s0 + $0x2ba] sm:$0xff]  ;;  %v11102_v50 = vunpack.i.h.bf16 %v11100_v33  ;;  %v11101_v36 = vunpack.i.l.bf16 %v11100_v33  ;;  %v11097_v23 = vunpack.i.h.bf16 %v11095_v17  ;;  %v11096_v37 = vunpack.i.l.bf16 %v11095_v17  ;;  %v9614_v33 = vld [vmem:[%s19081_s0 + $0x302] sm:$0xff] }
 0x135   :  { %v11398_v62 = vpack.i.bf16 %v9611_v20, %v9610_v16  ;;  %v11393_v43 = vpack.i.bf16 %v9609_v11, %v9608_v19  ;;  %v9613_v20 = vld [vmem:[%s19081_s0 + $0x2f2] sm:$0xff]  ;;  %v9616_v17 = vld [vmem:[%s19081_s0 + $0x31a] sm:$0xff] }
 0x136   :  { %v14230_v47 = vsel %vm2772_vm2, %v13816_v54, %v11101_v36  ;;  %v14234_v45 = vsel %vm2772_vm2, %v13819_v5, %v11102_v50  ;;  %v14245_v16 = vsel %vm2772_vm2, %v13832_v32, %v11096_v37  ;;  %v14249_v54 = vsel %vm2772_vm2, %v13835_v51, %v11097_v23  ;;  %v9618_v51 = vld [vmem:[%s19081_s0 + $0x332] sm:$0xff]  ;;  %v9619_v50 = vld [vmem:[%s19081_s0 + $0x33a] sm:$0xff]  ;;  %v9617_v23 = vld [vmem:[%s19081_s0 + $0x322] sm:$0xff] }
 0x137   :  { %11389 = vrot.lane.b32.xlu1 %v11388_v7, %s12413_s26  ;;  %19370 = vst [vmem:[#allocation74_spill] sm:$0xff] %v14230_v47  ;;  %19371 = vst [vmem:[#allocation75_spill] sm:$0xff] %v14234_v45  ;;  %v9615_v7 = vld [vmem:[%s19081_s0 + $0x30a] sm:$0xff]  ;;  %v14251_v5 = vpop.permute.xlu1 %11109  ;;  %v14259_v19 = vpop.permute.xlu0 %11104  ;;  %v16_v47 = vld [vmem:[%s19081_s0] sm:$0xff] }
 0x138   :  { %11384 = vrot.lane.b32.xlu0 %v11383_v42, %s12413_s26  ;;  %19372 = vst [vmem:[#allocation76_spill] sm:$0xff] %v14245_v16  ;;  %19373 = vst [vmem:[#allocation77_spill] sm:$0xff] %v14249_v54  ;;  %v9612_v42 = vld [vmem:[%s19081_s0 + $0x2ea] sm:$0xff]  ;;  %v11408_v32 = vpack.i.bf16 %v9615_v7, %v9614_v33 }
 0x139   :  { %19374 = vst [vmem:[#allocation78_spill] sm:$0xff] %v14251_v5  ;;  %19375 = vst [vmem:[#allocation79_spill] sm:$0xff] %v14259_v19  ;;  %v11403_v11 = vpack.i.bf16 %v9613_v20, %v9612_v42  ;;  %v9622_v33 = vld [vmem:[%s19081_s0 + $0x48] sm:$0xff]  ;;  %v9623_v7 = vld [vmem:[%s19081_s0 + $0x50] sm:$0xff] }
 0x13a   :  { %v9620_v20 = vld [vmem:[%s19081_s0 + $0x30] sm:$0xff]  ;;  %v12350_v19 = vld [vmem:[%s19081_s0 + $0x120] sm:$0xff] }
 0x13b   :  { %11399 = vrot.lane.b32.xlu1 %v11398_v62, %s12413_s26  ;;  %v14269_v36 = vpop.permute.xlu1 %11119  ;;  %v14277_v37 = vpop.permute.xlu0 %11114  ;;  %v11418_v62 = vpack.i.bf16 %v9619_v50, %v9618_v51  ;;  %v11428_v51 = vpack.i.bf16 %v9623_v7, %v9622_v33  ;;  %v19394_v30 = vld [vmem:[#allocation5_spill] sm:$0xff] }
 0x13c   :  { %11394 = vrot.lane.b32.xlu0 %v11393_v43, %s12413_s26  ;;  %19376 = vst [vmem:[#allocation80_spill] sm:$0xff] %v14269_v36  ;;  %19377 = vst [vmem:[#allocation81_spill] sm:$0xff] %v14277_v37  ;;  %v11413_v43 = vpack.i.bf16 %v9617_v23, %v9616_v17  ;;  %v9626_v17 = vld [vmem:[%s19081_s0 + $0x78] sm:$0xff]  ;;  %v9627_v23 = vld [vmem:[%s19081_s0 + $0x80] sm:$0xff]  ;;  %v10642_v39 = vunpack.i.h.bf16 %v19394_v30 }
 0x13d   :  { %v11438_v33 = vpack.i.bf16 %v9627_v23, %v9626_v17  ;;  %v9634_v23 = vld [vmem:[%s19081_s0 + $0xd8] sm:$0xff]  ;;  %v17_v37 = vld [vmem:[%s19081_s0 + $0x8] sm:$0xff] }
 0x13f   :  { %11409 = vrot.lane.b32.xlu1 %v11408_v32, %s12413_s26  ;;  %v14287_v42 = vpop.permute.xlu1 %11129  ;;  %v9621_v32 = vld [vmem:[%s19081_s0 + $0x38] sm:$0xff] }
 0x140   :  { %11404 = vrot.lane.b32.xlu0 %v11403_v11, %s12413_s26  ;;  %19378 = vst [vmem:[#allocation82_spill] sm:$0xff] %v14287_v42  ;;  %v14295_v11 = vpop.permute.xlu0 %11124  ;;  %v11423_v50 = vpack.i.bf16 %v9621_v32, %v9620_v20  ;;  %v9630_v20 = vld [vmem:[%s19081_s0 + $0xa8] sm:$0xff]  ;;  %v9631_v32 = vld [vmem:[%s19081_s0 + $0xb0] sm:$0xff] }
 0x141   :  { %19379 = vst [vmem:[#allocation83_spill] sm:$0xff] %v14295_v11  ;;  %v9624_v11 = vld [vmem:[%s19081_s0 + $0x60] sm:$0xff] }
 0x143   :  { %11419 = vrot.lane.b32.xlu1 %v11418_v62, %s12413_s26  ;;  %v14305_v54 = vpop.permute.xlu1 %11139  ;;  %v9625_v62 = vld [vmem:[%s19081_s0 + $0x68] sm:$0xff] }
 0x144   :  { %11414 = vrot.lane.b32.xlu0 %v11413_v43, %s12413_s26  ;;  %19380 = vst [vmem:[#allocation84_spill] sm:$0xff] %v14305_v54  ;;  %v14313_v43 = vpop.permute.xlu0 %11134  ;;  %s12414_s26 = smov 6   ;;  %v11433_v7 = vpack.i.bf16 %v9625_v62, %v9624_v11  ;;  %v11448_v11 = vpack.i.bf16 %v9631_v32, %v9630_v20  ;;  %v9635_v62 = vld [vmem:[%s19081_s0 + $0xe0] sm:$0xff]  ;;  %v9638_v32 = vld [vmem:[%s19081_s0 + $0x108] sm:$0xff] }
 0x145   :  { %19381 = vst [vmem:[#allocation85_spill] sm:$0xff] %v14313_v43  ;;  %v9628_v43 = vld [vmem:[%s19081_s0 + $0x90] sm:$0xff] }
 0x147   :  { %11429 = vrot.lane.b32.xlu1 %v11428_v51, %s12414_s26  ;;  %v14323_v54 = vpop.permute.xlu1 %11149  ;;  %v9629_v51 = vld [vmem:[%s19081_s0 + $0x98] sm:$0xff] }
 0x148   :  { %11424 = vrot.lane.b32.xlu0 %v11423_v50, %s12414_s26  ;;  %19382 = vst [vmem:[#allocation86_spill] sm:$0xff] %v14323_v54  ;;  %v14331_v50 = vpop.permute.xlu0 %11144  ;;  %v11443_v17 = vpack.i.bf16 %v9629_v51, %v9628_v43  ;;  %v11458_v43 = vpack.i.bf16 %v9635_v62, %v9634_v23  ;;  %v9639_v51 = vld [vmem:[%s19081_s0 + $0x110] sm:$0xff]  ;;  %v9642_v62 = vld [vmem:[%s19081_s0 + $0x138] sm:$0xff] }
 0x149   :  { %19383 = vst [vmem:[#allocation87_spill] sm:$0xff] %v14331_v50  ;;  %v9632_v50 = vld [vmem:[%s19081_s0 + $0xc0] sm:$0xff] }
 0x14b   :  { %11439 = vrot.lane.b32.xlu1 %v11438_v33, %s12414_s26  ;;  %v14341_v54 = vpop.permute.xlu1 %11159  ;;  %v9633_v33 = vld [vmem:[%s19081_s0 + $0xc8] sm:$0xff] }
 0x14c   :  { %11434 = vrot.lane.b32.xlu0 %v11433_v7, %s12414_s26  ;;  %19384 = vst [vmem:[#allocation88_spill] sm:$0xff] %v14341_v54  ;;  %v14349_v7 = vpop.permute.xlu0 %11154  ;;  %v11453_v20 = vpack.i.bf16 %v9633_v33, %v9632_v50  ;;  %v11468_v50 = vpack.i.bf16 %v9639_v51, %v9638_v32  ;;  %v9643_v33 = vld [vmem:[%s19081_s0 + $0x140] sm:$0xff]  ;;  %v9646_v51 = vld [vmem:[%s19081_s0 + $0x168] sm:$0xff] }
 0x14d   :  { %19385 = vst [vmem:[#allocation89_spill] sm:$0xff] %v14349_v7  ;;  %v9636_v7 = vld [vmem:[%s19081_s0 + $0xf0] sm:$0xff] }
 0x14f   :  { %11449 = vrot.lane.b32.xlu1 %v11448_v11, %s12414_s26  ;;  %v14359_v54 = vpop.permute.xlu1 %11169  ;;  %v9637_v11 = vld [vmem:[%s19081_s0 + $0xf8] sm:$0xff] }
 0x150   :  { %11444 = vrot.lane.b32.xlu0 %v11443_v17, %s12414_s26  ;;  %19386 = vst [vmem:[#allocation90_spill] sm:$0xff] %v14359_v54  ;;  %v14367_v17 = vpop.permute.xlu0 %11164  ;;  %v11463_v23 = vpack.i.bf16 %v9637_v11, %v9636_v7  ;;  %v11478_v7 = vpack.i.bf16 %v9643_v33, %v9642_v62  ;;  %v9647_v11 = vld [vmem:[%s19081_s0 + $0x170] sm:$0xff] }
 0x151   :  { %19387 = vst [vmem:[#allocation91_spill] sm:$0xff] %v14367_v17  ;;  %v9640_v17 = vld [vmem:[%s19081_s0 + $0x120] sm:$0xff]  ;;  %v11488_v42 = vpack.i.bf16 %v9647_v11, %v9646_v51  ;;  %v19395_v51 = vld [vmem:[#allocation6_spill] sm:$0xff] }
 0x152   :  { %v10631_v11 = vunpack.i.l.bf16 %v19395_v51  ;;  %v10632_v28 = vunpack.i.h.bf16 %v19395_v51  ;;  %v12328_v51 = vld [vmem:[%s19081_s0 + $0x48] sm:$0xff] }
 0x153   :  { %11459 = vrot.lane.b32.xlu1 %v11458_v43, %s12414_s26  ;;  %v14377_v54 = vpop.permute.xlu1 %11179  ;;  %v9641_v43 = vld [vmem:[%s19081_s0 + $0x128] sm:$0xff] }
 0x154   :  { %11454 = vrot.lane.b32.xlu0 %v11453_v20, %s12414_s26  ;;  %19388 = vst [vmem:[#allocation92_spill] sm:$0xff] %v14377_v54  ;;  %v14385_v20 = vpop.permute.xlu0 %11174  ;;  %v11473_v32 = vpack.i.bf16 %v9641_v43, %v9640_v17  ;;  %v19393_v43 = vld [vmem:[#allocation4_spill] sm:$0xff] }
 0x155   :  { %19389 = vst [vmem:[#allocation93_spill] sm:$0xff] %v14385_v20  ;;  %v9644_v20 = vld [vmem:[%s19081_s0 + $0x150] sm:$0xff]  ;;  %v10627_v16 = vunpack.i.h.bf16 %v19393_v43  ;;  %v10626_v45 = vunpack.i.l.bf16 %v19393_v43 }
 0x156   :  { %v9684_v43 = vld [vmem:[%s19081_s0 + $0x31] sm:$0xff] }
 0x157   :  { %11469 = vrot.lane.b32.xlu1 %v11468_v50, %s12414_s26  ;;  %v14395_v54 = vpop.permute.xlu1 %11189  ;;  %v9645_v50 = vld [vmem:[%s19081_s0 + $0x158] sm:$0xff]  ;;  %v14450_v57 = vsel %vm2642_vm0, %v16_v47, %v10626_v45  ;;  %v14453_v3 = vsel %vm2642_vm0, %v17_v37, %v10627_v16  ;;  %v12329_v47 = vld [vmem:[%s19081_s0 + $0x50] sm:$0xff] }
 0x158   :  { %11464 = vrot.lane.b32.xlu0 %v11463_v23, %s12414_s26  ;;  %19390 = vst [vmem:[#allocation94_spill] sm:$0xff] %v14395_v54  ;;  %v19391_v23 = vld [vmem:[#allocation3_spill] sm:$0xff]  ;;  %v14405_v33 = vpop.permute.xlu0 %11184  ;;  %v11483_v9 = vpack.i.bf16 %v9645_v50, %v9644_v20  ;;  %v12326_v20 = vld [vmem:[%s19081_s0 + $0x30] sm:$0xff]  ;;  %v12327_v50 = vld [vmem:[%s19081_s0 + $0x38] sm:$0xff]  ;;  %v14470_v45 = vsel %vm2642_vm0, %v12329_v47, %v10642_v39 }
 0x159   :  { %v10637_v17 = vunpack.i.h.bf16 %v19391_v23  ;;  %v10636_v62 = vunpack.i.l.bf16 %v19391_v23  ;;  %19392 = vst [vmem:[#allocation3_spill] sm:$0xff] %v14405_v33  ;;  %v10641_v23 = vunpack.i.l.bf16 %v19394_v30  ;;  %v9649_v30 = vld [vmem:[%s19081_s0 + $0x188] sm:$0xff]  ;;  %v12330_v37 = vld [vmem:[%s19081_s0 + $0x18] sm:$0xff]  ;;  %v19401_v47 = vld [vmem:[#allocation9_spill] sm:$0xff] }
 0x15a   :  { %v11493_v16 = vpack.i.bf16 %v9649_v30, %v9648_v29  ;;  %v9686_v39 = vld [vmem:[%s19081_s0 + $0x49] sm:$0xff]  ;;  %v9687_v29 = vld [vmem:[%s19081_s0 + $0x51] sm:$0xff]  ;;  %v10661_v34 = vunpack.i.l.bf16 %v19401_v47 }
 0x15b   :  { %11479 = vrot.lane.b32.xlu1 %v11478_v7, %s12414_s26  ;;  %v9685_v7 = vld [vmem:[%s19081_s0 + $0x39] sm:$0xff]  ;;  %v14426_v8 = vpop.permute.xlu1 %11199  ;;  %v14444_v48 = vsel %vm2642_vm0, %v12327_v50, %v10637_v17  ;;  %v14464_v50 = vsel %vm2642_vm0, %v12328_v51, %v10641_v23  ;;  %v10652_v23 = vunpack.i.h.bf16 %v19398_v61  ;;  %v11503_v35 = vpack.i.bf16 %v9687_v29, %v9686_v39  ;;  %v19406_v39 = vld [vmem:[#allocation13_spill] sm:$0xff] }
 0x15c   :  { %11474 = vrot.lane.b32.xlu0 %v11473_v32, %s12414_s26  ;;  %19396 = vst [vmem:[#allocation4_spill] sm:$0xff] %v14426_v8  ;;  %v14438_v32 = vsel %vm2642_vm0, %v12326_v20, %v10636_v62  ;;  %v10651_v62 = vunpack.i.l.bf16 %v19398_v61  ;;  %v11498_v20 = vpack.i.bf16 %v9685_v7, %v9684_v43  ;;  %v11903_v17 = vld [vmem:[%s19082_s1] sm:$0x1f]   ;;  %v19399_v43 = vld [vmem:[#allocation8_spill] sm:$0xff]  ;;  %v10682_v29 = vunpack.i.h.bf16 %v19406_v39 }
 0x15d   :  { %v14447_v1 = vpop.permute.xlu0 %11194  ;;  %v10646_v7 = vunpack.i.l.bf16 %v19399_v43  ;;  %10606 = vmatprep.subr.msk.bf16.mxu0 %vm3363_vm3, %v11903_v17  ;;  %v10647_v30 = vunpack.i.h.bf16 %v19399_v43 }
 0x15e   :  { %19397 = vst [vmem:[#allocation5_spill] sm:$0xff] %v14447_v1 }
 0x15f   :  { %11489 = vrot.lane.b32.xlu1 %v11488_v42, %s12414_s26  ;;  %v14477_v42 = vsel %vm2642_vm0, %v12330_v37, %v10631_v11  ;;  %v12331_v11 = vld [vmem:[%s19081_s0 + $0x20] sm:$0xff]  ;;  %v10662_v37 = vunpack.i.h.bf16 %v19401_v47 }
 0x160   :  { %11484 = vrot.lane.b32.xlu0 %v11483_v9, %s12414_s26  ;;  %v14481_v51 = vpop.permute.xlu1 %11209  ;;  %v3365_v9 = vsel %vm3363_vm3, %v11903_v17, 0  ;;  %v14493_v61 = vsel %vm2642_vm0, %v12331_v11, %v10632_v28  ;;  %v12332_v17 = vld [vmem:[%s19081_s0 + $0x78] sm:$0xff]  ;;  %v10656_v28 = vunpack.i.l.bf16 %v19403_v41  ;;  %v19404_v11 = vld [vmem:[#allocation11_spill] sm:$0xff]  ;;  %v9689_v41 = vld [vmem:[%s19081_s0 + $0x69] sm:$0xff] }
 0x161   :  { %19400 = vst [vmem:[#allocation6_spill] sm:$0xff] %v14481_v51  ;;  %10521 = vmatpush3.bf16.msra.mxu0 %v3365_v9  ;;  %v14504_v12 = vsel %vm2642_vm0, %v12332_v17, %v10651_v62  ;;  %v10672_v43 = vunpack.i.h.bf16 %v19404_v11  ;;  %v10671_v47 = vunpack.i.l.bf16 %v19404_v11  ;;  %v10667_v9 = vunpack.i.h.bf16 %v19405_v24  ;;  %v9688_v62 = vld [vmem:[%s19081_s0 + $0x61] sm:$0xff]  ;;  %v12347_v51 = vld [vmem:[%s19081_s0 + $0xf8] sm:$0xff] }
 0x162   :  { %v14498_v26 = vpop.permute.xlu0 %11204  ;;  %v12334_v24 = vld [vmem:[%s19081_s0 + $0x60] sm:$0xff]  ;;  %v10681_v11 = vunpack.i.l.bf16 %v19406_v39 }
 0x163   :  { %19402 = vst [vmem:[#allocation7_spill] sm:$0xff] %v14498_v26  ;;  %11499 = vrot.lane.b32.xlu1 %v11498_v20, %s12415_s15  ;;  %v12333_v20 = vld [vmem:[%s19081_s0 + $0x80] sm:$0xff] }
 0x164   :  { %11494 = vrot.lane.b32.xlu0 %v11493_v16, %s12414_s26  ;;  %v14524_v17 = vsel %vm2642_vm0, %v12333_v20, %v10652_v23  ;;  %v14530_v16 = vsel %vm2642_vm0, %v12334_v24, %v10646_v7  ;;  %v14540_v23 = vsel %vm2642_vm0, %v12335_v14, %v10647_v30  ;;  %v12336_v20 = vld [vmem:[%s19081_s0 + $0xa8] sm:$0xff]  ;;  %v12337_v24 = vld [vmem:[%s19081_s0 + $0xb0] sm:$0xff] }
 0x165   :  { %v14534_v13 = vpop.permute.xlu1 %11219  ;;  %v14546_v7 = vsel %vm2642_vm0, %v12336_v20, %v10661_v34  ;;  %v14552_v39 = vsel %vm2642_vm0, %v12337_v24, %v10662_v37  ;;  %v12338_v14 = vld [vmem:[%s19081_s0 + $0x90] sm:$0xff]  ;;  %v12339_v34 = vld [vmem:[%s19081_s0 + $0x98] sm:$0xff]  ;;  %v11518_v24 = vpack.i.bf16 %v9689_v41, %v9688_v62  ;;  %v12343_v62 = vld [vmem:[%s19081_s0 + $0xc8] sm:$0xff] }
 0x166   :  { %19407 = vst [vmem:[#allocation8_spill] sm:$0xff] %v14534_v13  ;;  %v19408_v13 = vld [vmem:[#allocation14_spill] sm:$0xff]  ;;  %v14555_v63 = vpop.permute.xlu0 %11214  ;;  %v14561_v30 = vsel %vm2642_vm0, %v12338_v14, %v10656_v28  ;;  %v14567_v20 = vsel %vm2642_vm0, %v12339_v34, %v10657_v25  ;;  %v12341_v14 = vld [vmem:[%s19081_s0 + $0xe0] sm:$0xff] }
 0x167   :  { %v10676_v46 = vunpack.i.l.bf16 %v19408_v13  ;;  %19409 = vst [vmem:[#allocation9_spill] sm:$0xff] %v14555_v63  ;;  %v10677_v37 = vunpack.i.h.bf16 %v19408_v13  ;;  %11509 = vrot.lane.b32.xlu1 %v13884_v21, %s12416_s7  ;;  %v12340_v63 = vld [vmem:[%s19081_s0 + $0xd8] sm:$0xff]  ;;  %v14582_v25 = vsel %vm2642_vm0, %v12341_v14, %v10672_v43  ;;  %v12342_v13 = vld [vmem:[%s19081_s0 + $0xc0] sm:$0xff]  ;;  %v12344_v43 = vld [vmem:[%s19081_s0 + $0x108] sm:$0xff] }
 0x168   :  { %v14576_v28 = vsel %vm2642_vm0, %v12340_v63, %v10671_v47  ;;  %v14588_v21 = vsel %vm2642_vm0, %v12342_v13, %v10666_v59  ;;  %v14594_v63 = vsel %vm2642_vm0, %v12343_v62, %v10667_v9  ;;  %11504 = vrot.lane.b32.xlu0 %v11503_v35, %s12415_s15  ;;  %v14601_v47 = vsel %vm2642_vm0, %v12344_v43, %v10681_v11  ;;  %v12345_v59 = vld [vmem:[%s19081_s0 + $0x110] sm:$0xff]  ;;  %v19410_v34 = vld [vmem:[#allocation15_spill] sm:$0xff]  ;;  %v19412_v43 = vld [vmem:[#allocation16_spill] sm:$0xff] }
 0x169   :  { %v14607_v41 = vsel %vm2642_vm0, %v12345_v59, %v10682_v29  ;;  %v10692_v14 = vunpack.i.h.bf16 %v19410_v34  ;;  %v10691_v9 = vunpack.i.l.bf16 %v19410_v34  ;;  %v14611_v13 = vpop.permute.xlu1 %11229  ;;  %v9690_v35 = vld [vmem:[%s19081_s0 + $0x79] sm:$0xff]  ;;  %v9691_v11 = vld [vmem:[%s19081_s0 + $0x81] sm:$0xff]  ;;  %v12346_v62 = vld [vmem:[%s19081_s0 + $0xf0] sm:$0xff]  ;;  %v10687_v59 = vunpack.i.h.bf16 %v19412_v43 }
 0x16a   :  { %19411 = vst [vmem:[#allocation10_spill] sm:$0xff] %v14611_v13  ;;  %v14623_v29 = vsel %vm2642_vm0, %v12346_v62, %v10676_v46  ;;  %v10686_v34 = vunpack.i.l.bf16 %v19412_v43  ;;  %v19413_v13 = vld [vmem:[#allocation17_spill] sm:$0xff]  ;;  %v14628_v26 = vpop.permute.xlu0 %11224  ;;  %v14634_v1 = vsel %vm2642_vm0, %v12347_v51, %v10677_v37  ;;  %v10697_v46 = vunpack.i.h.bf16 %v19415_v53  ;;  %v19416_v43 = vld [vmem:[#allocation35_spill] sm:$0xff]  ;;  %v12348_v37 = vld [vmem:[%s19081_s0 + $0x138] sm:$0xff] }
 0x16b   :  { %v10701_v40 = vunpack.i.l.bf16 %v19413_v13  ;;  %19414 = vst [vmem:[#allocation11_spill] sm:$0xff] %v14628_v26  ;;  %v10702_v8 = vunpack.i.h.bf16 %v19413_v13  ;;  %v10696_v62 = vunpack.i.l.bf16 %v19415_v53  ;;  %11519 = vrot.lane.b32.xlu1 %v11518_v24, %s12415_s15  ;;  %v10792_v60 = vunpack.i.h.bf16 %v19416_v43  ;;  %v19417_v26 = vld [vmem:[#allocation38_spill] sm:$0xff] }
 0x16c   :  { %v10791_v52 = vunpack.i.l.bf16 %v19416_v43  ;;  %v10786_v36 = vunpack.i.l.bf16 %v19417_v26  ;;  %11514 = vrot.lane.b32.xlu0 %v13908_v10, %s12416_s7  ;;  %v11523_v33 = vpack.i.bf16 %v9691_v11, %v9690_v35  ;;  %v9692_v51 = vld [vmem:[%s19081_s0 + $0x91] sm:$0xff]  ;;  %v9693_v53 = vld [vmem:[%s19081_s0 + $0x99] sm:$0xff]  ;;  %v14655_v24 = vsel %vm2642_vm0, %v12348_v37, %v10691_v9  ;;  %v12351_v37 = vld [vmem:[%s19081_s0 + $0x128] sm:$0xff] }
 0x16d   :  { %v12349_v10 = vld [vmem:[%s19081_s0 + $0x140] sm:$0xff]  ;;  %v10787_v35 = vunpack.i.h.bf16 %v19417_v26  ;;  %v19418_v11 = vld [vmem:[#allocation41_spill] sm:$0xff]  ;;  %v14665_v54 = vpop.permute.xlu1 %11239  ;;  %v14671_v9 = vsel %vm2642_vm0, %v12350_v19, %v10686_v34  ;;  %v12352_v26 = vld [vmem:[%s19081_s0 + $0x168] sm:$0xff] }
 0x16e   :  { %v14661_v13 = vsel %vm2642_vm0, %v12349_v10, %v10692_v14  ;;  %v10801_v43 = vunpack.i.l.bf16 %v19418_v11  ;;  %19419 = vst [vmem:[#allocation12_spill] sm:$0xff] %v14665_v54  ;;  %v14677_v14 = vsel %vm2642_vm0, %v12351_v37, %v10687_v59  ;;  %v14683_v10 = vsel %vm2642_vm0, %v12352_v26, %v10701_v40  ;;  %v14686_v5 = vpop.permute.xlu0 %11234  ;;  %v12353_v19 = vld [vmem:[%s19081_s0 + $0x170] sm:$0xff]  ;;  %v19421_v40 = vld [vmem:[#allocation42_spill] sm:$0xff] }
 0x16f   :  { %v10802_v54 = vunpack.i.h.bf16 %v19418_v11  ;;  %19420 = vst [vmem:[#allocation13_spill] sm:$0xff] %v14686_v5  ;;  %v14692_v34 = vsel %vm2642_vm0, %v12353_v19, %v10702_v8  ;;  %v12354_v59 = vld [vmem:[%s19081_s0 + $0x150] sm:$0xff]  ;;  %v10796_v26 = vunpack.i.l.bf16 %v19421_v40  ;;  %11529 = vrot.lane.b32.xlu1 %v13905_v18, %s12416_s7  ;;  %v11538_v11 = vpack.i.bf16 %v9693_v53, %v9692_v51  ;;  %v12355_v5 = vld [vmem:[%s19081_s0 + $0x158] sm:$0xff] }
 0x170   :  { %v14698_v37 = vsel %vm2642_vm0, %v12354_v59, %v10696_v62  ;;  %v14707_v8 = vsel %vm2642_vm0, %v12355_v5, %v10697_v46  ;;  %v14711_v19 = vsel %vm2707_vm1, %v14477_v42, %v10791_v52  ;;  %v14715_v62 = vsel %vm2707_vm1, %v14493_v61, %v10792_v60  ;;  %11524 = vrot.lane.b32.xlu0 %v11523_v33, %s12415_s15  ;;  %v19422_v42 = vld [vmem:[#allocation45_spill] sm:$0xff] }
 0x171   :  { %v14719_v59 = vsel %vm2707_vm1, %v14450_v57, %v10786_v36  ;;  %v14724_v18 = vsel %vm2707_vm1, %v14453_v3, %v10787_v35  ;;  %v14728_v5 = vsel %vm2707_vm1, %v14464_v50, %v10801_v43  ;;  %v10797_v52 = vunpack.i.h.bf16 %v19421_v40  ;;  %v14732_v60 = vpop.permute.xlu1 %11249  ;;  %v9694_v57 = vld [vmem:[%s19081_s0 + $0xa9] sm:$0xff]  ;;  %v9695_v36 = vld [vmem:[%s19081_s0 + $0xb1] sm:$0xff]  ;;  %v19427_v43 = vld [vmem:[#allocation47_spill] sm:$0xff] }
 0x172   :  { %v10811_v46 = vunpack.i.l.bf16 %v19422_v42  ;;  %19423 = vst [vmem:[#allocation14_spill] sm:$0xff] %v14732_v60  ;;  %v14742_v3 = vsel %vm2707_vm1, %v14470_v45, %v10802_v54  ;;  %v10812_v33 = vunpack.i.h.bf16 %v19422_v42  ;;  %v19424_v50 = vld [vmem:[#allocation46_spill] sm:$0xff]  ;;  %v14747_v53 = vpop.permute.xlu0 %11244  ;;  %v14751_v35 = vsel %vm2707_vm1, %v14438_v32, %v10796_v26  ;;  %v19429_v45 = vld [vmem:[#allocation49_spill] sm:$0xff]  ;;  %v9696_v32 = vld [vmem:[%s19081_s0 + $0xc1] sm:$0xff] }
 0x173   :  { %v10807_v61 = vunpack.i.h.bf16 %v19424_v50  ;;  %v10806_v51 = vunpack.i.l.bf16 %v19424_v50  ;;  %19425 = vst [vmem:[#allocation15_spill] sm:$0xff] %v14747_v53  ;;  %19426 = vst [vmem:[#allocation16_spill] sm:$0xff] %v14751_v35  ;;  %v10822_v40 = vunpack.i.h.bf16 %v19427_v43  ;;  %v10821_v60 = vunpack.i.l.bf16 %v19427_v43  ;;  %11539 = vrot.lane.b32.xlu1 %v11538_v11, %s12415_s15  ;;  %v9697_v26 = vld [vmem:[%s19081_s0 + $0xc9] sm:$0xff]  ;;  %v19430_v43 = vld [vmem:[#allocation50_spill] sm:$0xff] }
 0x174   :  { %v10816_v54 = vunpack.i.l.bf16 %v19428_v55  ;;  %v10832_v42 = vunpack.i.h.bf16 %v19429_v45  ;;  %v10831_v50 = vunpack.i.l.bf16 %v19429_v45  ;;  %11534 = vrot.lane.b32.xlu0 %v13932_v49, %s12416_s7  ;;  %v11543_v53 = vpack.i.bf16 %v9695_v36, %v9694_v57 }
 0x175   :  { %v14770_v11 = vsel %vm2707_vm1, %v14444_v48, %v10797_v52  ;;  %v14774_v55 = vsel %vm2707_vm1, %v14504_v12, %v10811_v46  ;;  %v10827_v45 = vunpack.i.h.bf16 %v19430_v43  ;;  %v10826_v49 = vunpack.i.l.bf16 %v19430_v43  ;;  %v14778_v57 = vpop.permute.xlu1 %11259  ;;  %v19431_v12 = vld [vmem:[#allocation51_spill] sm:$0xff] }
 0x176   :  { %v14782_v36 = vsel %vm2707_vm1, %v14524_v17, %v10812_v33  ;;  %v14786_v35 = vsel %vm2707_vm1, %v14530_v16, %v10806_v51  ;;  %v14790_v48 = vsel %vm2707_vm1, %v14540_v23, %v10807_v61  ;;  %v10841_v52 = vunpack.i.l.bf16 %v19431_v12  ;;  %v14793_v46 = vpop.permute.xlu0 %11254  ;;  %v9699_v51 = vld [vmem:[%s19081_s0 + $0xe1] sm:$0xff] }
 0x177   :  { %v14797_v43 = vsel %vm2707_vm1, %v14546_v7, %v10821_v60  ;;  %v14801_v17 = vsel %vm2707_vm1, %v14552_v39, %v10822_v40  ;;  %v10842_v33 = vunpack.i.h.bf16 %v19431_v12  ;;  %11549 = vrot.lane.b32.xlu1 %v13928_v6, %s12416_s7  ;;  %v11558_v16 = vpack.i.bf16 %v9697_v26, %v9696_v32 }
 0x178   :  { %v14808_v23 = vsel %vm2707_vm1, %v14561_v30, %v10816_v54  ;;  %v14812_v61 = vsel %vm2707_vm1, %v14567_v20, %v10817_v56  ;;  %v14816_v7 = vsel %vm2707_vm1, %v14576_v28, %v10831_v50  ;;  %v14820_v39 = vsel %vm2707_vm1, %v14582_v25, %v10832_v42  ;;  %11544 = vrot.lane.b32.xlu0 %v11543_v53, %s12415_s15  ;;  %v19432_v56 = vld [vmem:[#allocation52_spill] sm:$0xff]  ;;  %v9698_v25 = vld [vmem:[%s19081_s0 + $0xd9] sm:$0xff] }
 0x179   :  { %v14825_v6 = vsel %vm2707_vm1, %v14588_v21, %v10826_v49  ;;  %v14829_v30 = vsel %vm2707_vm1, %v14594_v63, %v10827_v45  ;;  %v10837_v20 = vunpack.i.h.bf16 %v19432_v56  ;;  %v10836_v60 = vunpack.i.l.bf16 %v19432_v56  ;;  %v14833_v28 = vpop.permute.xlu1 %11269  ;;  %v19434_v63 = vld [vmem:[#allocation53_spill] sm:$0xff]  ;;  %v19435_v54 = vld [vmem:[#allocation54_spill] sm:$0xff] }
 0x17a   :  { %19433 = vst [vmem:[#allocation17_spill] sm:$0xff] %v14833_v28  ;;  %v14843_v21 = vsel %vm2707_vm1, %v14601_v47, %v10841_v52  ;;  %v10852_v53 = vunpack.i.h.bf16 %v19434_v63  ;;  %v10851_v40 = vunpack.i.l.bf16 %v19434_v63  ;;  %v10846_v42 = vunpack.i.l.bf16 %v19435_v54  ;;  %v14848_v50 = vpop.permute.xlu0 %11264  ;;  %v19437_v45 = vld [vmem:[#allocation58_spill] sm:$0xff]  ;;  %v19438_v47 = vld [vmem:[#allocation60_spill] sm:$0xff] }
 0x17b   :  { %19436 = vst [vmem:[#allocation18_spill] sm:$0xff] %v14848_v50  ;;  %v14852_v32 = vsel %vm2707_vm1, %v14607_v41, %v10842_v33  ;;  %v10847_v26 = vunpack.i.h.bf16 %v19435_v54  ;;  %v10862_v49 = vunpack.i.h.bf16 %v19437_v45  ;;  %v10861_v12 = vunpack.i.l.bf16 %v19437_v45  ;;  %11559 = vrot.lane.b32.xlu1 %v11558_v16, %s12415_s15  ;;  %v9700_v41 = vld [vmem:[%s19081_s0 + $0xf1] sm:$0xff]  ;;  %v9701_v33 = vld [vmem:[%s19081_s0 + $0xf9] sm:$0xff] }
 0x17c   :  { %v10857_v52 = vunpack.i.h.bf16 %v19438_v47  ;;  %v10856_v56 = vunpack.i.l.bf16 %v19438_v47  ;;  %v10951_v63 = vunpack.i.l.bf16 %v13837_v0  ;;  %11554 = vrot.lane.b32.xlu0 %v13956_v15, %s12416_s7  ;;  %v11563_v50 = vpack.i.bf16 %v9699_v51, %v9698_v25 }
 0x17d   :  { %v14871_v16 = vsel %vm2707_vm1, %v14623_v29, %v10836_v60  ;;  %v14875_v54 = vsel %vm2707_vm1, %v14634_v1, %v10837_v20  ;;  %v10952_v45 = vunpack.i.h.bf16 %v13837_v0  ;;  %v10946_v15 = vunpack.i.l.bf16 %v13845_v4  ;;  %v14879_v25 = vpop.permute.xlu1 %11279 }
 0x17e   :  { %19439 = vst [vmem:[#allocation35_spill] sm:$0xff] %v14879_v25  ;;  %v14883_v51 = vsel %vm2707_vm1, %v14655_v24, %v10851_v40  ;;  %v14887_v47 = vsel %vm2707_vm1, %v14661_v13, %v10852_v53  ;;  %v14891_v29 = vsel %vm2707_vm1, %v14671_v9, %v10846_v42  ;;  %v10947_v1 = vunpack.i.h.bf16 %v13845_v4  ;;  %v14894_v20 = vpop.permute.xlu0 %11274  ;;  %v9703_v40 = vld [vmem:[%s19081_s0 + $0x111] sm:$0xff] }
 0x17f   :  { %19440 = vst [vmem:[#allocation38_spill] sm:$0xff] %v14894_v20  ;;  %v14898_v0 = vsel %vm2707_vm1, %v14677_v14, %v10847_v26  ;;  %v14902_v24 = vsel %vm2707_vm1, %v14683_v10, %v10861_v12  ;;  %v10961_v60 = vunpack.i.l.bf16 %v13855_v27  ;;  %11569 = vrot.lane.b32.xlu1 %v13952_v2, %s12416_s7  ;;  %v11578_v13 = vpack.i.bf16 %v9701_v33, %v9700_v41 }
 0x180   :  { %v14909_v9 = vsel %vm2707_vm1, %v14692_v34, %v10862_v49  ;;  %v14913_v4 = vsel %vm2707_vm1, %v14698_v37, %v10856_v56  ;;  %v14917_v14 = vsel %vm2707_vm1, %v14707_v8, %v10857_v52  ;;  %v14921_v10 = vsel %vm2772_vm2, %v14711_v19, %v10951_v63  ;;  %11564 = vrot.lane.b32.xlu0 %v11563_v50, %s12415_s15  ;;  %v9702_v19 = vld [vmem:[%s19081_s0 + $0x109] sm:$0xff]  ;;  %v19443_v56 = vld [vmem:[#allocation23_spill] sm:$0xff] }
 0x181   :  { %v14926_v2 = vsel %vm2772_vm2, %v14715_v62, %v10952_v45  ;;  %v14930_v34 = vsel %vm2772_vm2, %v14719_v59, %v10946_v15  ;;  %v10962_v37 = vunpack.i.h.bf16 %v13855_v27  ;;  %v10956_v53 = vunpack.i.l.bf16 %v13863_v31  ;;  %v14934_v8 = vpop.permute.xlu1 %11289 }
 0x182   :  { %19441 = vst [vmem:[#allocation41_spill] sm:$0xff] %v14934_v8  ;;  %v14944_v62 = vsel %vm2772_vm2, %v14724_v18, %v10947_v1  ;;  %v10957_v59 = vunpack.i.h.bf16 %v13863_v31  ;;  %v10972_v27 = vunpack.i.h.bf16 %v13873_v58  ;;  %v10971_v42 = vunpack.i.l.bf16 %v13873_v58  ;;  %v14949_v50 = vpop.permute.xlu0 %11284  ;;  %v15125_v8 = vld [vmem:[%s19081_s0 + $0x198] sm:$0xff] }
 0x183   :  { %19442 = vst [vmem:[#allocation42_spill] sm:$0xff] %v14949_v50  ;;  %v14953_v26 = vsel %vm2772_vm2, %v14728_v5, %v10961_v60  ;;  %v10967_v49 = vunpack.i.h.bf16 %v13881_v38  ;;  %v10966_v12 = vunpack.i.l.bf16 %v13881_v38  ;;  %v10981_v52 = vunpack.i.l.bf16 %v13893_v22  ;;  %11579 = vrot.lane.b32.xlu1 %v11578_v13, %s12415_s15  ;;  %v9704_v5 = vld [vmem:[%s19081_s0 + $0x121] sm:$0xff]  ;;  %v9705_v38 = vld [vmem:[%s19081_s0 + $0x129] sm:$0xff] }
 0x184   :  { %v10982_v31 = vunpack.i.h.bf16 %v13893_v22  ;;  %v10977_v18 = vunpack.i.h.bf16 %v13901_v44  ;;  %v10976_v58 = vunpack.i.l.bf16 %v13901_v44  ;;  %11574 = vrot.lane.b32.xlu0 %v19443_v56, %s12416_s7  ;;  %v11583_v63 = vpack.i.bf16 %v9703_v40, %v9702_v19  ;;  %v19444_v22 = vld [vmem:[#allocation16_spill] sm:$0xff]  ;;  %v19445_v44 = vld [vmem:[#allocation27_spill] sm:$0xff]  ;;  %v19463_v56 = vld [vmem:[#allocation21_spill] sm:$0xff] }
 0x185   :  { %v14972_v41 = vsel %vm2772_vm2, %v14742_v3, %v10962_v37  ;;  %v14976_v33 = vsel %vm2772_vm2, %v19444_v22, %v10956_v53  ;;  %v10992_v45 = vunpack.i.h.bf16 %v19445_v44  ;;  %v10991_v15 = vunpack.i.l.bf16 %v19445_v44  ;;  %v14980_v1 = vpop.permute.xlu1 %11299  ;;  %v19449_v37 = vld [vmem:[#allocation28_spill] sm:$0xff]  ;;  %v15075_v44 = vld [vmem:[%s19081_s0 + $0x159] sm:$0xff] }
 0x186   :  { %19446 = vst [vmem:[#allocation45_spill] sm:$0xff] %v14980_v1  ;;  %v14984_v60 = vsel %vm2772_vm2, %v14770_v11, %v10957_v59  ;;  %v14988_v13 = vsel %vm2772_vm2, %v14774_v55, %v10971_v42  ;;  %v14992_v3 = vsel %vm2772_vm2, %v14782_v36, %v10972_v27  ;;  %v10986_v53 = vunpack.i.l.bf16 %v19449_v37  ;;  %v14995_v19 = vpop.permute.xlu0 %11294  ;;  %v19454_v59 = vld [vmem:[#allocation55_spill] sm:$0xff]  ;;  %v19469_v1 = vld [vmem:[#allocation34_spill] sm:$0xff] }
 0x187   :  { %19447 = vst [vmem:[#allocation46_spill] sm:$0xff] %v14988_v13  ;;  %19448 = vst [vmem:[#allocation47_spill] sm:$0xff] %v14992_v3  ;;  %v14999_v40 = vsel %vm2772_vm2, %v14786_v35, %v10966_v12  ;;  %v15003_v11 = vsel %vm2772_vm2, %v14790_v48, %v10967_v49  ;;  %v15007_v55 = vsel %vm2772_vm2, %v14797_v43, %v10981_v52  ;;  %11589 = vrot.lane.b32.xlu1 %v19454_v59, %s12416_s7  ;;  %v15014_v27 = vld [vmem:[%s19081_s0 + $0x122] sm:$0xff]  ;;  %v15019_v35 = vld [vmem:[%s19081_s0 + $0x12a] sm:$0xff]  ;;  %vm4597_vm0 = vsmask.f32 256 }
 0x188   :  { %19450 = vst [vmem:[#allocation48_spill] sm:$0xff] %v14995_v19  ;;  %19451 = vst [vmem:[#allocation49_spill] sm:$0xff] %v14999_v40  ;;  %v11598_v36 = vpack.i.bf16 %v9705_v38, %v9704_v5  ;;  %v15023_v48 = vsel %vm2772_vm2, %v14801_v17, %v10982_v31  ;;  %v15027_v43 = vsel %vm2772_vm2, %v14808_v23, %v10976_v58  ;;  %v10987_v49 = vunpack.i.h.bf16 %v19449_v37  ;;  %v19460_v52 = vld [vmem:[#allocation20_spill] sm:$0xff]  ;;  %v19466_v59 = vld [vmem:[#allocation22_spill] sm:$0xff] }
 0x189   :  { %19452 = vst [vmem:[#allocation50_spill] sm:$0xff] %v15003_v11  ;;  %19453 = vst [vmem:[#allocation51_spill] sm:$0xff] %v15007_v55  ;;  %v15031_v42 = vsel %vm2772_vm2, %v14812_v61, %v10977_v18  ;;  %11584 = vrot.lane.b32.xlu0 %v11583_v63, %s12415_s15  ;;  %v15037_v12 = vsel %vm2772_vm2, %v14816_v7, %v10991_v15  ;;  %v15041_v17 = vsel %vm2772_vm2, %v14820_v39, %v10992_v45  ;;  %v15045_v58 = vpop.permute.xlu1 %11309  ;;  %v15050_v61 = vld [vmem:[%s19081_s0 + $0x139] sm:$0xff]  ;;  %v15055_v7 = vld [vmem:[%s19081_s0 + $0x141] sm:$0xff]  ;;  %vm4350_vm1 = vcmask 1044484  }
 0x18a   :  { %19455 = vst [vmem:[#allocation52_spill] sm:$0xff] %v15023_v48  ;;  %19456 = vst [vmem:[#allocation53_spill] sm:$0xff] %v15027_v43  ;;  %v11002_v31 = vunpack.i.h.bf16 %v19460_v52  ;;  %v11001_v23 = vunpack.i.l.bf16 %v19460_v52  ;;  %v15060_v39 = vld [vmem:[%s19081_s0 + $0x151] sm:$0xff]  ;;  %v15064_v18 = vsel %vm2772_vm2, %v14825_v6, %v10986_v53  ;;  %v10997_v63 = vunpack.i.h.bf16 %v19463_v56  ;;  %v15068_v38 = vpop.permute.xlu0 %11304  ;;  %v15080_v45 = vld [vmem:[%s19081_s0 + $0x13a] sm:$0xff] }
 0x18b   :  { %19457 = vst [vmem:[#allocation54_spill] sm:$0xff] %v15031_v42  ;;  %19458 = vst [vmem:[#allocation58_spill] sm:$0xff] %v15037_v12  ;;  %v10996_v5 = vunpack.i.l.bf16 %v19463_v56  ;;  %v11608_v22 = vpack.i.bf16 %v15019_v35, %v15014_v27  ;;  %v15085_v6 = vld [vmem:[%s19081_s0 + $0x142] sm:$0xff]  ;;  %v11007_v27 = vunpack.i.h.bf16 %v19466_v59  ;;  %v11006_v35 = vunpack.i.l.bf16 %v19466_v59  ;;  %11599 = vrot.lane.b32.xlu1 %v11598_v36, %s12415_s15  ;;  %v15095_v52 = vld [vmem:[%s19081_s0 + $0x152] sm:$0xff] }
 0x18c   :  { %19459 = vst [vmem:[#allocation60_spill] sm:$0xff] %v15041_v17  ;;  %19461 = vst [vmem:[#allocation23_spill] sm:$0xff] %v15045_v58  ;;  %v19465_v15 = vld [vmem:[#allocation19_spill] sm:$0xff]  ;;  %v15110_v59 = vld [vmem:[%s19081_s0 + $0x171] sm:$0xff]  ;;  %v15114_v36 = vsel %vm2772_vm2, %v14829_v30, %v10987_v49  ;;  %v11603_v50 = vpack.i.bf16 %v15055_v7, %v15050_v61  ;;  %v15144_v61 = vsel %vm2772_vm2, %v14843_v21, %v11001_v23 }
 0x18d   :  { %19462 = vst [vmem:[#allocation16_spill] sm:$0xff] %v15064_v18  ;;  %19464 = vst [vmem:[#allocation27_spill] sm:$0xff] %v15068_v38  ;;  %v11012_v37 = vunpack.i.h.bf16 %v19465_v15  ;;  %v11011_v53 = vunpack.i.l.bf16 %v19465_v15  ;;  %v15100_v56 = vld [vmem:[%s19081_s0 + $0x15a] sm:$0xff]  ;;  %v15105_v15 = vld [vmem:[%s19081_s0 + $0x169] sm:$0xff]  ;;  %11594 = vrot.lane.b32.xlu0 %v19469_v1, %s12416_s7  ;;  %v15148_v7 = vsel %vm2772_vm2, %v14852_v32, %v11002_v31  ;;  %v15152_v28 = vpop.permute.xlu1 %11319  ;;  %v15200_v18 = vsel %vm2772_vm2, %v14875_v54, %v10997_v63 }
 0x18e   :  { %19467 = vst [vmem:[#allocation28_spill] sm:$0xff] %v15114_v36  ;;  %v19468_v38 = vld [vmem:[#allocation26_spill] sm:$0xff]  ;;  %v15130_v30 = vld [vmem:[%s19081_s0 + $0x1a0] sm:$0xff]  ;;  %v15135_v49 = vld [vmem:[%s19081_s0 + $0x16a] sm:$0xff]  ;;  %v15202_v17 = vpop.permute.xlu0 %11314  ;;  %v11618_v12 = vpack.i.bf16 %v15075_v44, %v15060_v39  ;;  %v11613_v42 = vpack.i.bf16 %v15085_v6, %v15080_v45  ;;  %v15243_v45 = vsel %vm2772_vm2, %v14891_v29, %v11006_v35  ;;  %v15247_v6 = vsel %vm2772_vm2, %v14898_v0, %v11007_v27 }
 0x18f   :  { %v11022_v58 = vunpack.i.h.bf16 %v19468_v38  ;;  %v11021_v19 = vunpack.i.l.bf16 %v19468_v38  ;;  %v15140_v1 = vld [vmem:[%s19081_s0 + $0x172] sm:$0xff]  ;;  %19470 = vst [vmem:[#allocation55_spill] sm:$0xff] %v15144_v61  ;;  %19471 = vst [vmem:[#allocation20_spill] sm:$0xff] %v15148_v7  ;;  %v15162_v21 = vld [vmem:[%s19081_s0 + $0x1a1] sm:$0xff]  ;;  %v15196_v61 = vsel %vm2772_vm2, %v14871_v16, %v10996_v5  ;;  %v15235_v5 = vsel %vm2772_vm2, %v14883_v51, %v11011_v53  ;;  %11609 = vrot.lane.b32.xlu1 %v11608_v22, %s12416_s7 }
 0x190   :  { %v19472_v38 = vld [vmem:[#allocation33_spill] sm:$0xff]  ;;  %19473 = vst [vmem:[#allocation21_spill] sm:$0xff] %v15152_v28  ;;  %v15157_v36 = vld [vmem:[%s19081_s0 + $0x199] sm:$0xff]  ;;  %v15167_v32 = vld [vmem:[%s19081_s0 + $0x181] sm:$0xff]  ;;  %v15239_v44 = vsel %vm2772_vm2, %v14887_v47, %v11012_v37  ;;  %v11628_v22 = vpack.i.bf16 %v15100_v56, %v15095_v52  ;;  %v11623_v37 = vpack.i.bf16 %v15110_v59, %v15105_v15 }
 0x191   :  { %v11017_v20 = vunpack.i.h.bf16 %v19472_v38  ;;  %v11016_v25 = vunpack.i.l.bf16 %v19472_v38  ;;  %v15172_v31 = vld [vmem:[%s19081_s0 + $0x189] sm:$0xff]  ;;  %v15177_v23 = vld [vmem:[%s19081_s0 + $0x19a] sm:$0xff]  ;;  %19474 = vst [vmem:[#allocation19_spill] sm:$0xff] %v15196_v61  ;;  %19475 = vst [vmem:[#allocation22_spill] sm:$0xff] %v15200_v18  ;;  %v15267_v29 = vsel %vm2772_vm2, %v14902_v24, %v11021_v19  ;;  %v15271_v0 = vsel %vm2772_vm2, %v14909_v9, %v11022_v58  ;;  %11604 = vrot.lane.b32.xlu0 %v11603_v50, %s12415_s15  ;;  %v15306_v27 = vpop.permute.xlu1 %11329 }
 0x192   :  { %v15182_v38 = vld [vmem:[%s19081_s0 + $0x1a2] sm:$0xff]  ;;  %v15192_v7 = vld [vmem:[%s19081_s0 + $0x18a] sm:$0xff]  ;;  %19476 = vst [vmem:[#allocation26_spill] sm:$0xff] %v15202_v17  ;;  %v15211_v43 = vld [vmem:[%s19081_s0 + $0x1f8] sm:$0xff] }
 0x193   :  { %v15187_v28 = vld [vmem:[%s19081_s0 + $0x182] sm:$0xff]  ;;  %v15231_v63 = vld [vmem:[%s19081_s0 + $0x1f9] sm:$0xff]  ;;  %19477 = vst [vmem:[#allocation34_spill] sm:$0xff] %v15235_v5  ;;  %19478 = vst [vmem:[#allocation33_spill] sm:$0xff] %v15239_v44  ;;  %v15300_v19 = vsel %vm2772_vm2, %v14913_v4, %v11016_v25  ;;  %v15304_v58 = vsel %vm2772_vm2, %v14917_v14, %v11017_v20  ;;  %v15327_v4 = vpop.permute.xlu0 %11324  ;;  %11619 = vrot.lane.b32.xlu1 %v11618_v12, %s12415_s15  ;;  %vm4593_vm2 = vcmask 125953  }
 0x194   :  { %v15216_v16 = vld [vmem:[%s19081_s0 + $0x200] sm:$0xff]  ;;  %v15226_v39 = vld [vmem:[%s19081_s0 + $0x1e8] sm:$0xff]  ;;  %19479 = vst [vmem:[#allocation95_spill] sm:$0xff] %v15243_v45  ;;  %19480 = vst [vmem:[#allocation96_spill] sm:$0xff] %v15247_v6 }
 0x195   :  { %v15221_v54 = vld [vmem:[%s19081_s0 + $0x1e0] sm:$0xff]  ;;  %v15263_v47 = vld [vmem:[%s19081_s0 + $0x1e9] sm:$0xff]  ;;  %19481 = vst [vmem:[#allocation97_spill] sm:$0xff] %v15267_v29  ;;  %19482 = vst [vmem:[#allocation98_spill] sm:$0xff] %v15271_v0  ;;  %11614 = vrot.lane.b32.xlu0 %v11613_v42, %s12416_s7  ;;  %v15398_v42 = vpop.permute.xlu1 %11339 }
 0x196   :  { %v15253_v17 = vld [vmem:[%s19081_s0 + $0x201] sm:$0xff]  ;;  %v15296_v50 = vld [vmem:[%s19081_s0 + $0x1ea] sm:$0xff]  ;;  %19483 = vst [vmem:[#allocation99_spill] sm:$0xff] %v15300_v19  ;;  %19484 = vst [vmem:[#allocation100_spill] sm:$0xff] %v15304_v58 }
 0x197   :  { %v15258_v51 = vld [vmem:[%s19081_s0 + $0x1e1] sm:$0xff]  ;;  %19485 = vst [vmem:[#allocation101_spill] sm:$0xff] %v15306_v27  ;;  %v15320_v25 = vld [vmem:[%s19081_s0 + $0x230] sm:$0xff]  ;;  %19486 = vst [vmem:[#allocation102_spill] sm:$0xff] %v15327_v4  ;;  %v15406_v40 = vpop.permute.xlu0 %11334  ;;  %11629 = vrot.lane.b32.xlu1 %v11628_v22, %s12416_s7 }
 0x198   :  { %v15281_v53 = vld [vmem:[%s19081_s0 + $0x1fa] sm:$0xff]  ;;  %v15286_v24 = vld [vmem:[%s19081_s0 + $0x202] sm:$0xff]  ;;  %v15325_v20 = vld [vmem:[%s19081_s0 + $0x210] sm:$0xff] }
 0x199   :  { %v15291_v9 = vld [vmem:[%s19081_s0 + $0x1e2] sm:$0xff]  ;;  %v15340_v35 = vld [vmem:[%s19081_s0 + $0x218] sm:$0xff]  ;;  %v15374_v59 = vld [vmem:[%s19081_s0 + $0x22a] sm:$0xff]  ;;  %11624 = vrot.lane.b32.xlu0 %v11623_v37, %s12415_s15 }
 0x19a   :  { %v15315_v56 = vld [vmem:[%s19081_s0 + $0x228] sm:$0xff]  ;;  %v15350_v15 = vld [vmem:[%s19081_s0 + $0x231] sm:$0xff]  ;;  %v15369_v12 = vld [vmem:[%s19081_s0 + $0x219] sm:$0xff] }
 0x19b   :  { %v15345_v58 = vld [vmem:[%s19081_s0 + $0x229] sm:$0xff]  ;;  %v15364_v4 = vld [vmem:[%s19081_s0 + $0x211] sm:$0xff]  ;;  %v19488_v19 = vld [vmem:[#allocation79_spill] sm:$0xff]  ;;  %v11345_v37 = vpop.permute.xlu0 %11344 }
 0x19c   :  { %v19487_v52 = vld [vmem:[#allocation78_spill] sm:$0xff]  ;;  %v11107_v0 = vunpack.i.h.bf16 %v19488_v19  ;;  %v11106_v29 = vunpack.i.l.bf16 %v19488_v19  ;;  %v19491_v48 = vld [vmem:[#allocation3_spill] sm:$0xff]  ;;  %19492 = vst [vmem:[#allocation79_spill] sm:$0xff] %v15406_v40  ;;  %v19499_v40 = vld [vmem:[#allocation25_spill] sm:$0xff]  ;;  %v11346_v13 = vunpack.i.l.bf16 %v11345_v37 }
 0x19d   :  { %v11112_v14 = vunpack.i.h.bf16 %v19487_v52  ;;  %v11111_v27 = vunpack.i.l.bf16 %v19487_v52  ;;  %v15384_v6 = vld [vmem:[%s19081_s0 + $0x232] sm:$0xff]  ;;  %v15394_v52 = vld [vmem:[%s19081_s0 + $0x21a] sm:$0xff]  ;;  %19490 = vst [vmem:[#allocation78_spill] sm:$0xff] %v15398_v42  ;;  %v11187_v55 = vunpack.i.h.bf16 %v19491_v48  ;;  %v11186_v11 = vunpack.i.l.bf16 %v19491_v48  ;;  %v19497_v42 = vld [vmem:[#allocation80_spill] sm:$0xff] }
 0x19e   :  { %v15389_v45 = vld [vmem:[%s19081_s0 + $0x212] sm:$0xff]  ;;  %v15431_v22 = vsel %vm2837_vm4, %v14930_v34, %v11106_v29  ;;  %v15435_v61 = vsel %vm2837_vm4, %v14944_v62, %v11107_v0  ;;  %v19501_v29 = vld [vmem:[#allocation40_spill] sm:$0xff]  ;;  %vm17215_vm3 = vmand %vm4596_vm15, %vm4597_vm0  ;;  %vm8404_vm15 = vcmask 916480   ;;  %vm9368_vm0 = vcmask 29696  }
 0x19f   :  { %v19489_v44 = vld [vmem:[#allocation94_spill] sm:$0xff]  ;;  %v15423_v3 = vsel %vm2837_vm4, %v14921_v10, %v11111_v27  ;;  %19495 = vst [vmem:[#allocation103_spill] sm:$0xff] %v15431_v22  ;;  %19496 = vst [vmem:[#allocation104_spill] sm:$0xff] %v15435_v61  ;;  %v19498_v10 = vld [vmem:[#allocation24_spill] sm:$0xff]  ;;  %v2871_v62 = vsel %vm2837_vm4, %v19501_v29, %v11187_v55 }
 0x1a0   :  { %v11192_v5 = vunpack.i.h.bf16 %v19489_v44  ;;  %v11191_v19 = vunpack.i.l.bf16 %v19489_v44  ;;  %19493 = vst [vmem:[#allocation94_spill] sm:$0xff] %v15423_v3  ;;  %v15427_v44 = vsel %vm2837_vm4, %v14926_v2, %v11112_v14  ;;  %v11350_v14 = vpop.permute.xlu1 %11349  ;;  %v19502_v22 = vld [vmem:[#allocation4_spill] sm:$0xff]  ;;  %v11347_v3 = vunpack.i.h.bf16 %v11345_v37 }
 0x1a1   :  { %19494 = vst [vmem:[#allocation3_spill] sm:$0xff] %v15427_v44  ;;  %v19500_v44 = vld [vmem:[#allocation39_spill] sm:$0xff]  ;;  %v11352_v0 = vunpack.i.h.bf16 %v11350_v14  ;;  %v11351_v61 = vunpack.i.l.bf16 %v11350_v14  ;;  %v11202_v48 = vunpack.i.h.bf16 %v19502_v22  ;;  %v11201_v18 = vunpack.i.l.bf16 %v19502_v22 }
 0x1a2   :  { %v2872_v27 = vsel %vm2837_vm4, %v19498_v10, %v11191_v19  ;;  %v2873_v2 = vsel %vm2837_vm4, %v19499_v40, %v11192_v5  ;;  %v2870_v34 = vsel %vm2837_vm4, %v19500_v44, %v11186_v11  ;;  %v19503_v40 = vpack.i.bf16 %v15130_v30, %v15125_v8  ;;  %v19504_v5 = vld [vmem:[#allocation5_spill] sm:$0xff]  ;;  %v19508_v10 = vld [vmem:[#allocation6_spill] sm:$0xff] }
 0x1a3   :  { %v11197_v19 = vunpack.i.h.bf16 %v19504_v5  ;;  %v11196_v11 = vunpack.i.l.bf16 %v19504_v5  ;;  %v15457_v55 = vsel %vm2902_vm5, %v2872_v27, %v11351_v61  ;;  %v15460_v44 = vsel %vm2902_vm5, %v2873_v2, %v11352_v0  ;;  %v19511_v27 = vld [vmem:[#allocation7_spill] sm:$0xff]  ;;  %v11355_v5 = vpop.permute.xlu0 %11354 }
 0x1a4   :  { %11639 = vrot.lane.b32.xlu1 %v19503_v40, %s12414_s26  ;;  %19505 = vst [vmem:[#allocation80_spill] sm:$0xff] %v15457_v55  ;;  %19506 = vst [vmem:[#allocation24_spill] sm:$0xff] %v15460_v44  ;;  %v19507_v22 = vpack.i.bf16 %v15140_v1, %v15135_v49  ;;  %v11212_v14 = vunpack.i.h.bf16 %v19508_v10  ;;  %v11211_v8 = vunpack.i.l.bf16 %v19508_v10  ;;  %v15469_v30 = vsel %vm2902_vm5, %v2870_v34, %v11346_v13  ;;  %v11360_v61 = vpop.permute.xlu1 %11359  ;;  %v19512_v49 = vld [vmem:[#allocation30_spill] sm:$0xff]  ;;  %v19515_v34 = vld [vmem:[#allocation29_spill] sm:$0xff] }
 0x1a5   :  { %19509 = vst [vmem:[#allocation25_spill] sm:$0xff] %v15469_v30  ;;  %v15472_v29 = vsel %vm2902_vm5, %v2871_v62, %v11347_v3  ;;  %v11207_v37 = vunpack.i.h.bf16 %v19511_v27  ;;  %v11206_v2 = vunpack.i.l.bf16 %v19511_v27  ;;  %v11362_v0 = vunpack.i.h.bf16 %v11360_v61  ;;  %v19516_v27 = vld [vmem:[#allocation57_spill] sm:$0xff]  ;;  %v19630_v30 = vld [vmem:[#allocation20_spill] sm:$0xff] }
 0x1a6   :  { %11634 = vrot.lane.b32.xlu0 %v19507_v22, %s12416_s7  ;;  %19510 = vst [vmem:[#allocation39_spill] sm:$0xff] %v15472_v29  ;;  %v11361_v40 = vunpack.i.l.bf16 %v11360_v61  ;;  %v2876_v1 = vsel %vm2837_vm4, %v19512_v49, %v11201_v18  ;;  %v19513_v22 = vld [vmem:[#allocation31_spill] sm:$0xff]  ;;  %v11357_v44 = vunpack.i.h.bf16 %v11355_v5  ;;  %v11356_v13 = vunpack.i.l.bf16 %v11355_v5  ;;  %v19520_v5 = vld [vmem:[#allocation56_spill] sm:$0xff] }
 0x1a7   :  { %v2877_v10 = vsel %vm2837_vm4, %v19513_v22, %v11202_v48  ;;  %v19514_v3 = vpack.i.bf16 %v15162_v21, %v15157_v36  ;;  %v2874_v62 = vsel %vm2837_vm4, %v19515_v34, %v11196_v11  ;;  %v2875_v61 = vsel %vm2837_vm4, %v19516_v27, %v11197_v19  ;;  %v19521_v21 = vld [vmem:[#allocation32_spill] sm:$0xff]  ;;  %v19525_v22 = vld [vmem:[#allocation43_spill] sm:$0xff] }
 0x1a8   :  { %v15489_v29 = vsel %vm2902_vm5, %v2876_v1, %v11361_v40  ;;  %v15492_v18 = vsel %vm2902_vm5, %v2877_v10, %v11362_v0  ;;  %v19519_v48 = vpack.i.bf16 %v15172_v31, %v15167_v32  ;;  %v2880_v36 = vsel %vm2837_vm4, %v19520_v5, %v11211_v8  ;;  %v11370_v40 = vpop.permute.xlu1 %11369  ;;  %v19524_v0 = vld [vmem:[#allocation59_spill] sm:$0xff]  ;;  %v19526_v8 = vld [vmem:[#allocation8_spill] sm:$0xff] }
 0x1a9   :  { %11649 = vrot.lane.b32.xlu1 %v19514_v3, %s12415_s15  ;;  %19517 = vst [vmem:[#allocation40_spill] sm:$0xff] %v15489_v29  ;;  %19518 = vst [vmem:[#allocation4_spill] sm:$0xff] %v15492_v18  ;;  %v2881_v11 = vsel %vm2837_vm4, %v19521_v21, %v11212_v14  ;;  %v15503_v49 = vsel %vm2902_vm5, %v2874_v62, %v11356_v13  ;;  %v15506_v19 = vsel %vm2902_vm5, %v2875_v61, %v11357_v44  ;;  %v11365_v3 = vpop.permute.xlu0 %11364  ;;  %v19528_v62 = vld [vmem:[#allocation9_spill] sm:$0xff]  ;;  %v19532_v21 = vld [vmem:[#allocation10_spill] sm:$0xff] }
 0x1aa   :  { %11644 = vrot.lane.b32.xlu0 %v19519_v48, %s12415_s15  ;;  %19522 = vst [vmem:[#allocation5_spill] sm:$0xff] %v15503_v49  ;;  %19523 = vst [vmem:[#allocation6_spill] sm:$0xff] %v15506_v19  ;;  %v2878_v1 = vsel %vm2837_vm4, %v19524_v0, %v11206_v2  ;;  %v2879_v32 = vsel %vm2837_vm4, %v19525_v22, %v11207_v37  ;;  %v11372_v31 = vunpack.i.h.bf16 %v11370_v40  ;;  %v11371_v10 = vunpack.i.l.bf16 %v11370_v40  ;;  %v19535_v22 = vld [vmem:[#allocation11_spill] sm:$0xff]  ;;  %v15994_v49 = vld [vmem:[%s19081_s0 + $0x2aa] sm:$0xff] }
 0x1ab   :  { %v11222_v34 = vunpack.i.h.bf16 %v19526_v8  ;;  %v11221_v14 = vunpack.i.l.bf16 %v19526_v8  ;;  %v11367_v27 = vunpack.i.h.bf16 %v11365_v3  ;;  %v11366_v13 = vunpack.i.l.bf16 %v11365_v3  ;;  %v15989_v19 = vld [vmem:[%s19081_s0 + $0x2a2] sm:$0xff] }
 0x1ac   :  { %v19527_v44 = vpack.i.bf16 %v15182_v38, %v15177_v23  ;;  %v11217_v61 = vunpack.i.h.bf16 %v19528_v62  ;;  %v11216_v2 = vunpack.i.l.bf16 %v19528_v62  ;;  %v15521_v37 = vsel %vm2902_vm5, %v2880_v36, %v11371_v10  ;;  %v11380_v36 = vpop.permute.xlu1 %11379  ;;  %v19628_v18 = vld [vmem:[#allocation55_spill] sm:$0xff] }
 0x1ad   :  { %19529 = vst [vmem:[#allocation7_spill] sm:$0xff] %v15521_v37  ;;  %v15524_v48 = vsel %vm2902_vm5, %v2881_v11, %v11372_v31  ;;  %v19531_v5 = vpack.i.bf16 %v15192_v7, %v15187_v28  ;;  %v11232_v40 = vunpack.i.h.bf16 %v19532_v21  ;;  %v11231_v23 = vunpack.i.l.bf16 %v19532_v21  ;;  %v11375_v8 = vpop.permute.xlu0 %11374  ;;  %v19536_v28 = vld [vmem:[#allocation44_spill] sm:$0xff]  ;;  %v19540_v21 = vld [vmem:[#allocation61_spill] sm:$0xff] }
 0x1ae   :  { %11659 = vrot.lane.b32.xlu1 %v19527_v44, %s12416_s7  ;;  %19530 = vst [vmem:[#allocation30_spill] sm:$0xff] %v15524_v48  ;;  %v15533_v38 = vsel %vm2902_vm5, %v2878_v1, %v11366_v13  ;;  %v15536_v0 = vsel %vm2902_vm5, %v2879_v32, %v11367_v27  ;;  %v11227_v10 = vunpack.i.h.bf16 %v19535_v22  ;;  %v11226_v11 = vunpack.i.l.bf16 %v19535_v22  ;;  %v19537_v44 = vld [vmem:[#allocation36_spill] sm:$0xff]  ;;  %v19539_v27 = vld [vmem:[#allocation37_spill] sm:$0xff]  ;;  %v15959_v48 = vld [vmem:[%s19081_s0 + $0x2b9] sm:$0xff] }
 0x1af   :  { %11654 = vrot.lane.b32.xlu0 %v19531_v5, %s12416_s7  ;;  %19533 = vst [vmem:[#allocation31_spill] sm:$0xff] %v15533_v38  ;;  %19534 = vst [vmem:[#allocation29_spill] sm:$0xff] %v15536_v0  ;;  %v11382_v31 = vunpack.i.h.bf16 %v11380_v36  ;;  %v11381_v3 = vunpack.i.l.bf16 %v11380_v36  ;;  %v2884_v7 = vsel %vm2837_vm4, %v19536_v28, %v11221_v14  ;;  %v2885_v62 = vsel %vm2837_vm4, %v19537_v44, %v11222_v34  ;;  %v19549_v44 = vld [vmem:[#allocation65_spill] sm:$0xff]  ;;  %v15937_v0 = vld [vmem:[%s19081_s0 + $0x2c0] sm:$0xff] }
 0x1b0   :  { %v11377_v5 = vunpack.i.h.bf16 %v11375_v8  ;;  %v11376_v1 = vunpack.i.l.bf16 %v11375_v8  ;;  %v19538_v32 = vpack.i.bf16 %v15216_v16, %v15211_v43  ;;  %v2882_v13 = vsel %vm2837_vm4, %v19539_v27, %v11216_v2  ;;  %v19544_v8 = vld [vmem:[#allocation62_spill] sm:$0xff]  ;;  %v19545_v16 = vld [vmem:[#allocation63_spill] sm:$0xff] }
 0x1b1   :  { %v2883_v36 = vsel %vm2837_vm4, %v19540_v21, %v11217_v61  ;;  %v15553_v22 = vsel %vm2902_vm5, %v2884_v7, %v11381_v3  ;;  %v15556_v14 = vsel %vm2902_vm5, %v2885_v62, %v11382_v31  ;;  %v19543_v34 = vpack.i.bf16 %v15226_v39, %v15221_v54  ;;  %v11390_v3 = vpop.permute.xlu1 %11389  ;;  %v19548_v31 = vld [vmem:[#allocation64_spill] sm:$0xff]  ;;  %v15979_v38 = vld [vmem:[%s19081_s0 + $0x2ba] sm:$0xff] }
 0x1b2   :  { %11669 = vrot.lane.b32.xlu1 %v19538_v32, %s12414_s26  ;;  %19541 = vst [vmem:[#allocation57_spill] sm:$0xff] %v15553_v22  ;;  %19542 = vst [vmem:[#allocation56_spill] sm:$0xff] %v15556_v14  ;;  %v2888_v43 = vsel %vm2837_vm4, %v19544_v8, %v11231_v23  ;;  %v2889_v2 = vsel %vm2837_vm4, %v19545_v16, %v11232_v40  ;;  %v15567_v28 = vsel %vm2902_vm5, %v2882_v13, %v11376_v1  ;;  %v11385_v32 = vpop.permute.xlu0 %11384  ;;  %v19550_v23 = vld [vmem:[#allocation12_spill] sm:$0xff]  ;;  %v19552_v13 = vld [vmem:[#allocation13_spill] sm:$0xff] }
 0x1b3   :  { %11664 = vrot.lane.b32.xlu0 %v19543_v34, %s12414_s26  ;;  %19546 = vst [vmem:[#allocation32_spill] sm:$0xff] %v15567_v28  ;;  %v15570_v61 = vsel %vm2902_vm5, %v2883_v36, %v11377_v5  ;;  %v2886_v7 = vsel %vm2837_vm4, %v19548_v31, %v11226_v11  ;;  %v2887_v54 = vsel %vm2837_vm4, %v19549_v44, %v11227_v10  ;;  %v11392_v39 = vunpack.i.h.bf16 %v11390_v3  ;;  %v19556_v16 = vld [vmem:[#allocation14_spill] sm:$0xff]  ;;  %v19559_v44 = vld [vmem:[#allocation15_spill] sm:$0xff] }
 0x1b4   :  { %19547 = vst [vmem:[#allocation59_spill] sm:$0xff] %v15570_v61  ;;  %v11391_v62 = vunpack.i.l.bf16 %v11390_v3  ;;  %v11242_v27 = vunpack.i.h.bf16 %v19550_v23  ;;  %v11241_v40 = vunpack.i.l.bf16 %v19550_v23  ;;  %v11387_v21 = vunpack.i.h.bf16 %v11385_v32  ;;  %v19626_v28 = vld [vmem:[#allocation91_spill] sm:$0xff] }
 0x1b5   :  { %v11386_v1 = vunpack.i.l.bf16 %v11385_v32  ;;  %v19551_v5 = vpack.i.bf16 %v15253_v17, %v15231_v63  ;;  %v11237_v36 = vunpack.i.h.bf16 %v19552_v13  ;;  %v11236_v11 = vunpack.i.l.bf16 %v19552_v13  ;;  %v15964_v37 = vld [vmem:[%s19081_s0 + $0x2c1] sm:$0xff] }
 0x1b6   :  { %v15585_v10 = vsel %vm2902_vm5, %v2888_v43, %v11391_v62  ;;  %v15588_v34 = vsel %vm2902_vm5, %v2889_v2, %v11392_v39  ;;  %v19555_v8 = vpack.i.bf16 %v15263_v47, %v15258_v51  ;;  %v11252_v3 = vunpack.i.h.bf16 %v19556_v16  ;;  %v11400_v43 = vpop.permute.xlu1 %11399  ;;  %v11395_v23 = vpop.permute.xlu0 %11394  ;;  %v19560_v51 = vld [vmem:[#allocation66_spill] sm:$0xff] }
 0x1b7   :  { %11679 = vrot.lane.b32.xlu1 %v19551_v5, %s12415_s15  ;;  %19553 = vst [vmem:[#allocation43_spill] sm:$0xff] %v15585_v10  ;;  %19554 = vst [vmem:[#allocation8_spill] sm:$0xff] %v15588_v34  ;;  %v11251_v17 = vunpack.i.l.bf16 %v19556_v16  ;;  %v15597_v63 = vsel %vm2902_vm5, %v2886_v7, %v11386_v1  ;;  %v15600_v31 = vsel %vm2902_vm5, %v2887_v54, %v11387_v21  ;;  %v11247_v62 = vunpack.i.h.bf16 %v19559_v44  ;;  %v19561_v5 = vld [vmem:[#allocation67_spill] sm:$0xff]  ;;  %v19563_v21 = vld [vmem:[#allocation68_spill] sm:$0xff] }
 0x1b8   :  { %11674 = vrot.lane.b32.xlu0 %v19555_v8, %s12415_s15  ;;  %19557 = vst [vmem:[#allocation9_spill] sm:$0xff] %v15597_v63  ;;  %19558 = vst [vmem:[#allocation10_spill] sm:$0xff] %v15600_v31  ;;  %v11246_v2 = vunpack.i.l.bf16 %v19559_v44  ;;  %v11402_v39 = vunpack.i.h.bf16 %v11400_v43  ;;  %v11401_v32 = vunpack.i.l.bf16 %v11400_v43  ;;  %v2892_v47 = vsel %vm2837_vm4, %v19560_v51, %v11241_v40  ;;  %v19564_v16 = vld [vmem:[#allocation69_spill] sm:$0xff] }
 0x1b9   :  { %v2893_v13 = vsel %vm2837_vm4, %v19561_v5, %v11242_v27  ;;  %v11397_v8 = vunpack.i.h.bf16 %v11395_v23  ;;  %v11396_v7 = vunpack.i.l.bf16 %v11395_v23  ;;  %v19562_v54 = vpack.i.bf16 %v15286_v24, %v15281_v53  ;;  %v19568_v23 = vld [vmem:[#allocation70_spill] sm:$0xff]  ;;  %v19569_v24 = vld [vmem:[#allocation71_spill] sm:$0xff]  ;;  %v19573_v5 = vld [vmem:[#allocation73_spill] sm:$0xff] }
 0x1ba   :  { %v2890_v1 = vsel %vm2837_vm4, %v19563_v21, %v11236_v11  ;;  %v2891_v43 = vsel %vm2837_vm4, %v19564_v16, %v11237_v36  ;;  %v15617_v44 = vsel %vm2902_vm5, %v2892_v47, %v11401_v32  ;;  %v15620_v40 = vsel %vm2902_vm5, %v2893_v13, %v11402_v39  ;;  %v11410_v32 = vpop.permute.xlu1 %11409  ;;  %v19572_v39 = vld [vmem:[#allocation72_spill] sm:$0xff]  ;;  %v15911_v10 = vld [vmem:[%s19081_s0 + $0x272] sm:$0xff] }
 0x1bb   :  { %11689 = vrot.lane.b32.xlu1 %v19562_v54, %s12416_s7  ;;  %19565 = vst [vmem:[#allocation11_spill] sm:$0xff] %v15617_v44  ;;  %19566 = vst [vmem:[#allocation44_spill] sm:$0xff] %v15620_v40  ;;  %v19567_v27 = vpack.i.bf16 %v15296_v50, %v15291_v9  ;;  %v2896_v53 = vsel %vm2837_vm4, %v19568_v23, %v11251_v17  ;;  %v2897_v11 = vsel %vm2837_vm4, %v19569_v24, %v11252_v3  ;;  %v11405_v54 = vpop.permute.xlu0 %11404  ;;  %v19620_v44 = vld [vmem:[#allocation90_spill] sm:$0xff] }
 0x1bc   :  { %v15631_v51 = vsel %vm2902_vm5, %v2890_v1, %v11396_v7  ;;  %v15634_v36 = vsel %vm2902_vm5, %v2891_v43, %v11397_v8  ;;  %v2894_v47 = vsel %vm2837_vm4, %v19572_v39, %v11246_v2  ;;  %v2895_v9 = vsel %vm2837_vm4, %v19573_v5, %v11247_v62  ;;  %v19578_v43 = vld [vmem:[#allocation81_spill] sm:$0xff] }
 0x1bd   :  { %11684 = vrot.lane.b32.xlu0 %v19567_v27, %s12416_s7  ;;  %19570 = vst [vmem:[#allocation36_spill] sm:$0xff] %v15631_v51  ;;  %19571 = vst [vmem:[#allocation37_spill] sm:$0xff] %v15634_v36  ;;  %v11412_v50 = vunpack.i.h.bf16 %v11410_v32  ;;  %v11411_v13 = vunpack.i.l.bf16 %v11410_v32  ;;  %v11262_v17 = vunpack.i.h.bf16 %v14778_v57  ;;  %v11261_v3 = vunpack.i.l.bf16 %v14778_v57  ;;  %v19616_v36 = vld [vmem:[#allocation58_spill] sm:$0xff]  ;;  %v19618_v51 = vld [vmem:[#allocation60_spill] sm:$0xff] }
 0x1be   :  { %v11407_v21 = vunpack.i.h.bf16 %v11405_v54  ;;  %v11406_v7 = vunpack.i.l.bf16 %v11405_v54  ;;  %v19574_v8 = vpack.i.bf16 %v15320_v25, %v15315_v56  ;;  %v11257_v1 = vunpack.i.h.bf16 %v14793_v46  ;;  %v11420_v23 = vpop.permute.xlu1 %11419 }
 0x1bf   :  { %v11256_v2 = vunpack.i.l.bf16 %v14793_v46  ;;  %v15649_v62 = vsel %vm2902_vm5, %v2896_v53, %v11411_v13  ;;  %v15652_v16 = vsel %vm2902_vm5, %v2897_v11, %v11412_v50  ;;  %v19577_v57 = vpack.i.bf16 %v15340_v35, %v15325_v20  ;;  %v19581_v53 = vld [vmem:[#allocation82_spill] sm:$0xff]  ;;  %v11415_v5 = vpop.permute.xlu0 %11414 }
 0x1c0   :  { %11699 = vrot.lane.b32.xlu1 %v19574_v8, %s12414_s26  ;;  %19575 = vst [vmem:[#allocation61_spill] sm:$0xff] %v15649_v62  ;;  %19576 = vst [vmem:[#allocation62_spill] sm:$0xff] %v15652_v16  ;;  %v11117_v27 = vunpack.i.h.bf16 %v19578_v43  ;;  %v11116_v56 = vunpack.i.l.bf16 %v19578_v43  ;;  %v15661_v25 = vsel %vm2902_vm5, %v2894_v47, %v11406_v7  ;;  %v15664_v46 = vsel %vm2902_vm5, %v2895_v9, %v11407_v21  ;;  %v9662_v35 = vld [vmem:[%s19081_s0 + $0x258] sm:$0xff]  ;;  %v19583_v47 = vld [vmem:[#allocation75_spill] sm:$0xff] }
 0x1c1   :  { %11694 = vrot.lane.b32.xlu0 %v19577_v57, %s12414_s26  ;;  %19579 = vst [vmem:[#allocation63_spill] sm:$0xff] %v15661_v25  ;;  %19580 = vst [vmem:[#allocation64_spill] sm:$0xff] %v15664_v46  ;;  %v11132_v24 = vunpack.i.h.bf16 %v19581_v53  ;;  %v11131_v11 = vunpack.i.l.bf16 %v19581_v53  ;;  %v11422_v32 = vunpack.i.h.bf16 %v11420_v23  ;;  %v11421_v39 = vunpack.i.l.bf16 %v11420_v23  ;;  %v19582_v20 = vld [vmem:[#allocation74_spill] sm:$0xff]  ;;  %v9663_v7 = vld [vmem:[%s19081_s0 + $0x260] sm:$0xff] }
 0x1c2   :  { %v2900_v50 = vsel %vm2837_vm4, %v19582_v20, %v11261_v3  ;;  %v2901_v13 = vsel %vm2837_vm4, %v19583_v47, %v11262_v17  ;;  %v11417_v9 = vunpack.i.h.bf16 %v11415_v5  ;;  %v11416_v54 = vunpack.i.l.bf16 %v11415_v5  ;;  %v9660_v8 = vld [vmem:[%s19081_s0 + $0x240] sm:$0xff]  ;;  %v9661_v3 = vld [vmem:[%s19081_s0 + $0x248] sm:$0xff]  ;;  %v19586_v43 = vld [vmem:[#allocation77_spill] sm:$0xff] }
 0x1c3   :  { %v19584_v21 = vpack.i.bf16 %v15350_v15, %v15345_v58  ;;  %v19585_v17 = vld [vmem:[#allocation76_spill] sm:$0xff]  ;;  %v2899_v23 = vsel %vm2837_vm4, %v19586_v43, %v11257_v1  ;;  %v15693_v58 = vsel %vm2902_vm5, %v2900_v50, %v11421_v39  ;;  %v15696_v15 = vsel %vm2902_vm5, %v2901_v13, %v11422_v32  ;;  %v15705_v5 = vld [vmem:[%s19081_s0 + $0x259] sm:$0xff]  ;;  %v15715_v50 = vpop.permute.xlu1 %11429  ;;  %v19610_v25 = vld [vmem:[#allocation53_spill] sm:$0xff] }
 0x1c4   :  { %v2898_v57 = vsel %vm2837_vm4, %v19585_v17, %v11256_v2  ;;  %19587 = vst [vmem:[#allocation65_spill] sm:$0xff] %v15693_v58  ;;  %19588 = vst [vmem:[#allocation12_spill] sm:$0xff] %v15696_v15  ;;  %v19589_v53 = vpack.i.bf16 %v15369_v12, %v15364_v4  ;;  %v19590_v2 = vld [vmem:[#allocation83_spill] sm:$0xff]  ;;  %v15713_v32 = vsel %vm2902_vm5, %v2899_v23, %v11417_v9  ;;  %v15730_v47 = vld [vmem:[%s19081_s0 + $0x249] sm:$0xff]  ;;  %v19594_v13 = vunpack.i.l.bf16 %v19497_v42  ;;  %v15744_v17 = vpop.permute.xlu0 %11424 }
 0x1c5   :  { %11709 = vrot.lane.b32.xlu1 %v19584_v21, %s12415_s15  ;;  %v11127_v20 = vunpack.i.h.bf16 %v19590_v2  ;;  %v11126_v1 = vunpack.i.l.bf16 %v19590_v2  ;;  %v15710_v39 = vsel %vm2902_vm5, %v2898_v57, %v11416_v54  ;;  %19592 = vst [vmem:[#allocation14_spill] sm:$0xff] %v15713_v32  ;;  %19593 = vst [vmem:[#allocation15_spill] sm:$0xff] %v15715_v50  ;;  %v15720_v4 = vld [vmem:[%s19081_s0 + $0x261] sm:$0xff]  ;;  %v19595_v54 = vunpack.i.h.bf16 %v19497_v42  ;;  %v19611_v16 = vld [vmem:[#allocation54_spill] sm:$0xff] }
 0x1c6   :  { %11704 = vrot.lane.b32.xlu0 %v19589_v53, %s12415_s15  ;;  %19591 = vst [vmem:[#allocation13_spill] sm:$0xff] %v15710_v39  ;;  %v15725_v12 = vld [vmem:[%s19081_s0 + $0x241] sm:$0xff]  ;;  %v15736_v9 = vsel %vm2837_vm4, %v14953_v26, %v19594_v13  ;;  %v11728_v57 = vpack.i.bf16 %v9663_v7, %v9662_v35  ;;  %v11723_v43 = vpack.i.bf16 %v9661_v3, %v9660_v8  ;;  %v15889_v62 = vld [vmem:[%s19081_s0 + $0x28a] sm:$0xff]  ;;  %v11172_v31 = vunpack.i.h.bf16 %v19620_v44 }
 0x1c7   :  { %v15742_v21 = vsel %vm2837_vm4, %v14972_v41, %v19595_v54  ;;  %v15749_v23 = vld [vmem:[%s19081_s0 + $0x25a] sm:$0xff]  ;;  %v15753_v53 = vsel %vm2837_vm4, %v14976_v33, %v11116_v56  ;;  %v15757_v26 = vsel %vm2837_vm4, %v14984_v60, %v11117_v27  ;;  %v19596_v42 = vld [vmem:[#allocation84_spill] sm:$0xff]  ;;  %v19597_v35 = vpack.i.bf16 %v15384_v6, %v15374_v59  ;;  %v19598_v27 = vld [vmem:[#allocation85_spill] sm:$0xff] }
 0x1c8   :  { %v11142_v41 = vunpack.i.h.bf16 %v19596_v42  ;;  %v11141_v2 = vunpack.i.l.bf16 %v19596_v42  ;;  %v15768_v7 = vld [vmem:[%s19081_s0 + $0x262] sm:$0xff]  ;;  %v15778_v60 = vld [vmem:[%s19081_s0 + $0x24a] sm:$0xff]  ;;  %v11137_v56 = vunpack.i.h.bf16 %v19598_v27  ;;  %v11136_v6 = vunpack.i.l.bf16 %v19598_v27  ;;  %v19600_v54 = vld [vmem:[#allocation46_spill] sm:$0xff] }
 0x1c9   :  { %11719 = vrot.lane.b32.xlu1 %v19597_v35, %s12416_s7  ;;  %v15773_v33 = vld [vmem:[%s19081_s0 + $0x242] sm:$0xff]  ;;  %v19599_v59 = vpack.i.bf16 %v15394_v52, %v15389_v45  ;;  %v11738_v8 = vpack.i.bf16 %v15720_v4, %v15705_v5  ;;  %v11733_v3 = vpack.i.bf16 %v15730_v47, %v15725_v12  ;;  %v15797_v42 = vsel %vm2837_vm4, %v19600_v54, %v11131_v11  ;;  %v19602_v45 = vld [vmem:[#allocation49_spill] sm:$0xff]  ;;  %v19603_v5 = vld [vmem:[#allocation50_spill] sm:$0xff]  ;;  %v15811_v12 = vpop.permute.xlu1 %11439  ;;  %v15830_v54 = vpop.permute.xlu0 %11434 }
 0x1ca   :  { %v15793_v13 = vld [vmem:[%s19081_s0 + $0x288] sm:$0xff]  ;;  %v19601_v35 = vld [vmem:[#allocation47_spill] sm:$0xff]  ;;  %v15805_v52 = vsel %vm2837_vm4, %v19602_v45, %v11126_v1  ;;  %v15809_v4 = vsel %vm2837_vm4, %v19603_v5, %v11127_v20  ;;  %19604 = vst [vmem:[#allocation66_spill] sm:$0xff] %v15811_v12  ;;  %v15816_v47 = vld [vmem:[%s19081_s0 + $0x290] sm:$0xff]  ;;  %v15853_v45 = vsel %vm2837_vm4, %v19611_v16, %v11137_v56  ;;  %v11171_v63 = vunpack.i.l.bf16 %v19620_v44 }
 0x1cb   :  { %11714 = vrot.lane.b32.xlu0 %v19599_v59, %s12416_s7  ;;  %v15801_v27 = vsel %vm2837_vm4, %v19601_v35, %v11132_v24  ;;  %v15821_v24 = vld [vmem:[%s19081_s0 + $0x270] sm:$0xff]  ;;  %v15826_v11 = vld [vmem:[%s19081_s0 + $0x278] sm:$0xff]  ;;  %19606 = vst [vmem:[#allocation67_spill] sm:$0xff] %v15830_v54  ;;  %v19607_v5 = vld [vmem:[#allocation51_spill] sm:$0xff]  ;;  %v15849_v35 = vsel %vm2837_vm4, %v19610_v25, %v11136_v6  ;;  %v11167_v14 = vunpack.i.h.bf16 %v19626_v28  ;;  %v11166_v22 = vunpack.i.l.bf16 %v19626_v28 }
 0x1cc   :  { %v19605_v1 = vld [vmem:[#allocation86_spill] sm:$0xff]  ;;  %v15838_v32 = vsel %vm2837_vm4, %v19607_v5, %v11141_v2  ;;  %v19608_v39 = vld [vmem:[#allocation52_spill] sm:$0xff]  ;;  %v19609_v58 = vld [vmem:[#allocation87_spill] sm:$0xff]  ;;  %19612 = vst [vmem:[#allocation68_spill] sm:$0xff] %v15853_v45 }
 0x1cd   :  { %v11152_v20 = vunpack.i.h.bf16 %v19605_v1  ;;  %v11151_v59 = vunpack.i.l.bf16 %v19605_v1  ;;  %v15842_v15 = vsel %vm2837_vm4, %v19608_v39, %v11142_v41  ;;  %v11147_v46 = vunpack.i.h.bf16 %v19609_v58  ;;  %11729 = vrot.lane.b32.xlu1 %v11728_v57, %s12414_s26  ;;  %v15868_v25 = vld [vmem:[%s19081_s0 + $0x291] sm:$0xff]  ;;  %v19613_v57 = vld [vmem:[#allocation88_spill] sm:$0xff]  ;;  %v15879_v41 = vpop.permute.xlu1 %11449  ;;  %v15884_v39 = vld [vmem:[%s19081_s0 + $0x279] sm:$0xff]  ;;  %v15906_v34 = vpop.permute.xlu0 %11444 }
 0x1ce   :  { %v11146_v1 = vunpack.i.l.bf16 %v19609_v58  ;;  %v15863_v58 = vld [vmem:[%s19081_s0 + $0x289] sm:$0xff]  ;;  %v15873_v16 = vld [vmem:[%s19081_s0 + $0x271] sm:$0xff]  ;;  %v11161_v2 = vunpack.i.l.bf16 %v19613_v57  ;;  %19615 = vst [vmem:[#allocation69_spill] sm:$0xff] %v15879_v41  ;;  %19621 = vst [vmem:[#allocation72_spill] sm:$0xff] %v15906_v34 }
 0x1cf   :  { %11724 = vrot.lane.b32.xlu0 %v11723_v43, %s12414_s26  ;;  %v11162_v43 = vunpack.i.h.bf16 %v19613_v57  ;;  %v19614_v56 = vld [vmem:[#allocation89_spill] sm:$0xff]  ;;  %v15902_v40 = vsel %vm2837_vm4, %v19618_v51, %v11152_v20  ;;  %v15921_v51 = vld [vmem:[%s19081_s0 + $0x2b8] sm:$0xff]  ;;  %v19622_v20 = vld [vmem:[#allocation16_spill] sm:$0xff] }
 0x1d0   :  { %v11157_v6 = vunpack.i.h.bf16 %v19614_v56  ;;  %v11156_v5 = vunpack.i.l.bf16 %v19614_v56  ;;  %v15894_v57 = vld [vmem:[%s19081_s0 + $0x292] sm:$0xff]  ;;  %v15898_v56 = vsel %vm2837_vm4, %v19616_v36, %v11151_v59  ;;  %19619 = vst [vmem:[#allocation71_spill] sm:$0xff] %v15902_v40  ;;  %v15916_v36 = vld [vmem:[%s19081_s0 + $0x27a] sm:$0xff]  ;;  %v15925_v44 = vsel %vm2837_vm4, %v19622_v20, %v11146_v1  ;;  %v19624_v59 = vld [vmem:[#allocation28_spill] sm:$0xff] }
 0x1d1   :  { %19617 = vst [vmem:[#allocation70_spill] sm:$0xff] %v15898_v56  ;;  %19623 = vst [vmem:[#allocation73_spill] sm:$0xff] %v15925_v44  ;;  %v15929_v61 = vsel %vm2837_vm4, %v19624_v59, %v11147_v46  ;;  %11739 = vrot.lane.b32.xlu1 %v11738_v8, %s12415_s15  ;;  %v15942_v1 = vld [vmem:[%s19081_s0 + $0x2a0] sm:$0xff]  ;;  %v15947_v46 = vld [vmem:[%s19081_s0 + $0x2a8] sm:$0xff]  ;;  %v15998_v29 = vsel %vm2837_vm4, %v19628_v18, %v11161_v2  ;;  %v16002_v55 = vsel %vm2837_vm4, %v19630_v30, %v11162_v43  ;;  %v16012_v50 = vpop.permute.xlu1 %11459 }
 0x1d2   :  { %19625 = vst [vmem:[#allocation81_spill] sm:$0xff] %v15929_v61  ;;  %v19627_v20 = vld [vmem:[#allocation92_spill] sm:$0xff]  ;;  %19629 = vst [vmem:[#allocation82_spill] sm:$0xff] %v15998_v29  ;;  %v19632_v41 = vld [vmem:[#allocation19_spill] sm:$0xff] }
 0x1d3   :  { %v11182_v59 = vunpack.i.h.bf16 %v19627_v20  ;;  %v11181_v28 = vunpack.i.l.bf16 %v19627_v20  ;;  %11734 = vrot.lane.b32.xlu0 %v11733_v3, %s12415_s15  ;;  %v15969_v3 = vld [vmem:[%s19081_s0 + $0x2a1] sm:$0xff]  ;;  %v15974_v20 = vld [vmem:[%s19081_s0 + $0x2a9] sm:$0xff]  ;;  %19631 = vst [vmem:[#allocation74_spill] sm:$0xff] %v16002_v55  ;;  %v16006_v34 = vsel %vm2837_vm4, %v19632_v41, %v11156_v5  ;;  %v19634_v12 = vld [vmem:[#allocation22_spill] sm:$0xff]  ;;  %v16062_v55 = vpop.permute.xlu0 %11454 }
 0x1d4   :  { %v15984_v8 = vld [vmem:[%s19081_s0 + $0x2c2] sm:$0xff]  ;;  %19633 = vst [vmem:[#allocation75_spill] sm:$0xff] %v16006_v34  ;;  %v16010_v54 = vsel %vm2837_vm4, %v19634_v12, %v11157_v6  ;;  %19636 = vst [vmem:[#allocation77_spill] sm:$0xff] %v16012_v50  ;;  %v16022_v30 = vld [vmem:[%s19081_s0 + $0x2f0] sm:$0xff] }
 0x1d5   :  { %19635 = vst [vmem:[#allocation76_spill] sm:$0xff] %v16010_v54  ;;  %v16017_v61 = vld [vmem:[%s19081_s0 + $0x2e8] sm:$0xff]  ;;  %v16027_v18 = vld [vmem:[%s19081_s0 + $0x2d0] sm:$0xff]  ;;  %v16032_v12 = vld [vmem:[%s19081_s0 + $0x2d8] sm:$0xff] }
 0x1d6   :  { %v16037_v41 = vld [vmem:[%s19081_s0 + $0x2e9] sm:$0xff]  ;;  %v16042_v43 = vld [vmem:[%s19081_s0 + $0x2f1] sm:$0xff]  ;;  %v16052_v6 = vld [vmem:[%s19081_s0 + $0x2d9] sm:$0xff]  ;;  %19645 = vst [vmem:[#allocation50_spill] sm:$0xff] %v16062_v55  ;;  %v19654_v55 = vpack.i.bf16 %v15768_v7, %v15749_v23 }
 0x1d7   :  { %19637 = vst [vmem:[#allocation83_spill] sm:$0xff] %v16037_v41  ;;  %19638 = vst [vmem:[#allocation84_spill] sm:$0xff] %v16042_v43  ;;  %v16047_v2 = vld [vmem:[%s19081_s0 + $0x2d1] sm:$0xff]  ;;  %v19651_v44 = vld [vmem:[#allocation96_spill] sm:$0xff] }
 0x1d8   :  { %19639 = vst [vmem:[#allocation85_spill] sm:$0xff] %v16047_v2  ;;  %19640 = vst [vmem:[#allocation46_spill] sm:$0xff] %v16052_v6  ;;  %v19641_v5 = vld [vmem:[#allocation34_spill] sm:$0xff]  ;;  %v19643_v50 = vld [vmem:[#allocation33_spill] sm:$0xff]  ;;  %v16089_v29 = vsel %vm2837_vm4, %v19651_v44, %v11167_v14  ;;  %11749 = vrot.lane.b32.xlu1 %v19654_v55, %s12416_s7  ;;  %v19674_v2 = vpack.i.bf16 %v15826_v11, %v15821_v24 }
 0x1d9   :  { %v16056_v54 = vsel %vm2837_vm4, %v19641_v5, %v11171_v63  ;;  %v16060_v34 = vsel %vm2837_vm4, %v19643_v50, %v11172_v31  ;;  %v16071_v40 = vld [vmem:[%s19081_s0 + $0x2ea] sm:$0xff]  ;;  %v16076_v63 = vld [vmem:[%s19081_s0 + $0x2f2] sm:$0xff]  ;;  %v19649_v50 = vld [vmem:[#allocation95_spill] sm:$0xff]  ;;  %19652 = vst [vmem:[#allocation53_spill] sm:$0xff] %v16089_v29 }
 0x1da   :  { %19642 = vst [vmem:[#allocation47_spill] sm:$0xff] %v16056_v54  ;;  %19644 = vst [vmem:[#allocation49_spill] sm:$0xff] %v16060_v34  ;;  %v16081_v31 = vld [vmem:[%s19081_s0 + $0x2d2] sm:$0xff]  ;;  %v16085_v5 = vsel %vm2837_vm4, %v19649_v50, %v11166_v22  ;;  %v16101_v45 = vld [vmem:[%s19081_s0 + $0x2da] sm:$0xff]  ;;  %v19662_v54 = vpack.i.bf16 %v15778_v60, %v15773_v33  ;;  %v16143_v33 = vpop.permute.xlu1 %11469  ;;  %v16168_v60 = vpop.permute.xlu0 %11464 }
 0x1db   :  { %19646 = vst [vmem:[#allocation86_spill] sm:$0xff] %v16071_v40  ;;  %19647 = vst [vmem:[#allocation51_spill] sm:$0xff] %v16076_v63  ;;  %v16106_v22 = vld [vmem:[%s19081_s0 + $0x318] sm:$0xff]  ;;  %v16111_v14 = vld [vmem:[%s19081_s0 + $0x320] sm:$0xff] }
 0x1dc   :  { %19648 = vst [vmem:[#allocation52_spill] sm:$0xff] %v16081_v31  ;;  %19650 = vst [vmem:[#allocation87_spill] sm:$0xff] %v16085_v5  ;;  %v19658_v23 = vld [vmem:[#allocation97_spill] sm:$0xff]  ;;  %v19660_v7 = vld [vmem:[#allocation98_spill] sm:$0xff]  ;;  %11744 = vrot.lane.b32.xlu0 %v19662_v54, %s12416_s7 }
 0x1dd   :  { %19655 = vst [vmem:[#allocation54_spill] sm:$0xff] %v16101_v45  ;;  %19656 = vst [vmem:[#allocation88_spill] sm:$0xff] %v16106_v22  ;;  %v16115_v55 = vsel %vm2837_vm4, %v19658_v23, %v11181_v28  ;;  %v16119_v44 = vsel %vm2837_vm4, %v19660_v7, %v11182_v59  ;;  %v16131_v29 = vld [vmem:[%s19081_s0 + $0x300] sm:$0xff]  ;;  %v16136_v59 = vld [vmem:[%s19081_s0 + $0x308] sm:$0xff] }
 0x1de   :  { %19657 = vst [vmem:[#allocation89_spill] sm:$0xff] %v16111_v14  ;;  %19659 = vst [vmem:[#allocation58_spill] sm:$0xff] %v16115_v55  ;;  %v16141_v28 = vld [vmem:[%s19081_s0 + $0x319] sm:$0xff]  ;;  %v16156_v50 = vld [vmem:[%s19081_s0 + $0x321] sm:$0xff]  ;;  %v19672_v55 = vpack.i.bf16 %v15816_v47, %v15793_v13  ;;  %v16245_v45 = vpop.permute.xlu1 %11479 }
 0x1df   :  { %19661 = vst [vmem:[#allocation60_spill] sm:$0xff] %v16119_v44  ;;  %19663 = vst [vmem:[#allocation90_spill] sm:$0xff] %v16131_v29  ;;  %v16161_v56 = vld [vmem:[%s19081_s0 + $0x301] sm:$0xff]  ;;  %v16166_v54 = vld [vmem:[%s19081_s0 + $0x309] sm:$0xff] }
 0x1e0   :  { %19664 = vst [vmem:[#allocation16_spill] sm:$0xff] %v16136_v59  ;;  %19665 = vst [vmem:[#allocation28_spill] sm:$0xff] %v16141_v28  ;;  %v16181_v34 = vld [vmem:[%s19081_s0 + $0x31a] sm:$0xff]  ;;  %v16186_v5 = vld [vmem:[%s19081_s0 + $0x322] sm:$0xff]  ;;  %11759 = vrot.lane.b32.xlu1 %v19672_v55, %s12414_s26  ;;  %11754 = vrot.lane.b32.xlu0 %v19674_v2, %s12414_s26  ;;  %v16268_v59 = vpop.permute.xlu0 %11474 }
 0x1e1   :  { %19666 = vst [vmem:[#allocation91_spill] sm:$0xff] %v16143_v33  ;;  %19667 = vst [vmem:[#allocation92_spill] sm:$0xff] %v16156_v50  ;;  %v16191_v23 = vld [vmem:[%s19081_s0 + $0x302] sm:$0xff]  ;;  %v19671_v7 = vld [vmem:[#allocation17_spill] sm:$0xff] }
 0x1e2   :  { %19668 = vst [vmem:[#allocation55_spill] sm:$0xff] %v16161_v56  ;;  %19669 = vst [vmem:[#allocation20_spill] sm:$0xff] %v16166_v54  ;;  %v11272_v44 = vunpack.i.h.bf16 %v19671_v7  ;;  %v11271_v33 = vunpack.i.l.bf16 %v19671_v7  ;;  %v16206_v6 = vld [vmem:[%s19081_s0 + $0x30a] sm:$0xff]  ;;  %v19673_v47 = vld [vmem:[#allocation18_spill] sm:$0xff] }
 0x1e3   :  { %19670 = vst [vmem:[#allocation19_spill] sm:$0xff] %v16168_v60  ;;  %v16211_v7 = vld [vmem:[%s19081_s0 + $0x348] sm:$0xff]  ;;  %v16216_v13 = vld [vmem:[%s19081_s0 + $0x350] sm:$0xff]  ;;  %v11267_v55 = vunpack.i.h.bf16 %v19673_v47  ;;  %v11266_v60 = vunpack.i.l.bf16 %v19673_v47  ;;  %v16236_v47 = vld [vmem:[%s19081_s0 + $0x338] sm:$0xff] }
 0x1e4   :  { %v16231_v40 = vld [vmem:[%s19081_s0 + $0x330] sm:$0xff]  ;;  %v19676_v11 = vld [vmem:[#allocation35_spill] sm:$0xff]  ;;  %19677 = vst [vmem:[#allocation34_spill] sm:$0xff] %v16245_v45  ;;  %v19681_v45 = vld [vmem:[#allocation38_spill] sm:$0xff] }
 0x1e5   :  { %v16241_v24 = vld [vmem:[%s19081_s0 + $0x349] sm:$0xff]  ;;  %v11282_v2 = vunpack.i.h.bf16 %v19676_v11  ;;  %v11281_v31 = vunpack.i.l.bf16 %v19676_v11  ;;  %v16254_v22 = vld [vmem:[%s19081_s0 + $0x351] sm:$0xff]  ;;  %v16264_v11 = vld [vmem:[%s19081_s0 + $0x339] sm:$0xff]  ;;  %v11277_v29 = vunpack.i.h.bf16 %v19681_v45  ;;  %v11276_v28 = vunpack.i.l.bf16 %v19681_v45  ;;  %19682 = vst [vmem:[#allocation97_spill] sm:$0xff] %v16268_v59 }
 0x1e6   :  { %19675 = vst [vmem:[#allocation22_spill] sm:$0xff] %v16241_v24  ;;  %19678 = vst [vmem:[#allocation33_spill] sm:$0xff] %v16254_v22  ;;  %v16259_v14 = vld [vmem:[%s19081_s0 + $0x331] sm:$0xff]  ;;  %v19684_v41 = vld [vmem:[#allocation3_spill] sm:$0xff]  ;;  %v19685_v45 = vpack.i.bf16 %v15868_v25, %v15863_v58  ;;  %v19688_v58 = vpack.i.bf16 %v15884_v39, %v15873_v16 }
 0x1e7   :  { %19679 = vst [vmem:[#allocation95_spill] sm:$0xff] %v16259_v14  ;;  %19680 = vst [vmem:[#allocation96_spill] sm:$0xff] %v16264_v11  ;;  %v19683_v50 = vld [vmem:[#allocation94_spill] sm:$0xff]  ;;  %v16280_v43 = vsel %vm2902_vm5, %v19684_v41, %v11272_v44  ;;  %v19687_v44 = vld [vmem:[#allocation104_spill] sm:$0xff]  ;;  %v16324_v16 = vsel %vm2902_vm5, %v15736_v9, %v11281_v31  ;;  %v16336_v25 = vsel %vm2902_vm5, %v15753_v53, %v11276_v28 }
 0x1e8   :  { %v16276_v63 = vsel %vm2902_vm5, %v19683_v50, %v11271_v33  ;;  %11769 = vrot.lane.b32.xlu1 %v19685_v45, %s12415_s15  ;;  %v16293_v50 = vld [vmem:[%s19081_s0 + $0x34a] sm:$0xff]  ;;  %v19686_v33 = vld [vmem:[#allocation103_spill] sm:$0xff]  ;;  %v2904_v59 = vsel %vm2902_vm5, %v19687_v44, %v11267_v55  ;;  %11764 = vrot.lane.b32.xlu0 %v19688_v58, %s12415_s15  ;;  %v16310_v54 = vld [vmem:[%s19081_s0 + $0x352] sm:$0xff]  ;;  %v16328_v55 = vsel %vm2902_vm5, %v15742_v21, %v11282_v2  ;;  %v16332_v45 = vpop.permute.xlu1 %11489  ;;  %v16344_v2 = vpop.permute.xlu0 %11484 }
 0x1e9   :  { %v2903_v41 = vsel %vm2902_vm5, %v19686_v33, %v11266_v60  ;;  %v16315_v60 = vld [vmem:[%s19081_s0 + $0x332] sm:$0xff]  ;;  %v16320_v39 = vld [vmem:[%s19081_s0 + $0x33a] sm:$0xff]  ;;  %19690 = vst [vmem:[#allocation98_spill] sm:$0xff] %v16332_v45  ;;  %v16340_v56 = vsel %vm2902_vm5, %v15757_v26, %v11277_v29  ;;  %19692 = vst [vmem:[#allocation17_spill] sm:$0xff] %v16344_v2  ;;  %v19694_v53 = vpack.i.bf16 %v15894_v57, %v15889_v62  ;;  %s12418_s0 = smov 16  }
 0x1ea   :  { %v19689_v33 = vld [vmem:[#allocation41_spill] sm:$0xff]  ;;  %v19691_v9 = vld [vmem:[#allocation42_spill] sm:$0xff]  ;;  %v19695_v28 = vld [vmem:[#allocation48_spill] sm:$0xff] }
 0x1eb   :  { %v11292_v44 = vunpack.i.h.bf16 %v19689_v33  ;;  %v11291_v58 = vunpack.i.l.bf16 %v19689_v33  ;;  %v11287_v31 = vunpack.i.h.bf16 %v19691_v9  ;;  %v11286_v21 = vunpack.i.l.bf16 %v19691_v9  ;;  %v19693_v14 = vld [vmem:[#allocation45_spill] sm:$0xff]  ;;  %v19696_v11 = vld [vmem:[#allocation23_spill] sm:$0xff] }
 0x1ec   :  { %v11302_v33 = vunpack.i.h.bf16 %v19693_v14  ;;  %v11301_v45 = vunpack.i.l.bf16 %v19693_v14  ;;  %11779 = vrot.lane.b32.xlu1 %v19694_v53, %s12416_s7  ;;  %v11297_v9 = vunpack.i.h.bf16 %v19695_v28  ;;  %v11296_v2 = vunpack.i.l.bf16 %v19695_v28  ;;  %v19698_v53 = vld [vmem:[#allocation27_spill] sm:$0xff]  ;;  %v11500_v29 = vpop.permute.xlu1 %11499 }
 0x1ed   :  { %v11312_v24 = vunpack.i.h.bf16 %v19696_v11  ;;  %v11311_v22 = vunpack.i.l.bf16 %v19696_v11  ;;  %v19697_v14 = vpack.i.bf16 %v15916_v36, %v15911_v10  ;;  %v16366_v62 = vsel %vm2902_vm5, %v15797_v42, %v11291_v58 }
 0x1ee   :  { %v16370_v57 = vsel %vm2902_vm5, %v15801_v27, %v11292_v44  ;;  %v11307_v26 = vunpack.i.h.bf16 %v19698_v53  ;;  %v11306_v28 = vunpack.i.l.bf16 %v19698_v53  ;;  %v16376_v11 = vsel %vm2902_vm5, %v15805_v52, %v11286_v21  ;;  %v16384_v27 = vpop.permute.xlu0 %11494 }
 0x1ef   :  { %11774 = vrot.lane.b32.xlu0 %v19697_v14, %s12416_s7  ;;  %v16380_v10 = vsel %vm2902_vm5, %v15809_v4, %v11287_v31  ;;  %v11427_v42 = vunpack.i.h.bf16 %v15744_v17  ;;  %v11426_v36 = vunpack.i.l.bf16 %v15744_v17  ;;  %v16388_v44 = vsel %vm2902_vm5, %v15838_v32, %v11301_v45  ;;  %v19700_v31 = vld [vmem:[#allocation68_spill] sm:$0xff]  ;;  %v19701_v32 = vld [vmem:[#allocation70_spill] sm:$0xff] }
 0x1f0   :  { %v16392_v58 = vsel %vm2902_vm5, %v15842_v15, %v11302_v33  ;;  %v11502_v52 = vunpack.i.h.bf16 %v11500_v29  ;;  %v11501_v21 = vunpack.i.l.bf16 %v11500_v29  ;;  %v19699_v4 = vpack.i.bf16 %v15937_v0, %v15921_v51  ;;  %v19702_v15 = vld [vmem:[#allocation71_spill] sm:$0xff]  ;;  %v19704_v51 = vld [vmem:[#allocation73_spill] sm:$0xff] }
 0x1f1   :  { %v16400_v17 = vsel %vm2902_vm5, %v15849_v35, %v11296_v2  ;;  %v16404_v14 = vsel %vm2902_vm5, %v19700_v31, %v11297_v9  ;;  %v16408_v45 = vsel %vm2902_vm5, %v19701_v32, %v11311_v22  ;;  %v16412_v33 = vsel %vm2902_vm5, %v19702_v15, %v11312_v24  ;;  %v19705_v2 = vld [vmem:[#allocation81_spill] sm:$0xff]  ;;  %v19706_v9 = vld [vmem:[#allocation15_spill] sm:$0xff] }
 0x1f2   :  { %11789 = vrot.lane.b32.xlu1 %v19699_v4, %s12414_s26  ;;  %v19703_v0 = vpack.i.bf16 %v15947_v46, %v15942_v1  ;;  %v16420_v35 = vsel %vm2902_vm5, %v19704_v51, %v11306_v28  ;;  %v16424_v29 = vsel %vm2902_vm5, %v19705_v2, %v11307_v26  ;;  %v11432_v22 = vunpack.i.h.bf16 %v19706_v9  ;;  %v11510_v4 = vpop.permute.xlu1 %11509  ;;  %v11505_v32 = vpop.permute.xlu0 %11504  ;;  %v19707_v46 = vld [vmem:[#allocation21_spill] sm:$0xff] }
 0x1f3   :  { %v11431_v53 = vunpack.i.l.bf16 %v19706_v9  ;;  %v11512_v24 = vunpack.i.h.bf16 %v11510_v4  ;;  %v11511_v31 = vunpack.i.l.bf16 %v11510_v4  ;;  %v2968_v15 = vsel %vm2967_vm6, %v2903_v41, %v11426_v36  ;;  %v19710_v36 = vld [vmem:[#allocation67_spill] sm:$0xff] }
 0x1f4   :  { %11784 = vrot.lane.b32.xlu0 %v19703_v0, %s12414_s26  ;;  %v2969_v1 = vsel %vm2967_vm6, %v2904_v59, %v11427_v42  ;;  %v11321_v28 = vunpack.i.l.bf16 %v19707_v46  ;;  %v19708_v26 = vpack.i.bf16 %v15964_v37, %v15959_v48  ;;  %v3033_v51 = vsel %vm3032_vm7, %v2968_v15, %v11501_v21  ;;  %v19711_v15 = vld [vmem:[#allocation26_spill] sm:$0xff] }
 0x1f5   :  { %v3034_v2 = vsel %vm3032_vm7, %v2969_v1, %v11502_v52  ;;  %v11507_v9 = vunpack.i.h.bf16 %v11505_v32  ;;  %v11506_v4 = vunpack.i.l.bf16 %v11505_v32  ;;  %v19709_v41 = vpack.i.bf16 %v15974_v20, %v15969_v3 }
 0x1f6   :  { %11799 = vrot.lane.b32.xlu1 %v19708_v26, %s12415_s15  ;;  %v3098_v59 = vsel %vm3097_vm8, %v3033_v51, %v11511_v31  ;;  %v3099_v42 = vsel %vm3097_vm8, %v3034_v2, %v11512_v24  ;;  %v11437_v0 = vunpack.i.h.bf16 %v19710_v36  ;;  %v11436_v37 = vunpack.i.l.bf16 %v19710_v36  ;;  %v11520_v48 = vpop.permute.xlu1 %11519  ;;  %v11515_v20 = vpop.permute.xlu0 %11514 }
 0x1f7   :  { %v3163_v21 = vsel %vm3162_vm9, %v3098_v59, 1.0  ;;  %v3164_v52 = vsel %vm3162_vm9, %v3099_v42, 1.0  ;;  %v11317_v32 = vunpack.i.h.bf16 %v19711_v15  ;;  %v2970_v1 = vsel %vm2967_vm6, %v16276_v63, %v11431_v53  ;;  %v19713_v59 = vld [vmem:[#allocation66_spill] sm:$0xff] }
 0x1f8   :  { %11794 = vrot.lane.b32.xlu0 %v19709_v41, %s12415_s15  ;;  %v2971_v3 = vsel %vm2967_vm6, %v16280_v43, %v11432_v22  ;;  %v3227_v31 = vpack.c.bf16 %v3164_v52, %v3163_v21  ;;  %v11522_v24 = vunpack.i.h.bf16 %v11520_v48  ;;  %v11521_v26 = vunpack.i.l.bf16 %v11520_v48 }
 0x1f9   :  { %v11517_v51 = vunpack.i.h.bf16 %v11515_v20  ;;  %v11516_v2 = vunpack.i.l.bf16 %v11515_v20  ;;  %v19712_v41 = vpack.i.bf16 %v15984_v8, %v15979_v38  ;;  %v11442_v42 = vunpack.i.h.bf16 %v19713_v59 }
 0x1fa   :  { %v11441_v36 = vunpack.i.l.bf16 %v19713_v59  ;;  %v3035_v63 = vsel %vm3032_vm7, %v2970_v1, %v11506_v4  ;;  %v3036_v53 = vsel %vm3032_vm7, %v2971_v3, %v11507_v9  ;;  %v19714_v43 = vpack.i.bf16 %v15994_v49, %v15989_v19  ;;  %10522 = vmatprep.mubr.msk.bf16.mxu0 %vm3266_vm10, %v3227_v31  ;;  %v11530_v4 = vpop.permute.xlu1 %11529  ;;  %v11525_v52 = vpop.permute.xlu0 %11524 }
 0x1fb   :  { %11809 = vrot.lane.b32.xlu1 %v19712_v41, %s12416_s7  ;;  %v2972_v22 = vsel %vm2967_vm6, %v16336_v25, %v11436_v37  ;;  %v2973_v38 = vsel %vm2967_vm6, %v16340_v56, %v11437_v0  ;;  %v3100_v8 = vsel %vm3097_vm8, %v3035_v63, %v11516_v2  ;;  %v3101_v48 = vsel %vm3097_vm8, %v3036_v53, %v11517_v51  ;;  %v19718_v63 = vld [vmem:[#allocation82_spill] sm:$0xff] }
 0x1fc   :  { %11804 = vrot.lane.b32.xlu0 %v19714_v43, %s12416_s7  ;;  %v11532_v21 = vunpack.i.h.bf16 %v11530_v4  ;;  %v11531_v9 = vunpack.i.l.bf16 %v11530_v4  ;;  %v3165_v1 = vsel %vm3162_vm9, %v3100_v8, 1.0  ;;  %v3166_v49 = vsel %vm3162_vm9, %v3101_v48, 1.0 }
 0x1fd   :  { %v11316_v19 = vunpack.i.l.bf16 %v19711_v15  ;;  %v3037_v3 = vsel %vm3032_vm7, %v2972_v22, %v11521_v26  ;;  %v3038_v25 = vsel %vm3032_vm7, %v2973_v38, %v11522_v24  ;;  %v19715_v56 = vpack.i.bf16 %v16022_v30, %v16017_v61  ;;  %v19717_v26 = vld [vmem:[#allocation72_spill] sm:$0xff] }
 0x1fe   :  { %v3228_v0 = vpack.c.bf16 %v3166_v49, %v3165_v1  ;;  %v3102_v37 = vsel %vm3097_vm8, %v3037_v3, %v11531_v9  ;;  %v3103_v20 = vsel %vm3097_vm8, %v3038_v25, %v11532_v21  ;;  %v11527_v31 = vunpack.i.h.bf16 %v11525_v52  ;;  %v11540_v61 = vpop.permute.xlu1 %11539  ;;  %v19719_v21 = vld [vmem:[#allocation84_spill] sm:$0xff]  ;;  %v19720_v9 = vld [vmem:[#allocation83_spill] sm:$0xff]  ;;  %v19722_v1 = vld [vmem:[#allocation69_spill] sm:$0xff] }
 0x1ff   :  { %11819 = vrot.lane.b32.xlu1 %v19715_v56, %s12414_s26  ;;  %v11526_v51 = vunpack.i.l.bf16 %v11525_v52  ;;  %v19716_v2 = vpack.i.bf16 %v16032_v12, %v16027_v18  ;;  %v11447_v41 = vunpack.i.h.bf16 %v19717_v26  ;;  %v11446_v24 = vunpack.i.l.bf16 %v19717_v26  ;;  %v11535_v12 = vpop.permute.xlu0 %11534 }
 0x200   :  { %10523 = vmatmul.mubr.msk.bf16.vlgmr.msra.gmra.mxu0 %vm3266_vm10, %v3228_v0  ;;  %v3167_v30 = vsel %vm3162_vm9, %v3102_v37, 1.0  ;;  %v3168_v59 = vsel %vm3162_vm9, %v3103_v20, 1.0  ;;  %v16494_v53 = vsel %vm2902_vm5, %v19718_v63, %v11321_v28  ;;  %v2974_v43 = vsel %vm2967_vm6, %v16324_v16, %v11441_v36  ;;  %v19729_v63 = vld [vmem:[#allocation86_spill] sm:$0xff] }
 0x201   :  { %11814 = vrot.lane.b32.xlu0 %v19716_v2, %s12414_s26  ;;  %v2975_v18 = vsel %vm2967_vm6, %v16328_v55, %v11442_v42  ;;  %v3229_v22 = vpack.c.bf16 %v3168_v59, %v3167_v30  ;;  %v11542_v38 = vunpack.i.h.bf16 %v11540_v61  ;;  %v11541_v8 = vunpack.i.l.bf16 %v11540_v61  ;;  %v19723_v55 = vld [vmem:[#allocation46_spill] sm:$0xff]  ;;  %v19724_v42 = vld [vmem:[#allocation85_spill] sm:$0xff] }
 0x202   :  { %v11537_v48 = vunpack.i.h.bf16 %v11535_v12  ;;  %v11536_v4 = vunpack.i.l.bf16 %v11535_v12  ;;  %v19721_v52 = vpack.i.bf16 %v19719_v21, %v19720_v9  ;;  %v11452_v28 = vunpack.i.h.bf16 %v19722_v1  ;;  %v11550_v20 = vpop.permute.xlu1 %11549  ;;  %v19727_v59 = vld [vmem:[#allocation74_spill] sm:$0xff]  ;;  %v19732_v21 = vld [vmem:[#allocation52_spill] sm:$0xff] }
 0x203   :  { %v11451_v49 = vunpack.i.l.bf16 %v19722_v1  ;;  %v3039_v16 = vsel %vm3032_vm7, %v2974_v43, %v11526_v51  ;;  %v3040_v36 = vsel %vm3032_vm7, %v2975_v18, %v11527_v31  ;;  %v19725_v3 = vpack.i.bf16 %v19723_v55, %v19724_v42  ;;  %10526 = vmatprep.mubr.msk.bf16.mxu0 %vm3266_vm10, %v3229_v22  ;;  %v11545_v2 = vpop.permute.xlu0 %11544  ;;  %v19735_v55 = vld [vmem:[#allocation75_spill] sm:$0xff] }
 0x204   :  { %11829 = vrot.lane.b32.xlu1 %v19721_v52, %s12415_s15  ;;  %v2976_v25 = vsel %vm2967_vm6, %v16376_v11, %v11446_v24  ;;  %v2977_v56 = vsel %vm2967_vm6, %v16380_v10, %v11447_v41  ;;  %v3104_v0 = vsel %vm3097_vm8, %v3039_v16, %v11536_v4  ;;  %v3105_v37 = vsel %vm3097_vm8, %v3040_v36, %v11537_v48  ;;  %v19728_v24 = vld [vmem:[#allocation51_spill] sm:$0xff]  ;;  %v19731_v4 = vld [vmem:[#allocation54_spill] sm:$0xff] }
 0x205   :  { %11824 = vrot.lane.b32.xlu0 %v19725_v3, %s12415_s15  ;;  %v11552_v51 = vunpack.i.h.bf16 %v11550_v20  ;;  %v11551_v31 = vunpack.i.l.bf16 %v11550_v20  ;;  %v3169_v26 = vsel %vm3162_vm9, %v3104_v0, 1.0  ;;  %v3170_v61 = vsel %vm3162_vm9, %v3105_v37, 1.0 }
 0x206   :  { %v19726_v30 = vunpack.i.h.bf16 %v19707_v46  ;;  %v3041_v10 = vsel %vm3032_vm7, %v2976_v25, %v11541_v8  ;;  %v3042_v41 = vsel %vm3032_vm7, %v2977_v56, %v11542_v38  ;;  %v19730_v43 = vpack.i.bf16 %v19728_v24, %v19729_v63  ;;  %v19734_v8 = vld [vmem:[#allocation50_spill] sm:$0xff]  ;;  %v11560_v1 = vpop.permute.xlu1 %11559 }
 0x207   :  { %v3230_v18 = vpack.c.bf16 %v3170_v61, %v3169_v26  ;;  %v3106_v12 = vsel %vm3097_vm8, %v3041_v10, %v11551_v31  ;;  %v3107_v22 = vsel %vm3097_vm8, %v3042_v41, %v11552_v51  ;;  %v11547_v48 = vunpack.i.h.bf16 %v11545_v2  ;;  %v11555_v56 = vpop.permute.xlu0 %11554  ;;  %v19737_v26 = vld [vmem:[#allocation88_spill] sm:$0xff] }
 0x208   :  { %v16525_v11 = vsel %vm2902_vm5, %v19727_v59, %v19726_v30  ;;  %11839 = vrot.lane.b32.xlu1 %v19730_v43, %s12416_s7  ;;  %v11546_v46 = vunpack.i.l.bf16 %v11545_v2  ;;  %v19733_v9 = vpack.i.bf16 %v19731_v4, %v19732_v21  ;;  %v11457_v52 = vunpack.i.h.bf16 %v19734_v8  ;;  %v19736_v2 = vld [vmem:[#allocation89_spill] sm:$0xff]  ;;  %v19743_v21 = vld [vmem:[#allocation76_spill] sm:$0xff] }
 0x209   :  { %v11456_v38 = vunpack.i.l.bf16 %v19734_v8  ;;  %10527 = vmatmul.mubr.msk.bf16.gmra.mxu0 %vm3266_vm10, %v3230_v18  ;;  %v3171_v16 = vsel %vm3162_vm9, %v3106_v12, 1.0  ;;  %v3172_v36 = vsel %vm3162_vm9, %v3107_v22, 1.0  ;;  %v16546_v42 = vsel %vm2902_vm5, %v19735_v55, %v11316_v19  ;;  %v19739_v30 = vld [vmem:[#allocation77_spill] sm:$0xff]  ;;  %v19744_v8 = vld [vmem:[#allocation92_spill] sm:$0xff] }
 0x20a   :  { %11834 = vrot.lane.b32.xlu0 %v19733_v9, %s12416_s7  ;;  %v2978_v3 = vsel %vm2967_vm6, %v16366_v62, %v11451_v49  ;;  %v2979_v25 = vsel %vm2967_vm6, %v16370_v57, %v11452_v28  ;;  %v3231_v0 = vpack.c.bf16 %v3172_v36, %v3171_v16  ;;  %v11562_v37 = vunpack.i.h.bf16 %v11560_v1  ;;  %v19740_v57 = vld [vmem:[#allocation16_spill] sm:$0xff]  ;;  %v19741_v28 = vld [vmem:[#allocation90_spill] sm:$0xff]  ;;  %v11570_v18 = vpop.permute.xlu1 %11569 }
 0x20b   :  { %v11561_v20 = vunpack.i.l.bf16 %v11560_v1  ;;  %v11557_v51 = vunpack.i.h.bf16 %v11555_v56  ;;  %v11556_v31 = vunpack.i.l.bf16 %v11555_v56  ;;  %v19738_v61 = vpack.i.bf16 %v19736_v2, %v19737_v26  ;;  %v19750_v56 = vld [vmem:[#allocation19_spill] sm:$0xff]  ;;  %v19751_v2 = vld [vmem:[#allocation101_spill] sm:$0xff] }
 0x20c   :  { %v11462_v19 = vunpack.i.h.bf16 %v19739_v30  ;;  %v11461_v59 = vunpack.i.l.bf16 %v19739_v30  ;;  %v3043_v62 = vsel %vm3032_vm7, %v2978_v3, %v11546_v46  ;;  %v3044_v49 = vsel %vm3032_vm7, %v2979_v25, %v11547_v48  ;;  %10530 = vmatprep.mubr.msk.bf16.mxu0 %vm3266_vm10, %v3231_v0  ;;  %v11565_v48 = vpop.permute.xlu0 %11564  ;;  %v19747_v3 = vld [vmem:[#allocation20_spill] sm:$0xff] }
 0x20d   :  { %11849 = vrot.lane.b32.xlu1 %v19738_v61, %s12414_s26  ;;  %v19742_v10 = vpack.i.bf16 %v19740_v57, %v19741_v28  ;;  %v2980_v41 = vsel %vm2967_vm6, %v16400_v17, %v11456_v38  ;;  %v2981_v24 = vsel %vm2967_vm6, %v16404_v14, %v11457_v52  ;;  %v3108_v63 = vsel %vm3097_vm8, %v3043_v62, %v11556_v31  ;;  %v19745_v52 = vld [vmem:[#allocation28_spill] sm:$0xff] }
 0x20e   :  { %v3109_v43 = vsel %vm3097_vm8, %v3044_v49, %v11557_v51  ;;  %v11572_v12 = vunpack.i.h.bf16 %v11570_v18  ;;  %v11571_v22 = vunpack.i.l.bf16 %v11570_v18  ;;  %v3173_v46 = vsel %vm3162_vm9, %v3108_v63, 1.0  ;;  %v19753_v63 = vld [vmem:[#allocation91_spill] sm:$0xff] }
 0x20f   :  { %11844 = vrot.lane.b32.xlu0 %v19742_v10, %s12414_s26  ;;  %v3174_v4 = vsel %vm3162_vm9, %v3109_v43, 1.0  ;;  %v16577_v17 = vsel %vm2902_vm5, %v19743_v21, %v11317_v32  ;;  %v3045_v14 = vsel %vm3032_vm7, %v2980_v41, %v11561_v20  ;;  %v3046_v9 = vsel %vm3032_vm7, %v2981_v24, %v11562_v37  ;;  %v19748_v32 = vld [vmem:[#allocation55_spill] sm:$0xff]  ;;  %v11580_v20 = vpop.permute.xlu1 %11579 }
 0x210   :  { %v19746_v38 = vpack.i.bf16 %v19744_v8, %v19745_v52  ;;  %v3232_v1 = vpack.c.bf16 %v3174_v4, %v3173_v46  ;;  %v3110_v16 = vsel %vm3097_vm8, %v3045_v14, %v11571_v22  ;;  %v3111_v36 = vsel %vm3097_vm8, %v3046_v9, %v11572_v12  ;;  %v11575_v62 = vpop.permute.xlu0 %11574 }
 0x211   :  { %v11567_v55 = vunpack.i.h.bf16 %v11565_v48  ;;  %v11566_v15 = vunpack.i.l.bf16 %v11565_v48  ;;  %v19749_v25 = vpack.i.bf16 %v19747_v3, %v19748_v32  ;;  %v11467_v0 = vunpack.i.h.bf16 %v19750_v56  ;;  %v19758_v32 = vld [vmem:[#allocation102_spill] sm:$0xff] }
 0x212   :  { %11859 = vrot.lane.b32.xlu1 %v19746_v38, %s12415_s15  ;;  %v11466_v37 = vunpack.i.l.bf16 %v19750_v56  ;;  %10531 = vmatmul.mubr.msk.bf16.gmra.mxu0 %vm3266_vm10, %v3232_v1  ;;  %v3175_v51 = vsel %vm3162_vm9, %v3110_v16, 1.0  ;;  %v3176_v31 = vsel %vm3162_vm9, %v3111_v36, 1.0  ;;  %v11332_v26 = vunpack.i.h.bf16 %v19751_v2  ;;  %v19757_v36 = vld [vmem:[#allocation97_spill] sm:$0xff] }
 0x213   :  { %11854 = vrot.lane.b32.xlu0 %v19749_v25, %s12415_s15  ;;  %v2982_v61 = vsel %vm2967_vm6, %v16388_v44, %v11461_v59  ;;  %v2983_v30 = vsel %vm2967_vm6, %v16392_v58, %v11462_v19  ;;  %v3233_v49 = vpack.c.bf16 %v3176_v31, %v3175_v51  ;;  %v11582_v57 = vunpack.i.h.bf16 %v11580_v20  ;;  %v11590_v22 = vpop.permute.xlu1 %11589 }
 0x214   :  { %v11581_v28 = vunpack.i.l.bf16 %v11580_v20  ;;  %v11577_v10 = vunpack.i.h.bf16 %v11575_v62  ;;  %v11576_v41 = vunpack.i.l.bf16 %v11575_v62  ;;  %v19752_v24 = vpack.i.bf16 %v16186_v5, %v16181_v34  ;;  %v11585_v4 = vpop.permute.xlu0 %11584 }
 0x215   :  { %v11472_v43 = vunpack.i.h.bf16 %v19753_v63  ;;  %v11471_v18 = vunpack.i.l.bf16 %v19753_v63  ;;  %v3047_v44 = vsel %vm3032_vm7, %v2982_v61, %v11566_v15  ;;  %v3048_v59 = vsel %vm3032_vm7, %v2983_v30, %v11567_v55  ;;  %10534 = vmatprep.mubr.msk.bf16.mxu0 %vm3266_vm10, %v3233_v49  ;;  %v19759_v61 = vld [vmem:[#allocation33_spill] sm:$0xff]  ;;  %v19760_v30 = vld [vmem:[#allocation22_spill] sm:$0xff] }
 0x216   :  { %11869 = vrot.lane.b32.xlu1 %v19752_v24, %s12416_s7  ;;  %v19754_v58 = vpack.i.bf16 %v16206_v6, %v16191_v23  ;;  %v2984_v19 = vsel %vm2967_vm6, %v16420_v35, %v11466_v37  ;;  %v2985_v34 = vsel %vm2967_vm6, %v16424_v29, %v11467_v0  ;;  %v3112_v5 = vsel %vm3097_vm8, %v3047_v44, %v11576_v41  ;;  %v19762_v49 = vld [vmem:[#allocation34_spill] sm:$0xff]  ;;  %v19764_v41 = vld [vmem:[#allocation95_spill] sm:$0xff] }
 0x217   :  { %v3113_v12 = vsel %vm3097_vm8, %v3048_v59, %v11577_v10  ;;  %v11592_v48 = vunpack.i.h.bf16 %v11590_v22  ;;  %v11591_v46 = vunpack.i.l.bf16 %v11590_v22  ;;  %v3177_v21 = vsel %vm3162_vm9, %v3112_v5, 1.0 }
 0x218   :  { %11864 = vrot.lane.b32.xlu0 %v19754_v58, %s12416_s7  ;;  %v3178_v6 = vsel %vm3162_vm9, %v3113_v12, 1.0  ;;  %v11331_v23 = vunpack.i.l.bf16 %v19751_v2  ;;  %v3049_v14 = vsel %vm3032_vm7, %v2984_v19, %v11581_v28  ;;  %v3050_v35 = vsel %vm3032_vm7, %v2985_v34, %v11582_v57 }
 0x219   :  { %v19755_v29 = vpack.i.bf16 %v16216_v13, %v16211_v7  ;;  %v3234_v9 = vpack.c.bf16 %v3178_v6, %v3177_v21  ;;  %v3114_v8 = vsel %vm3097_vm8, %v3049_v14, %v11591_v46  ;;  %v3115_v52 = vsel %vm3097_vm8, %v3050_v35, %v11592_v48  ;;  %v11600_v7 = vpop.permute.xlu1 %11599 }
 0x21a   :  { %v11587_v38 = vunpack.i.h.bf16 %v11585_v4  ;;  %v11586_v1 = vunpack.i.l.bf16 %v11585_v4  ;;  %v19756_v16 = vpack.i.bf16 %v16236_v47, %v16231_v40  ;;  %v11477_v55 = vunpack.i.h.bf16 %v19757_v36  ;;  %v11595_v47 = vpop.permute.xlu0 %11594 }
 0x21b   :  { %11879 = vrot.lane.b32.xlu1 %v19755_v29, %s12414_s26  ;;  %v11476_v15 = vunpack.i.l.bf16 %v19757_v36  ;;  %10535 = vmatmul.mubr.msk.bf16.gmra.mxu0 %vm3266_vm10, %v3234_v9  ;;  %v3179_v13 = vsel %vm3162_vm9, %v3114_v8, 1.0  ;;  %v3180_v3 = vsel %vm3162_vm9, %v3115_v52, 1.0  ;;  %v11326_v25 = vunpack.i.l.bf16 %v19758_v32  ;;  %v19768_v29 = vld [vmem:[#allocation17_spill] sm:$0xff] }
 0x21c   :  { %11874 = vrot.lane.b32.xlu0 %v19756_v16, %s12414_s26  ;;  %v2986_v56 = vsel %vm2967_vm6, %v16408_v45, %v11471_v18  ;;  %v2987_v40 = vsel %vm2967_vm6, %v16412_v33, %v11472_v43  ;;  %v3235_v0 = vpack.c.bf16 %v3180_v3, %v3179_v13  ;;  %v11602_v37 = vunpack.i.h.bf16 %v11600_v7  ;;  %v19763_v33 = vld [vmem:[#allocation96_spill] sm:$0xff]  ;;  %v19770_v3 = vld [vmem:[#allocation53_spill] sm:$0xff] }
 0x21d   :  { %v11601_v20 = vunpack.i.l.bf16 %v11600_v7  ;;  %v11597_v51 = vunpack.i.h.bf16 %v11595_v47  ;;  %v11596_v31 = vunpack.i.l.bf16 %v11595_v47  ;;  %v19761_v62 = vpack.i.bf16 %v19759_v61, %v19760_v30  ;;  %v11610_v59 = vpop.permute.xlu1 %11609 }
 0x21e   :  { %v11482_v57 = vunpack.i.h.bf16 %v19762_v49  ;;  %v11481_v28 = vunpack.i.l.bf16 %v19762_v49  ;;  %v3051_v45 = vsel %vm3032_vm7, %v2986_v56, %v11586_v1  ;;  %v3052_v10 = vsel %vm3032_vm7, %v2987_v40, %v11587_v38  ;;  %10538 = vmatprep.mubr.msk.bf16.mxu0 %vm3266_vm10, %v3235_v0  ;;  %v11605_v34 = vpop.permute.xlu0 %11604  ;;  %v19769_v38 = vld [vmem:[#allocation87_spill] sm:$0xff]  ;;  %v19771_v56 = vld [vmem:[#allocation98_spill] sm:$0xff] }
 0x21f   :  { %11889 = vrot.lane.b32.xlu1 %v19761_v62, %s12415_s15  ;;  %v19765_v24 = vpack.i.bf16 %v19763_v33, %v19764_v41  ;;  %v2988_v63 = vsel %vm2967_vm6, %v16546_v42, %v11476_v15  ;;  %v2989_v43 = vsel %vm2967_vm6, %v16577_v17, %v11477_v55  ;;  %v3116_v18 = vsel %vm3097_vm8, %v3051_v45, %v11596_v31 }
 0x220   :  { %v3117_v44 = vsel %vm3097_vm8, %v3052_v10, %v11597_v51  ;;  %v11612_v58 = vunpack.i.h.bf16 %v11610_v59  ;;  %v11611_v19 = vunpack.i.l.bf16 %v11610_v59  ;;  %v3181_v5 = vsel %vm3162_vm9, %v3116_v18, 1.0  ;;  %v19774_v18 = vld [vmem:[#allocation99_spill] sm:$0xff] }
 0x221   :  { %11884 = vrot.lane.b32.xlu0 %v19765_v24, %s12415_s15  ;;  %v3182_v12 = vsel %vm3162_vm9, %v3117_v44, 1.0  ;;  %v11327_v22 = vunpack.i.h.bf16 %v19758_v32  ;;  %v3053_v48 = vsel %vm3032_vm7, %v2988_v63, %v11601_v20  ;;  %v3054_v42 = vsel %vm3032_vm7, %v2989_v43, %v11602_v37  ;;  %v19772_v63 = vld [vmem:[#allocation93_spill] sm:$0xff]  ;;  %v19775_v59 = vld [vmem:[#allocation47_spill] sm:$0xff] }
 0x222   :  { %v19766_v17 = vpack.i.bf16 %v16310_v54, %v16293_v50  ;;  %v3236_v46 = vpack.c.bf16 %v3182_v12, %v3181_v5  ;;  %v3118_v4 = vsel %vm3097_vm8, %v3053_v48, %v11611_v19  ;;  %v3119_v21 = vsel %vm3097_vm8, %v3054_v42, %v11612_v58  ;;  %v11620_v54 = vpop.permute.xlu1 %11619  ;;  %v19776_v12 = vld [vmem:[#allocation49_spill] sm:$0xff]  ;;  %v19777_v48 = vld [vmem:[#allocation78_spill] sm:$0xff] }
 0x223   :  { %v11607_v6 = vunpack.i.h.bf16 %v11605_v34  ;;  %v11606_v14 = vunpack.i.l.bf16 %v11605_v34  ;;  %v19767_v35 = vpack.i.bf16 %v16320_v39, %v16315_v60  ;;  %v11487_v9 = vunpack.i.h.bf16 %v19768_v29  ;;  %v11615_v39 = vpop.permute.xlu0 %11614 }
 0x224   :  { %11899 = vrot.lane.b32.xlu1 %v19766_v17, %s12416_s7  ;;  %v11486_v8 = vunpack.i.l.bf16 %v19768_v29  ;;  %10539 = vmatmul.mubr.msk.bf16.gmra.mxu0 %vm3266_vm10, %v3236_v46  ;;  %v3183_v50 = vsel %vm3162_vm9, %v3118_v4, 1.0  ;;  %v3184_v52 = vsel %vm3162_vm9, %v3119_v21, 1.0  ;;  %v2927_v1 = vsel %vm2902_vm5, %v19769_v38, %v11326_v25 }
 0x225   :  { %11894 = vrot.lane.b32.xlu0 %v19767_v35, %s12416_s7  ;;  %v2990_v16 = vsel %vm2967_vm6, %v16494_v53, %v11481_v28  ;;  %v2991_v60 = vsel %vm2967_vm6, %v16525_v11, %v11482_v57  ;;  %v3237_v36 = vpack.c.bf16 %v3184_v52, %v3183_v50  ;;  %v11622_v55 = vunpack.i.h.bf16 %v11620_v54  ;;  %v19778_v35 = vld [vmem:[#allocation79_spill] sm:$0xff] }
 0x226   :  { %v11621_v15 = vunpack.i.l.bf16 %v11620_v54  ;;  %v11617_v7 = vunpack.i.h.bf16 %v11615_v39  ;;  %v11616_v13 = vunpack.i.l.bf16 %v11615_v39  ;;  %v2928_v32 = vsel %vm2902_vm5, %v19770_v3, %v11327_v22  ;;  %v11630_v20 = vpop.permute.xlu1 %11629 }
 0x227   :  { %v11492_v40 = vunpack.i.h.bf16 %v19771_v56  ;;  %v3055_v47 = vsel %vm3032_vm7, %v2990_v16, %v11606_v14  ;;  %v3056_v25 = vsel %vm3032_vm7, %v2991_v60, %v11607_v6  ;;  %10542 = vmatprep.mubr.msk.bf16.mxu0 %vm3266_vm10, %v3237_v36  ;;  %v2992_v53 = vsel %vm2967_vm6, %v2927_v1, %v11486_v8  ;;  %v11625_v61 = vpop.permute.xlu0 %11624 }
 0x228   :  { %v2993_v11 = vsel %vm2967_vm6, %v2928_v32, %v11487_v9  ;;  %v3120_v0 = vsel %vm3097_vm8, %v3055_v47, %v11616_v13  ;;  %v3121_v37 = vsel %vm3097_vm8, %v3056_v25, %v11617_v7  ;;  %v11632_v51 = vunpack.i.h.bf16 %v11630_v20  ;;  %v19781_v25 = vld [vmem:[#allocation58_spill] sm:$0xff] }
 0x229   :  { %v11631_v31 = vunpack.i.l.bf16 %v11630_v20  ;;  %v3185_v30 = vsel %vm3162_vm9, %v3120_v0, 1.0  ;;  %v3186_v62 = vsel %vm3162_vm9, %v3121_v37, 1.0  ;;  %v11491_v49 = vunpack.i.l.bf16 %v19771_v56 }
 0x22a   :  { %v3057_v57 = vsel %vm3032_vm7, %v2992_v53, %v11621_v15  ;;  %v3058_v28 = vsel %vm3032_vm7, %v2993_v11, %v11622_v55  ;;  %v3238_v45 = vpack.c.bf16 %v3186_v62, %v3185_v30  ;;  %v11627_v41 = vunpack.i.h.bf16 %v11625_v61  ;;  %v11640_v19 = vpop.permute.xlu1 %11639  ;;  %v19780_v15 = vld [vmem:[#allocation100_spill] sm:$0xff] }
 0x22b   :  { %v3122_v10 = vsel %vm3097_vm8, %v3057_v57, %v11631_v31  ;;  %v3123_v33 = vsel %vm3097_vm8, %v3058_v28, %v11632_v51  ;;  %v11626_v24 = vunpack.i.l.bf16 %v11625_v61  ;;  %v19773_v43 = vunpack.i.l.bf16 %v19772_v63  ;;  %v11635_v46 = vpop.permute.xlu0 %11634  ;;  %v19782_v11 = vld [vmem:[#allocation60_spill] sm:$0xff] }
 0x22c   :  { %v2929_v58 = vsel %vm2902_vm5, %v19775_v59, %v11331_v23  ;;  %10543 = vmatmul.mubr.msk.bf16.gmra.mxu0 %vm3266_vm10, %v3238_v45  ;;  %v3187_v34 = vsel %vm3162_vm9, %v3122_v10, 1.0  ;;  %v3188_v5 = vsel %vm3162_vm9, %v3123_v33, 1.0  ;;  %v2930_v22 = vsel %vm2902_vm5, %v19776_v12, %v11332_v26 }
 0x22d   :  { %v2866_v44 = vsel %vm2837_vm4, %v19774_v18, %v19773_v43  ;;  %v11342_v42 = vunpack.i.h.bf16 %v19777_v48  ;;  %v11341_v17 = vunpack.i.l.bf16 %v19777_v48  ;;  %v3239_v4 = vpack.c.bf16 %v3188_v5, %v3187_v34 }
 0x22e   :  { %v2994_v23 = vsel %vm2967_vm6, %v2929_v58, %v11491_v49  ;;  %v2995_v21 = vsel %vm2967_vm6, %v2930_v22, %v11492_v40  ;;  %v11637_v6 = vunpack.i.h.bf16 %v11635_v46  ;;  %v11636_v14 = vunpack.i.l.bf16 %v11635_v46  ;;  %v11650_v38 = vpop.permute.xlu1 %11649 }
 0x22f   :  { %v11337_v29 = vunpack.i.h.bf16 %v19778_v35  ;;  %v11336_v9 = vunpack.i.l.bf16 %v19778_v35  ;;  %v3059_v2 = vsel %vm3032_vm7, %v2994_v23, %v11626_v24  ;;  %v3060_v26 = vsel %vm3032_vm7, %v2995_v21, %v11627_v41  ;;  %10546 = vmatprep.mubr.msk.bf16.mxu0 %vm3266_vm10, %v3239_v4  ;;  %v11645_v60 = vpop.permute.xlu0 %11644 }
 0x230   :  { %v11497_v8 = vunpack.i.h.bf16 %v16384_v27  ;;  %v11496_v54 = vunpack.i.l.bf16 %v16384_v27  ;;  %v3124_v50 = vsel %vm3097_vm8, %v3059_v2, %v11636_v14  ;;  %v3125_v52 = vsel %vm3097_vm8, %v3060_v26, %v11637_v6  ;;  %v19784_v2 = vld [vmem:[#allocation24_spill] sm:$0xff] }
 0x231   :  { %v11642_v1 = vunpack.i.h.bf16 %v11640_v19  ;;  %v11641_v16 = vunpack.i.l.bf16 %v11640_v19  ;;  %v3189_v39 = vsel %vm3162_vm9, %v3124_v50, 1.0  ;;  %v3190_v36 = vsel %vm3162_vm9, %v3125_v52, 1.0  ;;  %v19786_v52 = vld [vmem:[#allocation39_spill] sm:$0xff] }
 0x232   :  { %v19779_v55 = vunpack.i.h.bf16 %v19772_v63  ;;  %v11652_v13 = vunpack.i.h.bf16 %v11650_v38  ;;  %v11651_v3 = vunpack.i.l.bf16 %v11650_v38  ;;  %v3240_v27 = vpack.c.bf16 %v3190_v36, %v3189_v39  ;;  %v11660_v51 = vpop.permute.xlu1 %11659 }
 0x233   :  { %v2931_v32 = vsel %vm2902_vm5, %v2866_v44, %v11336_v9  ;;  %v11647_v40 = vunpack.i.h.bf16 %v11645_v60  ;;  %v11646_v47 = vunpack.i.l.bf16 %v11645_v60  ;;  %v2933_v53 = vsel %vm2902_vm5, %v19781_v25, %v11341_v17  ;;  %v11655_v49 = vpop.permute.xlu0 %11654 }
 0x234   :  { %v2867_v7 = vsel %vm2837_vm4, %v19780_v15, %v19779_v55  ;;  %v2934_v0 = vsel %vm2902_vm5, %v19782_v11, %v11342_v42  ;;  %v2996_v37 = vsel %vm2967_vm6, %v2931_v32, %v11496_v54  ;;  %10547 = vmatmul.mubr.msk.bf16.gmra.mxu0 %vm3266_vm10, %v3240_v27  ;;  %v2998_v31 = vsel %vm2967_vm6, %v2933_v53, %v11641_v16  ;;  %v19785_v54 = vld [vmem:[#allocation25_spill] sm:$0xff] }
 0x235   :  { %v2932_v56 = vsel %vm2902_vm5, %v2867_v7, %v11337_v29  ;;  %v2999_v61 = vsel %vm2967_vm6, %v2934_v0, %v11642_v1  ;;  %v11662_v30 = vunpack.i.h.bf16 %v11660_v51  ;;  %v11661_v62 = vunpack.i.l.bf16 %v11660_v51  ;;  %v19783_v29 = vld [vmem:[#allocation80_spill] sm:$0xff]  ;;  %vm17220_vm5 = vmor %vm4349_vm14, %vm4350_vm1 }
 0x236   :  { %v2997_v20 = vsel %vm2967_vm6, %v2932_v56, %v11497_v8  ;;  %v3063_v57 = vsel %vm3032_vm7, %v2998_v31, %v11651_v3  ;;  %v3064_v28 = vsel %vm3032_vm7, %v2999_v61, %v11652_v13  ;;  %v11657_v45 = vunpack.i.h.bf16 %v11655_v49  ;;  %v11670_v44 = vpop.permute.xlu1 %11669 }
 0x237   :  { %v11656_v10 = vunpack.i.l.bf16 %v11655_v49  ;;  %v3061_v33 = vsel %vm3032_vm7, %v2996_v37, %v11646_v47  ;;  %v3062_v41 = vsel %vm3032_vm7, %v2997_v20, %v11647_v40  ;;  %v3128_v24 = vsel %vm3097_vm8, %v3063_v57, %v11661_v62  ;;  %v11665_v19 = vpop.permute.xlu0 %11664 }
 0x238   :  { %v3129_v63 = vsel %vm3097_vm8, %v3064_v28, %v11662_v30  ;;  %v3127_v18 = vsel %vm3097_vm8, %v3062_v41, %v11657_v45  ;;  %v3193_v59 = vsel %vm3162_vm9, %v3128_v24, 1.0  ;;  %v11672_v48 = vunpack.i.h.bf16 %v11670_v44  ;;  %v19788_v24 = vld [vmem:[#allocation4_spill] sm:$0xff] }
 0x239   :  { %v3126_v43 = vsel %vm3097_vm8, %v3061_v33, %v11656_v10  ;;  %v3194_v58 = vsel %vm3162_vm9, %v3129_v63, 1.0  ;;  %v3192_v5 = vsel %vm3162_vm9, %v3127_v18, 1.0  ;;  %v11671_v42 = vunpack.i.l.bf16 %v11670_v44  ;;  %v19787_v33 = vld [vmem:[#allocation40_spill] sm:$0xff]  ;;  %v19789_v18 = vld [vmem:[#allocation5_spill] sm:$0xff] }
 0x23a   :  { %v3191_v34 = vsel %vm3162_vm9, %v3126_v43, 1.0  ;;  %v3242_v22 = vpack.c.bf16 %v3194_v58, %v3193_v59  ;;  %v11680_v17 = vpop.permute.xlu1 %11679  ;;  %v11667_v46 = vunpack.i.h.bf16 %v11665_v19  ;;  %v11666_v4 = vunpack.i.l.bf16 %v11665_v19  ;;  %v19790_v59 = vld [vmem:[#allocation6_spill] sm:$0xff] }
 0x23b   :  { %v3241_v12 = vpack.c.bf16 %v3192_v5, %v3191_v34  ;;  %v11675_v23 = vpop.permute.xlu0 %11674  ;;  %v11682_v21 = vunpack.i.h.bf16 %v11680_v17  ;;  %v11681_v6 = vunpack.i.l.bf16 %v11680_v17  ;;  %v3002_v9 = vsel %vm2967_vm6, %v19783_v29, %v11671_v42 }
 0x23c   :  { %v11677_v14 = vunpack.i.h.bf16 %v11675_v23  ;;  %v11676_v35 = vunpack.i.l.bf16 %v11675_v23  ;;  %v3003_v26 = vsel %vm2967_vm6, %v19784_v2, %v11672_v48  ;;  %v3000_v50 = vsel %vm2967_vm6, %v19785_v54, %v11666_v4 }
 0x23d   :  { %10550 = vmatprep.mubr.msk.bf16.mxu0 %vm3266_vm10, %v3241_v12  ;;  %v3001_v38 = vsel %vm2967_vm6, %v19786_v52, %v11667_v46  ;;  %v3067_v39 = vsel %vm3032_vm7, %v3002_v9, %v11681_v6  ;;  %v3068_v36 = vsel %vm3032_vm7, %v3003_v26, %v11682_v21 }
 0x23e   :  { %10551 = vmatmul.mubr.msk.bf16.gmra.mxu0 %vm3266_vm10, %v3242_v22  ;;  %v11690_v8 = vpop.permute.xlu1 %11689  ;;  %v3065_v7 = vsel %vm3032_vm7, %v3000_v50, %v11676_v35  ;;  %v3066_v13 = vsel %vm3032_vm7, %v3001_v38, %v11677_v14 }
 0x23f   :  { %v11692_v1 = vunpack.i.h.bf16 %v11690_v8  ;;  %v11691_v16 = vunpack.i.l.bf16 %v11690_v8  ;;  %v11685_v60 = vpop.permute.xlu0 %11684 }
 0x240   :  { %v11687_v55 = vunpack.i.h.bf16 %v11685_v60  ;;  %v11686_v15 = vunpack.i.l.bf16 %v11685_v60 }
 0x241   :  { %v3132_v3 = vsel %vm3097_vm8, %v3067_v39, %v11691_v16  ;;  %v3133_v27 = vsel %vm3097_vm8, %v3068_v36, %v11692_v1  ;;  %v12417_v1 = vmov 0  }
 0x242   :  { %v3130_v32 = vsel %vm3097_vm8, %v3065_v7, %v11686_v15  ;;  %v3131_v56 = vsel %vm3097_vm8, %v3066_v13, %v11687_v55  ;;  %v11700_v40 = vpop.permute.xlu1 %11699  ;;  %v3197_v47 = vsel %vm3162_vm9, %v3132_v3, 1.0  ;;  %v3198_v25 = vsel %vm3162_vm9, %v3133_v27, 1.0  ;;  %4055 = vst.msk [vmem:[#allocation2 + $0x18] sm:$0xf] %vm4047_vm11, %v12417_v1  ;;  %4056 = vst.msk [vmem:[#allocation2 + $0x1c] sm:$0xf] %vm4047_vm11, %v12417_v1  ;;  %10586 = vmatprep.subr.bf16.mxu1 %v12417_v1 }
 0x243   :  { %v11695_v53 = vpop.permute.xlu0 %11694  ;;  %v3195_v11 = vsel %vm3162_vm9, %v3130_v32, 1.0  ;;  %v3196_v0 = vsel %vm3162_vm9, %v3131_v56, 1.0  ;;  %v3244_v20 = vpack.c.bf16 %v3198_v25, %v3197_v47  ;;  %v11702_v51 = vunpack.i.h.bf16 %v11700_v40  ;;  %4048 = vst.msk [vmem:[#allocation2] sm:$0xf] %vm4047_vm11, %v12417_v1  ;;  %4049 = vst.msk [vmem:[#allocation2 + $0x4] sm:$0xf] %vm4047_vm11, %v12417_v1  ;;  %8713 = vmatprep.subr.bf16.mxu0 %v12417_v1 }
 0x244   :  { %v3243_v37 = vpack.c.bf16 %v3196_v0, %v3195_v11  ;;  %v11701_v31 = vunpack.i.l.bf16 %v11700_v40  ;;  %v11697_v30 = vunpack.i.h.bf16 %v11695_v53  ;;  %v11696_v62 = vunpack.i.l.bf16 %v11695_v53  ;;  %4052 = vst.msk [vmem:[#allocation2 + $0xc] sm:$0xf] %vm4047_vm11, %v12417_v1  ;;  %4053 = vst.msk [vmem:[#allocation2 + $0x10] sm:$0xf] %vm4047_vm11, %v12417_v1  ;;  %v19791_v13 = vld [vmem:[#allocation7_spill] sm:$0xff]  ;;  %v19792_v27 = vld [vmem:[#allocation30_spill] sm:$0xff] }
 0x245   :  { %v3007_v63 = vsel %vm2967_vm6, %v19788_v24, %v11702_v51  ;;  %4058 = vst.msk [vmem:[#allocation2 + $0x24] sm:$0xf] %vm4047_vm11, %v12417_v1  ;;  %4059 = vst.msk [vmem:[#allocation2 + $0x28] sm:$0xf] %vm4047_vm11, %v12417_v1  ;;  %v19793_v40 = vld [vmem:[#allocation31_spill] sm:$0xff]  ;;  %v19794_v25 = vld [vmem:[#allocation29_spill] sm:$0xff] }
 0x246   :  { %10554 = vmatprep.mubr.msk.bf16.mxu0 %vm3266_vm10, %v3243_v37  ;;  %v11710_v61 = vpop.permute.xlu1 %11709  ;;  %v3006_v41 = vsel %vm2967_vm6, %v19787_v33, %v11701_v31  ;;  %v3004_v44 = vsel %vm2967_vm6, %v19789_v18, %v11696_v62  ;;  %v3005_v58 = vsel %vm2967_vm6, %v19790_v59, %v11697_v30  ;;  %4061 = vst.msk [vmem:[#allocation2 + $0x30] sm:$0xf] %vm4047_vm11, %v12417_v1  ;;  %4062 = vst.msk [vmem:[#allocation2 + $0x34] sm:$0xf] %vm4047_vm11, %v12417_v1 }
 0x247   :  { %v11705_v49 = vpop.permute.xlu0 %11704  ;;  %10555 = vmatmul.mubr.msk.bf16.gmra.mxu0 %vm3266_vm10, %v3244_v20  ;;  %v11712_v57 = vunpack.i.h.bf16 %v11710_v61  ;;  %v11711_v28 = vunpack.i.l.bf16 %v11710_v61  ;;  %4064 = vst.msk [vmem:[#allocation2 + $0x3c] sm:$0xf] %vm4047_vm11, %v12417_v1  ;;  %4065 = vst.msk [vmem:[#allocation2 + $0x40] sm:$0xf] %vm4047_vm11, %v12417_v1 }
 0x248   :  { %v11707_v45 = vunpack.i.h.bf16 %v11705_v49  ;;  %v11706_v10 = vunpack.i.l.bf16 %v11705_v49  ;;  %4067 = vst.msk [vmem:[#allocation2 + $0x48] sm:$0xf] %vm4047_vm11, %v12417_v1  ;;  %4068 = vst.msk [vmem:[#allocation2 + $0x4c] sm:$0xf] %vm4047_vm11, %v12417_v1 }
 0x249   :  { %v3071_v12 = vsel %vm3032_vm7, %v3006_v41, %v11711_v28  ;;  %v3072_v22 = vsel %vm3032_vm7, %v3007_v63, %v11712_v57  ;;  %4070 = vst.msk [vmem:[#allocation2 + $0x54] sm:$0xf] %vm4047_vm11, %v12417_v1  ;;  %4071 = vst.msk [vmem:[#allocation2 + $0x58] sm:$0xf] %vm4047_vm11, %v12417_v1 }
 0x24a   :  { %v11720_v43 = vpop.permute.xlu1 %11719  ;;  %v3069_v17 = vsel %vm3032_vm7, %v3004_v44, %v11706_v10  ;;  %v3070_v46 = vsel %vm3032_vm7, %v3005_v58, %v11707_v45  ;;  %4073 = vst.msk [vmem:[#allocation2 + $0x60] sm:$0xf] %vm4047_vm11, %v12417_v1  ;;  %4074 = vst.msk [vmem:[#allocation2 + $0x64] sm:$0xf] %vm4047_vm11, %v12417_v1 }
 0x24b   :  { %v11722_v19 = vunpack.i.h.bf16 %v11720_v43  ;;  %v11721_v34 = vunpack.i.l.bf16 %v11720_v43  ;;  %v11715_v5 = vpop.permute.xlu0 %11714  ;;  %4076 = vst.msk [vmem:[#allocation2 + $0x6c] sm:$0xf] %vm4047_vm11, %v12417_v1  ;;  %4077 = vst.msk [vmem:[#allocation2 + $0x70] sm:$0xf] %vm4047_vm11, %v12417_v1 }
 0x24c   :  { %v11717_v48 = vunpack.i.h.bf16 %v11715_v5  ;;  %v11716_v42 = vunpack.i.l.bf16 %v11715_v5  ;;  %4079 = vst.msk [vmem:[#allocation2 + $0x78] sm:$0xf] %vm4047_vm11, %v12417_v1  ;;  %4080 = vst.msk [vmem:[#allocation2 + $0x7c] sm:$0xf] %vm4047_vm11, %v12417_v1 }
 0x24d   :  { %v3136_v4 = vsel %vm3097_vm8, %v3071_v12, %v11721_v34  ;;  %v3137_v23 = vsel %vm3097_vm8, %v3072_v22, %v11722_v19  ;;  %4082 = vst.msk [vmem:[#allocation2 + $0x84] sm:$0xf] %vm4047_vm11, %v12417_v1  ;;  %4083 = vst.msk [vmem:[#allocation2 + $0x88] sm:$0xf] %vm4047_vm11, %v12417_v1 }
 0x24e   :  { %v3134_v21 = vsel %vm3097_vm8, %v3069_v17, %v11716_v42  ;;  %v3135_v6 = vsel %vm3097_vm8, %v3070_v46, %v11717_v48  ;;  %v16804_v14 = vpop.permute.xlu1 %11729  ;;  %v16807_v35 = vsel %vm3162_vm9, %v3136_v4, 1.0  ;;  %v16810_v29 = vsel %vm3162_vm9, %v3137_v23, 1.0  ;;  %4085 = vst.msk [vmem:[#allocation2 + $0x90] sm:$0xf] %vm4047_vm11, %v12417_v1  ;;  %4086 = vst.msk [vmem:[#allocation2 + $0x94] sm:$0xf] %vm4047_vm11, %v12417_v1 }
 0x24f   :  { %v16812_v9 = vpop.permute.xlu0 %11724  ;;  %v3199_v2 = vsel %vm3162_vm9, %v3134_v21, 1.0  ;;  %v3200_v26 = vsel %vm3162_vm9, %v3135_v6, 1.0  ;;  %v3246_v54 = vpack.c.bf16 %v16810_v29, %v16807_v35  ;;  %v11732_v50 = vunpack.i.h.bf16 %v16804_v14  ;;  %4088 = vst.msk [vmem:[#allocation2 + $0x9c] sm:$0xf] %vm4047_vm11, %v12417_v1  ;;  %4089 = vst.msk [vmem:[#allocation2 + $0xa0] sm:$0xf] %vm4047_vm11, %v12417_v1 }
 0x250   :  { %v3245_v8 = vpack.c.bf16 %v3200_v26, %v3199_v2  ;;  %v11731_v52 = vunpack.i.l.bf16 %v16804_v14  ;;  %4091 = vst.msk [vmem:[#allocation2 + $0xa8] sm:$0xf] %vm4047_vm11, %v12417_v1  ;;  %4092 = vst.msk [vmem:[#allocation2 + $0xac] sm:$0xf] %vm4047_vm11, %v12417_v1  ;;  %v11727_v16 = vunpack.i.h.bf16 %v16812_v9  ;;  %v11726_v60 = vunpack.i.l.bf16 %v16812_v9  ;;  %v4748_v17 = vld [vmem:[#allocation2 + $0x4] sm:$0xf] }
 0x251   :  { %4094 = vst.msk [vmem:[#allocation2 + $0xb4] sm:$0xf] %vm4047_vm11, %v12417_v1  ;;  %4095 = vst.msk [vmem:[#allocation2 + $0xb8] sm:$0xf] %vm4047_vm11, %v12417_v1  ;;  %v3011_v32 = vsel %vm2967_vm6, %v19792_v27, %v11732_v50  ;;  %v4811_v46 = vld [vmem:[#allocation2] sm:$0xe] }
 0x252   :  { %10558 = vmatprep.mubr.msk.bf16.mxu0 %vm3266_vm10, %v3245_v8  ;;  %v16821_v38 = vpop.permute.xlu1 %11739  ;;  %4097 = vst.msk [vmem:[#allocation2 + $0xc0] sm:$0xf] %vm4047_vm11, %v12417_v1  ;;  %4098 = vst.msk [vmem:[#allocation2 + $0xc4] sm:$0xf] %vm4047_vm11, %v12417_v1  ;;  %v3010_v3 = vsel %vm2967_vm6, %v19791_v13, %v11731_v52  ;;  %v3008_v47 = vsel %vm2967_vm6, %v19793_v40, %v11726_v60  ;;  %v3009_v53 = vsel %vm2967_vm6, %v19794_v25, %v11727_v16  ;;  %v19795_v4 = vld [vmem:[#allocation57_spill] sm:$0xff]  ;;  %v19796_v35 = vld [vmem:[#allocation56_spill] sm:$0xff] }
 0x253   :  { %4100 = vst.msk [vmem:[#allocation2 + $0xcc] sm:$0xf] %vm4047_vm11, %v12417_v1  ;;  %4101 = vst.msk [vmem:[#allocation2 + $0xd0] sm:$0xf] %vm4047_vm11, %v12417_v1  ;;  %v11735_v39 = vpop.permute.xlu0 %11734  ;;  %10559 = vmatmul.mubr.msk.bf16.gmra.mxu0 %vm3266_vm10, %v3246_v54  ;;  %v11742_v36 = vunpack.i.h.bf16 %v16821_v38  ;;  %v11741_v55 = vunpack.i.l.bf16 %v16821_v38  ;;  %v9937_v6 = vcombine.low %v4811_v46, %v4748_v17  ;;  %v19797_v9 = vld [vmem:[#allocation32_spill] sm:$0xff]  ;;  %v19798_v26 = vld [vmem:[#allocation59_spill] sm:$0xff] }
 0x254   :  { %4103 = vst.msk [vmem:[#allocation2 + $0xd8] sm:$0xf] %vm4047_vm11, %v12417_v1  ;;  %4104 = vst.msk [vmem:[#allocation2 + $0xdc] sm:$0xf] %vm4047_vm11, %v12417_v1  ;;  %v11737_v15 = vunpack.i.h.bf16 %v11735_v39  ;;  %v11736_v7 = vunpack.i.l.bf16 %v11735_v39 }
 0x255   :  { %4106 = vst.msk [vmem:[#allocation2 + $0xe4] sm:$0xf] %vm4047_vm11, %v12417_v1  ;;  %4107 = vst.msk [vmem:[#allocation2 + $0xe8] sm:$0xf] %vm4047_vm11, %v12417_v1  ;;  %v3075_v20 = vsel %vm3032_vm7, %v3010_v3, %v11741_v55  ;;  %v3076_v51 = vsel %vm3032_vm7, %v3011_v32, %v11742_v36  ;;  %v5677_v60 = vrot.slane %v9937_v6, 1 }
 0x256   :  { %4109 = vst.msk [vmem:[#allocation2 + $0xf0] sm:$0xf] %vm4047_vm11, %v12417_v1  ;;  %4110 = vst.msk [vmem:[#allocation2 + $0xf4] sm:$0xf] %vm4047_vm11, %v12417_v1  ;;  %v11750_v56 = vpop.permute.xlu1 %11749  ;;  %v3073_v30 = vsel %vm3032_vm7, %v3008_v47, %v11736_v7  ;;  %v3074_v62 = vsel %vm3032_vm7, %v3009_v53, %v11737_v15 }
 0x257   :  { %4112 = vst.msk [vmem:[#allocation2 + $0xfc] sm:$0xf] %vm4047_vm11, %v12417_v1  ;;  %4113 = vst.msk [vmem:[#allocation2 + $0x100] sm:$0xf] %vm4047_vm11, %v12417_v1  ;;  %v11752_v11 = vunpack.i.h.bf16 %v11750_v56  ;;  %v11751_v0 = vunpack.i.l.bf16 %v11750_v56  ;;  %v11745_v37 = vpop.permute.xlu0 %11744 }
 0x258   :  { %4115 = vst.msk [vmem:[#allocation2 + $0x108] sm:$0xf] %vm4047_vm11, %v12417_v1  ;;  %4116 = vst.msk [vmem:[#allocation2 + $0x10c] sm:$0xf] %vm4047_vm11, %v12417_v1  ;;  %v11747_v31 = vunpack.i.h.bf16 %v11745_v37  ;;  %v11746_v61 = vunpack.i.l.bf16 %v11745_v37 }
 0x259   :  { %4118 = vst.msk [vmem:[#allocation2 + $0x114] sm:$0xf] %vm4047_vm11, %v12417_v1  ;;  %4119 = vst.msk [vmem:[#allocation2 + $0x118] sm:$0xf] %vm4047_vm11, %v12417_v1  ;;  %v3140_v49 = vsel %vm3097_vm8, %v3075_v20, %v11751_v0  ;;  %v3141_v57 = vsel %vm3097_vm8, %v3076_v51, %v11752_v11 }
 0x25a   :  { %4121 = vst.msk [vmem:[#allocation2 + $0x120] sm:$0xf] %vm4047_vm11, %v12417_v1  ;;  %4122 = vst.msk [vmem:[#allocation2 + $0x124] sm:$0xf] %vm4047_vm11, %v12417_v1  ;;  %v3138_v28 = vsel %vm3097_vm8, %v3073_v30, %v11746_v61  ;;  %v3139_v45 = vsel %vm3097_vm8, %v3074_v62, %v11747_v31  ;;  %v11760_v10 = vpop.permute.xlu1 %11759  ;;  %v3205_v33 = vsel %vm3162_vm9, %v3140_v49, 1.0  ;;  %v3206_v41 = vsel %vm3162_vm9, %v3141_v57, 1.0 }
 0x25b   :  { %4124 = vst.msk [vmem:[#allocation2 + $0x12c] sm:$0xf] %vm4047_vm11, %v12417_v1  ;;  %4125 = vst.msk [vmem:[#allocation2 + $0x130] sm:$0xf] %vm4047_vm11, %v12417_v1  ;;  %v11755_v24 = vpop.permute.xlu0 %11754  ;;  %v3203_v63 = vsel %vm3162_vm9, %v3138_v28, 1.0  ;;  %v3204_v43 = vsel %vm3162_vm9, %v3139_v45, 1.0  ;;  %v3248_v44 = vpack.c.bf16 %v3206_v41, %v3205_v33  ;;  %v11761_v59 = vunpack.i.l.bf16 %v11760_v10 }
 0x25c   :  { %4127 = vst.msk [vmem:[#allocation2 + $0x138] sm:$0xf] %vm4047_vm11, %v12417_v1  ;;  %4128 = vst.msk [vmem:[#allocation2 + $0x13c] sm:$0xf] %vm4047_vm11, %v12417_v1  ;;  %v3247_v18 = vpack.c.bf16 %v3204_v43, %v3203_v63  ;;  %v11762_v58 = vunpack.i.h.bf16 %v11760_v10  ;;  %v11757_v19 = vunpack.i.h.bf16 %v11755_v24  ;;  %v11756_v34 = vunpack.i.l.bf16 %v11755_v24  ;;  %v19799_v41 = vld [vmem:[#allocation43_spill] sm:$0xff]  ;;  %v19800_v63 = vld [vmem:[#allocation8_spill] sm:$0xff] }
 0x25d   :  { %4130 = vst.msk [vmem:[#allocation2 + $0x144] sm:$0xf] %vm4047_vm11, %v12417_v1  ;;  %4131 = vst.msk [vmem:[#allocation2 + $0x148] sm:$0xf] %vm4047_vm11, %v12417_v1  ;;  %v3014_v23 = vsel %vm2967_vm6, %v19795_v4, %v11761_v59  ;;  %v19802_v59 = vld [vmem:[#allocation10_spill] sm:$0xff] }
 0x25e   :  { %4133 = vst.msk [vmem:[#allocation2 + $0x150] sm:$0xf] %vm4047_vm11, %v12417_v1  ;;  %4134 = vst.msk [vmem:[#allocation2 + $0x154] sm:$0xf] %vm4047_vm11, %v12417_v1  ;;  %10562 = vmatprep.mubr.msk.bf16.mxu0 %vm3266_vm10, %v3247_v18  ;;  %v11770_v5 = vpop.permute.xlu1 %11769  ;;  %v3015_v29 = vsel %vm2967_vm6, %v19796_v35, %v11762_v58  ;;  %v3012_v2 = vsel %vm2967_vm6, %v19797_v9, %v11756_v34  ;;  %v3013_v8 = vsel %vm2967_vm6, %v19798_v26, %v11757_v19  ;;  %v19801_v18 = vld [vmem:[#allocation9_spill] sm:$0xff] }
 0x25f   :  { %4136 = vst.msk [vmem:[#allocation2 + $0x15c] sm:$0xf] %vm4047_vm11, %v12417_v1  ;;  %4137 = vst.msk [vmem:[#allocation2 + $0x160] sm:$0xf] %vm4047_vm11, %v12417_v1  ;;  %v11771_v12 = vunpack.i.l.bf16 %v11770_v5  ;;  %v11765_v22 = vpop.permute.xlu0 %11764  ;;  %10563 = vmatmul.mubr.msk.bf16.gmra.mxu0 %vm3266_vm10, %v3248_v44  ;;  %v11772_v48 = vunpack.i.h.bf16 %v11770_v5  ;;  %v4750_v5 = vld [vmem:[#allocation2 + $0x10] sm:$0xf] }
 0x260   :  { %4139 = vst.msk [vmem:[#allocation2 + $0x168] sm:$0xf] %vm4047_vm11, %v12417_v1  ;;  %4140 = vst.msk [vmem:[#allocation2 + $0x16c] sm:$0xf] %vm4047_vm11, %v12417_v1  ;;  %v11766_v42 = vunpack.i.l.bf16 %v11765_v22  ;;  %v11767_v21 = vunpack.i.h.bf16 %v11765_v22 }
 0x261   :  { %4142 = vst.msk [vmem:[#allocation2 + $0x174] sm:$0xf] %vm4047_vm11, %v12417_v1  ;;  %4143 = vst.msk [vmem:[#allocation2 + $0x178] sm:$0xf] %vm4047_vm11, %v12417_v1  ;;  %v3079_v54 = vsel %vm3032_vm7, %v3014_v23, %v11771_v12  ;;  %v3080_v36 = vsel %vm3032_vm7, %v3015_v29, %v11772_v48  ;;  %v4813_v12 = vld [vmem:[#allocation2 + $0xc] sm:$0xe] }
 0x262   :  { %4145 = vst.msk [vmem:[#allocation2 + $0x180] sm:$0xf] %vm4047_vm11, %v12417_v1  ;;  %4146 = vst.msk [vmem:[#allocation2 + $0x184] sm:$0xf] %vm4047_vm11, %v12417_v1  ;;  %v11780_v50 = vpop.permute.xlu1 %11779  ;;  %v3077_v55 = vsel %vm3032_vm7, %v3012_v2, %v11766_v42  ;;  %v3078_v13 = vsel %vm3032_vm7, %v3013_v8, %v11767_v21  ;;  %v9939_v46 = vcombine.low %v4813_v12, %v4750_v5 }
 0x263   :  { %4148 = vst.msk [vmem:[#allocation2 + $0x18c] sm:$0xf] %vm4047_vm11, %v12417_v1  ;;  %4149 = vst.msk [vmem:[#allocation2 + $0x190] sm:$0xf] %vm4047_vm11, %v12417_v1  ;;  %v11782_v52 = vunpack.i.h.bf16 %v11780_v50  ;;  %v11781_v38 = vunpack.i.l.bf16 %v11780_v50  ;;  %v11775_v16 = vpop.permute.xlu0 %11774 }
 0x264   :  { %4151 = vst.msk [vmem:[#allocation2 + $0x198] sm:$0xf] %vm4047_vm11, %v12417_v1  ;;  %4152 = vst.msk [vmem:[#allocation2 + $0x19c] sm:$0xf] %vm4047_vm11, %v12417_v1  ;;  %v11777_v15 = vunpack.i.h.bf16 %v11775_v16  ;;  %v11776_v7 = vunpack.i.l.bf16 %v11775_v16  ;;  %v5680_v9 = vrot.slane %v9939_v46, 1 }
 0x265   :  { %4154 = vst.msk [vmem:[#allocation2 + $0x1a4] sm:$0xf] %vm4047_vm11, %v12417_v1  ;;  %4155 = vst.msk [vmem:[#allocation2 + $0x1a8] sm:$0xf] %vm4047_vm11, %v12417_v1  ;;  %v3144_v3 = vsel %vm3097_vm8, %v3079_v54, %v11781_v38  ;;  %v3145_v27 = vsel %vm3097_vm8, %v3080_v36, %v11782_v52 }
 0x266   :  { %4157 = vst.msk [vmem:[#allocation2 + $0x1b0] sm:$0xf] %vm4047_vm11, %v12417_v1  ;;  %4158 = vst.msk [vmem:[#allocation2 + $0x1b4] sm:$0xf] %vm4047_vm11, %v12417_v1  ;;  %v3142_v56 = vsel %vm3097_vm8, %v3077_v55, %v11776_v7  ;;  %v3143_v40 = vsel %vm3097_vm8, %v3078_v13, %v11777_v15  ;;  %v11790_v47 = vpop.permute.xlu1 %11789  ;;  %v3209_v25 = vsel %vm3162_vm9, %v3144_v3, 1.0  ;;  %v3210_v53 = vsel %vm3162_vm9, %v3145_v27, 1.0 }
 0x267   :  { %4160 = vst.msk [vmem:[#allocation2 + $0x1bc] sm:$0xf] %vm4047_vm11, %v12417_v1  ;;  %4161 = vst.msk [vmem:[#allocation2 + $0x1c0] sm:$0xf] %vm4047_vm11, %v12417_v1  ;;  %v11785_v11 = vpop.permute.xlu0 %11784  ;;  %v3207_v0 = vsel %vm3162_vm9, %v3142_v56, 1.0  ;;  %v3208_v37 = vsel %vm3162_vm9, %v3143_v40, 1.0  ;;  %v3250_v51 = vpack.c.bf16 %v3210_v53, %v3209_v25  ;;  %v11791_v31 = vunpack.i.l.bf16 %v11790_v47 }
 0x268   :  { %4163 = vst.msk [vmem:[#allocation2 + $0x1c8] sm:$0xf] %vm4047_vm11, %v12417_v1  ;;  %4164 = vst.msk [vmem:[#allocation2 + $0x1cc] sm:$0xf] %vm4047_vm11, %v12417_v1  ;;  %v3249_v20 = vpack.c.bf16 %v3208_v37, %v3207_v0  ;;  %v11792_v61 = vunpack.i.h.bf16 %v11790_v47  ;;  %v11787_v30 = vunpack.i.h.bf16 %v11785_v11  ;;  %v11786_v62 = vunpack.i.l.bf16 %v11785_v11  ;;  %v19803_v53 = vld [vmem:[#allocation11_spill] sm:$0xff]  ;;  %v19804_v0 = vld [vmem:[#allocation44_spill] sm:$0xff] }
 0x269   :  { %4166 = vst.msk [vmem:[#allocation2 + $0x1d4] sm:$0xf] %vm4047_vm11, %v12417_v1  ;;  %4167 = vst.msk [vmem:[#allocation2 + $0x1d8] sm:$0xf] %vm4047_vm11, %v12417_v1  ;;  %v3018_v24 = vsel %vm2967_vm6, %v19799_v41, %v11791_v31 }
 0x26a   :  { %4057 = vst.msk [vmem:[#allocation2 + $0x20] sm:$0x3] %vm4050_vm12, %v12417_v1  ;;  %4051 = vst.msk [vmem:[#allocation2 + $0x8] sm:$0x3] %vm4050_vm12, %v12417_v1  ;;  %10566 = vmatprep.mubr.msk.bf16.mxu0 %vm3266_vm10, %v3249_v20  ;;  %v11800_v49 = vpop.permute.xlu1 %11799  ;;  %v3019_v43 = vsel %vm2967_vm6, %v19800_v63, %v11792_v61  ;;  %v3016_v44 = vsel %vm2967_vm6, %v19801_v18, %v11786_v62  ;;  %v3017_v58 = vsel %vm2967_vm6, %v19802_v59, %v11787_v30  ;;  %v19806_v61 = vld [vmem:[#allocation37_spill] sm:$0xff] }
 0x26b   :  { %4054 = vst.msk [vmem:[#allocation2 + $0x14] sm:$0x3] %vm4050_vm12, %v12417_v1  ;;  %4060 = vst.msk [vmem:[#allocation2 + $0x2c] sm:$0x3] %vm4050_vm12, %v12417_v1  ;;  %v11802_v57 = vunpack.i.h.bf16 %v11800_v49  ;;  %v11801_v28 = vunpack.i.l.bf16 %v11800_v49  ;;  %v11795_v45 = vpop.permute.xlu0 %11794  ;;  %10567 = vmatmul.mubr.msk.bf16.gmra.mxu0 %vm3266_vm10, %v3250_v51  ;;  %v19805_v51 = vld [vmem:[#allocation36_spill] sm:$0xff] }
 0x26c   :  { %4063 = vst.msk [vmem:[#allocation2 + $0x38] sm:$0x3] %vm4050_vm12, %v12417_v1  ;;  %4066 = vst.msk [vmem:[#allocation2 + $0x44] sm:$0x3] %vm4050_vm12, %v12417_v1  ;;  %v11797_v10 = vunpack.i.h.bf16 %v11795_v45  ;;  %v11796_v33 = vunpack.i.l.bf16 %v11795_v45 }
 0x26d   :  { %4069 = vst.msk [vmem:[#allocation2 + $0x50] sm:$0x3] %vm4050_vm12, %v12417_v1  ;;  %4072 = vst.msk [vmem:[#allocation2 + $0x5c] sm:$0x3] %vm4050_vm12, %v12417_v1  ;;  %v3083_v19 = vsel %vm3032_vm7, %v3018_v24, %v11801_v28  ;;  %v3084_v22 = vsel %vm3032_vm7, %v3019_v43, %v11802_v57 }
 0x26e   :  { %4075 = vst.msk [vmem:[#allocation2 + $0x68] sm:$0x3] %vm4050_vm12, %v12417_v1  ;;  %4078 = vst.msk [vmem:[#allocation2 + $0x74] sm:$0x3] %vm4050_vm12, %v12417_v1  ;;  %v11810_v34 = vpop.permute.xlu1 %11809  ;;  %v3081_v23 = vsel %vm3032_vm7, %v3016_v44, %v11796_v33  ;;  %v3082_v21 = vsel %vm3032_vm7, %v3017_v58, %v11797_v10 }
 0x26f   :  { %4081 = vst.msk [vmem:[#allocation2 + $0x80] sm:$0x3] %vm4050_vm12, %v12417_v1  ;;  %4084 = vst.msk [vmem:[#allocation2 + $0x8c] sm:$0x3] %vm4050_vm12, %v12417_v1  ;;  %v11812_v48 = vunpack.i.h.bf16 %v11810_v34  ;;  %v11811_v42 = vunpack.i.l.bf16 %v11810_v34  ;;  %v11805_v17 = vpop.permute.xlu0 %11804 }
 0x270   :  { %4087 = vst.msk [vmem:[#allocation2 + $0x98] sm:$0x3] %vm4050_vm12, %v12417_v1  ;;  %4090 = vst.msk [vmem:[#allocation2 + $0xa4] sm:$0x3] %vm4050_vm12, %v12417_v1  ;;  %v11807_v6 = vunpack.i.h.bf16 %v11805_v17 }
 0x271   :  { %4093 = vst.msk [vmem:[#allocation2 + $0xb0] sm:$0x3] %vm4050_vm12, %v12417_v1  ;;  %4096 = vst.msk [vmem:[#allocation2 + $0xbc] sm:$0x3] %vm4050_vm12, %v12417_v1  ;;  %v3148_v35 = vsel %vm3097_vm8, %v3083_v19, %v11811_v42  ;;  %v3149_v29 = vsel %vm3097_vm8, %v3084_v22, %v11812_v48 }
 0x272   :  { %4099 = vst.msk [vmem:[#allocation2 + $0xc8] sm:$0x3] %vm4050_vm12, %v12417_v1  ;;  %4102 = vst.msk [vmem:[#allocation2 + $0xd4] sm:$0x3] %vm4050_vm12, %v12417_v1  ;;  %v3147_v8 = vsel %vm3097_vm8, %v3082_v21, %v11807_v6  ;;  %v11820_v54 = vpop.permute.xlu1 %11819  ;;  %v3213_v50 = vsel %vm3162_vm9, %v3148_v35, 1.0  ;;  %v3214_v52 = vsel %vm3162_vm9, %v3149_v29, 1.0 }
 0x273   :  { %4105 = vst.msk [vmem:[#allocation2 + $0xe0] sm:$0x3] %vm4050_vm12, %v12417_v1  ;;  %4108 = vst.msk [vmem:[#allocation2 + $0xec] sm:$0x3] %vm4050_vm12, %v12417_v1  ;;  %v11815_v38 = vpop.permute.xlu0 %11814  ;;  %v3252_v36 = vpack.c.bf16 %v3214_v52, %v3213_v50  ;;  %v11822_v15 = vunpack.i.h.bf16 %v11820_v54  ;;  %v11821_v7 = vunpack.i.l.bf16 %v11820_v54  ;;  %v19809_v50 = vld [vmem:[#allocation63_spill] sm:$0xff] }
 0x274   :  { %4111 = vst.msk [vmem:[#allocation2 + $0xf8] sm:$0x3] %vm4050_vm12, %v12417_v1  ;;  %4114 = vst.msk [vmem:[#allocation2 + $0x104] sm:$0x3] %vm4050_vm12, %v12417_v1  ;;  %v11817_v3 = vunpack.i.h.bf16 %v11815_v38  ;;  %v11816_v27 = vunpack.i.l.bf16 %v11815_v38  ;;  %v19810_v38 = vld [vmem:[#allocation64_spill] sm:$0xff] }
 0x275   :  { %4117 = vst.msk [vmem:[#allocation2 + $0x110] sm:$0x3] %vm4050_vm12, %v12417_v1  ;;  %4120 = vst.msk [vmem:[#allocation2 + $0x11c] sm:$0x3] %vm4050_vm12, %v12417_v1  ;;  %v3022_v11 = vsel %vm2967_vm6, %v19803_v53, %v11821_v7  ;;  %v3023_v37 = vsel %vm2967_vm6, %v19804_v0, %v11822_v15 }
 0x276   :  { %4123 = vst.msk [vmem:[#allocation2 + $0x128] sm:$0x3] %vm4050_vm12, %v12417_v1  ;;  %4126 = vst.msk [vmem:[#allocation2 + $0x134] sm:$0x3] %vm4050_vm12, %v12417_v1  ;;  %v11830_v13 = vpop.permute.xlu1 %11829  ;;  %v3020_v31 = vsel %vm2967_vm6, %v19805_v51, %v11816_v27  ;;  %v3021_v30 = vsel %vm2967_vm6, %v19806_v61, %v11817_v3 }
 0x277   :  { %4129 = vst.msk [vmem:[#allocation2 + $0x140] sm:$0x3] %vm4050_vm12, %v12417_v1  ;;  %4132 = vst.msk [vmem:[#allocation2 + $0x14c] sm:$0x3] %vm4050_vm12, %v12417_v1  ;;  %v11832_v56 = vunpack.i.h.bf16 %v11830_v13  ;;  %v11831_v40 = vunpack.i.l.bf16 %v11830_v13 }
 0x278   :  { %4135 = vst.msk [vmem:[#allocation2 + $0x158] sm:$0x3] %vm4050_vm12, %v12417_v1  ;;  %4138 = vst.msk [vmem:[#allocation2 + $0x164] sm:$0x3] %vm4050_vm12, %v12417_v1 }
 0x279   :  { %4141 = vst.msk [vmem:[#allocation2 + $0x170] sm:$0x3] %vm4050_vm12, %v12417_v1  ;;  %4144 = vst.msk [vmem:[#allocation2 + $0x17c] sm:$0x3] %vm4050_vm12, %v12417_v1  ;;  %v3087_v28 = vsel %vm3032_vm7, %v3022_v11, %v11831_v40  ;;  %v3088_v45 = vsel %vm3032_vm7, %v3023_v37, %v11832_v56 }
 0x27a   :  { %4147 = vst.msk [vmem:[#allocation2 + $0x188] sm:$0x3] %vm4050_vm12, %v12417_v1  ;;  %4150 = vst.msk [vmem:[#allocation2 + $0x194] sm:$0x3] %vm4050_vm12, %v12417_v1  ;;  %v11840_v20 = vpop.permute.xlu1 %11839 }
 0x27b   :  { %4153 = vst.msk [vmem:[#allocation2 + $0x1a0] sm:$0x3] %vm4050_vm12, %v12417_v1  ;;  %4156 = vst.msk [vmem:[#allocation2 + $0x1ac] sm:$0x3] %vm4050_vm12, %v12417_v1  ;;  %v11842_v62 = vunpack.i.h.bf16 %v11840_v20  ;;  %v11841_v49 = vunpack.i.l.bf16 %v11840_v20 }
 0x27c   :  { %4159 = vst.msk [vmem:[#allocation2 + $0x1b8] sm:$0x3] %vm4050_vm12, %v12417_v1  ;;  %4162 = vst.msk [vmem:[#allocation2 + $0x1c4] sm:$0x3] %vm4050_vm12, %v12417_v1 }
 0x27d   :  { %4165 = vst.msk [vmem:[#allocation2 + $0x1d0] sm:$0x3] %vm4050_vm12, %v12417_v1  ;;  %4168 = vst.msk [vmem:[#allocation2 + $0x1dc] sm:$0x3] %vm4050_vm12, %v12417_v1  ;;  %v3152_v63 = vsel %vm3097_vm8, %v3087_v28, %v11841_v49  ;;  %v3153_v43 = vsel %vm3097_vm8, %v3088_v45, %v11842_v62  ;;  %vm8274_vm12 = vcmask 654336  }
 0x27e   :  { %v11905_v14 = vld [vmem:[#allocation2 + $0x8] ss:$0 sps:$4 sm:$0x11]   ;;  %v11909_v4 = vld [vmem:[#allocation2 + $0x14] ss:$0 sps:$4 sm:$0x11]  }
 0x27f   :  { %v5678_v39 = vrot.slane %v11905_v14, 1  ;;  %v11806_v14 = vunpack.i.l.bf16 %v11805_v17  ;;  %v5681_v2 = vrot.slane %v11909_v4, 1  ;;  %v11850_v59 = vpop.permute.xlu1 %11849  ;;  %v3217_v58 = vsel %vm3162_vm9, %v3152_v63, 1.0 }
 0x280   :  { %v3218_v19 = vsel %vm3162_vm9, %v3153_v43, 1.0  ;;  %v11852_v42 = vunpack.i.h.bf16 %v11850_v59  ;;  %v11851_v17 = vunpack.i.l.bf16 %v11850_v59  ;;  %v19812_v43 = vld [vmem:[#allocation12_spill] sm:$0xff]  ;;  %v19813_v59 = vld [vmem:[#allocation13_spill] sm:$0xff] }
 0x281   :  { %v5679_v32 = vsel %vm3776_vm13, %v5677_v60, %v5678_v39  ;;  %v3146_v26 = vsel %vm3097_vm8, %v3081_v23, %v11806_v14  ;;  %v3212_v60 = vsel %vm3162_vm9, %v3147_v8, 1.0  ;;  %v5682_v55 = vsel %vm3776_vm13, %v5680_v9, %v5681_v2  ;;  %v19807_v9 = vld [vmem:[#allocation61_spill] sm:$0xff] }
 0x282   :  { %5773 = vrot.lane.b32.xlu0 %v5679_v32, %s12418_s0  ;;  %v3211_v16 = vsel %vm3162_vm9, %v3146_v26, 1.0  ;;  %5775 = vrot.lane.b32.xlu1 %v5682_v55, %s12418_s0  ;;  %v11825_v32 = vpop.permute.xlu0 %11824  ;;  %v3254_v48 = vpack.c.bf16 %v3218_v19, %v3217_v58  ;;  %v3026_v2 = vsel %vm2967_vm6, %v19807_v9, %v11851_v17  ;;  %v19808_v26 = vld [vmem:[#allocation62_spill] sm:$0xff] }
 0x283   :  { %v3251_v39 = vpack.c.bf16 %v3212_v60, %v3211_v16  ;;  %v11827_v47 = vunpack.i.h.bf16 %v11825_v32  ;;  %v11826_v25 = vunpack.i.l.bf16 %v11825_v32  ;;  %v3027_v8 = vsel %vm2967_vm6, %v19808_v26, %v11852_v42  ;;  %v19814_v19 = vld [vmem:[#allocation14_spill] sm:$0xff] }
 0x284   :  { %v11860_v46 = vpop.permute.xlu1 %11859 }
 0x285   :  { %10570 = vmatprep.mubr.msk.bf16.mxu0 %vm3266_vm10, %v3251_v39  ;;  %v3085_v41 = vsel %vm3032_vm7, %v3020_v31, %v11826_v25  ;;  %v3086_v24 = vsel %vm3032_vm7, %v3021_v30, %v11827_v47  ;;  %v11862_v6 = vunpack.i.h.bf16 %v11860_v46  ;;  %v11861_v14 = vunpack.i.l.bf16 %v11860_v46 }
 0x286   :  { %10571 = vmatmul.mubr.msk.bf16.gmra.mxu0 %vm3266_vm10, %v3252_v36  ;;  %v11835_v57 = vpop.permute.xlu0 %11834 }
 0x287   :  { %v11837_v10 = vunpack.i.h.bf16 %v11835_v57  ;;  %v11836_v33 = vunpack.i.l.bf16 %v11835_v57  ;;  %v3091_v55 = vsel %vm3032_vm7, %v3026_v2, %v11861_v14  ;;  %v3092_v15 = vsel %vm3032_vm7, %v3027_v8, %v11862_v6 }
 0x288   :  { %v11870_v54 = vpop.permute.xlu1 %11869 }
 0x289   :  { %v3150_v18 = vsel %vm3097_vm8, %v3085_v41, %v11836_v33  ;;  %v3151_v44 = vsel %vm3097_vm8, %v3086_v24, %v11837_v10  ;;  %v11872_v60 = vunpack.i.h.bf16 %v11870_v54  ;;  %v11871_v39 = vunpack.i.l.bf16 %v11870_v54  ;;  %v19811_v24 = vld [vmem:[#allocation65_spill] sm:$0xff] }
 0x28a   :  { %v11845_v34 = vpop.permute.xlu0 %11844  ;;  %v3215_v5 = vsel %vm3162_vm9, %v3150_v18, 1.0  ;;  %v3216_v12 = vsel %vm3162_vm9, %v3151_v44, 1.0 }
 0x28b   :  { %v3253_v22 = vpack.c.bf16 %v3216_v12, %v3215_v5  ;;  %v11847_v4 = vunpack.i.h.bf16 %v11845_v34  ;;  %v11846_v23 = vunpack.i.l.bf16 %v11845_v34  ;;  %v3156_v32 = vsel %vm3097_vm8, %v3091_v55, %v11871_v39 }
 0x28c   :  { %v3157_v56 = vsel %vm3097_vm8, %v3092_v15, %v11872_v60  ;;  %v3221_v53 = vsel %vm3162_vm9, %v3156_v32, 1.0 }
 0x28d   :  { %10574 = vmatprep.mubr.msk.bf16.mxu0 %vm3266_vm10, %v3253_v22  ;;  %v3024_v52 = vsel %vm2967_vm6, %v19809_v50, %v11846_v23  ;;  %v3025_v16 = vsel %vm2967_vm6, %v19810_v38, %v11847_v4  ;;  %v11880_v25 = vpop.permute.xlu1 %11879  ;;  %v3222_v11 = vsel %vm3162_vm9, %v3157_v56, 1.0 }
 0x28e   :  { %v11855_v21 = vpop.permute.xlu0 %11854  ;;  %10575 = vmatmul.mubr.msk.bf16.gmra.mxu0 %vm3266_vm10, %v3254_v48  ;;  %v3256_v31 = vpack.c.bf16 %v3222_v11, %v3221_v53  ;;  %v11882_v61 = vunpack.i.h.bf16 %v11880_v25  ;;  %v11881_v30 = vunpack.i.l.bf16 %v11880_v25 }
 0x28f   :  { %v11857_v35 = vunpack.i.h.bf16 %v11855_v21  ;;  %v11856_v29 = vunpack.i.l.bf16 %v11855_v21 }
 0x290   :  { %v3030_v63 = vsel %vm2967_vm6, %v19811_v24, %v11881_v30  ;;  %v3031_v18 = vsel %vm2967_vm6, %v19812_v43, %v11882_v61 }
 0x291   :  { %v3089_v3 = vsel %vm3032_vm7, %v3024_v52, %v11856_v29  ;;  %v3090_v27 = vsel %vm3032_vm7, %v3025_v16, %v11857_v35  ;;  %v11890_v62 = vpop.permute.xlu1 %11889 }
 0x292   :  { %v11865_v36 = vpop.permute.xlu0 %11864  ;;  %v11892_v45 = vunpack.i.h.bf16 %v11890_v62  ;;  %v11891_v10 = vunpack.i.l.bf16 %v11890_v62 }
 0x293   :  { %v11867_v7 = vunpack.i.h.bf16 %v11865_v36  ;;  %v11866_v13 = vunpack.i.l.bf16 %v11865_v36 }
 0x294   :  { %v3095_v48 = vsel %vm3032_vm7, %v3030_v63, %v11891_v10  ;;  %v3096_v42 = vsel %vm3032_vm7, %v3031_v18, %v11892_v45  ;;  %v4599_v45 = vld [vmem:[#allocation2 + $0x20] sm:$0x1] }
 0x295   :  { %v3154_v40 = vsel %vm3097_vm8, %v3089_v3, %v11866_v13  ;;  %v3155_v47 = vsel %vm3097_vm8, %v3090_v27, %v11867_v7 }
 0x296   :  { %v11875_v0 = vpop.permute.xlu0 %11874  ;;  %v3219_v37 = vsel %vm3162_vm9, %v3154_v40, 1.0  ;;  %v3220_v20 = vsel %vm3162_vm9, %v3155_v47, 1.0  ;;  %v11900_v44 = vpop.permute.xlu1 %11899 }
 0x297   :  { %v3255_v51 = vpack.c.bf16 %v3220_v20, %v3219_v37  ;;  %v11877_v49 = vunpack.i.h.bf16 %v11875_v0  ;;  %v11876_v57 = vunpack.i.l.bf16 %v11875_v0  ;;  %v11902_v5 = vunpack.i.h.bf16 %v11900_v44 }
 0x298   :  { %v11901_v12 = vunpack.i.l.bf16 %v11900_v44 }
 0x299   :  { %10578 = vmatprep.mubr.msk.bf16.mxu0 %vm3266_vm10, %v3255_v51  ;;  %v3028_v58 = vsel %vm2967_vm6, %v19813_v59, %v11876_v57  ;;  %v3029_v34 = vsel %vm2967_vm6, %v19814_v19, %v11877_v49  ;;  %v3161_v6 = vsel %vm3097_vm8, %v3096_v42, %v11902_v5  ;;  %vm7982_vm6 = vcmask 130048  }
 0x29a   :  { %v11885_v28 = vpop.permute.xlu0 %11884  ;;  %10579 = vmatmul.mubr.msk.bf16.gmra.mxu0 %vm3266_vm10, %v3256_v31  ;;  %v3160_v21 = vsel %vm3097_vm8, %v3095_v48, %v11901_v12  ;;  %v3226_v9 = vsel %vm3162_vm9, %v3161_v6, 1.0 }
 0x29b   :  { %v11887_v33 = vunpack.i.h.bf16 %v11885_v28  ;;  %v11886_v41 = vunpack.i.l.bf16 %v11885_v28  ;;  %v3225_v29 = vsel %vm3162_vm9, %v3160_v21, 1.0 }
 0x29c   :  { %v3258_v8 = vpack.c.bf16 %v3226_v9, %v3225_v29  ;;  %v17236_v29 = vld [vmem:[#allocation2 + $0xd0] sm:$0xf] }
 0x29d   :  { %v3093_v4 = vsel %vm3032_vm7, %v3028_v58, %v11886_v41  ;;  %v3094_v23 = vsel %vm3032_vm7, %v3029_v34, %v11887_v33  ;;  %vm6029_vm7 = vcmask 1045504  }
 0x29e   :  { %v11895_v22 = vpop.permute.xlu0 %11894 }
 0x29f   :  { %v11897_v17 = vunpack.i.h.bf16 %v11895_v22  ;;  %v11896_v46 = vunpack.i.l.bf16 %v11895_v22 }
 0x2a1   :  { %v3158_v14 = vsel %vm3097_vm8, %v3093_v4, %v11896_v46  ;;  %v3159_v35 = vsel %vm3097_vm8, %v3094_v23, %v11897_v17  ;;  %vm8642_vm8 = vcmask 138240  }
 0x2a2   :  { %v3223_v2 = vsel %vm3162_vm9, %v3158_v14, 1.0  ;;  %v3224_v26 = vsel %vm3162_vm9, %v3159_v35, 1.0  ;;  %v17234_v35 = vld [vmem:[#allocation2 + $0xcc] sm:$0xf]  ;;  %vm8079_vm9 = vcmask 261120  }
 0x2a3   :  { %v3257_v54 = vpack.c.bf16 %v3224_v26, %v3223_v2 }
 0x2a5   :  { %10582 = vmatprep.mubr.msk.bf16.mxu0 %vm3266_vm10, %v3257_v54 }
 0x2a6   :  { %10583 = vmatmul.mubr.msk.bf16.gmra.mxu0 %vm3266_vm10, %v3258_v8  ;;  %vm8144_vm10 = vcmask 392192  }
 0x2c0   :  { %v10524_v50 = vpop.f32.mrf.mxu0 }
 0x2c2   :  { %v3401_v52 = vpop.f32.mrf.mxu0 }
 0x2c3   :  { %v3656_v16 = vmax.f32 %v3401_v52, %v10524_v50 }
 0x2c4   :  { %v10525_v38 = vpop.f32.mrf.mxu0 }
 0x2c5   :  { %v3777_v55 = vrot.slane %v3656_v16, 1 }
 0x2c6   :  { %v3404_v60 = vpop.f32.mrf.mxu0 }
 0x2c7   :  { %v3657_v39 = vmax.f32 %v3404_v60, %v10525_v38 }
 0x2c9   :  { %v10528_v36 = vpop.f32.mrf.mxu0  ;;  %v3778_v15 = vrot.slane %v3657_v39, 1 }
 0x2cb   :  { %v3417_v7 = vpop.f32.mrf.mxu0  ;;  %v3779_v13 = vsel %vm3776_vm13, %v3777_v55, %v3778_v15  ;;  %v3928_v3 = vmax.f32 %v3657_v39, %v3778_v15  ;;  %v4604_v15 = vld [vmem:[#allocation2 + $0x2c] sm:$0x1] }
 0x2cc   :  { %v3927_v27 = vmax.f32 %v3656_v16, %v3779_v13  ;;  %v3658_v32 = vmax.f32 %v10524_v50, %v3417_v7  ;;  %v3660_v47 = vmax.f32 %v3417_v7, %v10528_v36  ;;  %v17239_v50 = vld [vmem:[#allocation2 + $0xcc] sm:$0xe]  ;;  %v10238_v16 = vcombine.low %v17234_v35, %v17236_v29 }
 0x2cd   :  { %v10529_v56 = vpop.f32.mrf.mxu0  ;;  %v3988_v40 = vmax.f32 %v3928_v3, 0.0  ;;  %v10283_v60 = vcombine.low %v17239_v50, %v17236_v29 }
 0x2ce   :  { %v3987_v25 = vmax.f32 %v3927_v27, 0.0  ;;  %v3780_v51 = vrot.slane %v3658_v32, 1  ;;  %v3783_v30 = vrot.slane %v3660_v47, 1  ;;  %v4609_v27 = vld [vmem:[#allocation2 + $0x38] sm:$0x1] }
 0x2cf   :  { %v3420_v53 = vpop.f32.mrf.mxu0  ;;  %v10428_v11 = vpack.c.bf16 %v3988_v40, %v3988_v40 }
 0x2d0   :  { %v3659_v0 = vmax.f32 %v10525_v38, %v3420_v53  ;;  %v3661_v37 = vmax.f32 %v3420_v53, %v10529_v56  ;;  %v10427_v20 = vpack.c.bf16 %v3987_v25, %v3987_v25 }
 0x2d1   :  { %v4354_v61 = vrot.slane %v10428_v11, 7 }
 0x2d2   :  { %v10532_v31 = vpop.f32.mrf.mxu0  ;;  %v3781_v62 = vrot.slane %v3659_v0, 1  ;;  %v3784_v49 = vrot.slane %v3661_v37, 1  ;;  %v4352_v57 = vrot.slane %v10427_v20, 7 }
 0x2d3   :  { %v4356_v41 = vrot.slane %v4354_v61, 4 }
 0x2d4   :  { %v3433_v10 = vpop.f32.mrf.mxu0  ;;  %v3782_v24 = vsel %vm3776_vm13, %v3780_v51, %v3781_v62  ;;  %v3785_v63 = vsel %vm3776_vm13, %v3783_v30, %v3784_v49  ;;  %v3930_v43 = vmax.f32 %v3659_v0, %v3781_v62  ;;  %v4353_v18 = vrot.slane %v4352_v57, 4  ;;  %4594 = vst.msk [vmem:[#allocation2 + $0x18] sm:$0xe] %vm4593_vm2, %v4352_v57 }
 0x2d5   :  { %v3929_v44 = vmax.f32 %v3658_v32, %v3782_v24  ;;  %v3931_v59 = vmax.f32 %v3660_v47, %v3785_v63  ;;  %v3932_v58 = vmax.f32 %v3661_v37, %v3784_v49  ;;  %v4600_v34 = vsel %vm17215_vm3, %v4356_v41, %v4599_v45 }
 0x2d6   :  { %v17227_v19 = vpop.f32.mrf.mxu0  ;;  %v3990_v5 = vmax.f32 %v3930_v43, 0.0  ;;  %v3662_v12 = vmax.f32 %v10528_v36, %v3433_v10  ;;  %v3664_v22 = vmax.f32 %v3433_v10, %v10532_v31  ;;  %v4355_v48 = vsel %vm17220_vm5, %v4353_v18, %v4354_v61  ;;  %4601 = vst [vmem:[#allocation2 + $0x20] sm:$0x1] %v4600_v34 }
 0x2d7   :  { %v3989_v42 = vmax.f32 %v3929_v44, 0.0  ;;  %v3991_v17 = vmax.f32 %v3931_v59, 0.0  ;;  %v3992_v46 = vmax.f32 %v3932_v58, 0.0  ;;  %4595 = vst.msk [vmem:[#allocation2 + $0x1c] sm:$0xf] %vm4047_vm11, %v4355_v48 }
 0x2d8   :  { %v3436_v4 = vpop.f32.mrf.mxu0  ;;  %v10430_v23 = vpack.c.bf16 %v3990_v5, %v3990_v5  ;;  %v3786_v21 = vrot.slane %v3662_v12, 1  ;;  %v3789_v6 = vrot.slane %v3664_v22, 1 }
 0x2d9   :  { %v3663_v14 = vmax.f32 %v10529_v56, %v3436_v4  ;;  %v10429_v9 = vpack.c.bf16 %v3989_v42, %v3989_v42  ;;  %v10431_v2 = vpack.c.bf16 %v3991_v17, %v3991_v17  ;;  %v10432_v26 = vpack.c.bf16 %v3992_v46, %v3992_v46 }
 0x2da   :  { %v3665_v8 = vmax.f32 %v3436_v4, %v17227_v19  ;;  %v4359_v52 = vrot.slane %v10430_v23, 7 }
 0x2db   :  { %v10536_v54 = vpop.f32.mrf.mxu0  ;;  %v3787_v38 = vrot.slane %v3663_v14, 1  ;;  %v4357_v39 = vrot.slane %v10429_v9, 7  ;;  %v4362_v36 = vrot.slane %v10431_v2, 7  ;;  %v4364_v55 = vrot.slane %v10432_v26, 7  ;;  %v4815_v48 = vld [vmem:[#allocation2 + $0x18] sm:$0xe] }
 0x2dc   :  { %v3790_v7 = vrot.slane %v3665_v8, 1  ;;  %v4361_v3 = vrot.slane %v4359_v52, 4  ;;  %v4614_v9 = vld [vmem:[#allocation2 + $0x44] sm:$0x1]  ;;  %v4619_v26 = vld [vmem:[#allocation2 + $0x50] sm:$0x1] }
 0x2dd   :  { %v3449_v13 = vpop.f32.mrf.mxu0  ;;  %v3788_v32 = vsel %vm3776_vm13, %v3786_v21, %v3787_v38  ;;  %v3934_v56 = vmax.f32 %v3663_v14, %v3787_v38  ;;  %v4358_v47 = vrot.slane %v4357_v39, 4  ;;  %v4363_v25 = vrot.slane %v4362_v36, 4  ;;  %4602 = vst.msk [vmem:[#allocation2 + $0x24] sm:$0xe] %vm4593_vm2, %v4357_v39  ;;  %4607 = vst.msk [vmem:[#allocation2 + $0x30] sm:$0xe] %vm4593_vm2, %v4362_v36 }
 0x2de   :  { %v17246_v40 = vmax.f32 %v10532_v31, %v3449_v13  ;;  %v4366_v53 = vrot.slane %v4364_v55, 4  ;;  %v3791_v11 = vsel %vm3776_vm13, %v3789_v6, %v3790_v7  ;;  %v4605_v37 = vsel %vm17215_vm3, %v4361_v3, %v4604_v15  ;;  %v4752_v45 = vld [vmem:[#allocation2 + $0x1c] sm:$0xf]  ;;  %v11907_v39 = vld [vmem:[#allocation2 + $0x20] ss:$0 sps:$4 sm:$0x11]  }
 0x2df   :  { %v17251_v0 = vpop.f32.mrf.mxu0  ;;  %v3933_v20 = vmax.f32 %v3662_v12, %v3788_v32  ;;  %v3935_v51 = vmax.f32 %v3664_v22, %v3791_v11  ;;  %v3936_v61 = vmax.f32 %v3665_v8, %v3790_v7  ;;  %v4360_v31 = vsel %vm17220_vm5, %v4358_v47, %v4359_v52  ;;  %4606 = vst [vmem:[#allocation2 + $0x2c] sm:$0x1] %v4605_v37 }
 0x2e0   :  { %v4365_v30 = vsel %vm17220_vm5, %v4363_v25, %v4364_v55  ;;  %v4610_v62 = vsel %vm17215_vm3, %v4366_v53, %v4609_v27  ;;  %v3994_v49 = vmax.f32 %v3934_v56, 0.0  ;;  %4603 = vst.msk [vmem:[#allocation2 + $0x28] sm:$0xf] %vm4047_vm11, %v4360_v31  ;;  %v3668_v63 = vmax.f32 %v3449_v13, %v10536_v54 }
 0x2e1   :  { %v3452_v57 = vpop.f32.mrf.mxu0  ;;  %4608 = vst.msk [vmem:[#allocation2 + $0x34] sm:$0xf] %vm4047_vm11, %v4365_v30  ;;  %4611 = vst [vmem:[#allocation2 + $0x38] sm:$0x1] %v4610_v62  ;;  %v3993_v10 = vmax.f32 %v3933_v20, 0.0  ;;  %v3995_v41 = vmax.f32 %v3935_v51, 0.0  ;;  %v9941_v23 = vcombine.low %v4815_v48, %v4752_v45 }
 0x2e2   :  { %v3996_v24 = vmax.f32 %v3936_v61, 0.0  ;;  %v10434_v43 = vpack.c.bf16 %v3994_v49, %v3994_v49  ;;  %v3792_v18 = vrot.slane %v17246_v40, 1  ;;  %v3667_v44 = vmax.f32 %v17227_v19, %v3452_v57 }
 0x2e3   :  { %v3669_v59 = vmax.f32 %v3452_v57, %v17251_v0  ;;  %v10433_v34 = vpack.c.bf16 %v3993_v10, %v3993_v10  ;;  %v10435_v5 = vpack.c.bf16 %v3995_v41, %v3995_v41  ;;  %v3795_v22 = vrot.slane %v3668_v63, 1 }
 0x2e4   :  { %v17266_v58 = vpop.f32.mrf.mxu0  ;;  %v10436_v12 = vpack.c.bf16 %v3996_v24, %v3996_v24  ;;  %v4369_v42 = vrot.slane %v10434_v43, 7  ;;  %v3793_v17 = vrot.slane %v3667_v44, 1  ;;  %v5683_v62 = vrot.slane %v9941_v23, 1  ;;  %v4624_v43 = vld [vmem:[#allocation2 + $0x5c] sm:$0x1] }
 0x2e5   :  { %v3796_v46 = vrot.slane %v3669_v59, 1  ;;  %v4367_v21 = vrot.slane %v10433_v34, 7  ;;  %v4372_v6 = vrot.slane %v10435_v5, 7  ;;  %v5684_v49 = vrot.slane %v11907_v39, 1 }
 0x2e6   :  { %v3465_v4 = vpop.f32.mrf.mxu0  ;;  %v4374_v14 = vrot.slane %v10436_v12, 7  ;;  %v4371_v19 = vrot.slane %v4369_v42, 4  ;;  %v3794_v8 = vsel %vm3776_vm13, %v3792_v18, %v3793_v17  ;;  %v3938_v38 = vmax.f32 %v3667_v44, %v3793_v17 }
 0x2e7   :  { %v17268_v2 = vmax.f32 %v10536_v54, %v3465_v4  ;;  %v3797_v52 = vsel %vm3776_vm13, %v3795_v22, %v3796_v46  ;;  %v4368_v55 = vrot.slane %v4367_v21, 4  ;;  %v4373_v15 = vrot.slane %v4372_v6, 4  ;;  %4612 = vst.msk [vmem:[#allocation2 + $0x3c] sm:$0xe] %vm4593_vm2, %v4367_v21  ;;  %4617 = vst.msk [vmem:[#allocation2 + $0x48] sm:$0xe] %vm4593_vm2, %v4372_v6 }
 0x2e8   :  { %v17272_v36 = vpop.f32.mrf.mxu0  ;;  %v4376_v7 = vrot.slane %v4374_v14, 4  ;;  %v3937_v54 = vmax.f32 %v17246_v40, %v3794_v8  ;;  %v4615_v13 = vsel %vm17215_vm3, %v4371_v19, %v4614_v9  ;;  %v3939_v3 = vmax.f32 %v3668_v63, %v3797_v52  ;;  %v4629_v22 = vld [vmem:[#allocation2 + $0x68] sm:$0x1]  ;;  %v4756_v23 = vld [vmem:[#allocation2 + $0x34] sm:$0xf] }
 0x2e9   :  { %v3940_v27 = vmax.f32 %v3669_v59, %v3796_v46  ;;  %v3998_v32 = vmax.f32 %v3938_v38, 0.0  ;;  %v4370_v47 = vsel %vm17220_vm5, %v4368_v55, %v4369_v42  ;;  %v4375_v25 = vsel %vm17220_vm5, %v4373_v15, %v4374_v14  ;;  %4616 = vst [vmem:[#allocation2 + $0x44] sm:$0x1] %v4615_v13  ;;  %v11911_v9 = vld [vmem:[#allocation2 + $0x38] ss:$0 sps:$4 sm:$0x11]  }
 0x2ea   :  { %v3468_v56 = vpop.f32.mrf.mxu0  ;;  %v4620_v53 = vsel %vm17215_vm3, %v4376_v7, %v4619_v26  ;;  %v3997_v11 = vmax.f32 %v3937_v54, 0.0  ;;  %4613 = vst.msk [vmem:[#allocation2 + $0x40] sm:$0xf] %vm4047_vm11, %v4370_v47  ;;  %4618 = vst.msk [vmem:[#allocation2 + $0x4c] sm:$0xf] %vm4047_vm11, %v4375_v25  ;;  %v3999_v40 = vmax.f32 %v3939_v3, 0.0  ;;  %v17288_v51 = vmax.f32 %v3465_v4, %v17266_v58 }
 0x2eb   :  { %4621 = vst [vmem:[#allocation2 + $0x50] sm:$0x1] %v4620_v53  ;;  %v4000_v37 = vmax.f32 %v3940_v27, 0.0  ;;  %v10438_v20 = vpack.c.bf16 %v3998_v32, %v3998_v32  ;;  %v3798_v30 = vrot.slane %v17268_v2, 1  ;;  %v5685_v18 = vsel %vm3776_vm13, %v5683_v62, %v5684_v49  ;;  %v4754_v39 = vld [vmem:[#allocation2 + $0x28] sm:$0xf] }
 0x2ec   :  { %v17290_v61 = vpop.f32.mrf.mxu0  ;;  %v10437_v31 = vpack.c.bf16 %v3997_v11, %v3997_v11  ;;  %v10439_v57 = vpack.c.bf16 %v3999_v40, %v3999_v40  ;;  %v3801_v41 = vrot.slane %v17288_v51, 1  ;;  %v3671_v44 = vmax.f32 %v17251_v0, %v3468_v56  ;;  %5777 = vrot.lane.b32.xlu0 %v5685_v18, %s12418_s0  ;;  %v11913_v55 = vld [vmem:[#allocation2 + $0x2c] ss:$0 sps:$4 sm:$0x11]   ;;  %v4819_v3 = vld [vmem:[#allocation2 + $0x30] sm:$0xe] }
 0x2ed   :  { %v10440_v45 = vpack.c.bf16 %v4000_v37, %v4000_v37  ;;  %v4379_v10 = vrot.slane %v10438_v20, 7  ;;  %v3673_v59 = vmax.f32 %v3468_v56, %v17272_v36  ;;  %v4817_v27 = vld [vmem:[#allocation2 + $0x24] sm:$0xe]  ;;  %v5133_v32 = vld [vmem:[#allocation2 + $0x34] sm:$0xf]  ;;  %v9945_v11 = vcombine.low %v4819_v3, %v4756_v23 }
 0x2ee   :  { %v3481_v24 = vpop.f32.mrf.mxu0  ;;  %v4377_v63 = vrot.slane %v10437_v31, 7  ;;  %v4382_v5 = vrot.slane %v10439_v57, 7  ;;  %v3799_v46 = vrot.slane %v3671_v44, 1  ;;  %v11915_v40 = vld [vmem:[#allocation2 + $0x38] ss:$0 sps:$4 sm:$0x33]  }
 0x2ef   :  { %v4381_v34 = vrot.slane %v4379_v10, 4  ;;  %v4384_v12 = vrot.slane %v10440_v45, 7  ;;  %v17299_v48 = vmax.f32 %v17266_v58, %v3481_v24  ;;  %v3802_v4 = vrot.slane %v3673_v59, 1  ;;  %v5260_v45 = vld [vmem:[#allocation2 + $0x30] sm:$0xc] }
 0x2f0   :  { %v17301_v42 = vpop.f32.mrf.mxu0  ;;  %v4378_v17 = vrot.slane %v4377_v63, 4  ;;  %4622 = vst.msk [vmem:[#allocation2 + $0x54] sm:$0xe] %vm4593_vm2, %v4377_v63  ;;  %v17305_v0 = vmax.f32 %v3481_v24, %v17290_v61  ;;  %v4383_v21 = vrot.slane %v4382_v5, 4  ;;  %4627 = vst.msk [vmem:[#allocation2 + $0x60] sm:$0xe] %vm4593_vm2, %v4382_v5  ;;  %v3800_v8 = vsel %vm3776_vm13, %v3798_v30, %v3799_v46 }
 0x2f1   :  { %v4386_v6 = vrot.slane %v4384_v12, 4  ;;  %v4625_v14 = vsel %vm17215_vm3, %v4381_v34, %v4624_v43  ;;  %v3804_v58 = vrot.slane %v17299_v48, 1  ;;  %v3803_v52 = vsel %vm3776_vm13, %v3801_v41, %v3802_v4 }
 0x2f2   :  { %v3484_v19 = vpop.f32.mrf.mxu0  ;;  %v4380_v26 = vsel %vm17220_vm5, %v4378_v17, %v4379_v10  ;;  %4626 = vst [vmem:[#allocation2 + $0x5c] sm:$0x1] %v4625_v14  ;;  %v3942_v38 = vmax.f32 %v3671_v44, %v3799_v46  ;;  %v4385_v15 = vsel %vm17220_vm5, %v4383_v21, %v4384_v12  ;;  %v3941_v54 = vmax.f32 %v17268_v2, %v3800_v8  ;;  %v4639_v8 = vld [vmem:[#allocation2 + $0x80] sm:$0x1] }
 0x2f3   :  { %4623 = vst.msk [vmem:[#allocation2 + $0x58] sm:$0xf] %vm4047_vm11, %v4380_v26  ;;  %v4630_v7 = vsel %vm17215_vm3, %v4386_v6, %v4629_v22  ;;  %v3943_v13 = vmax.f32 %v17288_v51, %v3803_v52  ;;  %4628 = vst.msk [vmem:[#allocation2 + $0x64] sm:$0xf] %vm4047_vm11, %v4385_v15  ;;  %v3944_v47 = vmax.f32 %v3673_v59, %v3802_v4  ;;  %v3807_v53 = vrot.slane %v17305_v0, 1 }
 0x2f4   :  { %v17322_v56 = vpop.f32.mrf.mxu0  ;;  %4631 = vst [vmem:[#allocation2 + $0x68] sm:$0x1] %v4630_v7  ;;  %v4002_v25 = vmax.f32 %v3942_v38, 0.0  ;;  %v4001_v37 = vmax.f32 %v3941_v54, 0.0  ;;  %v5690_v31 = vrot.slane %v11911_v9, 1  ;;  %v9943_v2 = vcombine.low %v4817_v27, %v4754_v39 }
 0x2f5   :  { %v4003_v20 = vmax.f32 %v3943_v13, 0.0  ;;  %v4004_v51 = vmax.f32 %v3944_v47, 0.0  ;;  %v5689_v49 = vrot.slane %v9945_v11, 1  ;;  %v5687_v57 = vrot.slane %v11913_v55, 1  ;;  %v4634_v22 = vld [vmem:[#allocation2 + $0x74] sm:$0x1] }
 0x2f6   :  { %v3497_v30 = vpop.f32.mrf.mxu0  ;;  %v10442_v62 = vpack.c.bf16 %v4002_v25, %v4002_v25  ;;  %v10441_v10 = vpack.c.bf16 %v4001_v37, %v4001_v37  ;;  %v5686_v24 = vrot.slane %v9943_v2, 1  ;;  %v10321_v63 = vcombine.low %v5260_v45, %v5133_v32 }
 0x2f7   :  { %v10443_v41 = vpack.c.bf16 %v4003_v20, %v4003_v20  ;;  %v10444_v18 = vpack.c.bf16 %v4004_v51, %v4004_v51  ;;  %v5691_v59 = vsel %vm3776_vm13, %v5689_v49, %v5690_v31  ;;  %v7887_v34 = vrot.slane %v11915_v40, 2 }
 0x2f8   :  { %v17326_v43 = vpop.f32.mrf.mxu0  ;;  %v4389_v44 = vrot.slane %v10442_v62, 7  ;;  %v4387_v5 = vrot.slane %v10441_v10, 7  ;;  %5781 = vrot.lane.b32.xlu0 %v5691_v59, %s12418_s0  ;;  %v5688_v17 = vsel %vm3776_vm13, %v5686_v24, %v5687_v57  ;;  %v7886_v46 = vrot.slane %v10321_v63, 2  ;;  %v4644_v59 = vld [vmem:[#allocation2 + $0x8c] sm:$0x1] }
 0x2f9   :  { %v4392_v12 = vrot.slane %v10443_v41, 7  ;;  %v4394_v21 = vrot.slane %v10444_v18, 7  ;;  %5779 = vrot.lane.b32.xlu1 %v5688_v17, %s12418_s0  ;;  %v3675_v6 = vmax.f32 %v17272_v36, %v3484_v19  ;;  %v3677_v14 = vmax.f32 %v3484_v19, %v17301_v42  ;;  %v4649_v17 = vld [vmem:[#allocation2 + $0x98] sm:$0x1] }
 0x2fa   :  { %v3500_v4 = vpop.f32.mrf.mxu0  ;;  %v4391_v23 = vrot.slane %v4389_v44, 4  ;;  %v4388_v9 = vrot.slane %v4387_v5, 4  ;;  %4632 = vst.msk [vmem:[#allocation2 + $0x6c] sm:$0xe] %vm4593_vm2, %v4387_v5  ;;  %v7888_v52 = vsel %vm6029_vm7, %v7886_v46, %v7887_v34  ;;  %v17338_v38 = vmax.f32 %v17290_v61, %v3497_v30  ;;  %v11988_v5 = vld [vmem:[%s19083_s2 + $0x38] sm:$0xff]  }
 0x2fb   :  { %v4393_v26 = vrot.slane %v4392_v12, 4  ;;  %4637 = vst.msk [vmem:[#allocation2 + $0x78] sm:$0xe] %vm4593_vm2, %v4392_v12  ;;  %v4396_v39 = vrot.slane %v4394_v21, 4  ;;  %v8503_v36 = vsel %vm7982_vm6, %v7888_v52, 1065369472  ;;  %v3680_v61 = vmax.f32 %v3497_v30, %v17322_v56  ;;  %10596 = vmatpush1.bf16.msra.mxu1 %v11988_v5  ;;  %8714 = vmatpush1.bf16.msra.mxu0 %v11988_v5 }
 0x2fc   :  { %v4635_v55 = vsel %vm17215_vm3, %v4391_v23, %v4634_v22  ;;  %v3805_v15 = vrot.slane %v3675_v6, 1  ;;  %v4390_v7 = vsel %vm17220_vm5, %v4388_v9, %v4389_v44  ;;  %10395 = vmatprep.mubr.msk.bf16.mxu0 %vm8642_vm8, %v8503_v36  ;;  %v3808_v13 = vrot.slane %v3677_v14, 1  ;;  %10587 = vmatprep.subr.bf16.mxu1 %v12417_v1 }
 0x2fd   :  { %v4395_v54 = vsel %vm17220_vm5, %v4393_v26, %v4394_v21  ;;  %4636 = vst [vmem:[#allocation2 + $0x74] sm:$0x1] %v4635_v55  ;;  %4633 = vst.msk [vmem:[#allocation2 + $0x70] sm:$0xf] %vm4047_vm11, %v4390_v7  ;;  %v4640_v3 = vsel %vm17215_vm3, %v4396_v39, %v4639_v8  ;;  %v3810_v47 = vrot.slane %v17338_v38, 1  ;;  %v3813_v20 = vrot.slane %v3680_v61, 1  ;;  %8715 = vmatprep.subr.bf16.mxu0 %v12417_v1 }
 0x2fe   :  { %v10552_v19 = vpop.f32.mrf.mxu0  ;;  %4638 = vst.msk [vmem:[#allocation2 + $0x7c] sm:$0xf] %vm4047_vm11, %v4395_v54  ;;  %v3806_v27 = vsel %vm3776_vm13, %v3804_v58, %v3805_v15  ;;  %v3946_v32 = vmax.f32 %v3675_v6, %v3805_v15  ;;  %4641 = vst [vmem:[#allocation2 + $0x80] sm:$0x1] %v4640_v3  ;;  %v3809_v11 = vsel %vm3776_vm13, %v3807_v53, %v3808_v13 }
 0x2ff   :  { %v3945_v40 = vmax.f32 %v17299_v48, %v3806_v27  ;;  %v3948_v37 = vmax.f32 %v3677_v14, %v3808_v13  ;;  %v3947_v31 = vmax.f32 %v17305_v0, %v3809_v11  ;;  %v3679_v30 = vmax.f32 %v17301_v42, %v3500_v4 }
 0x300   :  { %v3513_v25 = vpop.f32.mrf.mxu0  ;;  %v4006_v2 = vmax.f32 %v3946_v32, 0.0  ;;  %v3681_v51 = vmax.f32 %v3500_v4, %v17326_v43  ;;  %v11993_v32 = vld [vmem:[%s19083_s2 + $0x30] sm:$0xff]  }
 0x301   :  { %v4005_v62 = vmax.f32 %v3945_v40, 0.0  ;;  %v4008_v58 = vmax.f32 %v3948_v37, 0.0  ;;  %v17363_v49 = vmax.f32 %v17322_v56, %v3513_v25  ;;  %v17365_v57 = vmax.f32 %v3513_v25, %v10552_v19  ;;  %10597 = vmatpush1.bf16.msra.mxu1 %v11993_v32  ;;  %8716 = vmatpush1.bf16.msra.mxu0 %v11993_v32 }
 0x302   :  { %v4007_v45 = vmax.f32 %v3947_v31, 0.0  ;;  %v10446_v53 = vpack.c.bf16 %v4006_v2, %v4006_v2  ;;  %v3811_v10 = vrot.slane %v3679_v30, 1  ;;  %v3814_v48 = vrot.slane %v3681_v51, 1  ;;  %v10553_v41 = vpop.f32.mrf.mxu0  ;;  %v4895_v37 = vld [vmem:[#allocation2 + $0x78] sm:$0xc]  ;;  %10588 = vmatprep.subr.bf16.mxu1 %v12417_v1  ;;  %8717 = vmatprep.subr.bf16.mxu0 %v12417_v1 }
 0x303   :  { %v10445_v24 = vpack.c.bf16 %v4005_v62, %v4005_v62  ;;  %v10448_v63 = vpack.c.bf16 %v4008_v58, %v4008_v58  ;;  %v3816_v0 = vrot.slane %v17363_v49, 1  ;;  %v3819_v42 = vrot.slane %v17365_v57, 1  ;;  %v11997_v58 = vld [vmem:[%s19083_s2 + $0x28] sm:$0xff]  }
 0x304   :  { %v10447_v18 = vpack.c.bf16 %v4007_v45, %v4007_v45  ;;  %v4399_v44 = vrot.slane %v10446_v53, 7  ;;  %v3812_v34 = vsel %vm3776_vm13, %v3810_v47, %v3811_v10  ;;  %v3815_v56 = vsel %vm3776_vm13, %v3813_v20, %v3814_v48  ;;  %v3516_v9 = vpop.f32.mrf.mxu0 }
 0x305   :  { %v4397_v12 = vrot.slane %v10445_v24, 7  ;;  %v4404_v22 = vrot.slane %v10448_v63, 7  ;;  %v3949_v46 = vmax.f32 %v17338_v38, %v3812_v34  ;;  %v3950_v4 = vmax.f32 %v3679_v30, %v3811_v10  ;;  %v17375_v26 = vld [vmem:[#allocation2 + $0x7c] sm:$0xf]  ;;  %v4654_v30 = vld [vmem:[#allocation2 + $0xa4] sm:$0x1]  ;;  %10598 = vmatpush1.bf16.msra.mxu1 %v11997_v58  ;;  %8718 = vmatpush1.bf16.msra.mxu0 %v11997_v58 }
 0x306   :  { %v4401_v23 = vrot.slane %v4399_v44, 4  ;;  %v4402_v21 = vrot.slane %v10447_v18, 7  ;;  %v3951_v6 = vmax.f32 %v3680_v61, %v3815_v56  ;;  %v3952_v14 = vmax.f32 %v3681_v51, %v3814_v48  ;;  %v17383_v7 = vld [vmem:[#allocation2 + $0x80] ss:$0 sps:$4 sm:$0x33]   ;;  %10589 = vmatprep.subr.bf16.mxu1 %v12417_v1  ;;  %8719 = vmatprep.subr.bf16.mxu0 %v12417_v1 }
 0x307   :  { %v4398_v8 = vrot.slane %v4397_v12, 4  ;;  %v4406_v52 = vrot.slane %v4404_v22, 4  ;;  %4642 = vst.msk [vmem:[#allocation2 + $0x84] sm:$0xe] %vm4593_vm2, %v4397_v12  ;;  %v4009_v39 = vmax.f32 %v3949_v46, 0.0  ;;  %v4010_v55 = vmax.f32 %v3950_v4, 0.0  ;;  %v17385_v54 = vpop.f32.mrf.mxu0 }
 0x308   :  { %v4403_v38 = vrot.slane %v4402_v21, 4  ;;  %v4645_v36 = vsel %vm17215_vm3, %v4401_v23, %v4644_v59  ;;  %4647 = vst.msk [vmem:[#allocation2 + $0x90] sm:$0xe] %vm4593_vm2, %v4402_v21  ;;  %v4011_v15 = vmax.f32 %v3951_v6, 0.0  ;;  %v4012_v19 = vmax.f32 %v3952_v14, 0.0 }
 0x309   :  { %v4400_v13 = vsel %vm17220_vm5, %v4398_v8, %v4399_v44  ;;  %4646 = vst [vmem:[#allocation2 + $0x8c] sm:$0x1] %v4645_v36  ;;  %v4650_v61 = vsel %vm17215_vm3, %v4406_v52, %v4649_v17  ;;  %v10449_v3 = vpack.c.bf16 %v4009_v39, %v4009_v39  ;;  %v10450_v27 = vpack.c.bf16 %v4010_v55, %v4010_v55  ;;  %v3529_v20 = vpop.f32.mrf.mxu0  ;;  %v4659_v10 = vld [vmem:[#allocation2 + $0xb0] sm:$0x1]  ;;  %v4831_v23 = vld [vmem:[#allocation2 + $0x78] sm:$0xe] }
 0x30a   :  { %v4405_v47 = vsel %vm17220_vm5, %v4403_v38, %v4404_v22  ;;  %4643 = vst.msk [vmem:[#allocation2 + $0x88] sm:$0xf] %vm4047_vm11, %v4400_v13  ;;  %4651 = vst [vmem:[#allocation2 + $0x98] sm:$0x1] %v4650_v61  ;;  %v10451_v25 = vpack.c.bf16 %v4011_v15, %v4011_v15  ;;  %v10452_v11 = vpack.c.bf16 %v4012_v19, %v4012_v19  ;;  %v6061_v48 = vrot.slane %v17383_v7, 2 }
 0x30b   :  { %v3683_v40 = vmax.f32 %v17326_v43, %v3516_v9  ;;  %4648 = vst.msk [vmem:[#allocation2 + $0x94] sm:$0xf] %vm4047_vm11, %v4405_v47  ;;  %v4407_v31 = vrot.slane %v10449_v3, 7  ;;  %v4409_v2 = vrot.slane %v10450_v27, 7  ;;  %v3685_v51 = vmax.f32 %v3516_v9, %v10553_v41  ;;  %v17407_v44 = vpop.f32.mrf.mxu0  ;;  %v12006_v27 = vld [vmem:[%s19083_s2 + $0x18] sm:$0xff]  }
 0x30c   :  { %v10021_v62 = vcombine.low %v4895_v37, %v17375_v26  ;;  %v4412_v45 = vrot.slane %v10451_v25, 7  ;;  %v4414_v53 = vrot.slane %v10452_v11, 7  ;;  %v11919_v12 = vld [vmem:[#allocation2 + $0x80] ss:$0 sps:$4 sm:$0x11]   ;;  %v9957_v39 = vcombine.low %v4831_v23, %v17375_v26 }
 0x30d   :  { %v3817_v43 = vrot.slane %v3683_v40, 1  ;;  %v4408_v24 = vrot.slane %v4407_v31, 4  ;;  %v4411_v41 = vrot.slane %v4409_v2, 4  ;;  %4652 = vst.msk [vmem:[#allocation2 + $0x9c] sm:$0xe] %vm4593_vm2, %v4407_v31  ;;  %v3820_v63 = vrot.slane %v3685_v51, 1  ;;  %v3532_v55 = vpop.f32.mrf.mxu0 }
 0x30e   :  { %v6060_v18 = vrot.slane %v10021_v62, 2  ;;  %v4413_v59 = vrot.slane %v4412_v45, 4  ;;  %v4416_v34 = vrot.slane %v4414_v53, 4  ;;  %4657 = vst.msk [vmem:[#allocation2 + $0xa8] sm:$0xe] %vm4593_vm2, %v4412_v45  ;;  %v5708_v36 = vrot.slane %v11919_v12, 1 }
 0x30f   :  { %v3818_v56 = vsel %vm3776_vm13, %v3816_v0, %v3817_v43  ;;  %v3954_v5 = vmax.f32 %v3683_v40, %v3817_v43  ;;  %v4410_v22 = vsel %vm17220_vm5, %v4408_v24, %v4409_v2  ;;  %v4655_v17 = vsel %vm17215_vm3, %v4411_v41, %v4654_v30  ;;  %v17427_v9 = vld [vmem:[#allocation2 + $0x90] sm:$0xf]  ;;  %v4664_v25 = vld [vmem:[#allocation2 + $0xbc] sm:$0x1]  ;;  %v4669_v30 = vld [vmem:[#allocation2 + $0xc8] sm:$0x1] }
 0x310   :  { %v3821_v46 = vsel %vm3776_vm13, %v3819_v42, %v3820_v63  ;;  %v3953_v4 = vmax.f32 %v17363_v49, %v3818_v56  ;;  %v4415_v21 = vsel %vm17220_vm5, %v4413_v59, %v4414_v53  ;;  %4653 = vst.msk [vmem:[#allocation2 + $0xa0] sm:$0xf] %vm4047_vm11, %v4410_v22  ;;  %4656 = vst [vmem:[#allocation2 + $0xa4] sm:$0x1] %v4655_v17  ;;  %v12002_v49 = vld [vmem:[%s19083_s2 + $0x20] sm:$0xff]   ;;  %v5707_v61 = vrot.slane %v9957_v39, 1 }
 0x311   :  { %v4660_v0 = vsel %vm17215_vm3, %v4416_v34, %v4659_v10  ;;  %v3955_v6 = vmax.f32 %v17365_v57, %v3821_v46  ;;  %v3956_v14 = vmax.f32 %v3685_v51, %v3820_v63  ;;  %4658 = vst.msk [vmem:[#allocation2 + $0xac] sm:$0xf] %vm4047_vm11, %v4415_v21  ;;  %v4014_v8 = vmax.f32 %v3954_v5, 0.0  ;;  %v11921_v3 = vld [vmem:[#allocation2 + $0x98] ss:$0 sps:$4 sm:$0x11]   ;;  %10599 = vmatpush1.bf16.msra.mxu1 %v12002_v49 }
 0x312   :  { %4661 = vst [vmem:[#allocation2 + $0xb0] sm:$0x1] %v4660_v0  ;;  %v4013_v42 = vmax.f32 %v3953_v4, 0.0  ;;  %v6062_v52 = vsel %vm6029_vm7, %v6060_v18, %v6061_v48  ;;  %v17438_v15 = vmax.f32 %v3529_v20, %v17385_v54  ;;  %v17440_v19 = vld [vmem:[#allocation2 + $0x94] sm:$0xf]  ;;  %v3687_v40 = vmax.f32 %v3532_v55, %v17407_v44  ;;  %10590 = vmatprep.subr.bf16.mxu1 %v12417_v1 }
 0x313   :  { %v4015_v57 = vmax.f32 %v3955_v6, 0.0  ;;  %v4016_v38 = vmax.f32 %v3956_v14, 0.0  ;;  %6146 = vrot.lane.b32.xlu0 %v6062_v52, %s12419_s18  ;;  %v10454_v13 = vpack.c.bf16 %v4014_v8, %v4014_v8  ;;  %v10075_v26 = vcombine.low %v17427_v9, %v17440_v19  ;;  %v5023_v37 = vld [vmem:[#allocation2 + $0x90] sm:$0xe]  ;;  %v17450_v20 = vpop.f32.mrf.mxu0  ;;  %8720 = vmatpush1.bf16.msra.mxu0 %v12002_v49  ;;  %v17482_v55 = vld [vmem:[#allocation2 + $0x88] sm:$0xf] }
 0x314   :  { %v10453_v7 = vpack.c.bf16 %v4013_v42, %v4013_v42  ;;  %v3822_v11 = vrot.slane %v17438_v15, 1  ;;  %v5709_v51 = vsel %vm3776_vm13, %v5707_v61, %v5708_v36  ;;  %v10117_v62 = vcombine.low %v5023_v37, %v17440_v19  ;;  %v5087_v43 = vld [vmem:[#allocation2 + $0x90] sm:$0xc]  ;;  %8721 = vmatprep.subr.bf16.mxu0 %v12417_v1  ;;  %v11922_v59 = vld [vmem:[#allocation2 + $0x98] ss:$0 sps:$4 sm:$0x33]  }
 0x315   :  { %v10455_v32 = vpack.c.bf16 %v4015_v57, %v4015_v57  ;;  %v10456_v47 = vpack.c.bf16 %v4016_v38, %v4016_v38  ;;  %v4419_v2 = vrot.slane %v10454_v13, 7  ;;  %5793 = vrot.lane.b32.xlu1 %v5709_v51, %s12418_s0  ;;  %v3823_v53 = vrot.slane %v3687_v40, 1  ;;  %v3545_v48 = vpop.f32.mrf.mxu0  ;;  %10600 = vmatpush1.bf16.msra.mxu1 %v12006_v27  ;;  %v5152_v22 = vld [vmem:[#allocation2 + $0xa8] sm:$0xf]  ;;  %v12010_v9 = vld [vmem:[%s19083_s2 + $0x10] sm:$0xff]  }
 0x316   :  { %v4417_v31 = vrot.slane %v10453_v7, 7  ;;  %v6637_v10 = vrot.slane %v11921_v3, 1  ;;  %v6636_v63 = vrot.slane %v10117_v62, 1  ;;  %v10181_v18 = vcombine.low %v5087_v43, %v17440_v19  ;;  %10591 = vmatprep.subr.bf16.mxu1 %v12417_v1  ;;  %v17468_v6 = vld [vmem:[#allocation2 + $0x8c] ss:$0 sps:$4 sm:$0x11]  }
 0x317   :  { %v4422_v58 = vrot.slane %v10455_v32, 7  ;;  %v4424_v45 = vrot.slane %v10456_v47, 7  ;;  %v4421_v41 = vrot.slane %v4419_v2, 4  ;;  %v3824_v5 = vsel %vm3776_vm13, %v3822_v11, %v3823_v53  ;;  %v17470_v14 = vpop.f32.mrf.mxu0  ;;  %8722 = vmatpush1.bf16.msra.mxu0 %v12006_v27  ;;  %v5216_v19 = vld [vmem:[#allocation2 + $0xa8] sm:$0xe]  ;;  %v12019_v43 = vld [vmem:[%s19083_s2] sm:$0xff]  }
 0x318   :  { %v4418_v24 = vrot.slane %v4417_v31, 4  ;;  %4662 = vst.msk [vmem:[#allocation2 + $0xb4] sm:$0xe] %vm4593_vm2, %v4417_v31  ;;  %v3958_v12 = vmax.f32 %v3687_v40, %v3823_v53  ;;  %v5153_v17 = vld [vmem:[#allocation2 + $0xac] sm:$0xf]  ;;  %v3957_v23 = vmax.f32 %v17438_v15, %v3824_v5  ;;  %v6638_v21 = vsel %vm3776_vm13, %v6636_v63, %v6637_v10  ;;  %8723 = vmatprep.subr.bf16.mxu0 %v12417_v1 }
 0x319   :  { %v4423_v34 = vrot.slane %v4422_v58, 4  ;;  %v4426_v56 = vrot.slane %v4424_v45, 4  ;;  %4667 = vst.msk [vmem:[#allocation2 + $0xc0] sm:$0xe] %vm4593_vm2, %v4422_v58  ;;  %v4665_v4 = vsel %vm17215_vm3, %v4421_v41, %v4664_v25  ;;  %6370 = vrot.lane.b32.xlu1 %v10075_v26, %s12420_s23  ;;  %6722 = vrot.lane.b32.xlu0 %v6638_v21, %s12421_s24  ;;  %v6988_v52 = vrot.slane %v10181_v18, 2  ;;  %v12015_v7 = vld [vmem:[%s19083_s2 + $0x8] sm:$0xff]   ;;  %v3548_v37 = vpop.f32.mrf.mxu0 }
 0x31a   :  { %v4420_v46 = vsel %vm17220_vm5, %v4418_v24, %v4419_v2  ;;  %v11925_v0 = vld [vmem:[#allocation2 + $0xb0] ss:$0 sps:$4 sm:$0x11]   ;;  %4666 = vst [vmem:[#allocation2 + $0xbc] sm:$0x1] %v4665_v4  ;;  %v4018_v8 = vmax.f32 %v3958_v12, 0.0  ;;  %v10235_v36 = vcombine.low %v5152_v22, %v5153_v17  ;;  %v17486_v15 = vmax.f32 %v17385_v54, %v3545_v48  ;;  %10601 = vmatpush1.bf16.msra.mxu1 %v12010_v9 }
 0x31b   :  { %v4425_v49 = vsel %vm17220_vm5, %v4423_v34, %v4424_v45  ;;  %4663 = vst.msk [vmem:[#allocation2 + $0xb8] sm:$0xf] %vm4047_vm11, %v4420_v46  ;;  %v4670_v42 = vsel %vm17215_vm3, %v4426_v56, %v4669_v30  ;;  %v11927_v39 = vld [vmem:[#allocation2 + $0xb0] ss:$0 sps:$4 sm:$0x33]   ;;  %v4017_v57 = vmax.f32 %v3957_v23, 0.0  ;;  %v17493_v61 = vmax.f32 %v3545_v48, %v17450_v20  ;;  %10592 = vmatprep.subr.bf16.mxu1 %v12417_v1 }
 0x31c   :  { %4668 = vst.msk [vmem:[#allocation2 + $0xc4] sm:$0xf] %vm4047_vm11, %v4425_v49  ;;  %4671 = vst [vmem:[#allocation2 + $0xc8] sm:$0x1] %v4670_v42  ;;  %v6989_v38 = vrot.slane %v11922_v59, 2  ;;  %v10458_v13 = vpack.c.bf16 %v4018_v8, %v4018_v8  ;;  %v10277_v26 = vcombine.low %v5216_v19, %v5153_v17  ;;  %v7565_v3 = vrot.slane %v11925_v0, 1  ;;  %8724 = vmatpush1.bf16.msra.mxu0 %v12010_v9 }
 0x31d   :  { %v5280_v27 = vld [vmem:[#allocation2 + $0xa8] sm:$0xc]  ;;  %v10457_v32 = vpack.c.bf16 %v4017_v57, %v4017_v57  ;;  %v4674_v54 = vld [vmem:[#allocation2 + $0x110] sm:$0x1]  ;;  %v3825_v25 = vrot.slane %v17486_v15, 1  ;;  %7298 = vrot.lane.b32.xlu0 %v10235_v36, %s12423_s29  ;;  %v3828_v30 = vrot.slane %v17493_v61, 1  ;;  %8725 = vmatprep.subr.bf16.mxu0 %v12417_v1  ;;  %v3689_v41 = vmax.f32 %v17407_v44, %v3548_v37 }
 0x31e   :  { %v6990_v47 = vsel %vm6029_vm7, %v6988_v52, %v6989_v38  ;;  %v10341_v11 = vcombine.low %v5280_v27, %v5153_v17  ;;  %v4833_v40 = vld [vmem:[#allocation2 + $0x84] sm:$0xe]  ;;  %v11930_v31 = vld [vmem:[#allocation2 + $0x8c] ss:$0 sps:$4 sm:$0x33]   ;;  %v4429_v2 = vrot.slane %v10458_v13, 7  ;;  %10602 = vmatpush1.bf16.msra.mxu1 %v12015_v7  ;;  %v3691_v63 = vmax.f32 %v3548_v37, %v17470_v14 }
 0x31f   :  { %7074 = vrot.lane.b32.xlu1 %v6990_v47, %s12422_s27  ;;  %v7564_v51 = vrot.slane %v10277_v26, 1  ;;  %v7917_v62 = vrot.slane %v11927_v39, 2  ;;  %v4427_v58 = vrot.slane %v10457_v32, 7  ;;  %v9959_v53 = vcombine.low %v4833_v40, %v17482_v55  ;;  %v4897_v18 = vld [vmem:[#allocation2 + $0x84] sm:$0xc]  ;;  %v17512_v34 = vpop.f32.mrf.mxu0  ;;  %10593 = vmatprep.subr.bf16.mxu1 %v12417_v1 }
 0x320   :  { %v7916_v45 = vrot.slane %v10341_v11, 2  ;;  %v5711_v10 = vrot.slane %v17468_v6, 1  ;;  %v4431_v48 = vrot.slane %v4429_v2, 4  ;;  %v17510_v59 = vld [vmem:[#allocation2 + $0xa4] ss:$0 sps:$4 sm:$0x11]   ;;  %v10023_v22 = vcombine.low %v4897_v18, %v17482_v55  ;;  %8726 = vmatpush1.bf16.msra.mxu0 %v12015_v7 }
 0x321   :  { %v7566_v24 = vsel %vm3776_vm13, %v7564_v51, %v7565_v3  ;;  %v4428_v56 = vrot.slane %v4427_v58, 4  ;;  %4672 = vst.msk [vmem:[#allocation2 + $0x108] sm:$0xe] %vm4593_vm2, %v4427_v58  ;;  %v5710_v12 = vrot.slane %v9959_v53, 1  ;;  %v3826_v46 = vrot.slane %v3689_v41, 1  ;;  %v3561_v21 = vpop.f32.mrf.mxu0  ;;  %8727 = vmatprep.subr.bf16.mxu0 %v12417_v1 }
 0x322   :  { %v7918_v5 = vsel %vm6029_vm7, %v7916_v45, %v7917_v62  ;;  %v4675_v44 = vsel %vm17215_vm3, %v4431_v48, %v4674_v54  ;;  %v3829_v4 = vrot.slane %v3691_v63, 1  ;;  %v4962_v23 = vld [vmem:[#allocation2 + $0xa0] sm:$0xf]  ;;  %v6063_v9 = vrot.slane %v10023_v22, 2  ;;  %10603 = vmatpush1.bf16.msra.mxu1 %v12019_v43  ;;  %v4961_v57 = vld [vmem:[#allocation2 + $0x9c] sm:$0xf] }
 0x323   :  { %7650 = vrot.lane.b32.xlu1 %v7566_v24, %s12424_s5  ;;  %v8523_v17 = vsel %vm7982_vm6, %v7918_v5, 1065369472  ;;  %v4430_v0 = vsel %vm17220_vm5, %v4428_v56, %v4429_v2  ;;  %4676 = vst [vmem:[#allocation2 + $0x110] sm:$0x1] %v4675_v44  ;;  %v5712_v6 = vsel %vm3776_vm13, %v5710_v12, %v5711_v10  ;;  %v6064_v49 = vrot.slane %v11930_v31, 2  ;;  %10594 = vmatprep.subr.bf16.mxu1 %v12417_v1  ;;  %v17537_v47 = vpop.f32.mrf.mxu0 }
 0x324   :  { %10405 = vmatprep.mubr.msk.bf16.mxu1 %vm8642_vm8, %v8523_v17  ;;  %v11935_v42 = vld [vmem:[#allocation2 + $0xa4] ss:$0 sps:$4 sm:$0x33]   ;;  %4673 = vst.msk [vmem:[#allocation2 + $0x10c] sm:$0xf] %vm4047_vm11, %v4430_v0  ;;  %5795 = vrot.lane.b32.xlu0 %v5712_v6, %s12418_s0  ;;  %v3827_v8 = vsel %vm3776_vm13, %v3825_v25, %v3826_v46  ;;  %v3830_v52 = vsel %vm3776_vm13, %v3828_v30, %v3829_v4  ;;  %v6640_v32 = vrot.slane %v17510_v59, 1 }
 0x325   :  { %v3960_v39 = vmax.f32 %v3689_v41, %v3826_v46  ;;  %v3962_v55 = vmax.f32 %v3691_v63, %v3829_v4  ;;  %v3959_v38 = vmax.f32 %v17486_v15, %v3827_v8  ;;  %v3961_v36 = vmax.f32 %v17493_v61, %v3830_v52  ;;  %v5025_v13 = vld [vmem:[#allocation2 + $0x9c] sm:$0xe]  ;;  %8728 = vmatpush1.bf16.msra.mxu0 %v12019_v43  ;;  %v5155_v30 = vld [vmem:[#allocation2 + $0xb8] sm:$0xf]  ;;  %v4679_v58 = vld [vmem:[#allocation2 + $0x11c] sm:$0x1] }
 0x326   :  { %v6065_v19 = vsel %vm6029_vm7, %v6063_v9, %v6064_v49  ;;  %v10076_v7 = vcombine.low %v4961_v57, %v4962_v23  ;;  %v10119_v27 = vcombine.low %v5025_v13, %v4962_v23  ;;  %v5089_v54 = vld [vmem:[#allocation2 + $0x9c] sm:$0xc]  ;;  %v6992_v11 = vrot.slane %v11935_v42, 2  ;;  %8741 = vmatprep.subr.bf16.mxu0 %v12417_v1  ;;  %v4684_v45 = vld [vmem:[#allocation2 + $0x128] sm:$0x1] }
 0x327   :  { %v4020_v26 = vmax.f32 %v3960_v39, 0.0  ;;  %v4022_v3 = vmax.f32 %v3962_v55, 0.0  ;;  %6148 = vrot.lane.b32.xlu1 %v6065_v19, %s12419_s18  ;;  %v4019_v15 = vmax.f32 %v3959_v38, 0.0  ;;  %v4021_v25 = vmax.f32 %v3961_v36, 0.0  ;;  %v5154_v43 = vld [vmem:[#allocation2 + $0xb4] sm:$0xf] }
 0x328   :  { %v10183_v61 = vcombine.low %v5089_v54, %v4962_v23  ;;  %6372 = vrot.lane.b32.xlu0 %v10076_v7, %s12420_s23  ;;  %v6639_v31 = vrot.slane %v10119_v27, 1  ;;  %v17542_v2 = vmax.f32 %v17450_v20, %v3561_v21  ;;  %v17545_v10 = vmax.f32 %v3561_v21, %v17512_v34  ;;  %v5218_v48 = vld [vmem:[#allocation2 + $0xb4] sm:$0xe]  ;;  %v11938_v24 = vld [vmem:[#allocation2 + $0xbc] ss:$0 sps:$4 sm:$0x11]   ;;  %v3564_v20 = vpop.f32.mrf.mxu0 }
 0x329   :  { %v10460_v40 = vpack.c.bf16 %v4020_v26, %v4020_v26  ;;  %v10462_v37 = vpack.c.bf16 %v4022_v3, %v4022_v3  ;;  %v10459_v51 = vpack.c.bf16 %v4019_v15, %v4019_v15  ;;  %v10461_v62 = vpack.c.bf16 %v4021_v25, %v4021_v25  ;;  %v4772_v56 = vld [vmem:[#allocation2 + $0x94] sm:$0xf]  ;;  %v11940_v21 = vld [vmem:[#allocation2 + $0x98] ss:$0 sps:$4 sm:$0x11]  }
 0x32a   :  { %v6991_v53 = vrot.slane %v10183_v61, 2  ;;  %v6641_v18 = vsel %vm3776_vm13, %v6639_v31, %v6640_v32  ;;  %v3831_v59 = vrot.slane %v17542_v2, 1  ;;  %v3834_v44 = vrot.slane %v17545_v10, 1  ;;  %v11942_v8 = vld [vmem:[#allocation2 + $0x98] ss:$0 sps:$4 sm:$0x33]  }
 0x32b   :  { %v4434_v41 = vrot.slane %v10460_v40, 7  ;;  %v4439_v63 = vrot.slane %v10462_v37, 7  ;;  %v4432_v5 = vrot.slane %v10459_v51, 7  ;;  %v4437_v12 = vrot.slane %v10461_v62, 7  ;;  %6724 = vrot.lane.b32.xlu1 %v6641_v18, %s12421_s24  ;;  %v17553_v0 = vpop.f32.mrf.mxu0  ;;  %v4835_v38 = vld [vmem:[#allocation2 + $0x90] sm:$0xe] }
 0x32c   :  { %v6993_v22 = vsel %vm6029_vm7, %v6991_v53, %v6992_v11  ;;  %v10236_v4 = vcombine.low %v5154_v43, %v5155_v30  ;;  %v10279_v23 = vcombine.low %v5218_v48, %v5155_v30  ;;  %v7568_v49 = vrot.slane %v11938_v24, 1  ;;  %v4899_v36 = vld [vmem:[#allocation2 + $0x90] sm:$0xc]  ;;  %v4964_v3 = vld [vmem:[#allocation2 + $0xac] sm:$0xf] }
 0x32d   :  { %v4436_v17 = vrot.slane %v4434_v41, 4  ;;  %v4441_v46 = vrot.slane %v4439_v63, 4  ;;  %7076 = vrot.lane.b32.xlu0 %v6993_v22, %s12422_s27  ;;  %v4433_v6 = vrot.slane %v4432_v5, 4  ;;  %v4438_v9 = vrot.slane %v4437_v12, 4  ;;  %4677 = vst.msk [vmem:[#allocation2 + $0x114] sm:$0xe] %vm4593_vm2, %v4432_v5  ;;  %v3577_v19 = vpop.f32.mrf.mxu0 }
 0x32e   :  { %4682 = vst.msk [vmem:[#allocation2 + $0x120] sm:$0xe] %vm4593_vm2, %v4437_v12  ;;  %v3693_v42 = vmax.f32 %v17470_v14, %v3564_v20  ;;  %v7567_v55 = vrot.slane %v10279_v23, 1  ;;  %v3695_v57 = vmax.f32 %v3564_v20, %v17537_v47  ;;  %v9961_v26 = vcombine.low %v4835_v38, %v4772_v56  ;;  %v11945_v25 = vld [vmem:[#allocation2 + $0xb0] ss:$0 sps:$4 sm:$0x11]  }
 0x32f   :  { %v4680_v52 = vsel %vm17215_vm3, %v4436_v17, %v4679_v58  ;;  %v4685_v39 = vsel %vm17215_vm3, %v4441_v46, %v4684_v45  ;;  %v4435_v7 = vsel %vm17220_vm5, %v4433_v6, %v4434_v41  ;;  %v4440_v13 = vsel %vm17220_vm5, %v4438_v9, %v4439_v63  ;;  %7300 = vrot.lane.b32.xlu1 %v10236_v4, %s12423_s29  ;;  %v4963_v58 = vld [vmem:[#allocation2 + $0xa8] sm:$0xf]  ;;  %v17575_v45 = vpop.f32.mrf.mxu0  ;;  %v4689_v46 = vld [vmem:[#allocation2 + $0x134] sm:$0x1] }
 0x330   :  { %4681 = vst [vmem:[#allocation2 + $0x11c] sm:$0x1] %v4680_v52  ;;  %4686 = vst [vmem:[#allocation2 + $0x128] sm:$0x1] %v4685_v39  ;;  %v3832_v14 = vrot.slane %v3693_v42, 1  ;;  %v7569_v27 = vsel %vm3776_vm13, %v7567_v55, %v7568_v49  ;;  %v3835_v32 = vrot.slane %v3695_v57, 1  ;;  %v10025_v15 = vcombine.low %v4899_v36, %v4772_v56 }
 0x331   :  { %4678 = vst.msk [vmem:[#allocation2 + $0x118] sm:$0xf] %vm4047_vm11, %v4435_v7  ;;  %4683 = vst.msk [vmem:[#allocation2 + $0x124] sm:$0xf] %vm4047_vm11, %v4440_v13  ;;  %v5714_v54 = vrot.slane %v11940_v21, 1  ;;  %7652 = vrot.lane.b32.xlu0 %v7569_v27, %s12424_s5  ;;  %v5713_v40 = vrot.slane %v9961_v26, 1  ;;  %v10077_v24 = vcombine.low %v4963_v58, %v4964_v3  ;;  %v17586_v23 = vmax.f32 %v3577_v19, %v17553_v0  ;;  %v3580_v6 = vpop.f32.mrf.mxu0 }
 0x332   :  { %v3833_v61 = vsel %vm3776_vm13, %v3831_v59, %v3832_v14  ;;  %v3964_v11 = vmax.f32 %v3693_v42, %v3832_v14  ;;  %v6067_v37 = vrot.slane %v11942_v8, 2  ;;  %v3836_v31 = vsel %vm3776_vm13, %v3834_v44, %v3835_v32  ;;  %v5027_v41 = vld [vmem:[#allocation2 + $0xa8] sm:$0xe]  ;;  %v5157_v21 = vld [vmem:[#allocation2 + $0xc4] sm:$0xf] }
 0x333   :  { %v3963_v30 = vmax.f32 %v17542_v2, %v3833_v61  ;;  %v3966_v51 = vmax.f32 %v3695_v57, %v3835_v32  ;;  %v6066_v62 = vrot.slane %v10025_v15, 2  ;;  %v3965_v53 = vmax.f32 %v17545_v10, %v3836_v31  ;;  %v11947_v2 = vld [vmem:[#allocation2 + $0xb0] ss:$0 sps:$4 sm:$0x33]   ;;  %v5091_v22 = vld [vmem:[#allocation2 + $0xa8] sm:$0xc] }
 0x334   :  { %v4024_v43 = vmax.f32 %v3964_v11, 0.0  ;;  %v5715_v48 = vsel %vm3776_vm13, %v5713_v40, %v5714_v54  ;;  %v10121_v20 = vcombine.low %v5027_v41, %v4964_v3  ;;  %v6643_v12 = vrot.slane %v11945_v25, 1  ;;  %v4694_v42 = vld [vmem:[#allocation2 + $0x140] sm:$0x1] }
 0x335   :  { %v4023_v63 = vmax.f32 %v3963_v30, 0.0  ;;  %v4026_v18 = vmax.f32 %v3966_v51, 0.0  ;;  %5797 = vrot.lane.b32.xlu1 %v5715_v48, %s12418_s0  ;;  %v6068_v59 = vsel %vm6029_vm7, %v6066_v62, %v6067_v37  ;;  %v4025_v56 = vmax.f32 %v3965_v53, 0.0  ;;  %v11949_v39 = vld [vmem:[#allocation2 + $0xc8] ss:$0 sps:$4 sm:$0x11]  }
 0x336   :  { %v10464_v5 = vpack.c.bf16 %v4024_v43, %v4024_v43  ;;  %6150 = vrot.lane.b32.xlu0 %v6068_v59, %s12419_s18  ;;  %v17583_v10 = vmax.f32 %v17512_v34, %v3577_v19  ;;  %v6642_v4 = vrot.slane %v10121_v20, 1  ;;  %v10185_v52 = vcombine.low %v5091_v22, %v4964_v3  ;;  %v11951_v36 = vld [vmem:[#allocation2 + $0xa4] ss:$0 sps:$4 sm:$0x11]   ;;  %v5156_v27 = vld [vmem:[#allocation2 + $0xc0] sm:$0xf] }
 0x337   :  { %v10463_v44 = vpack.c.bf16 %v4023_v63, %v4023_v63  ;;  %v10466_v17 = vpack.c.bf16 %v4026_v18, %v4026_v18  ;;  %v10465_v9 = vpack.c.bf16 %v4025_v56, %v4025_v56  ;;  %v3840_v38 = vrot.slane %v17586_v23, 1  ;;  %v4774_v25 = vld [vmem:[#allocation2 + $0xa0] sm:$0xf]  ;;  %v4837_v53 = vld [vmem:[#allocation2 + $0x9c] sm:$0xe] }
 0x338   :  { %v4444_v49 = vrot.slane %v10464_v5, 7  ;;  %v3837_v8 = vrot.slane %v17583_v10, 1  ;;  %v6644_v57 = vsel %vm3776_vm13, %v6642_v4, %v6643_v12  ;;  %v6994_v14 = vrot.slane %v10185_v52, 2  ;;  %v5220_v30 = vld [vmem:[#allocation2 + $0xc0] sm:$0xe] }
 0x339   :  { %v4442_v55 = vrot.slane %v10463_v44, 7  ;;  %v4449_v34 = vrot.slane %v10466_v17, 7  ;;  %6374 = vrot.lane.b32.xlu1 %v10077_v24, %s12420_s23  ;;  %v4447_v13 = vrot.slane %v10465_v9, 7  ;;  %v6995_v26 = vrot.slane %v11947_v2, 2  ;;  %v4901_v56 = vld [vmem:[#allocation2 + $0x9c] sm:$0xc] }
 0x33a   :  { %v4446_v7 = vrot.slane %v4444_v49, 4  ;;  %6726 = vrot.lane.b32.xlu0 %v6644_v57, %s12421_s24  ;;  %v10237_v54 = vcombine.low %v5156_v27, %v5157_v21  ;;  %v3697_v15 = vmax.f32 %v17537_v47, %v3580_v6  ;;  %v3699_v31 = vmax.f32 %v3580_v6, %v17575_v45  ;;  %v11953_v63 = vld [vmem:[#allocation2 + $0xa4] ss:$0 sps:$4 sm:$0x33]  }
 0x33b   :  { %v4443_v3 = vrot.slane %v4442_v55, 4  ;;  %v4451_v32 = vrot.slane %v4449_v34, 4  ;;  %4687 = vst.msk [vmem:[#allocation2 + $0x12c] sm:$0xe] %vm4593_vm2, %v4442_v55  ;;  %v4448_v11 = vrot.slane %v4447_v13, 4  ;;  %v6996_v37 = vsel %vm6029_vm7, %v6994_v14, %v6995_v26 }
 0x33c   :  { %v4690_v40 = vsel %vm17215_vm3, %v4446_v7, %v4689_v46  ;;  %4692 = vst.msk [vmem:[#allocation2 + $0x138] sm:$0xe] %vm4593_vm2, %v4447_v13  ;;  %v3838_v62 = vrot.slane %v3697_v15, 1  ;;  %v10281_v58 = vcombine.low %v5220_v30, %v5157_v21  ;;  %v3841_v48 = vrot.slane %v3699_v31, 1  ;;  %v4966_v46 = vld [vmem:[#allocation2 + $0xb8] sm:$0xf] }
 0x33d   :  { %v4445_v51 = vsel %vm17220_vm5, %v4443_v3, %v4444_v49  ;;  %4691 = vst [vmem:[#allocation2 + $0x134] sm:$0x1] %v4690_v40  ;;  %v4695_v47 = vsel %vm17215_vm3, %v4451_v32, %v4694_v42  ;;  %7078 = vrot.lane.b32.xlu1 %v6996_v37, %s12422_s27  ;;  %v4450_v43 = vsel %vm17220_vm5, %v4448_v11, %v4449_v34  ;;  %v7571_v24 = vrot.slane %v11949_v39, 1  ;;  %v4965_v49 = vld [vmem:[#allocation2 + $0xb4] sm:$0xf] }
 0x33e   :  { %4688 = vst.msk [vmem:[#allocation2 + $0x130] sm:$0xf] %vm4047_vm11, %v4445_v51  ;;  %4696 = vst [vmem:[#allocation2 + $0x140] sm:$0x1] %v4695_v47  ;;  %7302 = vrot.lane.b32.xlu0 %v10237_v54, %s12423_s29  ;;  %v9963_v41 = vcombine.low %v4837_v53, %v4774_v25  ;;  %v3839_v18 = vsel %vm3776_vm13, %v3837_v8, %v3838_v62  ;;  %v3968_v59 = vmax.f32 %v3697_v15, %v3838_v62  ;;  %v4699_v54 = vld [vmem:[#allocation2 + $0x14c] sm:$0x1] }
 0x33f   :  { %4693 = vst.msk [vmem:[#allocation2 + $0x13c] sm:$0xf] %vm4047_vm11, %v4450_v43  ;;  %v7570_v20 = vrot.slane %v10281_v58, 1  ;;  %v5717_v2 = vrot.slane %v11951_v36, 1  ;;  %v3842_v12 = vsel %vm3776_vm13, %v3840_v38, %v3841_v48  ;;  %v3967_v22 = vmax.f32 %v17583_v10, %v3839_v18  ;;  %v4704_v30 = vld [vmem:[#allocation2 + $0x158] sm:$0x1] }
 0x340   :  { %v3970_v44 = vmax.f32 %v3699_v31, %v3841_v48  ;;  %v5716_v17 = vrot.slane %v9963_v41, 1  ;;  %v3969_v4 = vmax.f32 %v17586_v23, %v3842_v12  ;;  %v4028_v21 = vmax.f32 %v3968_v59, 0.0  ;;  %v11956_v55 = vld [vmem:[#allocation2 + $0xbc] ss:$0 sps:$4 sm:$0x11]  }
 0x341   :  { %v7572_v6 = vsel %vm3776_vm13, %v7570_v20, %v7571_v24  ;;  %v10027_v9 = vcombine.low %v4901_v56, %v4774_v25  ;;  %v4027_v42 = vmax.f32 %v3967_v22, 0.0  ;;  %v6070_v39 = vrot.slane %v11953_v63, 2  ;;  %v5029_v23 = vld [vmem:[#allocation2 + $0xb4] sm:$0xe]  ;;  %v4776_v56 = vld [vmem:[#allocation2 + $0xac] sm:$0xf] }
 0x342   :  { %v4030_v8 = vmax.f32 %v3970_v44, 0.0  ;;  %7654 = vrot.lane.b32.xlu1 %v7572_v6, %s12424_s5  ;;  %v5718_v52 = vsel %vm3776_vm13, %v5716_v17, %v5717_v2  ;;  %v4029_v34 = vmax.f32 %v3969_v4, 0.0  ;;  %v10468_v10 = vpack.c.bf16 %v4028_v21, %v4028_v21  ;;  %v11958_v27 = vld [vmem:[#allocation2 + $0xbc] ss:$0 sps:$4 sm:$0x33]  }
 0x343   :  { %5799 = vrot.lane.b32.xlu0 %v5718_v52, %s12418_s0  ;;  %v6069_v57 = vrot.slane %v10027_v9, 2  ;;  %v10078_v38 = vcombine.low %v4965_v49, %v4966_v46  ;;  %v10467_v7 = vpack.c.bf16 %v4027_v42, %v4027_v42  ;;  %v10123_v25 = vcombine.low %v5029_v23, %v4966_v46  ;;  %v11961_v11 = vld [vmem:[#allocation2 + $0xd4] ss:$0 sps:$4 sm:$0x11]   ;;  %v5093_v43 = vld [vmem:[#allocation2 + $0xb4] sm:$0xc] }
 0x344   :  { %v10470_v13 = vpack.c.bf16 %v4030_v8, %v4030_v8  ;;  %v10469_v3 = vpack.c.bf16 %v4029_v34, %v4029_v34  ;;  %v4454_v32 = vrot.slane %v10468_v10, 7  ;;  %v11963_v51 = vld [vmem:[#allocation2 + $0xb0] ss:$0 sps:$4 sm:$0x11]   ;;  %v6646_v53 = vrot.slane %v11956_v55, 1 }
 0x345   :  { %v6071_v15 = vsel %vm6029_vm7, %v6069_v57, %v6070_v39  ;;  %v4452_v37 = vrot.slane %v10467_v7, 7  ;;  %v6645_v58 = vrot.slane %v10123_v25, 1  ;;  %v10187_v41 = vcombine.low %v5093_v43, %v4966_v46  ;;  %v4839_v4 = vld [vmem:[#allocation2 + $0xa8] sm:$0xe]  ;;  %v4714_v43 = vld [vmem:[#allocation2 + $0x170] sm:$0x1] }
 0x346   :  { %v17592_v19 = vpop.f32.mrf.mxu0  ;;  %v4459_v31 = vrot.slane %v10470_v13, 7  ;;  %6152 = vrot.lane.b32.xlu1 %v6071_v15, %s12419_s18  ;;  %v4456_v47 = vrot.slane %v4454_v32, 4  ;;  %v4457_v62 = vrot.slane %v10469_v3, 7  ;;  %v6998_v63 = vrot.slane %v11958_v27, 2  ;;  %v4903_v55 = vld [vmem:[#allocation2 + $0xa8] sm:$0xc] }
 0x347   :  { %6376 = vrot.lane.b32.xlu0 %v10078_v38, %s12420_s23  ;;  %v4453_v48 = vrot.slane %v4452_v37, 4  ;;  %4697 = vst.msk [vmem:[#allocation2 + $0x144] sm:$0xe] %vm4593_vm2, %v4452_v37  ;;  %v6647_v20 = vsel %vm3776_vm13, %v6645_v58, %v6646_v53  ;;  %v6997_v17 = vrot.slane %v10187_v41, 2  ;;  %v7573_v6 = vrot.slane %v10283_v60, 1 }
 0x348   :  { %v3593_v61 = vpop.f32.mrf.mxu0  ;;  %v4461_v24 = vrot.slane %v4459_v31, 4  ;;  %v4458_v18 = vrot.slane %v4457_v62, 4  ;;  %v4700_v59 = vsel %vm17215_vm3, %v4456_v47, %v4699_v54  ;;  %4702 = vst.msk [vmem:[#allocation2 + $0x150] sm:$0xe] %vm4593_vm2, %v4457_v62  ;;  %v7574_v9 = vrot.slane %v11961_v11, 1 }
 0x349   :  { %v17623_v14 = vmax.f32 %v17553_v0, %v3593_v61  ;;  %v17626_v26 = vmax.f32 %v3593_v61, %v17592_v19  ;;  %v4455_v22 = vsel %vm17220_vm5, %v4453_v48, %v4454_v32  ;;  %4701 = vst [vmem:[#allocation2 + $0x14c] sm:$0x1] %v4700_v59  ;;  %v11965_v49 = vld [vmem:[#allocation2 + $0xb0] ss:$0 sps:$4 sm:$0x33]   ;;  %v6999_v42 = vsel %vm6029_vm7, %v6997_v17, %v6998_v63 }
 0x34a   :  { %v17613_v5 = vpop.f32.mrf.mxu0  ;;  %v4705_v44 = vsel %vm17215_vm3, %v4461_v24, %v4704_v30  ;;  %6728 = vrot.lane.b32.xlu1 %v6647_v20, %s12421_s24  ;;  %v4460_v21 = vsel %vm17220_vm5, %v4458_v18, %v4459_v31  ;;  %4698 = vst.msk [vmem:[#allocation2 + $0x148] sm:$0xf] %vm4047_vm11, %v4455_v22  ;;  %v9965_v52 = vcombine.low %v4839_v4, %v4776_v56  ;;  %v5720_v39 = vrot.slane %v11963_v51, 1  ;;  %v17667_v54 = vld [vmem:[#allocation2 + $0xc4] sm:$0xf] }
 0x34b   :  { %v3843_v0 = vrot.slane %v17623_v14, 1  ;;  %v3846_v61 = vrot.slane %v17626_v26, 1  ;;  %4706 = vst [vmem:[#allocation2 + $0x158] sm:$0x1] %v4705_v44  ;;  %4703 = vst.msk [vmem:[#allocation2 + $0x154] sm:$0xf] %vm4047_vm11, %v4460_v21  ;;  %7080 = vrot.lane.b32.xlu0 %v6999_v42, %s12422_s27  ;;  %v7575_v57 = vsel %vm3776_vm13, %v7573_v6, %v7574_v9  ;;  %v10029_v38 = vcombine.low %v4903_v55, %v4776_v56 }
 0x34c   :  { %v3596_v36 = vpop.f32.mrf.mxu0  ;;  %v5719_v7 = vrot.slane %v9965_v52, 1  ;;  %v6073_v32 = vrot.slane %v11965_v49, 2  ;;  %v11968_v37 = vld [vmem:[#allocation2 + $0xc8] ss:$0 sps:$4 sm:$0x11]  }
 0x34d   :  { %v3701_v2 = vmax.f32 %v17575_v45, %v3596_v36  ;;  %v3703_v46 = vmax.f32 %v3596_v36, %v17613_v5  ;;  %v6072_v3 = vrot.slane %v10029_v38, 2  ;;  %v4709_v51 = vld [vmem:[#allocation2 + $0x164] sm:$0x1]  ;;  %v5031_v62 = vld [vmem:[#allocation2 + $0xc0] sm:$0xe]  ;;  %v6649_v18 = vrot.slane %v11968_v37, 1 }
 0x34e   :  { %v17629_v40 = vpop.f32.mrf.mxu0  ;;  %7304 = vrot.lane.b32.xlu1 %v10238_v16, %s12423_s29  ;;  %v5721_v11 = vsel %vm3776_vm13, %v5719_v7, %v5720_v39  ;;  %v4967_v16 = vld [vmem:[#allocation2 + $0xc0] sm:$0xf]  ;;  %v10125_v24 = vcombine.low %v5031_v62, %v17667_v54  ;;  %v5161_v52 = vld [vmem:[#allocation2 + $0xdc] sm:$0xf]  ;;  %v4778_v7 = vld [vmem:[#allocation2 + $0xb8] sm:$0xf] }
 0x34f   :  { %v3844_v45 = vrot.slane %v3701_v2, 1  ;;  %v3847_v8 = vrot.slane %v3703_v46, 1  ;;  %7656 = vrot.lane.b32.xlu0 %v7575_v57, %s12424_s5  ;;  %v6074_v35 = vsel %vm6029_vm7, %v6072_v3, %v6073_v32  ;;  %v10079_v47 = vcombine.low %v4967_v16, %v17667_v54  ;;  %v5095_v22 = vld [vmem:[#allocation2 + $0xc0] sm:$0xc]  ;;  %v5224_v57 = vld [vmem:[#allocation2 + $0xd8] sm:$0xe] }
 0x350   :  { %v3609_v12 = vpop.f32.mrf.mxu0  ;;  %v6648_v56 = vrot.slane %v10125_v24, 1  ;;  %v10189_v21 = vcombine.low %v5095_v22, %v17667_v54  ;;  %v11972_v6 = vld [vmem:[#allocation2 + $0xe0] ss:$0 sps:$4 sm:$0x11]   ;;  %v4969_v24 = vld [vmem:[#allocation2 + $0xcc] sm:$0xf] }
 0x351   :  { %v3845_v34 = vsel %vm3776_vm13, %v3843_v0, %v3844_v45  ;;  %v3972_v10 = vmax.f32 %v3701_v2, %v3844_v45  ;;  %v3848_v60 = vsel %vm3776_vm13, %v3846_v61, %v3847_v8  ;;  %v3974_v36 = vmax.f32 %v3703_v46, %v3847_v8  ;;  %v5160_v45 = vld [vmem:[#allocation2 + $0xd8] sm:$0xf]  ;;  %v4905_v22 = vld [vmem:[#allocation2 + $0xb4] sm:$0xc] }
 0x352   :  { %v17658_v50 = vpop.f32.mrf.mxu0  ;;  %v3971_v23 = vmax.f32 %v17623_v14, %v3845_v34  ;;  %v3973_v13 = vmax.f32 %v17626_v26, %v3848_v60  ;;  %v17671_v14 = vmax.f32 %v17592_v19, %v3609_v12  ;;  %v17676_v29 = vmax.f32 %v3609_v12, %v17629_v40  ;;  %5801 = vrot.lane.b32.xlu1 %v5721_v11, %s12418_s0 }
 0x353   :  { %v4032_v27 = vmax.f32 %v3972_v10, 0.0  ;;  %v4034_v25 = vmax.f32 %v3974_v36, 0.0  ;;  %6154 = vrot.lane.b32.xlu0 %v6074_v35, %s12419_s18  ;;  %v6650_v42 = vsel %vm3776_vm13, %v6648_v56, %v6649_v18  ;;  %v7000_v32 = vrot.slane %v10189_v21, 2 }
 0x354   :  { %v4031_v15 = vmax.f32 %v3971_v23, 0.0  ;;  %v4033_v31 = vmax.f32 %v3973_v13, 0.0  ;;  %v3612_v26 = vpop.f32.mrf.mxu0  ;;  %v3849_v19 = vrot.slane %v17671_v14, 1  ;;  %v3852_v48 = vrot.slane %v17676_v29, 1 }
 0x355   :  { %v10472_v30 = vpack.c.bf16 %v4032_v27, %v4032_v27  ;;  %v10474_v61 = vpack.c.bf16 %v4034_v25, %v4034_v25  ;;  %v3705_v59 = vmax.f32 %v17613_v5, %v3612_v26  ;;  %v3707_v12 = vmax.f32 %v3612_v26, %v17658_v50  ;;  %v11969_v5 = vld [vmem:[#allocation2 + $0xc8] ss:$0 sps:$4 sm:$0x33]  }
 0x356   :  { %v10471_v0 = vpack.c.bf16 %v4031_v15, %v4031_v15  ;;  %v10473_v58 = vpack.c.bf16 %v4033_v31, %v4033_v31  ;;  %6378 = vrot.lane.b32.xlu1 %v10079_v47, %s12420_s23  ;;  %v7001_v54 = vrot.slane %v11969_v5, 2  ;;  %v11974_v15 = vld [vmem:[#allocation2 + $0xbc] ss:$0 sps:$4 sm:$0x11]   ;;  %v10239_v37 = vcombine.low %v5160_v45, %v5161_v52 }
 0x357   :  { %v4464_v53 = vrot.slane %v10472_v30, 7  ;;  %v4469_v63 = vrot.slane %v10474_v61, 7  ;;  %v3850_v4 = vrot.slane %v3705_v59, 1  ;;  %v3853_v8 = vrot.slane %v3707_v12, 1  ;;  %6730 = vrot.lane.b32.xlu0 %v6650_v42, %s12421_s24  ;;  %v4841_v30 = vld [vmem:[#allocation2 + $0xb4] sm:$0xe] }
 0x358   :  { %v4462_v41 = vrot.slane %v10471_v0, 7  ;;  %v4467_v2 = vrot.slane %v10473_v58, 7  ;;  %v10285_v31 = vcombine.low %v5224_v57, %v5161_v52  ;;  %v7577_v26 = vrot.slane %v11972_v6, 1  ;;  %v11976_v0 = vld [vmem:[#allocation2 + $0xbc] ss:$0 sps:$4 sm:$0x33]  }
 0x359   :  { %v4466_v20 = vrot.slane %v4464_v53, 4  ;;  %v4471_v46 = vrot.slane %v4469_v63, 4  ;;  %v3851_v34 = vsel %vm3776_vm13, %v3849_v19, %v3850_v4  ;;  %v3976_v10 = vmax.f32 %v3705_v59, %v3850_v4  ;;  %v4719_v19 = vld [vmem:[#allocation2 + $0x17c] sm:$0x1]  ;;  %v5097_v52 = vld [vmem:[#allocation2 + $0xcc] sm:$0xc] }
 0x35a   :  { %v17686_v44 = vpop.f32.mrf.mxu0  ;;  %v4463_v17 = vrot.slane %v4462_v41, 4  ;;  %4707 = vst.msk [vmem:[#allocation2 + $0x15c] sm:$0xe] %vm4593_vm2, %v4462_v41  ;;  %v4468_v9 = vrot.slane %v4467_v2, 4  ;;  %4712 = vst.msk [vmem:[#allocation2 + $0x168] sm:$0xe] %vm4593_vm2, %v4467_v2  ;;  %v3854_v60 = vsel %vm3776_vm13, %v3852_v48, %v3853_v8  ;;  %v3975_v23 = vmax.f32 %v17671_v14, %v3851_v34 }
 0x35b   :  { %v4710_v49 = vsel %vm17215_vm3, %v4466_v20, %v4709_v51  ;;  %v4715_v55 = vsel %vm17215_vm3, %v4471_v46, %v4714_v43  ;;  %v3978_v36 = vmax.f32 %v3707_v12, %v3853_v8  ;;  %v3977_v27 = vmax.f32 %v17676_v29, %v3854_v60  ;;  %7306 = vrot.lane.b32.xlu0 %v10239_v37, %s12423_s29  ;;  %v4724_v43 = vld [vmem:[#allocation2 + $0x188] sm:$0x1]  ;;  %v11978_v20 = vld [vmem:[#allocation2 + $0xd4] ss:$0 sps:$4 sm:$0x11]  }
 0x35c   :  { %v4465_v39 = vsel %vm17220_vm5, %v4463_v17, %v4464_v53  ;;  %4711 = vst [vmem:[#allocation2 + $0x164] sm:$0x1] %v4710_v49  ;;  %v4470_v38 = vsel %vm17220_vm5, %v4468_v9, %v4469_v63  ;;  %4716 = vst [vmem:[#allocation2 + $0x170] sm:$0x1] %v4715_v55  ;;  %v3625_v13 = vpop.f32.mrf.mxu0  ;;  %v4036_v3 = vmax.f32 %v3976_v10, 0.0  ;;  %v4035_v25 = vmax.f32 %v3975_v23, 0.0 }
 0x35d   :  { %4708 = vst.msk [vmem:[#allocation2 + $0x160] sm:$0xf] %vm4047_vm11, %v4465_v39  ;;  %4713 = vst.msk [vmem:[#allocation2 + $0x16c] sm:$0xf] %vm4047_vm11, %v4470_v38  ;;  %v4038_v11 = vmax.f32 %v3978_v36, 0.0  ;;  %v4037_v35 = vmax.f32 %v3977_v27, 0.0  ;;  %v7002_v14 = vsel %vm6029_vm7, %v7000_v32, %v7001_v54  ;;  %v9967_v47 = vcombine.low %v4841_v30, %v4778_v7 }
 0x35e   :  { %v10476_v16 = vpack.c.bf16 %v4036_v3, %v4036_v3  ;;  %v10475_v61 = vpack.c.bf16 %v4035_v25, %v4035_v25  ;;  %7082 = vrot.lane.b32.xlu1 %v7002_v14, %s12422_s27  ;;  %v7576_v29 = vrot.slane %v10285_v31, 1  ;;  %v17711_v62 = vpop.f32.mrf.mxu0  ;;  %v5723_v48 = vrot.slane %v11974_v15, 1  ;;  %v4970_v17 = vld [vmem:[#allocation2 + $0xd0] sm:$0xf]  ;;  %v5033_v9 = vld [vmem:[#allocation2 + $0xcc] sm:$0xe] }
 0x35f   :  { %v10478_v51 = vpack.c.bf16 %v4038_v11, %v4038_v11  ;;  %v10477_v58 = vpack.c.bf16 %v4037_v35, %v4037_v35  ;;  %v5722_v59 = vrot.slane %v9967_v47, 1  ;;  %v17715_v12 = vmax.f32 %v17629_v40, %v3625_v13  ;;  %v11979_v46 = vld [vmem:[#allocation2 + $0xd4] ss:$0 sps:$4 sm:$0x33]   ;;  %v5162_v3 = vld [vmem:[#allocation2 + $0xe4] sm:$0xf] }
 0x360   :  { %v4474_v53 = vrot.slane %v10476_v16, 7  ;;  %v4472_v41 = vrot.slane %v10475_v61, 7  ;;  %v7578_v18 = vsel %vm3776_vm13, %v7576_v29, %v7577_v26  ;;  %v10031_v45 = vcombine.low %v4905_v22, %v4778_v7  ;;  %v3628_v6 = vpop.f32.mrf.mxu0  ;;  %v5163_v32 = vld [vmem:[#allocation2 + $0xe8] sm:$0xf]  ;;  %v5226_v54 = vld [vmem:[#allocation2 + $0xe4] sm:$0xe] }
 0x361   :  { %v4479_v63 = vrot.slane %v10478_v51, 7  ;;  %v4477_v56 = vrot.slane %v10477_v58, 7  ;;  %v5724_v5 = vsel %vm3776_vm13, %v5722_v59, %v5723_v48  ;;  %v3710_v40 = vmax.f32 %v3625_v13, %v17686_v44  ;;  %v11982_v35 = vld [vmem:[#allocation2 + $0xec] ss:$0 sps:$4 sm:$0x11]  }
 0x362   :  { %v4476_v2 = vrot.slane %v4474_v53, 4  ;;  %v4473_v4 = vrot.slane %v4472_v41, 4  ;;  %4717 = vst.msk [vmem:[#allocation2 + $0x174] sm:$0xe] %vm4593_vm2, %v4472_v41  ;;  %7658 = vrot.lane.b32.xlu1 %v7578_v18, %s12424_s5  ;;  %5803 = vrot.lane.b32.xlu0 %v5724_v5, %s12418_s0  ;;  %v6076_v8 = vrot.slane %v11976_v0, 2  ;;  %v6075_v34 = vrot.slane %v10031_v45, 2 }
 0x363   :  { %v4481_v21 = vrot.slane %v4479_v63, 4  ;;  %v4478_v49 = vrot.slane %v4477_v56, 4  ;;  %4722 = vst.msk [vmem:[#allocation2 + $0x180] sm:$0xe] %vm4593_vm2, %v4477_v56  ;;  %v10080_v10 = vcombine.low %v4969_v24, %v4970_v17  ;;  %v3855_v38 = vrot.slane %v17715_v12, 1 }
 0x364   :  { %v4720_v42 = vsel %vm17215_vm3, %v4476_v2, %v4719_v19  ;;  %v4475_v39 = vsel %vm17220_vm5, %v4473_v4, %v4474_v53  ;;  %v3709_v60 = vmax.f32 %v17658_v50, %v3628_v6  ;;  %v3711_v23 = vmax.f32 %v3628_v6, %v17711_v62  ;;  %v4780_v24 = vld [vmem:[#allocation2 + $0xf4] sm:$0xf]  ;;  %v4843_v59 = vld [vmem:[#allocation2 + $0xf0] sm:$0xe] }
 0x365   :  { %4721 = vst [vmem:[#allocation2 + $0x17c] sm:$0x1] %v4720_v42  ;;  %v4725_v55 = vsel %vm17215_vm3, %v4481_v21, %v4724_v43  ;;  %v4480_v57 = vsel %vm17220_vm5, %v4478_v49, %v4479_v63  ;;  %4718 = vst.msk [vmem:[#allocation2 + $0x178] sm:$0xf] %vm4047_vm11, %v4475_v39  ;;  %v6077_v36 = vsel %vm6029_vm7, %v6075_v34, %v6076_v8  ;;  %v6652_v13 = vrot.slane %v11978_v20, 1 }
 0x366   :  { %4726 = vst [vmem:[#allocation2 + $0x188] sm:$0x1] %v4725_v55  ;;  %4723 = vst.msk [vmem:[#allocation2 + $0x184] sm:$0xf] %vm4047_vm11, %v4480_v57  ;;  %v10127_v7 = vcombine.low %v5033_v9, %v4970_v17  ;;  %v10191_v27 = vcombine.low %v5097_v52, %v4970_v17  ;;  %v10584_v15 = vpop.f32.mrf.mxu0  ;;  %v3858_v25 = vrot.slane %v3710_v40, 1  ;;  %6156 = vrot.lane.b32.xlu1 %v6077_v36, %s12419_s18  ;;  %6380 = vrot.lane.b32.xlu0 %v10080_v10, %s12420_s23 }
 0x367   :  { %v3856_v11 = vrot.slane %v3709_v60, 1  ;;  %v3859_v50 = vrot.slane %v3711_v23, 1  ;;  %v7004_v37 = vrot.slane %v11979_v46, 2  ;;  %v10240_v43 = vcombine.low %v5162_v3, %v5163_v32  ;;  %v4907_v46 = vld [vmem:[#allocation2 + $0xf0] sm:$0xc] }
 0x368   :  { %v6651_v31 = vrot.slane %v10127_v7, 1  ;;  %v7003_v30 = vrot.slane %v10191_v27, 2  ;;  %v3641_v47 = vpop.f32.mrf.mxu0  ;;  %v10287_v48 = vcombine.low %v5226_v54, %v5163_v32  ;;  %v7580_v18 = vrot.slane %v11982_v35, 1  ;;  %v11986_v4 = vld [vmem:[#allocation2 + $0xf8] ss:$0 sps:$4 sm:$0x33]  }
 0x369   :  { %v3857_v16 = vsel %vm3776_vm13, %v3855_v38, %v3856_v11  ;;  %v3860_v14 = vsel %vm3776_vm13, %v3858_v25, %v3859_v50  ;;  %v3980_v26 = vmax.f32 %v3709_v60, %v3856_v11  ;;  %v3982_v0 = vmax.f32 %v3711_v23, %v3859_v50  ;;  %v4729_v6 = vld [vmem:[#allocation2 + $0x194] sm:$0x1]  ;;  %v4734_v8 = vld [vmem:[#allocation2 + $0x1a0] sm:$0x1]  ;;  %v4972_v7 = vld [vmem:[#allocation2 + $0x10c] sm:$0xf] }
 0x36a   :  { %v3979_v61 = vmax.f32 %v17715_v12, %v3857_v16  ;;  %v3981_v51 = vmax.f32 %v3710_v40, %v3860_v14  ;;  %v6653_v19 = vsel %vm3776_vm13, %v6651_v31, %v6652_v13  ;;  %v7005_v29 = vsel %vm6029_vm7, %v7003_v30, %v7004_v37  ;;  %v11984_v12 = vld [vmem:[#allocation2 + $0xf8] ss:$0 sps:$4 sm:$0x11]   ;;  %v10585_v21 = vpop.f32.mrf.mxu0  ;;  %v4971_v32 = vld [vmem:[#allocation2 + $0x108] sm:$0xf] }
 0x36b   :  { %v4040_v58 = vmax.f32 %v3980_v26, 0.0  ;;  %v4042_v53 = vmax.f32 %v3982_v0, 0.0  ;;  %6732 = vrot.lane.b32.xlu1 %v6653_v19, %s12421_s24  ;;  %7084 = vrot.lane.b32.xlu0 %v7005_v29, %s12422_s27  ;;  %v7579_v56 = vrot.slane %v10287_v48, 1  ;;  %v17749_v49 = vmax.f32 %v17686_v44, %v3641_v47  ;;  %v11990_v54 = vld [vmem:[#allocation2 + $0x110] ss:$0 sps:$4 sm:$0x11]  }
 0x36c   :  { %v4039_v41 = vmax.f32 %v3979_v61, 0.0  ;;  %v4041_v63 = vmax.f32 %v3981_v51, 0.0  ;;  %v17752_v52 = vmax.f32 %v3641_v47, %v10584_v15  ;;  %v9969_v39 = vcombine.low %v4843_v59, %v4780_v24  ;;  %v3644_v36 = vpop.f32.mrf.mxu0  ;;  %v5035_v50 = vld [vmem:[#allocation2 + $0x108] sm:$0xe]  ;;  %v5165_v14 = vld [vmem:[#allocation2 + $0x124] sm:$0xf] }
 0x36d   :  { %v10480_v20 = vpack.c.bf16 %v4040_v58, %v4040_v58  ;;  %v10482_v2 = vpack.c.bf16 %v4042_v53, %v4042_v53  ;;  %v7581_v9 = vsel %vm3776_vm13, %v7579_v56, %v7580_v18  ;;  %v5726_v10 = vrot.slane %v11984_v12, 1  ;;  %v11992_v37 = vld [vmem:[#allocation2 + $0x110] ss:$0 sps:$4 sm:$0x33]   ;;  %v5099_v16 = vld [vmem:[#allocation2 + $0x108] sm:$0xc] }
 0x36e   :  { %v10479_v22 = vpack.c.bf16 %v4039_v41, %v4039_v41  ;;  %v10481_v17 = vpack.c.bf16 %v4041_v63, %v4041_v63  ;;  %v10033_v57 = vcombine.low %v4907_v46, %v4780_v24  ;;  %v5725_v44 = vrot.slane %v9969_v39, 1  ;;  %v5164_v19 = vld [vmem:[#allocation2 + $0x120] sm:$0xf]  ;;  %v4845_v47 = vld [vmem:[#allocation2 + $0xfc] sm:$0xe] }
 0x36f   :  { %v4484_v5 = vrot.slane %v10480_v20, 7  ;;  %v4489_v45 = vrot.slane %v10482_v2, 7  ;;  %7308 = vrot.lane.b32.xlu1 %v10240_v43, %s12423_s29  ;;  %7660 = vrot.lane.b32.xlu0 %v7581_v9, %s12424_s5  ;;  %v6079_v23 = vrot.slane %v11986_v4, 2  ;;  %v3713_v30 = vmax.f32 %v17711_v62, %v3644_v36  ;;  %v4782_v29 = vld [vmem:[#allocation2 + $0x100] sm:$0xf] }
 0x370   :  { %v4482_v42 = vrot.slane %v10479_v22, 7  ;;  %v4487_v40 = vrot.slane %v10481_v17, 7  ;;  %v6078_v3 = vrot.slane %v10033_v57, 2  ;;  %v5727_v11 = vsel %vm3776_vm13, %v5725_v44, %v5726_v10  ;;  %v5228_v24 = vld [vmem:[#allocation2 + $0x120] sm:$0xe] }
 0x371   :  { %v4486_v55 = vrot.slane %v4484_v5, 4  ;;  %v4491_v34 = vrot.slane %v4489_v45, 4  ;;  %v3715_v35 = vmax.f32 %v3644_v36, %v10585_v21  ;;  %v3861_v26 = vrot.slane %v17749_v49, 1  ;;  %v11999_v59 = vld [vmem:[#allocation2 + $0x104] ss:$0 sps:$4 sm:$0x11]  }
 0x372   :  { %v4483_v38 = vrot.slane %v4482_v42, 4  ;;  %v4488_v60 = vrot.slane %v4487_v40, 4  ;;  %4727 = vst.msk [vmem:[#allocation2 + $0x18c] sm:$0xe] %vm4593_vm2, %v4482_v42  ;;  %4732 = vst.msk [vmem:[#allocation2 + $0x198] sm:$0xe] %vm4593_vm2, %v4487_v40  ;;  %v6080_v31 = vsel %vm6029_vm7, %v6078_v3, %v6079_v23  ;;  %v10081_v61 = vcombine.low %v4971_v32, %v4972_v7 }
 0x373   :  { %v4730_v13 = vsel %vm17215_vm3, %v4486_v55, %v4729_v6  ;;  %v4735_v27 = vsel %vm17215_vm3, %v4491_v34, %v4734_v8  ;;  %5805 = vrot.lane.b32.xlu1 %v5727_v11, %s12418_s0  ;;  %v3864_v0 = vrot.slane %v17752_v52, 1  ;;  %6158 = vrot.lane.b32.xlu0 %v6080_v31, %s12419_s18  ;;  %v10129_v51 = vcombine.low %v5035_v50, %v4972_v7  ;;  %v11996_v22 = vld [vmem:[#allocation2 + $0x128] ss:$0 sps:$4 sm:$0x11]   ;;  %v17780_v8 = vpop.permute.xlu0 %5773  ;;  %v4739_v36 = vld [vmem:[#allocation2 + $0x1ac] sm:$0x1] }
 0x374   :  { %v4485_v15 = vsel %vm17220_vm5, %v4483_v38, %v4484_v5  ;;  %v4490_v25 = vsel %vm17220_vm5, %v4488_v60, %v4489_v45  ;;  %4731 = vst [vmem:[#allocation2 + $0x194] sm:$0x1] %v4730_v13  ;;  %4736 = vst [vmem:[#allocation2 + $0x1a0] sm:$0x1] %v4735_v27  ;;  %v3862_v58 = vrot.slane %v3713_v30, 1  ;;  %v3865_v53 = vrot.slane %v3715_v35, 1 }
 0x375   :  { %4728 = vst.msk [vmem:[#allocation2 + $0x190] sm:$0xf] %vm4047_vm11, %v4485_v15  ;;  %4733 = vst.msk [vmem:[#allocation2 + $0x19c] sm:$0xf] %vm4047_vm11, %v4490_v25  ;;  %v6655_v43 = vrot.slane %v11990_v54, 1  ;;  %v10193_v48 = vcombine.low %v5099_v16, %v4972_v7  ;;  %v6654_v62 = vrot.slane %v10129_v51, 1  ;;  %v10241_v63 = vcombine.low %v5164_v19, %v5165_v14  ;;  %v17787_v25 = vpop.permute.xlu1 %5775 }
 0x376   :  { %v7007_v41 = vrot.slane %v11992_v37, 2  ;;  %v10289_v18 = vcombine.low %v5228_v24, %v5165_v14  ;;  %v3863_v20 = vsel %vm3776_vm13, %v3861_v26, %v3862_v58  ;;  %v3866_v2 = vsel %vm3776_vm13, %v3864_v0, %v3865_v53  ;;  %v4909_v5 = vld [vmem:[#allocation2 + $0xfc] sm:$0xc]  ;;  %v12001_v45 = vld [vmem:[#allocation2 + $0x104] ss:$0 sps:$4 sm:$0x33]  }
 0x377   :  { %v3984_v56 = vmax.f32 %v3713_v30, %v3862_v58  ;;  %v3986_v12 = vmax.f32 %v3715_v35, %v3865_v53  ;;  %6382 = vrot.lane.b32.xlu1 %v10081_v61, %s12420_s23  ;;  %v3983_v17 = vmax.f32 %v17749_v49, %v3863_v20  ;;  %v3985_v46 = vmax.f32 %v17752_v52, %v3866_v2  ;;  %v4974_v60 = vld [vmem:[#allocation2 + $0x118] sm:$0xf]  ;;  %v5037_v15 = vld [vmem:[#allocation2 + $0x114] sm:$0xe]  ;;  %v17790_v26 = vpop.permute.xlu0 %5777  ;;  %v5167_v53 = vld [vmem:[#allocation2 + $0x130] sm:$0xf] }
 0x378   :  { %v6656_v4 = vsel %vm3776_vm13, %v6654_v62, %v6655_v43  ;;  %v7006_v21 = vrot.slane %v10193_v48, 2  ;;  %v7582_v42 = vrot.slane %v10289_v18, 1  ;;  %v9971_v40 = vcombine.low %v4845_v47, %v4782_v29  ;;  %v4744_v37 = vld [vmem:[#allocation2 + $0x1b8] sm:$0x1]  ;;  %v5101_v14 = vld [vmem:[#allocation2 + $0x114] sm:$0xc] }
 0x379   :  { %v4044_v6 = vmax.f32 %v3984_v56, 0.0  ;;  %v4046_v9 = vmax.f32 %v3986_v12, 0.0  ;;  %6734 = vrot.lane.b32.xlu0 %v6656_v4, %s12421_s24  ;;  %v4043_v39 = vmax.f32 %v3983_v17, 0.0  ;;  %v4045_v55 = vmax.f32 %v3985_v46, 0.0  ;;  %v4973_v24 = vld [vmem:[#allocation2 + $0x114] sm:$0xf]  ;;  %v17809_v20 = vpop.permute.xlu1 %5779 }
 0x37a   :  { %v7008_v34 = vsel %vm6029_vm7, %v7006_v21, %v7007_v41  ;;  %v5729_v49 = vrot.slane %v11999_v59, 1  ;;  %v7583_v57 = vrot.slane %v11996_v22, 1  ;;  %v5728_v38 = vrot.slane %v9971_v40, 1  ;;  %v12005_v19 = vld [vmem:[#allocation2 + $0x11c] ss:$0 sps:$4 sm:$0x11]  }
 0x37b   :  { %v10484_v10 = vpack.c.bf16 %v4044_v6, %v4044_v6  ;;  %v10486_v52 = vpack.c.bf16 %v4046_v9, %v4046_v9  ;;  %7086 = vrot.lane.b32.xlu1 %v7008_v34, %s12422_s27  ;;  %v10483_v44 = vpack.c.bf16 %v4043_v39, %v4043_v39  ;;  %v10485_v23 = vpack.c.bf16 %v4045_v55, %v4045_v55  ;;  %v12008_v41 = vld [vmem:[#allocation2 + $0x11c] ss:$0 sps:$4 sm:$0x33]   ;;  %v4784_v18 = vld [vmem:[#allocation2 + $0x10c] sm:$0xf]  ;;  %v17807_v59 = vpop.permute.xlu0 %5781 }
 0x37c   :  { %v10035_v7 = vcombine.low %v4909_v5, %v4782_v29  ;;  %v6082_v13 = vrot.slane %v12001_v45, 2  ;;  %v7584_v32 = vsel %vm3776_vm13, %v7582_v42, %v7583_v57  ;;  %v5730_v54 = vsel %vm3776_vm13, %v5728_v38, %v5729_v49  ;;  %v12012_v12 = vld [vmem:[#allocation2 + $0x134] ss:$0 sps:$4 sm:$0x11]   ;;  %v4847_v22 = vld [vmem:[#allocation2 + $0x108] sm:$0xe] }
 0x37d   :  { %v4494_v27 = vrot.slane %v10484_v10, 7  ;;  %v4499_v3 = vrot.slane %v10486_v52, 7  ;;  %7310 = vrot.lane.b32.xlu0 %v10241_v63, %s12423_s29  ;;  %v4492_v11 = vrot.slane %v10483_v44, 7  ;;  %v4497_v50 = vrot.slane %v10485_v23, 7  ;;  %v5230_v63 = vld [vmem:[#allocation2 + $0x12c] sm:$0xe] }
 0x37e   :  { %v6081_v31 = vrot.slane %v10035_v7, 2  ;;  %v10131_v30 = vcombine.low %v5037_v15, %v4974_v60  ;;  %v10195_v29 = vcombine.low %v5101_v14, %v4974_v60  ;;  %v10082_v28 = vcombine.low %v4973_v24, %v4974_v60  ;;  %v5166_v4 = vld [vmem:[#allocation2 + $0x12c] sm:$0xf]  ;;  %v12024_v5 = vld [vmem:[%s19083_s2 + $0x48] ss:$0 sps:$4 sm:$0x11]  }
 0x37f   :  { %v4496_v35 = vrot.slane %v4494_v27, 4  ;;  %v4501_v16 = vrot.slane %v4499_v3, 4  ;;  %7662 = vrot.lane.b32.xlu1 %v7584_v32, %s12424_s5  ;;  %v4493_v0 = vrot.slane %v4492_v11, 4  ;;  %v4498_v61 = vrot.slane %v4497_v50, 4  ;;  %4737 = vst.msk [vmem:[#allocation2 + $0x1a4] sm:$0xe] %vm4593_vm2, %v4492_v11 }
 0x380   :  { %4742 = vst.msk [vmem:[#allocation2 + $0x1b0] sm:$0xe] %vm4593_vm2, %v4497_v50  ;;  %v6083_v51 = vsel %vm6029_vm7, %v6081_v31, %v6082_v13  ;;  %v6657_v62 = vrot.slane %v10131_v30, 1  ;;  %v6658_v33 = vrot.slane %v12005_v19, 1  ;;  %v7009_v2 = vrot.slane %v10195_v29, 2  ;;  %v12028_v7 = vld [vmem:[%s19083_s2 + $0x40] sm:$0xff]  }
 0x381   :  { %v4740_v47 = vsel %vm17215_vm3, %v4496_v35, %v4739_v36  ;;  %v4745_v58 = vsel %vm17215_vm3, %v4501_v16, %v4744_v37  ;;  %5807 = vrot.lane.b32.xlu0 %v5730_v54, %s12418_s0  ;;  %v4495_v43 = vsel %vm17220_vm5, %v4493_v0, %v4494_v27  ;;  %v4500_v48 = vsel %vm17220_vm5, %v4498_v61, %v4499_v3  ;;  %v12014_v45 = vld [vmem:[#allocation2 + $0x110] ss:$0 sps:$4 sm:$0x11]   ;;  %v4911_v6 = vld [vmem:[#allocation2 + $0x108] sm:$0xc] }
 0x382   :  { %4741 = vst [vmem:[#allocation2 + $0x1ac] sm:$0x1] %v4740_v47  ;;  %4746 = vst [vmem:[#allocation2 + $0x1b8] sm:$0x1] %v4745_v58  ;;  %v10291_v56 = vcombine.low %v5230_v63, %v5167_v53  ;;  %v6659_v17 = vsel %vm3776_vm13, %v6657_v62, %v6658_v33  ;;  %v7010_v46 = vrot.slane %v12008_v41, 2  ;;  %v9973_v21 = vcombine.low %v4847_v22, %v4784_v18 }
 0x383   :  { %4738 = vst.msk [vmem:[#allocation2 + $0x1a8] sm:$0xf] %vm4047_vm11, %v4495_v43  ;;  %4743 = vst.msk [vmem:[#allocation2 + $0x1b4] sm:$0xf] %vm4047_vm11, %v4500_v48  ;;  %6160 = vrot.lane.b32.xlu1 %v6083_v51, %s12419_s18  ;;  %v4767_v39 = vld [vmem:[#allocation2 + $0x78] sm:$0xf]  ;;  %v10037_v34 = vcombine.low %v4911_v6, %v4784_v18  ;;  %v10242_v10 = vcombine.low %v5166_v4, %v5167_v53 }
 0x384   :  { %v7011_v9 = vsel %vm6029_vm7, %v7009_v2, %v7010_v46  ;;  %v7585_v42 = vrot.slane %v10291_v56, 1  ;;  %v12017_v49 = vld [vmem:[#allocation2 + $0x110] ss:$0 sps:$4 sm:$0x33]   ;;  %v12356_v52 = vld [vmem:[#allocation2 + $0x7c] sm:$0xf] }
 0x385   :  { %6384 = vrot.lane.b32.xlu0 %v10082_v28, %s12420_s23  ;;  %v6147_v40 = vpop.permute.xlu0 %6146  ;;  %v9915_v57 = vcombine.low %v4767_v39, %v12356_v52  ;;  %v4976_v38 = vld [vmem:[#allocation2 + $0x124] sm:$0xf]  ;;  %v8709_v60 = vsel %vm4349_vm14, 65535, %v12417_v1  ;;  %v7586_v44 = vrot.slane %v12012_v12, 1  ;;  %v5731_v23 = vrot.slane %v9973_v21, 1 }
 0x386   :  { %v8711_v36 = vand.u32 %v12024_v5, %v8709_v60  ;;  %v5732_v27 = vrot.slane %v12014_v45, 1  ;;  %v5039_v3 = vld [vmem:[#allocation2 + $0x120] sm:$0xe]  ;;  %v6084_v54 = vrot.slane %v10037_v34, 2  ;;  %v5282_v31 = vld [vmem:[#allocation2 + $0xb4] sm:$0xc] }
 0x387   :  { %6736 = vrot.lane.b32.xlu1 %v6659_v17, %s12421_s24  ;;  %v5794_v55 = vpop.permute.xlu1 %5793  ;;  %v7587_v32 = vsel %vm3776_vm13, %v7585_v42, %v7586_v44  ;;  %v10133_v11 = vcombine.low %v5039_v3, %v4976_v38  ;;  %v5103_v37 = vld [vmem:[#allocation2 + $0x120] sm:$0xc]  ;;  %v6085_v30 = vrot.slane %v12017_v49, 2  ;;  %vm8209_vm11 = vcmask 523264   ;;  %v12357_v19 = vld [vmem:[#allocation2 + $0xb8] sm:$0xf] }
 0x388   :  { %v8015_v13 = vsel %vm7982_vm6, %v9915_v57, %v5794_v55  ;;  %10604 = vmatpush2.bf16.msra.mxu1 %v8711_v36  ;;  %8742 = vmatpush2.bf16.msra.mxu0 %v8711_v36  ;;  %v12033_v35 = vld [vmem:[#allocation2 + $0xbc] ss:$0 sps:$4 sm:$0x33]   ;;  %v5733_v16 = vsel %vm3776_vm13, %v5731_v23, %v5732_v27  ;;  %v4975_v0 = vld [vmem:[#allocation2 + $0x120] sm:$0xf]  ;;  %v10197_v51 = vcombine.low %v5103_v37, %v4976_v38  ;;  %vm8339_vm14 = vcmask 785408  }
 0x389   :  { %7088 = vrot.lane.b32.xlu0 %v7011_v9, %s12422_s27  ;;  %10595 = vmatprep.subr.bf16.mxu1 %v12417_v1  ;;  %v8101_v14 = vsel %vm8079_vm9, %v8015_v13, %v6147_v40  ;;  %v12021_v61 = vld [vmem:[#allocation2 + $0x128] ss:$0 sps:$4 sm:$0x11]   ;;  %v10343_v29 = vcombine.low %v5282_v31, %v12357_v19  ;;  %v5169_v58 = vld [vmem:[#allocation2 + $0x13c] sm:$0xf]  ;;  %v6086_v53 = vsel %vm6029_vm7, %v6084_v54, %v6085_v30  ;;  %v6660_v43 = vrot.slane %v10133_v11, 1 }
 0x38a   :  { %8743 = vmatprep.subr.bf16.mxu0 %v12417_v1  ;;  %v12023_v62 = vld [vmem:[#allocation2 + $0x128] ss:$0 sps:$4 sm:$0x33]   ;;  %v10083_v1 = vcombine.low %v4975_v0, %v4976_v38  ;;  %v5232_v63 = vld [vmem:[#allocation2 + $0x138] sm:$0xe]  ;;  %v7920_v33 = vrot.slane %v12033_v35, 2 }
 0x38b   :  { %7312 = vrot.lane.b32.xlu1 %v10242_v10, %s12423_s29  ;;  %v6371_v15 = vpop.permute.xlu1 %6370  ;;  %v6723_v50 = vpop.permute.xlu0 %6722  ;;  %v7919_v28 = vrot.slane %v10343_v29, 2  ;;  %v4786_v18 = vld [vmem:[#allocation2 + $0x118] sm:$0xf]  ;;  %v6661_v2 = vrot.slane %v12021_v61, 1  ;;  %v7012_v56 = vrot.slane %v10197_v51, 2  ;;  %v10293_v12 = vcombine.low %v5232_v63, %v5169_v58 }
 0x38c   :  { %v8166_v47 = vsel %vm8144_vm10, %v8101_v14, %v6371_v15  ;;  %10605 = vmatpush2.bf16.msra.mxu1 %v12028_v7  ;;  %8744 = vmatpush2.bf16.msra.mxu0 %v12028_v7  ;;  %v4849_v17 = vld [vmem:[#allocation2 + $0x114] sm:$0xe]  ;;  %v7013_v21 = vrot.slane %v12023_v62, 2  ;;  %v5168_v5 = vld [vmem:[#allocation2 + $0x138] sm:$0xf] }
 0x38d   :  { %7664 = vrot.lane.b32.xlu0 %v7587_v32, %s12424_s5  ;;  %v8231_v48 = vsel %vm8209_vm11, %v8166_v47, %v6723_v50  ;;  %v7921_v46 = vsel %vm6029_vm7, %v7919_v28, %v7920_v33  ;;  %v6662_v4 = vsel %vm3776_vm13, %v6660_v43, %v6661_v2  ;;  %v12027_v6 = vld [vmem:[#allocation2 + $0x140] ss:$0 sps:$4 sm:$0x11]   ;;  %v9975_v9 = vcombine.low %v4849_v17, %v4786_v18  ;;  %v4913_v40 = vld [vmem:[#allocation2 + $0x114] sm:$0xc] }
 0x38e   :  { %v12030_v39 = vld [vmem:[#allocation2 + $0x11c] ss:$0 sps:$4 sm:$0x11]   ;;  %v4769_v55 = vld [vmem:[#allocation2 + $0x84] sm:$0xf]  ;;  %v10039_v49 = vcombine.low %v4913_v40, %v4786_v18  ;;  %v7014_v10 = vsel %vm6029_vm7, %v7012_v56, %v7013_v21  ;;  %v7588_v52 = vrot.slane %v10293_v12, 1  ;;  %v10243_v60 = vcombine.low %v5168_v5, %v5169_v58 }
 0x38f   :  { %5809 = vrot.lane.b32.xlu1 %v5733_v16, %s12418_s0  ;;  %v7299_v41 = vpop.permute.xlu0 %7298  ;;  %v8525_v38 = vsel %vm7982_vm6, %v7921_v46, 1065369472  ;;  %v12358_v44 = vld [vmem:[#allocation2 + $0x88] sm:$0xf]  ;;  %v4978_v7 = vld [vmem:[#allocation2 + $0x130] sm:$0xf] }
 0x390   :  { %v9916_v23 = vcombine.low %v4769_v55, %v12358_v44  ;;  %v12032_v36 = vld [vmem:[#allocation2 + $0x11c] ss:$0 sps:$4 sm:$0x33]   ;;  %v7589_v13 = vrot.slane %v12027_v6, 1  ;;  %v5734_v27 = vrot.slane %v9975_v9, 1  ;;  %v5735_v54 = vrot.slane %v12030_v39, 1 }
 0x391   :  { %v7075_v24 = vpop.permute.xlu1 %7074  ;;  %6162 = vrot.lane.b32.xlu0 %v6086_v53, %s12419_s18  ;;  %v5041_v32 = vld [vmem:[#allocation2 + $0x12c] sm:$0xe]  ;;  %v6087_v11 = vrot.slane %v10039_v49, 2  ;;  %v5284_v50 = vld [vmem:[#allocation2 + $0xc0] sm:$0xc]  ;;  %v6088_v19 = vrot.slane %v12032_v36, 2 }
 0x392   :  { %v8296_v22 = vsel %vm8274_vm12, %v8231_v48, %v7075_v24  ;;  %v7590_v37 = vsel %vm3776_vm13, %v7588_v52, %v7589_v13  ;;  %v10135_v35 = vcombine.low %v5041_v32, %v4978_v7  ;;  %v12359_v16 = vld [vmem:[#allocation2 + $0xc4] sm:$0xf]  ;;  %v12036_v0 = vld [vmem:[#allocation2 + $0x134] ss:$0 sps:$4 sm:$0x11]   ;;  %v5736_v51 = vsel %vm3776_vm13, %v5734_v27, %v5735_v54 }
 0x393   :  { %6386 = vrot.lane.b32.xlu1 %v10083_v1, %s12420_s23  ;;  %v8361_v45 = vsel %vm8339_vm14, %v8296_v22, %v7299_v41  ;;  %v10345_v14 = vcombine.low %v5284_v50, %v12359_v16  ;;  %v5105_v61 = vld [vmem:[#allocation2 + $0x12c] sm:$0xc]  ;;  %v12046_v47 = vld [vmem:[#allocation2 + $0xc8] ss:$0 sps:$4 sm:$0x33]   ;;  %v6089_v24 = vsel %vm6029_vm7, %v6087_v11, %v6088_v19  ;;  %v6664_v56 = vrot.slane %v12036_v0, 1 }
 0x394   :  { %v10199_v29 = vcombine.low %v5105_v61, %v4978_v7  ;;  %v12038_v53 = vld [vmem:[#allocation2 + $0x134] ss:$0 sps:$4 sm:$0x33]   ;;  %v5171_v48 = vld [vmem:[#allocation2 + $0x148] sm:$0xf]  ;;  %v6663_v41 = vrot.slane %v10135_v35, 1 }
 0x395   :  { %v7651_v42 = vpop.permute.xlu1 %7650  ;;  %6738 = vrot.lane.b32.xlu0 %v6662_v4, %s12421_s24  ;;  %v4977_v62 = vld [vmem:[#allocation2 + $0x12c] sm:$0xf]  ;;  %v7922_v63 = vrot.slane %v10345_v14, 2  ;;  %v5234_v33 = vld [vmem:[#allocation2 + $0x144] sm:$0xe]  ;;  %v7923_v17 = vrot.slane %v12046_v47, 2 }
 0x396   :  { %v8436_v34 = vsel %vm8404_vm15, %v8361_v45, %v7651_v42  ;;  %v5796_v57 = vpop.permute.xlu0 %5795  ;;  %v10084_v18 = vcombine.low %v4977_v62, %v4978_v7  ;;  %v4788_v2 = vld [vmem:[#allocation2 + $0x124] sm:$0xf]  ;;  %v7015_v12 = vrot.slane %v10199_v29, 2  ;;  %v10295_v22 = vcombine.low %v5234_v33, %v5171_v48  ;;  %v4851_v5 = vld [vmem:[#allocation2 + $0x120] sm:$0xe] }
 0x397   :  { %8826 = vmatmul.mubr.bf16.vlgmr.msra.gmra.mxu1 %v8436_v34  ;;  %7090 = vrot.lane.b32.xlu1 %v7014_v10, %s12422_s27  ;;  %v8018_v15 = vsel %vm7982_vm6, %v9916_v23, %v5796_v57  ;;  %v7016_v46 = vrot.slane %v12038_v53, 2  ;;  %v6665_v45 = vsel %vm3776_vm13, %v6663_v41, %v6664_v56  ;;  %v5170_v6 = vld [vmem:[#allocation2 + $0x144] sm:$0xf]  ;;  %v12041_v9 = vld [vmem:[#allocation2 + $0x14c] ss:$0 sps:$4 sm:$0x11]   ;;  %v9977_v40 = vcombine.low %v4851_v5, %v4788_v2 }
 0x398   :  { %10406 = vmatprep.mubr.msk.bf16.mxu1 %vm8642_vm8, %v8525_v38  ;;  %v4915_v39 = vld [vmem:[#allocation2 + $0x120] sm:$0xc]  ;;  %v7924_v55 = vsel %vm6029_vm7, %v7922_v63, %v7923_v17  ;;  %v12043_v49 = vld [vmem:[#allocation2 + $0x128] ss:$0 sps:$4 sm:$0x11]   ;;  %v7591_v57 = vrot.slane %v10295_v22, 1  ;;  %v10244_v23 = vcombine.low %v5170_v6, %v5171_v48 }
 0x399   :  { %v6149_v3 = vpop.permute.xlu1 %6148  ;;  %7314 = vrot.lane.b32.xlu0 %v10243_v60, %s12423_s29  ;;  %v10041_v10 = vcombine.low %v4915_v39, %v4788_v2  ;;  %v7017_v52 = vsel %vm6029_vm7, %v7015_v12, %v7016_v46  ;;  %v12045_v60 = vld [vmem:[#allocation2 + $0x128] ss:$0 sps:$4 sm:$0x33]   ;;  %v4771_v44 = vld [vmem:[#allocation2 + $0x90] sm:$0xf]  ;;  %v7592_v27 = vrot.slane %v12041_v9, 1 }
 0x39a   :  { %v8103_v31 = vsel %vm8079_vm9, %v8018_v15, %v6149_v3  ;;  %v6373_v30 = vpop.permute.xlu0 %6372  ;;  %v8527_v36 = vsel %vm7982_vm6, %v7924_v55, 1065369472  ;;  %v4980_v7 = vld [vmem:[#allocation2 + $0x13c] sm:$0xf]  ;;  %v5286_v13 = vld [vmem:[#allocation2 + $0xcc] sm:$0xc] }
 0x39b   :  { %7666 = vrot.lane.b32.xlu1 %v7590_v37, %s12424_s5  ;;  %v8168_v58 = vsel %vm8144_vm10, %v8103_v31, %v6373_v30  ;;  %v5737_v3 = vrot.slane %v9977_v40, 1  ;;  %v12360_v32 = vld [vmem:[#allocation2 + $0x94] sm:$0xf]  ;;  %v5738_v11 = vrot.slane %v12043_v49, 1  ;;  %v6090_v50 = vrot.slane %v10041_v10, 2 }
 0x39c   :  { %v9917_v54 = vcombine.low %v4771_v44, %v12360_v32  ;;  %v5043_v31 = vld [vmem:[#allocation2 + $0x138] sm:$0xe]  ;;  %v7593_v30 = vsel %vm3776_vm13, %v7591_v57, %v7592_v27  ;;  %v12361_v14 = vld [vmem:[#allocation2 + $0xd0] sm:$0xf]  ;;  %v5173_v41 = vld [vmem:[#allocation2 + $0x154] sm:$0xf] }
 0x39d   :  { %5811 = vrot.lane.b32.xlu0 %v5736_v51, %s12418_s0  ;;  %v6725_v43 = vpop.permute.xlu1 %6724  ;;  %v10137_v16 = vcombine.low %v5043_v31, %v4980_v7  ;;  %v10347_v0 = vcombine.low %v5286_v13, %v12361_v14  ;;  %v12067_v61 = vld [vmem:[#allocation2 + $0xd4] ss:$0 sps:$4 sm:$0x33]   ;;  %v6091_v51 = vrot.slane %v12045_v60, 2  ;;  %v5107_v19 = vld [vmem:[#allocation2 + $0x138] sm:$0xc]  ;;  %v5739_v29 = vsel %vm3776_vm13, %v5737_v3, %v5738_v11 }
 0x39e   :  { %v8233_v28 = vsel %vm8209_vm11, %v8168_v58, %v6725_v43  ;;  %v12049_v47 = vld [vmem:[#allocation2 + $0x140] ss:$0 sps:$4 sm:$0x11]   ;;  %v10201_v53 = vcombine.low %v5107_v19, %v4980_v7  ;;  %v7926_v33 = vrot.slane %v12067_v61, 2  ;;  %v5236_v56 = vld [vmem:[#allocation2 + $0x150] sm:$0xe] }
 0x39f   :  { %v7077_v1 = vpop.permute.xlu0 %7076  ;;  %6164 = vrot.lane.b32.xlu1 %v6089_v24, %s12419_s18  ;;  %v6092_v43 = vsel %vm6029_vm7, %v6090_v50, %v6091_v51  ;;  %v12051_v62 = vld [vmem:[#allocation2 + $0x140] ss:$0 sps:$4 sm:$0x33]   ;;  %v4790_v12 = vld [vmem:[#allocation2 + $0x130] sm:$0xf]  ;;  %v6667_v22 = vrot.slane %v12049_v47, 1 }
 0x3a0   :  { %v8298_v4 = vsel %vm8274_vm12, %v8233_v28, %v7077_v1  ;;  %v4979_v28 = vld [vmem:[#allocation2 + $0x138] sm:$0xf]  ;;  %v6666_v1 = vrot.slane %v10137_v16, 1  ;;  %v7018_v17 = vrot.slane %v10201_v53, 2  ;;  %v7019_v5 = vrot.slane %v12051_v62, 2 }
 0x3a1   :  { %6388 = vrot.lane.b32.xlu0 %v10084_v18, %s12420_s23  ;;  %v7301_v21 = vpop.permute.xlu1 %7300  ;;  %v7925_v18 = vrot.slane %v10347_v0, 2  ;;  %v10085_v2 = vcombine.low %v4979_v28, %v4980_v7  ;;  %v4853_v6 = vld [vmem:[#allocation2 + $0x12c] sm:$0xe]  ;;  %v12054_v40 = vld [vmem:[#allocation2 + $0x158] ss:$0 sps:$4 sm:$0x11]  }
 0x3a2   :  { %v8363_v42 = vsel %vm8339_vm14, %v8298_v4, %v7301_v21  ;;  %v10297_v4 = vcombine.low %v5236_v56, %v5173_v41  ;;  %v6668_v9 = vsel %vm3776_vm13, %v6666_v1, %v6667_v22  ;;  %v9979_v39 = vcombine.low %v4853_v6, %v4790_v12  ;;  %v12056_v55 = vld [vmem:[#allocation2 + $0x134] ss:$0 sps:$4 sm:$0x11]   ;;  %v4917_v49 = vld [vmem:[#allocation2 + $0x12c] sm:$0xc] }
 0x3a3   :  { %6740 = vrot.lane.b32.xlu1 %v6665_v45, %s12421_s24  ;;  %v7653_v34 = vpop.permute.xlu0 %7652  ;;  %v7020_v10 = vsel %vm6029_vm7, %v7018_v17, %v7019_v5  ;;  %v12058_v60 = vld [vmem:[#allocation2 + $0x134] ss:$0 sps:$4 sm:$0x33]   ;;  %v4982_v7 = vld [vmem:[#allocation2 + $0x148] sm:$0xf]  ;;  %v7595_v27 = vrot.slane %v12054_v40, 1 }
 0x3a4   :  { %v8439_v38 = vsel %vm8404_vm15, %v8363_v42, %v7653_v34  ;;  %v7927_v34 = vsel %vm6029_vm7, %v7925_v18, %v7926_v33  ;;  %v7594_v57 = vrot.slane %v10297_v4, 1  ;;  %v5740_v3 = vrot.slane %v9979_v39, 1  ;;  %v4773_v32 = vld [vmem:[#allocation2 + $0x9c] sm:$0xf]  ;;  %v5288_v11 = vld [vmem:[#allocation2 + $0xd8] sm:$0xc] }
 0x3a5   :  { %7092 = vrot.lane.b32.xlu0 %v7017_v52, %s12422_s27  ;;  %8834 = vmatmul.mubr.bf16.gmra.mxu1 %v8439_v38  ;;  %v5172_v52 = vld [vmem:[#allocation2 + $0x150] sm:$0xf]  ;;  %v10043_v38 = vcombine.low %v4917_v49, %v4790_v12  ;;  %v8529_v13 = vsel %vm7982_vm6, %v7927_v34, 1065369472  ;;  %v12362_v50 = vld [vmem:[#allocation2 + $0xa0] sm:$0xf] }
 0x3a6   :  { %10407 = vmatprep.mubr.msk.bf16.mxu1 %vm8642_vm8, %v8527_v36  ;;  %v10245_v44 = vcombine.low %v5172_v52, %v5173_v41  ;;  %v5045_v31 = vld [vmem:[#allocation2 + $0x144] sm:$0xe]  ;;  %v12363_v19 = vld [vmem:[#allocation2 + $0xdc] sm:$0xf]  ;;  %v6094_v53 = vrot.slane %v12058_v60, 2 }
 0x3a7   :  { %v5798_v15 = vpop.permute.xlu1 %5797  ;;  %7316 = vrot.lane.b32.xlu1 %v10244_v23, %s12423_s29  ;;  %v6093_v16 = vrot.slane %v10043_v38, 2  ;;  %v10139_v14 = vcombine.low %v5045_v31, %v4982_v7  ;;  %v5109_v51 = vld [vmem:[#allocation2 + $0x144] sm:$0xc]  ;;  %v12081_v47 = vld [vmem:[#allocation2 + $0xe0] ss:$0 sps:$4 sm:$0x33]  }
 0x3a8   :  { %v6151_v37 = vpop.permute.xlu0 %6150  ;;  %v8021_v35 = vsel %vm7982_vm6, %v9917_v54, %v5798_v15  ;;  %v10203_v62 = vcombine.low %v5109_v51, %v4982_v7  ;;  %v4981_v41 = vld [vmem:[#allocation2 + $0x144] sm:$0xf]  ;;  %v5175_v28 = vld [vmem:[#allocation2 + $0x160] sm:$0xf]  ;;  %v5238_v33 = vld [vmem:[#allocation2 + $0x15c] sm:$0xe] }
 0x3a9   :  { %7668 = vrot.lane.b32.xlu0 %v7593_v30, %s12424_s5  ;;  %v8105_v48 = vsel %vm8079_vm9, %v8021_v35, %v6151_v37  ;;  %v9918_v37 = vcombine.low %v4773_v32, %v12362_v50  ;;  %v7596_v30 = vsel %vm3776_vm13, %v7594_v57, %v7595_v27  ;;  %v5741_v35 = vrot.slane %v12056_v55, 1  ;;  %v12063_v18 = vld [vmem:[#allocation2 + $0x14c] ss:$0 sps:$4 sm:$0x33]   ;;  %v4792_v17 = vld [vmem:[#allocation2 + $0x13c] sm:$0xf] }
 0x3aa   :  { %v6095_v1 = vsel %vm6029_vm7, %v6093_v16, %v6094_v53  ;;  %v12066_v22 = vld [vmem:[#allocation2 + $0x164] ss:$0 sps:$4 sm:$0x11]   ;;  %v12070_v40 = vld [vmem:[#allocation2 + $0x8] ss:$0 sps:$4 sm:$0x33]  }
 0x3ab   :  { %v6375_v58 = vpop.permute.xlu1 %6374  ;;  %5813 = vrot.lane.b32.xlu1 %v5739_v29, %s12418_s0  ;;  %v10349_v29 = vcombine.low %v5288_v11, %v12363_v19  ;;  %v7022_v55 = vrot.slane %v12063_v18, 2  ;;  %v5174_v38 = vld [vmem:[#allocation2 + $0x15c] sm:$0xf]  ;;  %v6031_v32 = vrot.slane %v12070_v40, 2  ;;  %v5290_v51 = vld [vmem:[#allocation2 + $0xe4] sm:$0xc] }
 0x3ac   :  { %v6727_v24 = vpop.permute.xlu0 %6726  ;;  %v8170_v63 = vsel %vm8144_vm10, %v8105_v48, %v6375_v58  ;;  %v5742_v58 = vsel %vm3776_vm13, %v5740_v3, %v5741_v35  ;;  %v10246_v27 = vcombine.low %v5174_v38, %v5175_v28  ;;  %v7598_v3 = vrot.slane %v12066_v22, 1  ;;  %v4775_v35 = vld [vmem:[#allocation2 + $0xa8] sm:$0xf]  ;;  %v12365_v19 = vld [vmem:[#allocation2 + $0xac] sm:$0xf] }
 0x3ad   :  { %6166 = vrot.lane.b32.xlu0 %v6092_v43, %s12419_s18  ;;  %v8235_v21 = vsel %vm8209_vm11, %v8170_v63, %v6727_v24  ;;  %v12061_v24 = vld [vmem:[#allocation2 + $0x14c] ss:$0 sps:$4 sm:$0x11]   ;;  %v6669_v63 = vrot.slane %v10139_v14, 1  ;;  %v7928_v4 = vrot.slane %v10349_v29, 2  ;;  %v9919_v29 = vcombine.low %v4775_v35, %v12365_v19 }
 0x3ae   :  { %v6670_v5 = vrot.slane %v12061_v24, 1  ;;  %v4984_v24 = vld [vmem:[#allocation2 + $0x154] sm:$0xf] }
 0x3af   :  { %v7079_v46 = vpop.permute.xlu1 %7078  ;;  %6390 = vrot.lane.b32.xlu1 %v10085_v2, %s12420_s23  ;;  %v10086_v2 = vcombine.low %v4981_v41, %v4982_v7  ;;  %v5003_v41 = vld [vmem:[#allocation2 + $0x18] sm:$0xe] }
 0x3b0   :  { %v7303_v45 = vpop.permute.xlu0 %7302  ;;  %v8300_v42 = vsel %vm8274_vm12, %v8235_v21, %v7079_v46  ;;  %v4875_v46 = vld [vmem:[#allocation2] sm:$0xc]  ;;  %v7929_v21 = vrot.slane %v12081_v47, 2  ;;  %v6671_v39 = vsel %vm3776_vm13, %v6669_v63, %v6670_v5  ;;  %v4940_v47 = vld [vmem:[#allocation2 + $0x1c] sm:$0xf] }
 0x3b1   :  { %6742 = vrot.lane.b32.xlu0 %v6668_v9, %s12421_s24  ;;  %v8365_v23 = vsel %vm8339_vm14, %v8300_v42, %v7303_v45  ;;  %v7021_v45 = vrot.slane %v10203_v62, 2  ;;  %v10299_v9 = vcombine.low %v5238_v33, %v5175_v28  ;;  %v4855_v42 = vld [vmem:[#allocation2 + $0x138] sm:$0xe]  ;;  %v12366_v28 = vld [vmem:[#allocation2 + $0xe8] sm:$0xf] }
 0x3b2   :  { %v9981_v49 = vcombine.low %v4855_v42, %v4792_v17  ;;  %v12090_v63 = vld [vmem:[#allocation2 + $0xec] ss:$0 sps:$4 sm:$0x33]  }
 0x3b3   :  { %7094 = vrot.lane.b32.xlu1 %v7020_v10, %s12422_s27  ;;  %v12364_v10 = vld [vmem:[#allocation2 + $0x4] sm:$0xf]  ;;  %v7932_v40 = vrot.slane %v12090_v63, 2 }
 0x3b4   :  { %v7655_v36 = vpop.permute.xlu1 %7654  ;;  %v10001_v52 = vcombine.low %v4875_v46, %v12364_v10  ;;  %v5743_v11 = vrot.slane %v9981_v49, 1  ;;  %v12080_v10 = vld [vmem:[#allocation2 + $0x20] ss:$0 sps:$4 sm:$0x33]  }
 0x3b5   :  { %v5800_v54 = vpop.permute.xlu0 %5799  ;;  %v8442_v15 = vsel %vm8404_vm15, %v8365_v23, %v7655_v36  ;;  %7318 = vrot.lane.b32.xlu0 %v10245_v44, %s12423_s29  ;;  %v7930_v44 = vsel %vm6029_vm7, %v7928_v4, %v7929_v21  ;;  %v7023_v23 = vsel %vm6029_vm7, %v7021_v45, %v7022_v55  ;;  %v7597_v36 = vrot.slane %v10299_v9, 1  ;;  %v12076_v4 = vld [vmem:[#allocation2 + $0x20] ss:$0 sps:$4 sm:$0x11]   ;;  %v5067_v9 = vld [vmem:[#allocation2 + $0x18] sm:$0xc] }
 0x3b6   :  { %8842 = vmatmul.mubr.bf16.gmra.mxu1 %v8442_v15  ;;  %v8024_v0 = vsel %vm7982_vm6, %v9918_v37, %v5800_v54  ;;  %v4919_v54 = vld [vmem:[#allocation2 + $0x138] sm:$0xc]  ;;  %v6030_v50 = vrot.slane %v10001_v52, 2  ;;  %v8531_v31 = vsel %vm7982_vm6, %v7930_v44, 1065369472  ;;  %v6607_v38 = vrot.slane %v12076_v4, 1 }
 0x3b7   :  { %10408 = vmatprep.mubr.msk.bf16.mxu1 %vm8642_vm8, %v8529_v13  ;;  %7670 = vrot.lane.b32.xlu1 %v7596_v30, %s12424_s5  ;;  %v12069_v13 = vld [vmem:[#allocation2 + $0x140] ss:$0 sps:$4 sm:$0x11]   ;;  %v10045_v37 = vcombine.low %v4919_v54, %v4792_v17  ;;  %v7599_v14 = vsel %vm3776_vm13, %v7597_v36, %v7598_v3  ;;  %v4939_v17 = vld [vmem:[#allocation2 + $0x18] sm:$0xf] }
 0x3b8   :  { %v6153_v61 = vpop.permute.xlu1 %6152  ;;  %v6032_v53 = vsel %vm6029_vm7, %v6030_v50, %v6031_v32  ;;  %v10065_v5 = vcombine.low %v4939_v17, %v4940_v47  ;;  %v12078_v55 = vld [vmem:[#allocation2 + $0x158] ss:$0 sps:$4 sm:$0x11]   ;;  %v5111_v52 = vld [vmem:[#allocation2 + $0x150] sm:$0xc] }
 0x3b9   :  { %v8107_v43 = vsel %vm8079_vm9, %v8024_v0, %v6153_v61  ;;  %v6377_v48 = vpop.permute.xlu0 %6376  ;;  %5815 = vrot.lane.b32.xlu0 %v5742_v58, %s12418_s0  ;;  %v5744_v0 = vrot.slane %v12069_v13, 1  ;;  %v12072_v61 = vld [vmem:[#allocation2 + $0x140] ss:$0 sps:$4 sm:$0x33]   ;;  %v10205_v36 = vcombine.low %v5111_v52, %v4984_v24  ;;  %v6673_v3 = vrot.slane %v12078_v55, 1 }
 0x3ba   :  { %v8172_v56 = vsel %vm8144_vm10, %v8107_v43, %v6377_v48  ;;  %v6096_v48 = vrot.slane %v10045_v37, 2  ;;  %v6097_v18 = vrot.slane %v12072_v61, 2  ;;  %v12083_v54 = vld [vmem:[#allocation2 + $0x158] ss:$0 sps:$4 sm:$0x33]  }
 0x3bb   :  { %6168 = vrot.lane.b32.xlu1 %v6095_v1, %s12419_s18  ;;  %v5745_v58 = vsel %vm3776_vm13, %v5743_v11, %v5744_v0  ;;  %v10351_v1 = vcombine.low %v5290_v51, %v12366_v28  ;;  %v17933_v11 = vld [vmem:[#allocation2 + $0x16c] sm:$0xf]  ;;  %v7024_v35 = vrot.slane %v10205_v36, 2  ;;  %v12367_v51 = vld [vmem:[#allocation2 + $0x34] sm:$0xf] }
 0x3bc   :  { %v6729_v12 = vpop.permute.xlu1 %6728  ;;  %v6098_v22 = vsel %vm6029_vm7, %v6096_v48, %v6097_v18  ;;  %v12368_v48 = vld [vmem:[#allocation2 + $0xb8] sm:$0xf]  ;;  %v4857_v18 = vld [vmem:[#allocation2 + $0x144] sm:$0xe] }
 0x3bd   :  { %v8237_v6 = vsel %vm8209_vm11, %v8172_v56, %v6729_v12  ;;  %6392 = vrot.lane.b32.xlu0 %v10086_v2, %s12420_s23  ;;  %v7081_v34 = vpop.permute.xlu0 %7080  ;;  %v10097_v2 = vcombine.low %v5003_v41, %v4940_v47  ;;  %v5047_v56 = vld [vmem:[#allocation2 + $0x150] sm:$0xe]  ;;  %v7931_v42 = vrot.slane %v10351_v1, 2  ;;  %v4877_v41 = vld [vmem:[#allocation2 + $0xc] sm:$0xc] }
 0x3be   :  { %v8302_v57 = vsel %vm8274_vm12, %v8237_v6, %v7081_v34  ;;  %v10141_v21 = vcombine.low %v5047_v56, %v4984_v24  ;;  %v4983_v6 = vld [vmem:[#allocation2 + $0x150] sm:$0xf]  ;;  %v10161_v34 = vcombine.low %v5067_v9, %v4940_v47  ;;  %v12369_v4 = vld [vmem:[#allocation2 + $0x124] sm:$0xf] }
 0x3bf   :  { %6744 = vrot.lane.b32.xlu1 %v6671_v39, %s12421_s24  ;;  %v6606_v39 = vrot.slane %v10097_v2, 1  ;;  %v10087_v49 = vcombine.low %v4983_v6, %v4984_v24  ;;  %v7933_v13 = vsel %vm6029_vm7, %v7931_v42, %v7932_v40  ;;  %v5132_v1 = vld [vmem:[#allocation2 + $0x30] sm:$0xf]  ;;  %v12089_v9 = vld [vmem:[#allocation2 + $0x14c] ss:$0 sps:$4 sm:$0x11]  }
 0x3c0   :  { %v7305_v60 = vpop.permute.xlu1 %7304  ;;  %v6958_v32 = vrot.slane %v10161_v34, 2  ;;  %v10225_v56 = vcombine.low %v5132_v1, %v12367_v51  ;;  %v12370_v42 = vld [vmem:[#allocation2 + $0x10] sm:$0xf]  ;;  %v12095_v34 = vld [vmem:[#allocation2 + $0x128] ss:$0 sps:$4 sm:$0x33]  }
 0x3c1   :  { %v8367_v7 = vsel %vm8339_vm14, %v8302_v57, %v7305_v60  ;;  %7096 = vrot.lane.b32.xlu0 %v7023_v23, %s12422_s27  ;;  %v7657_v15 = vpop.permute.xlu0 %7656  ;;  %v6672_v23 = vrot.slane %v10141_v21, 1  ;;  %v10003_v40 = vcombine.low %v4877_v41, %v12370_v42  ;;  %v12099_v41 = vld [vmem:[#allocation2 + $0x2c] ss:$0 sps:$4 sm:$0x11]   ;;  %v12372_v42 = vld [vmem:[#allocation2 + $0x130] sm:$0xf] }
 0x3c2   :  { %v8445_v30 = vsel %vm8404_vm15, %v8367_v7, %v7657_v15  ;;  %v6959_v15 = vrot.slane %v12080_v10, 2 }
 0x3c3   :  { %7320 = vrot.lane.b32.xlu1 %v10246_v27, %s12423_s29  ;;  %8850 = vmatmul.mubr.bf16.gmra.mxu1 %v8445_v30  ;;  %v6608_v27 = vsel %vm3776_vm13, %v6606_v39, %v6607_v38  ;;  %v6674_v37 = vsel %vm3776_vm13, %v6672_v23, %v6673_v3  ;;  %v4777_v30 = vld [vmem:[#allocation2 + $0xb4] sm:$0xf]  ;;  %v4921_v23 = vld [vmem:[#allocation2 + $0x144] sm:$0xc] }
 0x3c4   :  { %v5802_v16 = vpop.permute.xlu1 %5801  ;;  %10409 = vmatprep.mubr.msk.bf16.mxu1 %vm8642_vm8, %v8531_v31  ;;  %v6960_v47 = vsel %vm6029_vm7, %v6958_v32, %v6959_v15  ;;  %v9920_v24 = vcombine.low %v4777_v30, %v12368_v48  ;;  %v7935_v32 = vrot.slane %v12095_v34, 2  ;;  %v5747_v15 = vrot.slane %v12089_v9, 1  ;;  %v4779_v30 = vld [vmem:[#allocation2 + $0xf0] sm:$0xf]  ;;  %v5113_v9 = vld [vmem:[#allocation2 + $0x15c] sm:$0xc] }
 0x3c5   :  { %7672 = vrot.lane.b32.xlu0 %v7599_v14, %s12424_s5  ;;  %v6155_v43 = vpop.permute.xlu0 %6154  ;;  %v8027_v62 = vsel %vm7982_vm6, %v9919_v29, %v5802_v16  ;;  %v5196_v16 = vld [vmem:[#allocation2 + $0x30] sm:$0xe]  ;;  %v8533_v14 = vsel %vm7982_vm6, %v7933_v13, 1065369472 }
 0x3c6   :  { %v8109_v12 = vsel %vm8079_vm9, %v8027_v62, %v6155_v43  ;;  %v10257_v19 = vcombine.low %v5196_v16, %v12367_v51  ;;  %v12085_v29 = vld [vmem:[#allocation2 + $0x38] ss:$0 sps:$4 sm:$0x11]   ;;  %v12087_v43 = vld [vmem:[#allocation2 + $0x170] ss:$0 sps:$4 sm:$0x11]  }
 0x3c7   :  { %5817 = vrot.lane.b32.xlu1 %v5745_v58, %s12418_s0  ;;  %v7025_v58 = vrot.slane %v12083_v54, 2  ;;  %v4794_v62 = vld [vmem:[#allocation2 + $0x148] sm:$0xf]  ;;  %v7535_v55 = vrot.slane %v12085_v29, 1  ;;  %v7601_v10 = vrot.slane %v12087_v43, 1 }
 0x3c8   :  { %v6379_v33 = vpop.permute.xlu1 %6378  ;;  %v7534_v17 = vrot.slane %v10257_v19, 1  ;;  %v9983_v6 = vcombine.low %v4857_v18, %v4794_v62  ;;  %v10047_v3 = vcombine.low %v4921_v23, %v4794_v62  ;;  %v4942_v16 = vld [vmem:[#allocation2 + $0x28] sm:$0xf]  ;;  %v12371_v43 = vld [vmem:[#allocation2 + $0xf4] sm:$0xf] }
 0x3c9   :  { %6126 = vrot.lane.b32.xlu0 %v6032_v53, %s12419_s18  ;;  %v6731_v46 = vpop.permute.xlu0 %6730  ;;  %v8174_v45 = vsel %vm8144_vm10, %v8109_v12, %v6379_v33  ;;  %v5240_v53 = vld [vmem:[#allocation2 + $0x168] sm:$0xe]  ;;  %v7026_v28 = vsel %vm6029_vm7, %v7024_v35, %v7025_v58  ;;  %v5292_v33 = vld [vmem:[#allocation2 + $0x120] sm:$0xc]  ;;  %v5005_v58 = vld [vmem:[#allocation2 + $0x24] sm:$0xe]  ;;  %v9921_v48 = vcombine.low %v4779_v30, %v12371_v43 }
 0x3ca   :  { %v8239_v57 = vsel %vm8209_vm11, %v8174_v45, %v6731_v46  ;;  %v10301_v63 = vcombine.low %v5240_v53, %v17933_v11  ;;  %v12091_v46 = vld [vmem:[#allocation2 + $0x14] ss:$0 sps:$4 sm:$0x33]   ;;  %v10353_v21 = vcombine.low %v5292_v33, %v12369_v4  ;;  %v5176_v45 = vld [vmem:[#allocation2 + $0x168] sm:$0xf]  ;;  %v5746_v13 = vrot.slane %v9983_v6, 1 }
 0x3cb   :  { %6170 = vrot.lane.b32.xlu1 %v6098_v22, %s12419_s18  ;;  %v10247_v39 = vcombine.low %v5176_v45, %v17933_v11  ;;  %v6099_v19 = vrot.slane %v10047_v3, 2  ;;  %v10099_v62 = vcombine.low %v5005_v58, %v4942_v16  ;;  %v12101_v33 = vld [vmem:[#allocation2 + $0x164] ss:$0 sps:$4 sm:$0x11]   ;;  %v6610_v6 = vrot.slane %v12099_v41, 1 }
 0x3cc   :  { %v7934_v36 = vrot.slane %v10353_v21, 2  ;;  %v12105_v23 = vld [vmem:[#allocation2 + $0x164] ss:$0 sps:$4 sm:$0x33]   ;;  %v4796_v58 = vld [vmem:[#allocation2 + $0x154] sm:$0xf] }
 0x3cd   :  { %6350 = vrot.lane.b32.xlu0 %v10065_v5, %s12420_s23  ;;  %v7307_v44 = vpop.permute.xlu0 %7306  ;;  %v6609_v4 = vrot.slane %v10099_v62, 1  ;;  %v12373_v43 = vld [vmem:[#allocation2 + $0x100] sm:$0xf]  ;;  %v12114_v62 = vld [vmem:[#allocation2 + $0x17c] ss:$0 sps:$4 sm:$0x11]  }
 0x3ce   :  { %v7936_v35 = vsel %vm6029_vm7, %v7934_v36, %v7935_v32  ;;  %v17975_v36 = vld [vmem:[#allocation2 + $0x40] sm:$0xf] }
 0x3cf   :  { %6394 = vrot.lane.b32.xlu1 %v10087_v49, %s12420_s23  ;;  %v7600_v49 = vrot.slane %v10301_v63, 1  ;;  %v4941_v63 = vld [vmem:[#allocation2 + $0x24] sm:$0xf] }
 0x3d0   :  { %v7083_v60 = vpop.permute.xlu1 %7082 }
 0x3d1   :  { %v8304_v7 = vsel %vm8274_vm12, %v8239_v57, %v7083_v60  ;;  %6702 = vrot.lane.b32.xlu0 %v6608_v27, %s12421_s24  ;;  %v7536_v57 = vsel %vm3776_vm13, %v7534_v17, %v7535_v55  ;;  %v6033_v27 = vrot.slane %v10003_v40, 2  ;;  %v7602_v54 = vsel %vm3776_vm13, %v7600_v49, %v7601_v10  ;;  %v12103_v55 = vld [vmem:[#allocation2 + $0x2c] ss:$0 sps:$4 sm:$0x33]  }
 0x3d2   :  { %v8369_v50 = vsel %vm8339_vm14, %v8304_v7, %v7307_v44  ;;  %v6034_v44 = vrot.slane %v12091_v46, 2  ;;  %v4985_v46 = vld [vmem:[#allocation2 + $0x15c] sm:$0xf]  ;;  %v6962_v3 = vrot.slane %v12103_v55, 2 }
 0x3d3   :  { %6746 = vrot.lane.b32.xlu1 %v6674_v37, %s12421_s24 }
 0x3d4   :  { %v7659_v31 = vpop.permute.xlu1 %7658  ;;  %v5804_v0 = vpop.permute.xlu0 %5803  ;;  %v6035_v51 = vsel %vm6029_vm7, %v6033_v27, %v6034_v44 }
 0x3d5   :  { %v8448_v61 = vsel %vm8404_vm15, %v8369_v50, %v7659_v31  ;;  %7054 = vrot.lane.b32.xlu0 %v6960_v47, %s12422_s27  ;;  %v8030_v2 = vsel %vm7982_vm6, %v9920_v24, %v5804_v0  ;;  %v12093_v50 = vld [vmem:[#allocation2 + $0x14c] ss:$0 sps:$4 sm:$0x33]   ;;  %v4986_v47 = vld [vmem:[#allocation2 + $0x160] sm:$0xf] }
 0x3d6   :  { %8858 = vmatmul.mubr.bf16.gmra.mxu1 %v8448_v61  ;;  %v6100_v53 = vrot.slane %v12093_v50, 2  ;;  %v8535_v24 = vsel %vm7982_vm6, %v7936_v35, 1065369472  ;;  %v10088_v45 = vcombine.low %v4985_v46, %v4986_v47  ;;  %v10207_v34 = vcombine.low %v5113_v9, %v4986_v47  ;;  %v12374_v9 = vld [vmem:[#allocation2 + $0x1c] sm:$0xf] }
 0x3d7   :  { %10410 = vmatprep.mubr.msk.bf16.mxu1 %vm8642_vm8, %v8533_v14  ;;  %7098 = vrot.lane.b32.xlu1 %v7026_v28, %s12422_s27  ;;  %v5748_v14 = vsel %vm3776_vm13, %v5746_v13, %v5747_v15  ;;  %v5049_v28 = vld [vmem:[#allocation2 + $0x15c] sm:$0xe] }
 0x3d8   :  { %v6157_v12 = vpop.permute.xlu1 %6156  ;;  %v6381_v22 = vpop.permute.xlu0 %6380  ;;  %v6101_v1 = vsel %vm6029_vm7, %v6099_v19, %v6100_v53  ;;  %v10143_v18 = vcombine.low %v5049_v28, %v4986_v47  ;;  %v7027_v32 = vrot.slane %v10207_v34, 2  ;;  %v5198_v15 = vld [vmem:[#allocation2 + $0x3c] sm:$0xe]  ;;  %v4923_v34 = vld [vmem:[#allocation2 + $0x150] sm:$0xc] }
 0x3d9   :  { %v8111_v5 = vsel %vm8079_vm9, %v8030_v2, %v6157_v12  ;;  %7278 = vrot.lane.b32.xlu0 %v10225_v56, %s12423_s29  ;;  %v10066_v56 = vcombine.low %v4941_v63, %v4942_v16  ;;  %v5069_v12 = vld [vmem:[#allocation2 + $0x24] sm:$0xc]  ;;  %v10259_v35 = vcombine.low %v5198_v15, %v17975_v36 }
 0x3da   :  { %v8176_v52 = vsel %vm8144_vm10, %v8111_v5, %v6381_v22  ;;  %v10163_v21 = vcombine.low %v5069_v12, %v4942_v16  ;;  %v5294_v5 = vld [vmem:[#allocation2 + $0x12c] sm:$0xc] }
 0x3db   :  { %7322 = vrot.lane.b32.xlu1 %v10247_v39, %s12423_s29  ;;  %v10355_v40 = vcombine.low %v5294_v5, %v12372_v42  ;;  %v6675_v39 = vrot.slane %v10143_v18, 1  ;;  %v7537_v63 = vrot.slane %v10259_v35, 1  ;;  %v4859_v18 = vld [vmem:[#allocation2 + $0x150] sm:$0xe]  ;;  %v4879_v5 = vld [vmem:[#allocation2 + $0x18] sm:$0xc] }
 0x3dc   :  { %v6961_v44 = vrot.slane %v10163_v21, 2  ;;  %v12116_v21 = vld [vmem:[#allocation2 + $0x158] ss:$0 sps:$4 sm:$0x11]   ;;  %v10005_v42 = vcombine.low %v4879_v5, %v12374_v9 }
 0x3dd   :  { %v6733_v38 = vpop.permute.xlu1 %6732  ;;  %v7085_v60 = vpop.permute.xlu0 %7084  ;;  %7630 = vrot.lane.b32.xlu0 %v7536_v57, %s12424_s5  ;;  %v12109_v57 = vld [vmem:[#allocation2 + $0x134] ss:$0 sps:$4 sm:$0x33]   ;;  %v7937_v13 = vrot.slane %v10355_v40, 2 }
 0x3de   :  { %v8241_v7 = vsel %vm8209_vm11, %v8176_v52, %v6733_v38  ;;  %v6676_v52 = vrot.slane %v12101_v33, 1  ;;  %v7938_v30 = vrot.slane %v12109_v57, 2  ;;  %v12117_v40 = vld [vmem:[#allocation2 + $0x20] ss:$0 sps:$4 sm:$0x33]   ;;  %v10049_v57 = vcombine.low %v4923_v34, %v4796_v58 }
 0x3df   :  { %v8306_v37 = vsel %vm8274_vm12, %v8241_v7, %v7085_v60  ;;  %7674 = vrot.lane.b32.xlu1 %v7602_v54, %s12424_s5  ;;  %v6611_v60 = vsel %vm3776_vm13, %v6609_v4, %v6610_v6  ;;  %v17979_v54 = vld [vmem:[#allocation2 + $0x178] sm:$0xf]  ;;  %v7604_v6 = vrot.slane %v12114_v62, 1 }
 0x3e0   :  { %v6677_v27 = vsel %vm3776_vm13, %v6675_v39, %v6676_v52  ;;  %v6102_v35 = vrot.slane %v10049_v57, 2 }
 0x3e1   :  { %v7309_v31 = vpop.permute.xlu1 %7308  ;;  %v7661_v61 = vpop.permute.xlu0 %7660  ;;  %5819 = vrot.lane.b32.xlu0 %v5748_v14, %s12418_s0  ;;  %v6963_v14 = vsel %vm6029_vm7, %v6961_v44, %v6962_v3  ;;  %v12122_v3 = vld [vmem:[#allocation2 + $0x140] ss:$0 sps:$4 sm:$0x33]  }
 0x3e2   :  { %v8371_v0 = vsel %vm8339_vm14, %v8306_v37, %v7309_v31  ;;  %v4781_v31 = vld [vmem:[#allocation2 + $0xfc] sm:$0xf] }
 0x3e3   :  { %v8451_v29 = vsel %vm8404_vm15, %v8371_v0, %v7661_v61  ;;  %6128 = vrot.lane.b32.xlu1 %v6035_v51, %s12419_s18  ;;  %v7028_v0 = vrot.slane %v12105_v23, 2  ;;  %v12112_v61 = vld [vmem:[#allocation2 + $0x44] ss:$0 sps:$4 sm:$0x11]   ;;  %v5242_v51 = vld [vmem:[#allocation2 + $0x174] sm:$0xe] }
 0x3e4   :  { %8866 = vmatmul.mubr.bf16.gmra.mxu1 %v8451_v29  ;;  %v7939_v29 = vsel %vm6029_vm7, %v7937_v13, %v7938_v30  ;;  %v10303_v47 = vcombine.low %v5242_v51, %v17979_v54  ;;  %v7538_v12 = vrot.slane %v12112_v61, 1  ;;  %v5750_v23 = vrot.slane %v12116_v21, 1  ;;  %v5007_v61 = vld [vmem:[#allocation2 + $0x30] sm:$0xe] }
 0x3e5   :  { %10411 = vmatprep.mubr.msk.bf16.mxu1 %vm8642_vm8, %v8535_v24  ;;  %6172 = vrot.lane.b32.xlu0 %v6101_v1, %s12419_s18  ;;  %v5806_v2 = vpop.permute.xlu1 %5805  ;;  %v6159_v17 = vpop.permute.xlu0 %6158  ;;  %v7029_v53 = vsel %vm6029_vm7, %v7027_v32, %v7028_v0  ;;  %v5134_v24 = vld [vmem:[#allocation2 + $0x3c] sm:$0xf]  ;;  %v4988_v0 = vld [vmem:[#allocation2 + $0x16c] sm:$0xf] }
 0x3e6   :  { %v8033_v22 = vsel %vm7982_vm6, %v9921_v48, %v5806_v2  ;;  %v9922_v48 = vcombine.low %v4781_v31, %v12373_v43  ;;  %v10226_v1 = vcombine.low %v5134_v24, %v17975_v36  ;;  %v8537_v2 = vsel %vm7982_vm6, %v7939_v29, 1065369472  ;;  %v12126_v43 = vld [vmem:[#allocation2 + $0x38] ss:$0 sps:$4 sm:$0x11]  }
 0x3e7   :  { %6352 = vrot.lane.b32.xlu1 %v10066_v56, %s12420_s23  ;;  %v8113_v49 = vsel %vm8079_vm9, %v8033_v22, %v6159_v17  ;;  %v5178_v56 = vld [vmem:[#allocation2 + $0x174] sm:$0xf]  ;;  %v9985_v22 = vcombine.low %v4859_v18, %v4796_v58  ;;  %v7603_v4 = vrot.slane %v10303_v47, 1  ;;  %v7539_v55 = vsel %vm3776_vm13, %v7537_v63, %v7538_v12 }
 0x3e8   :  { %v10248_v46 = vcombine.low %v5178_v56, %v17979_v54  ;;  %v7941_v29 = vrot.slane %v12122_v3, 2  ;;  %v5071_v56 = vld [vmem:[#allocation2 + $0x30] sm:$0xc]  ;;  %v6613_v9 = vrot.slane %v12126_v43, 1 }
 0x3e9   :  { %6396 = vrot.lane.b32.xlu0 %v10088_v45, %s12420_s23  ;;  %v6383_v10 = vpop.permute.xlu1 %6382  ;;  %v5749_v52 = vrot.slane %v9985_v22, 1  ;;  %v7605_v13 = vsel %vm3776_vm13, %v7603_v4, %v7604_v6  ;;  %v12376_v22 = vld [vmem:[#allocation2 + $0x10c] sm:$0xf] }
 0x3ea   :  { %v8178_v38 = vsel %vm8144_vm10, %v8113_v49, %v6383_v10  ;;  %v5296_v49 = vld [vmem:[#allocation2 + $0x138] sm:$0xc] }
 0x3eb   :  { %v6735_v7 = vpop.permute.xlu0 %6734  ;;  %6704 = vrot.lane.b32.xlu1 %v6611_v60, %s12421_s24  ;;  %v5751_v30 = vsel %vm3776_vm13, %v5749_v52, %v5750_v23  ;;  %v5298_v52 = vld [vmem:[#allocation2 + $0x144] sm:$0xc] }
 0x3ec   :  { %v8243_v50 = vsel %vm8209_vm11, %v8178_v38, %v6735_v7  ;;  %v12375_v38 = vld [vmem:[#allocation2 + $0x13c] sm:$0xf]  ;;  %v12119_v7 = vld [vmem:[#allocation2 + $0x158] ss:$0 sps:$4 sm:$0x33]  }
 0x3ed   :  { %6748 = vrot.lane.b32.xlu0 %v6677_v27, %s12421_s24  ;;  %v7087_v37 = vpop.permute.xlu1 %7086  ;;  %v10357_v60 = vcombine.low %v5296_v49, %v12375_v38  ;;  %v6036_v27 = vrot.slane %v10005_v42, 2  ;;  %v5115_v42 = vld [vmem:[#allocation2 + $0x168] sm:$0xc] }
 0x3ee   :  { %v8308_v16 = vsel %vm8274_vm12, %v8243_v50, %v7087_v37  ;;  %v6037_v50 = vrot.slane %v12117_v40, 2  ;;  %v4944_v37 = vld [vmem:[#allocation2 + $0x34] sm:$0xf]  ;;  %v10209_v34 = vcombine.low %v5115_v42, %v4988_v0 }
 0x3ef   :  { %v7311_v19 = vpop.permute.xlu0 %7310  ;;  %7056 = vrot.lane.b32.xlu1 %v6963_v14, %s12422_s27  ;;  %v10101_v47 = vcombine.low %v5007_v61, %v4944_v37  ;;  %v10165_v21 = vcombine.low %v5071_v56, %v4944_v37 }
 0x3f0   :  { %v8373_v41 = vsel %vm8339_vm14, %v8308_v16, %v7311_v19  ;;  %v7940_v16 = vrot.slane %v10357_v60, 2  ;;  %v6038_v51 = vsel %vm6029_vm7, %v6036_v27, %v6037_v50  ;;  %v6103_v19 = vrot.slane %v12119_v7, 2  ;;  %v12132_v60 = vld [vmem:[#allocation2 + $0x170] ss:$0 sps:$4 sm:$0x33]  }
 0x3f1   :  { %7100 = vrot.lane.b32.xlu0 %v7029_v53, %s12422_s27  ;;  %v7663_v28 = vpop.permute.xlu1 %7662  ;;  %v6612_v4 = vrot.slane %v10101_v47, 1  ;;  %v6964_v38 = vrot.slane %v10165_v21, 2  ;;  %v18025_v27 = vld [vmem:[#allocation2 + $0x4c] sm:$0xf]  ;;  %v7030_v50 = vrot.slane %v10209_v34, 2 }
 0x3f2   :  { %v8454_v33 = vsel %vm8404_vm15, %v8373_v41, %v7663_v28  ;;  %v6104_v62 = vsel %vm6029_vm7, %v6102_v35, %v6103_v19  ;;  %v4943_v41 = vld [vmem:[#allocation2 + $0x30] sm:$0xf]  ;;  %v7942_v28 = vsel %vm6029_vm7, %v7940_v16, %v7941_v29  ;;  %v5200_v35 = vld [vmem:[#allocation2 + $0x48] sm:$0xe]  ;;  %v5244_v47 = vld [vmem:[#allocation2 + $0x180] sm:$0xe] }
 0x3f3   :  { %v5808_v17 = vpop.permute.xlu0 %5807  ;;  %8874 = vmatmul.mubr.bf16.gmra.mxu1 %v8454_v33  ;;  %7280 = vrot.lane.b32.xlu1 %v10226_v1, %s12423_s29  ;;  %v4783_v1 = vld [vmem:[#allocation2 + $0x108] sm:$0xf]  ;;  %v10067_v33 = vcombine.low %v4943_v41, %v4944_v37  ;;  %v8539_v5 = vsel %vm7982_vm6, %v7942_v28, 1065369472  ;;  %v6614_v57 = vsel %vm3776_vm13, %v6612_v4, %v6613_v9  ;;  %v10261_v61 = vcombine.low %v5200_v35, %v18025_v27 }
 0x3f4   :  { %v8036_v45 = vsel %vm7982_vm6, %v9922_v48, %v5808_v17  ;;  %10412 = vmatprep.mubr.msk.bf16.mxu1 %vm8642_vm8, %v8537_v2  ;;  %v5051_v48 = vld [vmem:[#allocation2 + $0x168] sm:$0xe]  ;;  %v12128_v2 = vld [vmem:[#allocation2 + $0x170] ss:$0 sps:$4 sm:$0x11]   ;;  %v9923_v17 = vcombine.low %v4783_v1, %v12376_v22 }
 0x3f5   :  { %7324 = vrot.lane.b32.xlu0 %v10248_v46, %s12423_s29  ;;  %v6161_v39 = vpop.permute.xlu1 %6160  ;;  %v10145_v63 = vcombine.low %v5051_v48, %v4988_v0  ;;  %v4987_v46 = vld [vmem:[#allocation2 + $0x168] sm:$0xf]  ;;  %v12137_v37 = vld [vmem:[#allocation2 + $0x14c] ss:$0 sps:$4 sm:$0x33]  }
 0x3f6   :  { %v8115_v10 = vsel %vm8079_vm9, %v8036_v45, %v6161_v39  ;;  %v10089_v6 = vcombine.low %v4987_v46, %v4988_v0  ;;  %v5136_v48 = vld [vmem:[#allocation2 + $0x48] sm:$0xf]  ;;  %v4785_v46 = vld [vmem:[#allocation2 + $0x114] sm:$0xf] }
 0x3f7   :  { %v6385_v44 = vpop.permute.xlu0 %6384  ;;  %7632 = vrot.lane.b32.xlu1 %v7539_v55, %s12424_s5  ;;  %v6678_v39 = vrot.slane %v10145_v63, 1  ;;  %v12130_v55 = vld [vmem:[#allocation2 + $0x38] ss:$0 sps:$4 sm:$0x33]   ;;  %v10227_v1 = vcombine.low %v5136_v48, %v18025_v27 }
 0x3f8   :  { %v8180_v32 = vsel %vm8144_vm10, %v8115_v10, %v6385_v44  ;;  %v6679_v10 = vrot.slane %v12128_v2, 1  ;;  %v12377_v44 = vld [vmem:[#allocation2 + $0x148] sm:$0xf]  ;;  %v7540_v2 = vrot.slane %v10261_v61, 1 }
 0x3f9   :  { %7676 = vrot.lane.b32.xlu0 %v7605_v13, %s12424_s5  ;;  %v6737_v15 = vpop.permute.xlu1 %6736  ;;  %v10359_v23 = vcombine.low %v5298_v52, %v12377_v44  ;;  %v12141_v63 = vld [vmem:[#allocation2 + $0x188] ss:$0 sps:$4 sm:$0x11]  }
 0x3fa   :  { %v8245_v31 = vsel %vm8209_vm11, %v8180_v32, %v6737_v15  ;;  %v6680_v32 = vsel %vm3776_vm13, %v6678_v39, %v6679_v10  ;;  %v6965_v15 = vrot.slane %v12130_v55, 2  ;;  %v12379_v39 = vld [vmem:[#allocation2 + $0x118] sm:$0xf]  ;;  %v4925_v10 = vld [vmem:[#allocation2 + $0x15c] sm:$0xc] }
 0x3fb   :  { %v7089_v14 = vpop.permute.xlu0 %7088  ;;  %5821 = vrot.lane.b32.xlu1 %v5751_v30, %s12418_s0  ;;  %v18030_v30 = vld [vmem:[#allocation2 + $0x184] sm:$0xf]  ;;  %v7943_v0 = vrot.slane %v10359_v23, 2  ;;  %v9924_v55 = vcombine.low %v4785_v46, %v12379_v39  ;;  %v5073_v46 = vld [vmem:[#allocation2 + $0x3c] sm:$0xc] }
 0x3fc   :  { %v8310_v58 = vsel %vm8274_vm12, %v8245_v31, %v7089_v14  ;;  %v6966_v16 = vsel %vm6029_vm7, %v6964_v38, %v6965_v15  ;;  %v7031_v14 = vrot.slane %v12132_v60, 2  ;;  %v10305_v41 = vcombine.low %v5244_v47, %v18030_v30 }
 0x3fd   :  { %6130 = vrot.lane.b32.xlu0 %v6038_v51, %s12419_s18  ;;  %v7313_v53 = vpop.permute.xlu1 %7312  ;;  %v12139_v51 = vld [vmem:[#allocation2 + $0x50] ss:$0 sps:$4 sm:$0x11]  }
 0x3fe   :  { %v8375_v24 = vsel %vm8339_vm14, %v8310_v58, %v7313_v53  ;;  %v4798_v58 = vld [vmem:[#allocation2 + $0x160] sm:$0xf]  ;;  %v7032_v43 = vsel %vm6029_vm7, %v7030_v50, %v7031_v14  ;;  %v7541_v21 = vrot.slane %v12139_v51, 1  ;;  %v7606_v42 = vrot.slane %v10305_v41, 1 }
 0x3ff   :  { %v7665_v18 = vpop.permute.xlu0 %7664  ;;  %6174 = vrot.lane.b32.xlu1 %v6104_v62, %s12419_s18  ;;  %v7944_v62 = vrot.slane %v12137_v37, 2  ;;  %v10051_v60 = vcombine.low %v4925_v10, %v4798_v58  ;;  %v12146_v50 = vld [vmem:[#allocation2 + $0x164] ss:$0 sps:$4 sm:$0x33]   ;;  %v12380_v37 = vld [vmem:[#allocation2 + $0x154] sm:$0xf] }
 0x400   :  { %v8457_v12 = vsel %vm8404_vm15, %v8375_v24, %v7665_v18  ;;  %v5180_v24 = vld [vmem:[#allocation2 + $0x180] sm:$0xf]  ;;  %v4861_v18 = vld [vmem:[#allocation2 + $0x15c] sm:$0xe]  ;;  %v7542_v52 = vsel %vm3776_vm13, %v7540_v2, %v7541_v21  ;;  %v6106_v48 = vrot.slane %v12146_v50, 2 }
 0x401   :  { %8882 = vmatmul.mubr.bf16.gmra.mxu1 %v8457_v12  ;;  %6354 = vrot.lane.b32.xlu0 %v10067_v33, %s12420_s23  ;;  %v5810_v45 = vpop.permute.xlu1 %5809  ;;  %v7945_v33 = vsel %vm6029_vm7, %v7943_v0, %v7944_v62  ;;  %v9987_v56 = vcombine.low %v4861_v18, %v4798_v58  ;;  %v4881_v12 = vld [vmem:[#allocation2 + $0x24] sm:$0xc]  ;;  %v10249_v4 = vcombine.low %v5180_v24, %v18030_v30  ;;  %v4946_v14 = vld [vmem:[#allocation2 + $0x40] sm:$0xf]  ;;  %v6105_v61 = vrot.slane %v10051_v60, 2 }
 0x402   :  { %10413 = vmatprep.mubr.msk.bf16.mxu1 %vm8642_vm8, %v8539_v5  ;;  %v8039_v40 = vsel %vm7982_vm6, %v9923_v17, %v5810_v45  ;;  %v12143_v5 = vld [vmem:[#allocation2 + $0x164] ss:$0 sps:$4 sm:$0x11]   ;;  %v12378_v45 = vld [vmem:[#allocation2 + $0x28] sm:$0xf] }
 0x403   :  { %v6163_v49 = vpop.permute.xlu0 %6162  ;;  %6398 = vrot.lane.b32.xlu1 %v10089_v6, %s12420_s23  ;;  %v10007_v6 = vcombine.low %v4881_v12, %v12378_v45  ;;  %v5752_v38 = vrot.slane %v9987_v56, 1  ;;  %v5753_v15 = vrot.slane %v12143_v5, 1  ;;  %v12150_v51 = vld [vmem:[#allocation2 + $0x158] ss:$0 sps:$4 sm:$0x33]  }
 0x404   :  { %v8117_v7 = vsel %vm8079_vm9, %v8039_v40, %v6163_v49  ;;  %v12144_v40 = vld [vmem:[#allocation2 + $0x2c] ss:$0 sps:$4 sm:$0x33]   ;;  %v8541_v49 = vsel %vm7982_vm6, %v7945_v33, 1065369472  ;;  %v7947_v33 = vrot.slane %v12150_v51, 2 }
 0x405   :  { %6706 = vrot.lane.b32.xlu0 %v6614_v57, %s12421_s24  ;;  %v6387_v13 = vpop.permute.xlu1 %6386  ;;  %v7607_v57 = vrot.slane %v12141_v63, 1  ;;  %v5754_v0 = vsel %vm3776_vm13, %v5752_v38, %v5753_v15  ;;  %v4990_v58 = vld [vmem:[#allocation2 + $0x178] sm:$0xf]  ;;  %v12153_v41 = vld [vmem:[#allocation2 + $0x44] ss:$0 sps:$4 sm:$0x11]   ;;  %v6107_v63 = vsel %vm6029_vm7, %v6105_v61, %v6106_v48 }
 0x406   :  { %v8182_v3 = vsel %vm8144_vm10, %v8117_v7, %v6387_v13  ;;  %v6039_v7 = vrot.slane %v10007_v6, 2  ;;  %v5300_v13 = vld [vmem:[#allocation2 + $0x150] sm:$0xc]  ;;  %v4945_v18 = vld [vmem:[#allocation2 + $0x3c] sm:$0xf]  ;;  %v10167_v6 = vcombine.low %v5073_v46, %v4946_v14  ;;  %v6616_v39 = vrot.slane %v12153_v41, 1 }
 0x407   :  { %v6739_v31 = vpop.permute.xlu0 %6738  ;;  %6750 = vrot.lane.b32.xlu1 %v6680_v32, %s12421_s24  ;;  %v7608_v32 = vsel %vm3776_vm13, %v7606_v42, %v7607_v57  ;;  %v12155_v45 = vld [vmem:[#allocation2 + $0x17c] ss:$0 sps:$4 sm:$0x11]   ;;  %v12157_v57 = vld [vmem:[#allocation2 + $0x44] ss:$0 sps:$4 sm:$0x33]  }
 0x408   :  { %v8247_v19 = vsel %vm8209_vm11, %v8182_v3, %v6739_v31  ;;  %v10361_v31 = vcombine.low %v5300_v13, %v12380_v37  ;;  %v18073_v15 = vld [vmem:[#allocation2 + $0x58] sm:$0xf]  ;;  %v5302_v37 = vld [vmem:[#allocation2 + $0x15c] sm:$0xc]  ;;  %v5138_v48 = vld [vmem:[#allocation2 + $0x54] sm:$0xf] }
 0x409   :  { %7058 = vrot.lane.b32.xlu0 %v6966_v16, %s12422_s27  ;;  %v7091_v29 = vpop.permute.xlu1 %7090  ;;  %v6040_v16 = vrot.slane %v12144_v40, 2  ;;  %v4787_v40 = vld [vmem:[#allocation2 + $0x120] sm:$0xf] }
 0x40a   :  { %v8312_v53 = vsel %vm8274_vm12, %v8247_v19, %v7091_v29  ;;  %v7946_v24 = vrot.slane %v10361_v31, 2 }
 0x40b   :  { %v7315_v28 = vpop.permute.xlu0 %7314  ;;  %7102 = vrot.lane.b32.xlu1 %v7032_v43, %s12422_s27  ;;  %v6041_v47 = vsel %vm6029_vm7, %v6039_v7, %v6040_v16 }
 0x40c   :  { %v8377_v22 = vsel %vm8339_vm14, %v8312_v53, %v7315_v28  ;;  %v5009_v53 = vld [vmem:[#allocation2 + $0x3c] sm:$0xe]  ;;  %v7948_v21 = vsel %vm6029_vm7, %v7946_v24, %v7947_v33  ;;  %v12166_v24 = vld [vmem:[#allocation2 + $0x164] ss:$0 sps:$4 sm:$0x33]  }
 0x40d   :  { %7282 = vrot.lane.b32.xlu0 %v10227_v1, %s12423_s29  ;;  %v7667_v17 = vpop.permute.xlu1 %7666  ;;  %v10103_v62 = vcombine.low %v5009_v53, %v4946_v14  ;;  %v5053_v1 = vld [vmem:[#allocation2 + $0x174] sm:$0xe]  ;;  %v8543_v60 = vsel %vm7982_vm6, %v7948_v21, 1065369472 }
 0x40e   :  { %v8460_v9 = vsel %vm8404_vm15, %v8377_v22, %v7667_v17  ;;  %v10147_v2 = vcombine.low %v5053_v1, %v4990_v58  ;;  %v10068_v22 = vcombine.low %v4945_v18, %v4946_v14  ;;  %v4989_v17 = vld [vmem:[#allocation2 + $0x174] sm:$0xf]  ;;  %v5246_v1 = vld [vmem:[#allocation2 + $0x18c] sm:$0xe] }
 0x40f   :  { %v5812_v34 = vpop.permute.xlu0 %5811  ;;  %8890 = vmatmul.mubr.bf16.gmra.mxu1 %v8460_v9  ;;  %7326 = vrot.lane.b32.xlu1 %v10249_v4, %s12423_s29  ;;  %v6615_v5 = vrot.slane %v10103_v62, 1  ;;  %v10090_v42 = vcombine.low %v4989_v17, %v4990_v58  ;;  %v5202_v14 = vld [vmem:[#allocation2 + $0x54] sm:$0xe]  ;;  %v4800_v62 = vld [vmem:[#allocation2 + $0x16c] sm:$0xf] }
 0x410   :  { %10414 = vmatprep.mubr.msk.bf16.mxu1 %vm8642_vm8, %v8541_v49  ;;  %v8042_v44 = vsel %vm7982_vm6, %v9924_v55, %v5812_v34  ;;  %v5117_v55 = vld [vmem:[#allocation2 + $0x174] sm:$0xc]  ;;  %v12381_v49 = vld [vmem:[#allocation2 + $0x124] sm:$0xf]  ;;  %v5182_v17 = vld [vmem:[#allocation2 + $0x18c] sm:$0xf] }
 0x411   :  { %7634 = vrot.lane.b32.xlu0 %v7542_v52, %s12424_s5  ;;  %v6165_v23 = vpop.permute.xlu1 %6164  ;;  %v9925_v10 = vcombine.low %v4787_v40, %v12381_v49  ;;  %v6681_v52 = vrot.slane %v10147_v2, 1  ;;  %v10211_v38 = vcombine.low %v5117_v55, %v4990_v58  ;;  %v6617_v13 = vsel %vm3776_vm13, %v6615_v5, %v6616_v39  ;;  %v4863_v2 = vld [vmem:[#allocation2 + $0x168] sm:$0xe]  ;;  %v4883_v40 = vld [vmem:[#allocation2 + $0x30] sm:$0xc] }
 0x412   :  { %v8119_v3 = vsel %vm8079_vm9, %v8042_v44, %v6165_v23  ;;  %v12159_v23 = vld [vmem:[#allocation2 + $0x17c] ss:$0 sps:$4 sm:$0x33]   ;;  %v7950_v5 = vrot.slane %v12166_v24, 2  ;;  %v12383_v49 = vld [vmem:[#allocation2 + $0x34] sm:$0xf] }
 0x413   :  { %v6389_v35 = vpop.permute.xlu0 %6388  ;;  %7678 = vrot.lane.b32.xlu1 %v7608_v32, %s12424_s5  ;;  %v6967_v32 = vrot.slane %v10167_v6, 2  ;;  %v7033_v16 = vrot.slane %v10211_v38, 2  ;;  %v4789_v38 = vld [vmem:[#allocation2 + $0x12c] sm:$0xf] }
 0x414   :  { %v8184_v19 = vsel %vm8144_vm10, %v8119_v3, %v6389_v35  ;;  %v6682_v3 = vrot.slane %v12155_v45, 1  ;;  %v6968_v35 = vrot.slane %v12157_v57, 2  ;;  %v12168_v45 = vld [vmem:[#allocation2 + $0x194] ss:$0 sps:$4 sm:$0x11]  }
 0x415   :  { %5823 = vrot.lane.b32.xlu0 %v5754_v0, %s12418_s0  ;;  %v6741_v29 = vpop.permute.xlu1 %6740  ;;  %v12382_v0 = vld [vmem:[#allocation2 + $0x160] sm:$0xf] }
 0x416   :  { %v8249_v43 = vsel %vm8209_vm11, %v8184_v19, %v6741_v29  ;;  %v6683_v31 = vsel %vm3776_vm13, %v6681_v52, %v6682_v3  ;;  %v10363_v61 = vcombine.low %v5302_v37, %v12382_v0  ;;  %v18079_v29 = vld [vmem:[#allocation2 + $0x190] sm:$0xf]  ;;  %v6969_v53 = vsel %vm6029_vm7, %v6967_v32, %v6968_v35  ;;  %v12171_v3 = vld [vmem:[#allocation2 + $0x38] ss:$0 sps:$4 sm:$0x33]  }
 0x417   :  { %v7093_v28 = vpop.permute.xlu0 %7092  ;;  %6132 = vrot.lane.b32.xlu1 %v6041_v47, %s12419_s18  ;;  %v10263_v47 = vcombine.low %v5202_v14, %v18073_v15  ;;  %v10307_v33 = vcombine.low %v5246_v1, %v18079_v29  ;;  %v5011_v1 = vld [vmem:[#allocation2 + $0x48] sm:$0xe] }
 0x418   :  { %v8314_v56 = vsel %vm8274_vm12, %v8249_v43, %v7093_v28  ;;  %v7034_v43 = vrot.slane %v12159_v23, 2  ;;  %v12164_v28 = vld [vmem:[#allocation2 + $0x5c] ss:$0 sps:$4 sm:$0x11]   ;;  %v7949_v18 = vrot.slane %v10363_v61, 2 }
 0x419   :  { %6176 = vrot.lane.b32.xlu0 %v6107_v63, %s12419_s18  ;;  %v7317_v12 = vpop.permute.xlu1 %7316  ;;  %v7543_v46 = vrot.slane %v10263_v47, 1  ;;  %v7544_v39 = vrot.slane %v12164_v28, 1  ;;  %v12173_v61 = vld [vmem:[#allocation2 + $0x170] ss:$0 sps:$4 sm:$0x33]  }
 0x41a   :  { %v8379_v4 = vsel %vm8339_vm14, %v8314_v56, %v7317_v12  ;;  %v7035_v63 = vsel %vm6029_vm7, %v7033_v16, %v7034_v43  ;;  %v7951_v55 = vsel %vm6029_vm7, %v7949_v18, %v7950_v5  ;;  %v4992_v28 = vld [vmem:[#allocation2 + $0x184] sm:$0xf]  ;;  %v6109_v18 = vrot.slane %v12173_v61, 2 }
 0x41b   :  { %v7669_v9 = vpop.permute.xlu0 %7668  ;;  %6356 = vrot.lane.b32.xlu1 %v10068_v22, %s12420_s23  ;;  %v10228_v22 = vcombine.low %v5138_v48, %v18073_v15  ;;  %v8545_v35 = vsel %vm7982_vm6, %v7951_v55, 1065369472  ;;  %v6043_v48 = vrot.slane %v12171_v3, 2 }
 0x41c   :  { %v8463_v34 = vsel %vm8404_vm15, %v8379_v4, %v7669_v9  ;;  %v9989_v4 = vcombine.low %v4863_v2, %v4800_v62  ;;  %v10250_v9 = vcombine.low %v5182_v17, %v18079_v29  ;;  %v12179_v2 = vld [vmem:[#allocation2 + $0x170] ss:$0 sps:$4 sm:$0x33]   ;;  %v5055_v17 = vld [vmem:[#allocation2 + $0x180] sm:$0xe] }
 0x41d   :  { %8898 = vmatmul.mubr.bf16.gmra.mxu1 %v8463_v34  ;;  %6400 = vrot.lane.b32.xlu0 %v10090_v42, %s12420_s23  ;;  %v5814_v44 = vpop.permute.xlu1 %5813  ;;  %v12170_v42 = vld [vmem:[#allocation2 + $0x170] ss:$0 sps:$4 sm:$0x11]   ;;  %v7609_v34 = vrot.slane %v10307_v33, 1  ;;  %v10149_v5 = vcombine.low %v5055_v17, %v4992_v28  ;;  %v7953_v55 = vrot.slane %v12179_v2, 2 }
 0x41e   :  { %10415 = vmatprep.mubr.msk.bf16.mxu1 %vm8642_vm8, %v8543_v60  ;;  %v8045_v7 = vsel %vm7982_vm6, %v9925_v10, %v5814_v44  ;;  %v10009_v10 = vcombine.low %v4883_v40, %v12383_v49  ;;  %v5755_v60 = vrot.slane %v9989_v4, 1  ;;  %v4927_v44 = vld [vmem:[#allocation2 + $0x168] sm:$0xc]  ;;  %v5756_v16 = vrot.slane %v12170_v42, 1  ;;  %v4991_v40 = vld [vmem:[#allocation2 + $0x180] sm:$0xf] }
 0x41f   :  { %v6167_v50 = vpop.permute.xlu0 %6166  ;;  %6708 = vrot.lane.b32.xlu1 %v6617_v13, %s12421_s24  ;;  %v7610_v13 = vrot.slane %v12168_v45, 1  ;;  %v10053_v32 = vcombine.low %v4927_v44, %v4800_v62  ;;  %v4947_v4 = vld [vmem:[#allocation2 + $0x48] sm:$0xf]  ;;  %v4821_v2 = vld [vmem:[#allocation2 + $0x3c] sm:$0xe] }
 0x420   :  { %v8121_v51 = vsel %vm8079_vm9, %v8045_v7, %v6167_v50  ;;  %v7545_v7 = vsel %vm3776_vm13, %v7543_v46, %v7544_v39  ;;  %v12384_v50 = vld [vmem:[#allocation2 + $0x130] sm:$0xf]  ;;  %v6042_v0 = vrot.slane %v10009_v10, 2  ;;  %v5757_v47 = vsel %vm3776_vm13, %v5755_v60, %v5756_v16  ;;  %v12182_v45 = vld [vmem:[#allocation2 + $0x188] ss:$0 sps:$4 sm:$0x11]  }
 0x421   :  { %6752 = vrot.lane.b32.xlu0 %v6683_v31, %s12421_s24  ;;  %v6391_v19 = vpop.permute.xlu1 %6390  ;;  %v9926_v37 = vcombine.low %v4789_v38, %v12384_v50  ;;  %v7611_v14 = vsel %vm3776_vm13, %v7609_v34, %v7610_v13  ;;  %v6108_v24 = vrot.slane %v10053_v32, 2  ;;  %v5075_v42 = vld [vmem:[#allocation2 + $0x48] sm:$0xc]  ;;  %v5119_v38 = vld [vmem:[#allocation2 + $0x180] sm:$0xc]  ;;  %v6685_v32 = vrot.slane %v12182_v45, 1 }
 0x422   :  { %v8186_v58 = vsel %vm8144_vm10, %v8121_v51, %v6391_v19  ;;  %v10213_v13 = vcombine.low %v5119_v38, %v4992_v28  ;;  %v12192_v17 = vld [vmem:[#allocation2 + $0x1a0] ss:$0 sps:$4 sm:$0x11]  }
 0x423   :  { %v6743_v41 = vpop.permute.xlu0 %6742  ;;  %7060 = vrot.lane.b32.xlu1 %v6969_v53, %s12422_s27  ;;  %v5304_v53 = vld [vmem:[#allocation2 + $0x168] sm:$0xc] }
 0x424   :  { %v8251_v56 = vsel %vm8209_vm11, %v8186_v58, %v6743_v41  ;;  %v4948_v58 = vld [vmem:[#allocation2 + $0x4c] sm:$0xf]  ;;  %v10365_v62 = vcombine.low %v5304_v53, %v17933_v11  ;;  %v6110_v11 = vsel %vm6029_vm7, %v6108_v24, %v6109_v18  ;;  %v5204_v53 = vld [vmem:[#allocation2 + $0x60] sm:$0xe] }
 0x425   :  { %7104 = vrot.lane.b32.xlu0 %v7035_v63, %s12422_s27  ;;  %v7095_v12 = vpop.permute.xlu1 %7094  ;;  %v6044_v63 = vsel %vm6029_vm7, %v6042_v0, %v6043_v48  ;;  %v10105_v33 = vcombine.low %v5011_v1, %v4948_v58  ;;  %v10169_v34 = vcombine.low %v5075_v42, %v4948_v58  ;;  %v5141_v0 = vld [vmem:[#allocation2 + $0x64] sm:$0xf]  ;;  %v5248_v1 = vld [vmem:[#allocation2 + $0x198] sm:$0xe]  ;;  %v5140_v18 = vld [vmem:[#allocation2 + $0x60] sm:$0xf] }
 0x426   :  { %v8316_v21 = vsel %vm8274_vm12, %v8251_v56, %v7095_v12  ;;  %v10265_v24 = vcombine.low %v5204_v53, %v5141_v0 }
 0x427   :  { %v7319_v6 = vpop.permute.xlu0 %7318  ;;  %7284 = vrot.lane.b32.xlu1 %v10228_v22, %s12423_s29  ;;  %v12177_v22 = vld [vmem:[#allocation2 + $0x50] ss:$0 sps:$4 sm:$0x11]   ;;  %v6618_v39 = vrot.slane %v10105_v33, 1 }
 0x428   :  { %v8381_v52 = vsel %vm8339_vm14, %v8316_v21, %v7319_v6  ;;  %v7952_v21 = vrot.slane %v10365_v62, 2  ;;  %v4758_v62 = vld [vmem:[#allocation2 + $0x40] sm:$0xf] }
 0x429   :  { %7328 = vrot.lane.b32.xlu0 %v10250_v9, %s12423_s29  ;;  %v7671_v57 = vpop.permute.xlu1 %7670  ;;  %v10069_v9 = vcombine.low %v4947_v4, %v4948_v58  ;;  %v5185_v58 = vld [vmem:[#allocation2 + $0x19c] sm:$0xf]  ;;  %v7546_v4 = vrot.slane %v10265_v24, 1 }
 0x42a   :  { %v8466_v23 = vsel %vm8404_vm15, %v8381_v52, %v7671_v57  ;;  %v10091_v52 = vcombine.low %v4991_v40, %v4992_v28  ;;  %v6619_v57 = vrot.slane %v12177_v22, 1  ;;  %v7954_v44 = vsel %vm6029_vm7, %v7952_v21, %v7953_v55  ;;  %v12190_v28 = vld [vmem:[#allocation2 + $0x68] ss:$0 sps:$4 sm:$0x11]   ;;  %v4865_v21 = vld [vmem:[#allocation2 + $0x174] sm:$0xe] }
 0x42b   :  { %v5816_v31 = vpop.permute.xlu0 %5815  ;;  %8906 = vmatmul.mubr.bf16.gmra.mxu1 %v8466_v23  ;;  %7636 = vrot.lane.b32.xlu1 %v7545_v7, %s12424_s5  ;;  %v6684_v23 = vrot.slane %v10149_v5, 1  ;;  %v12184_v7 = vld [vmem:[#allocation2 + $0x50] ss:$0 sps:$4 sm:$0x33]   ;;  %v8547_v16 = vsel %vm7982_vm6, %v7954_v44, 1065369472  ;;  %v10309_v33 = vcombine.low %v5248_v1, %v5185_v58  ;;  %v10229_v22 = vcombine.low %v5140_v18, %v5141_v0 }
 0x42c   :  { %10416 = vmatprep.mubr.msk.bf16.mxu1 %vm8642_vm8, %v8545_v35  ;;  %v8048_v51 = vsel %vm7982_vm6, %v9926_v37, %v5816_v31  ;;  %v6620_v37 = vsel %vm3776_vm13, %v6618_v39, %v6619_v57  ;;  %v6970_v31 = vrot.slane %v10169_v34, 2  ;;  %v12186_v35 = vld [vmem:[#allocation2 + $0x188] ss:$0 sps:$4 sm:$0x33]   ;;  %v4747_v5 = vld [vmem:[#allocation2] sm:$0xf] }
 0x42d   :  { %7680 = vrot.lane.b32.xlu0 %v7611_v14, %s12424_s5  ;;  %v6169_v19 = vpop.permute.xlu1 %6168  ;;  %v6686_v61 = vsel %vm3776_vm13, %v6684_v23, %v6685_v32  ;;  %v7037_v48 = vrot.slane %v12186_v35, 2  ;;  %v7547_v40 = vrot.slane %v12190_v28, 1  ;;  %v7612_v39 = vrot.slane %v10309_v33, 1  ;;  %v12196_v55 = vld [vmem:[#allocation2 + $0x17c] ss:$0 sps:$4 sm:$0x11]  }
 0x42e   :  { %v8123_v43 = vsel %vm8079_vm9, %v8048_v51, %v6169_v19  ;;  %v6971_v51 = vrot.slane %v12184_v7, 2  ;;  %v7036_v19 = vrot.slane %v10213_v13, 2  ;;  %v5262_v44 = vld [vmem:[#allocation2 + $0x3c] sm:$0xc]  ;;  %v5759_v53 = vrot.slane %v12196_v55, 1 }
 0x42f   :  { %v6393_v41 = vpop.permute.xlu0 %6392  ;;  %5825 = vrot.lane.b32.xlu1 %v5757_v47, %s12418_s0  ;;  %v7548_v57 = vsel %vm3776_vm13, %v7546_v4, %v7547_v40  ;;  %v12203_v0 = vld [vmem:[#allocation2 + $0x44] ss:$0 sps:$4 sm:$0x33]   ;;  %v12207_v1 = vld [vmem:[#allocation2 + $0x17c] ss:$0 sps:$4 sm:$0x33]  }
 0x430   :  { %v8188_v56 = vsel %vm8144_vm10, %v8123_v43, %v6393_v41  ;;  %v6972_v43 = vsel %vm6029_vm7, %v6970_v31, %v6971_v51  ;;  %v5306_v51 = vld [vmem:[#allocation2 + $0x174] sm:$0xc]  ;;  %v12386_v18 = vld [vmem:[#allocation2 + $0x13c] sm:$0xf]  ;;  %v4994_v4 = vld [vmem:[#allocation2 + $0x190] sm:$0xf] }
 0x431   :  { %6134 = vrot.lane.b32.xlu0 %v6044_v63, %s12419_s18  ;;  %v6745_v12 = vpop.permute.xlu1 %6744  ;;  %v7038_v63 = vsel %vm6029_vm7, %v7036_v19, %v7037_v48  ;;  %v4791_v19 = vld [vmem:[#allocation2 + $0x138] sm:$0xf]  ;;  %v10367_v24 = vcombine.low %v5306_v51, %v17979_v54  ;;  %v5121_v51 = vld [vmem:[#allocation2 + $0x18c] sm:$0xc] }
 0x432   :  { %v8253_v46 = vsel %vm8209_vm11, %v8188_v56, %v6745_v12  ;;  %v4802_v56 = vld [vmem:[#allocation2 + $0x178] sm:$0xf]  ;;  %v9927_v33 = vcombine.low %v4791_v19, %v12386_v18  ;;  %v5143_v18 = vld [vmem:[#allocation2 + $0x70] sm:$0xf] }
 0x433   :  { %v7097_v6 = vpop.permute.xlu0 %7096  ;;  %6178 = vrot.lane.b32.xlu1 %v6110_v11, %s12419_s18  ;;  %v5184_v11 = vld [vmem:[#allocation2 + $0x198] sm:$0xf]  ;;  %v9991_v42 = vcombine.low %v4865_v21, %v4802_v56 }
 0x434   :  { %v8318_v49 = vsel %vm8274_vm12, %v8253_v46, %v7097_v6  ;;  %v9947_v46 = vcombine.low %v4821_v2, %v4758_v62  ;;  %v10251_v6 = vcombine.low %v5184_v11, %v5185_v58  ;;  %v18148_v48 = vld [vmem:[#allocation2 + $0x58] sm:$0xf]  ;;  %v7890_v11 = vrot.slane %v12203_v0, 2 }
 0x435   :  { %6358 = vrot.lane.b32.xlu0 %v10069_v9, %s12420_s23  ;;  %v7321_v10 = vpop.permute.xlu1 %7320  ;;  %v12194_v9 = vld [vmem:[#allocation2 + $0x44] ss:$0 sps:$4 sm:$0x11]   ;;  %v5758_v13 = vrot.slane %v9991_v42, 1 }
 0x436   :  { %v8383_v60 = vsel %vm8339_vm14, %v8318_v49, %v7321_v10  ;;  %v7613_v49 = vrot.slane %v12192_v17, 1  ;;  %v5692_v10 = vrot.slane %v9947_v46, 1  ;;  %v5693_v7 = vrot.slane %v12194_v9, 1 }
 0x437   :  { %v7673_v3 = vpop.permute.xlu0 %7672  ;;  %6402 = vrot.lane.b32.xlu1 %v10091_v52, %s12420_s23  ;;  %v4885_v52 = vld [vmem:[#allocation2 + $0x3c] sm:$0xc]  ;;  %v5760_v2 = vsel %vm3776_vm13, %v5758_v13, %v5759_v53  ;;  %v7955_v9 = vrot.slane %v10367_v24, 2  ;;  %v12213_v53 = vld [vmem:[#allocation2 + $0x5c] ss:$0 sps:$4 sm:$0x33]  }
 0x438   :  { %v8469_v50 = vsel %vm8404_vm15, %v8383_v60, %v7673_v3  ;;  %v10011_v38 = vcombine.low %v4885_v52, %v4758_v62  ;;  %v4929_v60 = vld [vmem:[#allocation2 + $0x174] sm:$0xc]  ;;  %v12198_v3 = vld [vmem:[#allocation2 + $0x44] ss:$0 sps:$4 sm:$0x33]   ;;  %v7614_v35 = vsel %vm3776_vm13, %v7612_v39, %v7613_v49  ;;  %v5694_v58 = vsel %vm3776_vm13, %v5692_v10, %v5693_v7 }
 0x439   :  { %8914 = vmatmul.mubr.bf16.gmra.mxu1 %v8469_v50  ;;  %6710 = vrot.lane.b32.xlu0 %v6620_v37, %s12421_s24  ;;  %v18123_v14 = vpop.permute.xlu1 %5817  ;;  %v10055_v32 = vcombine.low %v4929_v60, %v4802_v56  ;;  %v10323_v50 = vcombine.low %v5262_v44, %v17975_v36  ;;  %v12385_v37 = vld [vmem:[#allocation2 + $0x4] sm:$0xf]  ;;  %v6046_v56 = vrot.slane %v12198_v3, 2  ;;  %v12209_v49 = vld [vmem:[#allocation2 + $0x5c] ss:$0 sps:$4 sm:$0x11]  }
 0x43a   :  { %10417 = vmatprep.mubr.msk.bf16.mxu1 %vm8642_vm8, %v8547_v16  ;;  %v9905_v31 = vcombine.low %v4747_v5, %v12385_v37  ;;  %v12200_v16 = vld [vmem:[#allocation2 + $0x17c] ss:$0 sps:$4 sm:$0x33]   ;;  %v4949_v52 = vld [vmem:[#allocation2 + $0x54] sm:$0xf] }
 0x43b   :  { %v18127_v47 = vpop.permute.xlu0 %6126  ;;  %6754 = vrot.lane.b32.xlu1 %v6686_v61, %s12421_s24  ;;  %v6111_v62 = vrot.slane %v10055_v32, 2  ;;  %v7889_v28 = vrot.slane %v10323_v50, 2  ;;  %v6112_v54 = vrot.slane %v12200_v16, 2  ;;  %v10070_v44 = vcombine.low %v4949_v52, %v18148_v48  ;;  %v4993_v7 = vld [vmem:[#allocation2 + $0x18c] sm:$0xf] }
 0x43c   :  { %v5077_v3 = vld [vmem:[#allocation2 + $0x54] sm:$0xc]  ;;  %v12211_v37 = vld [vmem:[#allocation2 + $0x194] ss:$0 sps:$4 sm:$0x11]   ;;  %v10092_v0 = vcombine.low %v4993_v7, %v4994_v4 }
 0x43d   :  { %7062 = vrot.lane.b32.xlu0 %v6972_v43, %s12422_s27  ;;  %v18132_v41 = vpop.permute.xlu1 %6170  ;;  %v6045_v43 = vrot.slane %v10011_v38, 2  ;;  %v6113_v39 = vsel %vm6029_vm7, %v6111_v62, %v6112_v54  ;;  %v7891_v55 = vsel %vm6029_vm7, %v7889_v28, %v7890_v11  ;;  %v6688_v62 = vrot.slane %v12211_v37, 1  ;;  %v5206_v54 = vld [vmem:[#allocation2 + $0x6c] sm:$0xe] }
 0x43e   :  { %v12221_v52 = vld [vmem:[#allocation2 + $0x1ac] ss:$0 sps:$4 sm:$0x11]   ;;  %v12223_v37 = vld [vmem:[#allocation2 + $0x50] ss:$0 sps:$4 sm:$0x11]  }
 0x43f   :  { %v18135_v12 = vpop.permute.xlu0 %6350  ;;  %7106 = vrot.lane.b32.xlu1 %v7038_v63, %s12422_s27  ;;  %v7985_v63 = vsel %vm7982_vm6, %v9905_v31, %v17780_v8  ;;  %v8051_v8 = vsel %vm7982_vm6, %v9927_v33, %v18123_v14  ;;  %v5057_v14 = vld [vmem:[#allocation2 + $0x18c] sm:$0xe]  ;;  %v10171_v31 = vcombine.low %v5077_v3, %v18148_v48 }
 0x440   :  { %v8081_v17 = vsel %vm8079_vm9, %v7985_v63, %v18127_v47  ;;  %v8125_v47 = vsel %vm8079_vm9, %v8051_v8, %v18132_v41  ;;  %v10151_v38 = vcombine.low %v5057_v14, %v4994_v4  ;;  %v10267_v8 = vcombine.low %v5206_v54, %v5143_v18  ;;  %v4804_v14 = vld [vmem:[#allocation2 + $0x184] sm:$0xf] }
 0x441   :  { %7286 = vrot.lane.b32.xlu0 %v10229_v22, %s12423_s29  ;;  %v18139_v45 = vpop.permute.xlu1 %6394  ;;  %v5013_v22 = vld [vmem:[#allocation2 + $0x54] sm:$0xe]  ;;  %v8146_v5 = vsel %vm8144_vm10, %v8081_v17, %v18135_v12  ;;  %v6973_v28 = vrot.slane %v10171_v31, 2  ;;  %v4887_v31 = vld [vmem:[#allocation2 + $0x48] sm:$0xc] }
 0x442   :  { %v10107_v21 = vcombine.low %v5013_v22, %v18148_v48  ;;  %v8190_v12 = vsel %vm8144_vm10, %v8125_v47, %v18139_v45  ;;  %v5250_v47 = vld [vmem:[#allocation2 + $0x1a4] sm:$0xe] }
 0x443   :  { %v6703_v34 = vpop.permute.xlu0 %6702  ;;  %7330 = vrot.lane.b32.xlu1 %v10251_v6, %s12423_s29  ;;  %v6047_v6 = vsel %vm6029_vm7, %v6045_v43, %v6046_v56  ;;  %v10215_v43 = vcombine.low %v5121_v51, %v4994_v4  ;;  %v12387_v51 = vld [vmem:[#allocation2 + $0x10] sm:$0xf] }
 0x444   :  { %v8211_v42 = vsel %vm8209_vm11, %v8146_v5, %v6703_v34  ;;  %v6621_v13 = vrot.slane %v10107_v21, 1  ;;  %v5142_v21 = vld [vmem:[#allocation2 + $0x6c] sm:$0xf]  ;;  %v12219_v5 = vld [vmem:[#allocation2 + $0x74] ss:$0 sps:$4 sm:$0x11]  }
 0x445   :  { %7638 = vrot.lane.b32.xlu0 %v7548_v57, %s12424_s5  ;;  %v6747_v23 = vpop.permute.xlu1 %6746  ;;  %v7956_v57 = vrot.slane %v12207_v1, 2  ;;  %v12215_v1 = vld [vmem:[#allocation2 + $0x194] ss:$0 sps:$4 sm:$0x33]   ;;  %v7039_v56 = vrot.slane %v10215_v43, 2  ;;  %v7550_v3 = vrot.slane %v12219_v5, 1 }
 0x446   :  { %v8255_v41 = vsel %vm8209_vm11, %v8190_v12, %v6747_v23  ;;  %v7040_v4 = vrot.slane %v12215_v1, 2  ;;  %v4931_v43 = vld [vmem:[#allocation2 + $0x180] sm:$0xc]  ;;  %v12388_v5 = vld [vmem:[#allocation2 + $0x148] sm:$0xf] }
 0x447   :  { %v7055_v61 = vpop.permute.xlu0 %7054  ;;  %7682 = vrot.lane.b32.xlu1 %v7614_v35, %s12424_s5  ;;  %v7957_v50 = vsel %vm6029_vm7, %v7955_v9, %v7956_v57  ;;  %v8505_v35 = vsel %vm7982_vm6, %v7891_v55, 1065369472  ;;  %v4823_v57 = vld [vmem:[#allocation2 + $0x48] sm:$0xe]  ;;  %v10057_v1 = vcombine.low %v4931_v43, %v4804_v14 }
 0x448   :  { %v8276_v10 = vsel %vm8274_vm12, %v8211_v42, %v7055_v61  ;;  %v6622_v61 = vrot.slane %v12209_v49, 1  ;;  %v8549_v48 = vsel %vm7982_vm6, %v7957_v50, 1065369472  ;;  %v4760_v42 = vld [vmem:[#allocation2 + $0x4c] sm:$0xf] }
 0x449   :  { %5783 = vrot.lane.b32.xlu0 %v5694_v58, %s12418_s0  ;;  %v7099_v36 = vpop.permute.xlu1 %7098  ;;  %v6687_v58 = vrot.slane %v10151_v38, 1  ;;  %v7549_v38 = vrot.slane %v10267_v8, 1  ;;  %v12238_v43 = vld [vmem:[#allocation2 + $0x68] ss:$0 sps:$4 sm:$0x11]  }
 0x44a   :  { %v8320_v32 = vsel %vm8274_vm12, %v8255_v41, %v7099_v36  ;;  %v6623_v36 = vsel %vm3776_vm13, %v6621_v13, %v6622_v61  ;;  %v9949_v41 = vcombine.low %v4823_v57, %v4760_v42  ;;  %v10013_v61 = vcombine.low %v4887_v31, %v4760_v42  ;;  %v4952_v57 = vld [vmem:[#allocation2 + $0x64] sm:$0xf] }
 0x44b   :  { %v7279_v46 = vpop.permute.xlu0 %7278  ;;  %5827 = vrot.lane.b32.xlu1 %v5760_v2, %s12418_s0  ;;  %v6689_v33 = vsel %vm3776_vm13, %v6687_v58, %v6688_v62  ;;  %v6974_v2 = vrot.slane %v12213_v53, 2  ;;  %v7551_v58 = vsel %vm3776_vm13, %v7549_v38, %v7550_v3 }
 0x44c   :  { %v8341_v34 = vsel %vm8339_vm14, %v8276_v10, %v7279_v46  ;;  %v5187_v46 = vld [vmem:[#allocation2 + $0x1a8] sm:$0xf]  ;;  %v10230_v10 = vcombine.low %v5142_v21, %v5143_v18  ;;  %v5695_v53 = vrot.slane %v9949_v41, 1  ;;  %v4793_v18 = vld [vmem:[#allocation2 + $0x144] sm:$0xf] }
 0x44d   :  { %6136 = vrot.lane.b32.xlu0 %v6047_v6, %s12419_s18  ;;  %v7323_v40 = vpop.permute.xlu1 %7322  ;;  %v6975_v11 = vsel %vm6029_vm7, %v6973_v28, %v6974_v2  ;;  %v10311_v49 = vcombine.low %v5250_v47, %v5187_v46  ;;  %v12227_v28 = vld [vmem:[#allocation2 + $0x50] ss:$0 sps:$4 sm:$0x33]   ;;  %v5696_v2 = vrot.slane %v12223_v37, 1 }
 0x44e   :  { %v8385_v23 = vsel %vm8339_vm14, %v8320_v32, %v7323_v40  ;;  %v7041_v40 = vsel %vm6029_vm7, %v7039_v56, %v7040_v4  ;;  %v6048_v4 = vrot.slane %v10013_v61, 2  ;;  %v12229_v21 = vld [vmem:[#allocation2 + $0x188] ss:$0 sps:$4 sm:$0x33]   ;;  %v4951_v61 = vld [vmem:[#allocation2 + $0x60] sm:$0xf] }
 0x44f   :  { %v7631_v60 = vpop.permute.xlu0 %7630  ;;  %6180 = vrot.lane.b32.xlu1 %v6113_v39, %s12419_s18  ;;  %v5186_v39 = vld [vmem:[#allocation2 + $0x1a4] sm:$0xf]  ;;  %v7615_v50 = vrot.slane %v10311_v49, 1  ;;  %v5697_v47 = vsel %vm3776_vm13, %v5695_v53, %v5696_v2  ;;  %v6115_v3 = vrot.slane %v12229_v21, 2 }
 0x450   :  { %v8406_v45 = vsel %vm8404_vm15, %v8341_v34, %v7631_v60  ;;  %v4867_v60 = vld [vmem:[#allocation2 + $0x180] sm:$0xe]  ;;  %v10252_v13 = vcombine.low %v5186_v39, %v5187_v46  ;;  %v12242_v21 = vld [vmem:[#allocation2 + $0x68] ss:$0 sps:$4 sm:$0x33]  }
 0x451   :  { %8746 = vmatmul.mubr.bf16.vlgmr.msra.gmra.mxu0 %v8406_v45  ;;  %6360 = vrot.lane.b32.xlu0 %v10070_v44, %s12420_s23  ;;  %v7675_v16 = vpop.permute.xlu1 %7674  ;;  %v4749_v44 = vld [vmem:[#allocation2 + $0xc] sm:$0xf]  ;;  %v9993_v32 = vcombine.low %v4867_v60, %v4804_v14  ;;  %v5264_v45 = vld [vmem:[#allocation2 + $0x48] sm:$0xc]  ;;  %v6049_v14 = vrot.slane %v12227_v28, 2  ;;  %v10071_v28 = vcombine.low %v4951_v61, %v4952_v57 }
 0x452   :  { %10396 = vmatprep.mubr.msk.bf16.mxu0 %vm8642_vm8, %v8505_v35  ;;  %v8472_v19 = vsel %vm8404_vm15, %v8385_v23, %v7675_v16  ;;  %v10325_v23 = vcombine.low %v5264_v45, %v18025_v27  ;;  %v7616_v16 = vrot.slane %v12221_v52, 1  ;;  %v5308_v27 = vld [vmem:[#allocation2 + $0x180] sm:$0xc]  ;;  %v4996_v45 = vld [vmem:[#allocation2 + $0x19c] sm:$0xf] }
 0x453   :  { %v18186_v24 = vpop.permute.xlu0 %5819  ;;  %8922 = vmatmul.mubr.bf16.gmra.mxu1 %v8472_v19  ;;  %6404 = vrot.lane.b32.xlu1 %v10092_v0, %s12420_s23  ;;  %v12225_v0 = vld [vmem:[#allocation2 + $0x188] ss:$0 sps:$4 sm:$0x11]   ;;  %v9906_v19 = vcombine.low %v4749_v44, %v12387_v51  ;;  %v5761_v62 = vrot.slane %v9993_v32, 1  ;;  %v10369_v46 = vcombine.low %v5308_v27, %v18030_v30  ;;  %v5188_v61 = vld [vmem:[#allocation2 + $0x1b0] sm:$0xf] }
 0x454   :  { %10418 = vmatprep.mubr.msk.bf16.mxu1 %vm8642_vm8, %v8549_v48  ;;  %v12231_v48 = vld [vmem:[#allocation2 + $0x50] ss:$0 sps:$4 sm:$0x33]   ;;  %v7892_v56 = vrot.slane %v10325_v23, 2 }
 0x455   :  { %6712 = vrot.lane.b32.xlu0 %v6623_v36, %s12421_s24  ;;  %v18193_v63 = vpop.permute.xlu1 %6128  ;;  %v7988_v8 = vsel %vm7982_vm6, %v9906_v19, %v17787_v25  ;;  %v7893_v42 = vrot.slane %v12231_v48, 2  ;;  %v5059_v19 = vld [vmem:[#allocation2 + $0x198] sm:$0xe]  ;;  %v12240_v27 = vld [vmem:[#allocation2 + $0x1a0] ss:$0 sps:$4 sm:$0x11]  }
 0x456   :  { %v8083_v39 = vsel %vm8079_vm9, %v7988_v8, %v18193_v63  ;;  %v10153_v48 = vcombine.low %v5059_v19, %v4996_v45  ;;  %v12249_v19 = vld [vmem:[#allocation2 + $0x1b8] ss:$0 sps:$4 sm:$0x11]  }
 0x457   :  { %v18196_v22 = vpop.f32.mrf.mxu1  ;;  %v18198_v17 = vpop.permute.xlu0 %6172  ;;  %6756 = vrot.lane.b32.xlu1 %v6689_v33, %s12421_s24  ;;  %v7617_v33 = vsel %vm3776_vm13, %v7615_v50, %v7616_v16  ;;  %v7894_v41 = vsel %vm6029_vm7, %v7892_v56, %v7893_v42  ;;  %v6691_v42 = vrot.slane %v12240_v27, 1 }
 0x459   :  { %v8829_v6 = vpop.f32.mrf.mxu1  ;;  %7064 = vrot.lane.b32.xlu0 %v6975_v11, %s12422_s27  ;;  %v18203_v9 = vpop.permute.xlu1 %6352  ;;  %v5762_v11 = vrot.slane %v12225_v0, 1  ;;  %v8507_v0 = vsel %vm7982_vm6, %v7894_v41, 1065369472 }
 0x45a   :  { %v9928_v6 = vcombine.low %v4793_v18, %v12388_v5  ;;  %v8148_v38 = vsel %vm8144_vm10, %v8083_v39, %v18203_v9  ;;  %v5079_v18 = vld [vmem:[#allocation2 + $0x60] sm:$0xc]  ;;  %v6625_v5 = vrot.slane %v12238_v43, 1 }
 0x45b   :  { %v18206_v55 = vpop.f32.mrf.mxu1  ;;  %v18208_v12 = vpop.permute.xlu0 %6396  ;;  %7108 = vrot.lane.b32.xlu1 %v7041_v40, %s12422_s27  ;;  %v12235_v40 = vld [vmem:[#allocation2 + $0x188] ss:$0 sps:$4 sm:$0x33]   ;;  %v5763_v49 = vsel %vm3776_vm13, %v5761_v62, %v5762_v11  ;;  %v10173_v56 = vcombine.low %v5079_v18, %v4952_v57 }
 0x45c   :  { %v8054_v25 = vsel %vm7982_vm6, %v9928_v6, %v18186_v24  ;;  %v5015_v24 = vld [vmem:[#allocation2 + $0x60] sm:$0xe]  ;;  %v7959_v37 = vrot.slane %v12235_v40, 2  ;;  %v6690_v6 = vrot.slane %v10153_v48, 1 }
 0x45d   :  { %v8832_v34 = vpop.f32.mrf.mxu1  ;;  %7288 = vrot.lane.b32.xlu0 %v10230_v10, %s12423_s29  ;;  %v6705_v7 = vpop.permute.xlu1 %6704  ;;  %v6114_v10 = vrot.slane %v10057_v1, 2  ;;  %v8127_v63 = vsel %vm8079_vm9, %v8054_v25, %v18198_v17  ;;  %v10109_v31 = vcombine.low %v5015_v24, %v4952_v57  ;;  %v6976_v39 = vrot.slane %v10173_v56, 2  ;;  %v5189_v25 = vld [vmem:[#allocation2 + $0x1b4] sm:$0xf] }
 0x45e   :  { %v7958_v34 = vrot.slane %v10369_v46, 2  ;;  %v8213_v60 = vsel %vm8209_vm11, %v8148_v38, %v6705_v7  ;;  %v8192_v9 = vsel %vm8144_vm10, %v8127_v63, %v18208_v12  ;;  %v5123_v46 = vld [vmem:[#allocation2 + $0x198] sm:$0xc]  ;;  %v6692_v41 = vsel %vm3776_vm13, %v6690_v6, %v6691_v42  ;;  %v18270_v63 = vld [vmem:[#allocation2 + $0x190] sm:$0xf] }
 0x45f   :  { %v6749_v35 = vpop.permute.xlu0 %6748  ;;  %7332 = vrot.lane.b32.xlu1 %v10252_v13, %s12423_s29  ;;  %v6050_v13 = vsel %vm6029_vm7, %v6048_v4, %v6049_v14  ;;  %v6116_v16 = vsel %vm6029_vm7, %v6114_v10, %v6115_v3  ;;  %v6624_v2 = vrot.slane %v10109_v31, 1  ;;  %v10217_v8 = vcombine.low %v5123_v46, %v4996_v45  ;;  %v5208_v38 = vld [vmem:[#allocation2 + $0x78] sm:$0xe] }
 0x460   :  { %v8257_v17 = vsel %vm8209_vm11, %v8192_v9, %v6749_v35  ;;  %v7960_v53 = vsel %vm6029_vm7, %v7958_v34, %v7959_v37  ;;  %v4995_v35 = vld [vmem:[#allocation2 + $0x198] sm:$0xf]  ;;  %v6977_v10 = vrot.slane %v12242_v21, 2  ;;  %v4825_v9 = vld [vmem:[#allocation2 + $0x54] sm:$0xe]  ;;  %v10253_v56 = vcombine.low %v5188_v61, %v5189_v25 }
 0x461   :  { %7640 = vrot.lane.b32.xlu0 %v7551_v58, %s12424_s5  ;;  %v7057_v36 = vpop.permute.xlu1 %7056  ;;  %v8551_v11 = vsel %vm7982_vm6, %v7960_v53, 1065369472  ;;  %v10093_v4 = vcombine.low %v4995_v35, %v4996_v45  ;;  %v6626_v40 = vsel %vm3776_vm13, %v6624_v2, %v6625_v5  ;;  %v7042_v57 = vrot.slane %v10217_v8, 2  ;;  %v18268_v34 = vld [vmem:[#allocation2 + $0x58] sm:$0xf] }
 0x462   :  { %v8278_v50 = vsel %vm8274_vm12, %v8213_v60, %v7057_v36  ;;  %v6978_v3 = vsel %vm6029_vm7, %v6976_v39, %v6977_v10  ;;  %v4751_v37 = vld [vmem:[#allocation2 + $0x18] sm:$0xf]  ;;  %v4889_v21 = vld [vmem:[#allocation2 + $0x54] sm:$0xc]  ;;  %v7619_v6 = vrot.slane %v12249_v19, 1 }
 0x463   :  { %v7101_v54 = vpop.permute.xlu0 %7100  ;;  %7684 = vrot.lane.b32.xlu1 %v7617_v33, %s12424_s5  ;;  %v12255_v39 = vld [vmem:[#allocation2 + $0x5c] ss:$0 sps:$4 sm:$0x33]  }
 0x464   :  { %v8322_v12 = vsel %vm8274_vm12, %v8257_v17, %v7101_v54  ;;  %v5144_v17 = vld [vmem:[#allocation2 + $0x78] sm:$0xf] }
 0x465   :  { %5785 = vrot.lane.b32.xlu0 %v5697_v47, %s12418_s0  ;;  %v7281_v30 = vpop.permute.xlu1 %7280  ;;  %v18226_v52 = vpop.f32.mrf.mxu1 }
 0x466   :  { %v8343_v7 = vsel %vm8339_vm14, %v8278_v50, %v7281_v30  ;;  %v12244_v30 = vld [vmem:[#allocation2 + $0x1a0] ss:$0 sps:$4 sm:$0x33]   ;;  %v4869_v50 = vld [vmem:[#allocation2 + $0x18c] sm:$0xe] }
 0x467   :  { %v7325_v44 = vpop.permute.xlu0 %7324  ;;  %5829 = vrot.lane.b32.xlu1 %v5763_v49, %s12418_s0  ;;  %v8837_v32 = vpop.f32.mrf.mxu1  ;;  %v5145_v49 = vld [vmem:[#allocation2 + $0x7c] sm:$0xf] }
 0x468   :  { %v8387_v36 = vsel %vm8339_vm14, %v8322_v12, %v7325_v44  ;;  %v12248_v44 = vld [vmem:[#allocation2 + $0x80] ss:$0 sps:$4 sm:$0x11]   ;;  %v7043_v32 = vrot.slane %v12244_v30, 2  ;;  %v10269_v45 = vcombine.low %v5208_v38, %v5145_v49  ;;  %v10231_v43 = vcombine.low %v5144_v17, %v5145_v49  ;;  %v12390_v49 = vld [vmem:[#allocation2 + $0x154] sm:$0xf] }
 0x469   :  { %6138 = vrot.lane.b32.xlu0 %v6050_v13, %s12419_s18  ;;  %v7633_v23 = vpop.permute.xlu1 %7632  ;;  %v18246_v51 = vpop.f32.mrf.mxu1  ;;  %v5252_v13 = vld [vmem:[#allocation2 + $0x1b0] sm:$0xe]  ;;  %v12251_v12 = vld [vmem:[#allocation2 + $0x5c] ss:$0 sps:$4 sm:$0x11]   ;;  %v7553_v27 = vrot.slane %v12248_v44, 1 }
 0x46a   :  { %v8409_v58 = vsel %vm8404_vm15, %v8343_v7, %v7633_v23  ;;  %v10313_v24 = vcombine.low %v5252_v13, %v5189_v25  ;;  %v9951_v23 = vcombine.low %v4825_v9, %v18268_v34  ;;  %v5699_v42 = vrot.slane %v12251_v12, 1 }
 0x46b   :  { %v7677_v62 = vpop.permute.xlu0 %7676  ;;  %8754 = vmatmul.mubr.bf16.gmra.mxu0 %v8409_v58  ;;  %6182 = vrot.lane.b32.xlu1 %v6116_v16, %s12419_s18  ;;  %v8840_v1 = vpop.f32.mrf.mxu1  ;;  %v9995_v16 = vcombine.low %v4869_v50, %v18270_v63  ;;  %v12389_v58 = vld [vmem:[#allocation2 + $0x1c] sm:$0xf]  ;;  %v4933_v50 = vld [vmem:[#allocation2 + $0x18c] sm:$0xc]  ;;  %v6052_v12 = vrot.slane %v12255_v39, 2 }
 0x46c   :  { %10397 = vmatprep.mubr.msk.bf16.mxu0 %vm8642_vm8, %v8507_v0  ;;  %v8475_v33 = vsel %vm8404_vm15, %v8387_v36, %v7677_v62  ;;  %v7044_v0 = vsel %vm6029_vm7, %v7042_v57, %v7043_v32  ;;  %v9907_v53 = vcombine.low %v4751_v37, %v12389_v58  ;;  %v12253_v36 = vld [vmem:[#allocation2 + $0x194] ss:$0 sps:$4 sm:$0x11]   ;;  %v4795_v62 = vld [vmem:[#allocation2 + $0x150] sm:$0xf]  ;;  %v7552_v1 = vrot.slane %v10269_v45, 1 }
 0x46d   :  { %8930 = vmatmul.mubr.bf16.gmra.mxu1 %v8475_v33  ;;  %6362 = vrot.lane.b32.xlu0 %v10071_v28, %s12420_s23  ;;  %v18256_v54 = vpop.permute.xlu1 %5821  ;;  %v7618_v18 = vrot.slane %v10313_v24, 1  ;;  %v5266_v33 = vld [vmem:[#allocation2 + $0x54] sm:$0xc]  ;;  %v9929_v10 = vcombine.low %v4795_v62, %v12390_v49  ;;  %v5765_v38 = vrot.slane %v12253_v36, 1  ;;  %v5061_v39 = vld [vmem:[#allocation2 + $0x1a4] sm:$0xe] }
 0x46e   :  { %10419 = vmatprep.mubr.msk.bf16.mxu1 %vm8642_vm8, %v8551_v11  ;;  %v5698_v11 = vrot.slane %v9951_v23, 1  ;;  %v10327_v8 = vcombine.low %v5266_v33, %v18073_v15  ;;  %v7991_v30 = vsel %vm7982_vm6, %v9907_v53, %v17790_v26  ;;  %v5310_v15 = vld [vmem:[#allocation2 + $0x18c] sm:$0xc]  ;;  %v7554_v13 = vsel %vm3776_vm13, %v7552_v1, %v7553_v27  ;;  %v12258_v53 = vld [vmem:[#allocation2 + $0x194] ss:$0 sps:$4 sm:$0x33]  }
 0x46f   :  { %v18260_v47 = vpop.permute.xlu0 %6130  ;;  %6406 = vrot.lane.b32.xlu1 %v10093_v4, %s12420_s23  ;;  %v5764_v4 = vrot.slane %v9995_v16, 1  ;;  %v10371_v32 = vcombine.low %v5310_v15, %v18079_v29  ;;  %v7620_v26 = vsel %vm3776_vm13, %v7618_v18, %v7619_v6  ;;  %v10059_v16 = vcombine.low %v4933_v50, %v18270_v63  ;;  %v4954_v18 = vld [vmem:[#allocation2 + $0x70] sm:$0xf]  ;;  %v4953_v15 = vld [vmem:[#allocation2 + $0x6c] sm:$0xf] }
 0x470   :  { %v5700_v45 = vsel %vm3776_vm13, %v5698_v11, %v5699_v42  ;;  %v7895_v9 = vrot.slane %v10327_v8, 2  ;;  %v8085_v29 = vsel %vm8079_vm9, %v7991_v30, %v18260_v47  ;;  %v5017_v8 = vld [vmem:[#allocation2 + $0x6c] sm:$0xe] }
 0x471   :  { %6714 = vrot.lane.b32.xlu0 %v6626_v40, %s12421_s24  ;;  %v18265_v14 = vpop.permute.xlu1 %6174  ;;  %v10015_v40 = vcombine.low %v4889_v21, %v18268_v34  ;;  %v5766_v24 = vsel %vm3776_vm13, %v5764_v4, %v5765_v38  ;;  %v7961_v62 = vrot.slane %v10371_v32, 2  ;;  %v6118_v21 = vrot.slane %v12258_v53, 2  ;;  %v12265_v53 = vld [vmem:[#allocation2 + $0x1ac] ss:$0 sps:$4 sm:$0x33]  }
 0x473   :  { %v18272_v60 = vpop.permute.xlu0 %6354  ;;  %6758 = vrot.lane.b32.xlu1 %v6692_v41, %s12421_s24  ;;  %v12256_v41 = vld [vmem:[#allocation2 + $0x5c] ss:$0 sps:$4 sm:$0x33]   ;;  %v6051_v23 = vrot.slane %v10015_v40, 2  ;;  %v10111_v40 = vcombine.low %v5017_v8, %v4954_v18  ;;  %v4827_v8 = vld [vmem:[#allocation2 + $0x60] sm:$0xe] }
 0x474   :  { %v7896_v58 = vrot.slane %v12256_v41, 2 }
 0x475   :  { %7066 = vrot.lane.b32.xlu0 %v6978_v3, %s12422_s27  ;;  %v18277_v31 = vpop.permute.xlu1 %6398  ;;  %v6053_v4 = vsel %vm6029_vm7, %v6051_v23, %v6052_v12  ;;  %v12264_v12 = vld [vmem:[#allocation2 + $0x74] ss:$0 sps:$4 sm:$0x33]  }
 0x476   :  { %v18279_v7 = vpop.f32.mrf.mxu1  ;;  %v7897_v27 = vsel %vm6029_vm7, %v7895_v9, %v7896_v58  ;;  %v4997_v9 = vld [vmem:[#allocation2 + $0x1a4] sm:$0xf] }
 0x477   :  { %v18284_v35 = vpop.permute.xlu0 %6706  ;;  %7110 = vrot.lane.b32.xlu1 %v7044_v0, %s12422_s27  ;;  %v9022_v28 = vmax.f32 %v18196_v22, %v18279_v7  ;;  %v12259_v0 = vld [vmem:[#allocation2 + $0x194] ss:$0 sps:$4 sm:$0x33]  }
 0x478   :  { %v8845_v48 = vpop.f32.mrf.mxu1  ;;  %v7962_v33 = vrot.slane %v12259_v0, 2 }
 0x479   :  { %7290 = vrot.lane.b32.xlu0 %v10231_v43, %s12423_s29  ;;  %v18290_v2 = vpop.permute.xlu1 %6750  ;;  %v9145_v44 = vrot.slane %v9022_v28, 2  ;;  %v8057_v43 = vsel %vm7982_vm6, %v9929_v10, %v18256_v54  ;;  %v8150_v48 = vsel %vm8144_vm10, %v8085_v29, %v18272_v60  ;;  %v8509_v10 = vsel %vm7982_vm6, %v7897_v27, 1065369472  ;;  %v5254_v27 = vld [vmem:[#allocation2 + $0x1bc] sm:$0xe] }
 0x47a   :  { %v18292_v46 = vpop.f32.mrf.mxu1  ;;  %v8129_v63 = vsel %vm8079_vm9, %v8057_v43, %v18265_v14  ;;  %v8215_v47 = vsel %vm8209_vm11, %v8150_v48, %v18284_v35  ;;  %v6117_v14 = vrot.slane %v10059_v16, 2  ;;  %v18329_v35 = vld [vmem:[#allocation2 + $0x1a8] sm:$0xf] }
 0x47b   :  { %v9023_v5 = vmax.f32 %v18206_v55, %v18292_v46  ;;  %v7059_v57 = vpop.permute.xlu0 %7058  ;;  %7334 = vrot.lane.b32.xlu1 %v10253_v56, %s12423_s29  ;;  %v8194_v54 = vsel %vm8144_vm10, %v8129_v63, %v18277_v31  ;;  %v10094_v23 = vcombine.low %v4997_v9, %v18329_v35 }
 0x47c   :  { %v8848_v25 = vpop.f32.mrf.mxu1  ;;  %v8280_v60 = vsel %vm8274_vm12, %v8215_v47, %v7059_v57  ;;  %v8259_v56 = vsel %vm8209_vm11, %v8194_v54, %v18290_v2  ;;  %v7963_v2 = vsel %vm6029_vm7, %v7961_v62, %v7962_v33  ;;  %v12262_v57 = vld [vmem:[#allocation2 + $0x74] ss:$0 sps:$4 sm:$0x11]   ;;  %v6119_v41 = vsel %vm6029_vm7, %v6117_v14, %v6118_v21  ;;  %v18371_v47 = vld [vmem:[#allocation2 + $0x88] sm:$0xf] }
 0x47d   :  { %v9146_v3 = vrot.slane %v9023_v5, 2  ;;  %7642 = vrot.lane.b32.xlu0 %v7554_v13, %s12424_s5  ;;  %v7103_v34 = vpop.permute.xlu1 %7102  ;;  %v10155_v25 = vcombine.low %v5061_v39, %v18329_v35  ;;  %v5081_v13 = vld [vmem:[#allocation2 + $0x6c] sm:$0xc]  ;;  %v6628_v0 = vrot.slane %v12262_v57, 1  ;;  %v18382_v33 = vld [vmem:[#allocation2 + $0x1bc] sm:$0xf] }
 0x47e   :  { %v5210_v21 = vld [vmem:[#allocation2 + $0x84] sm:$0xe]  ;;  %v12270_v39 = vld [vmem:[#allocation2 + $0x1c4] ss:$0 sps:$4 sm:$0x11]  }
 0x47f   :  { %v9147_v37 = vsel %vm6029_vm7, %v9145_v44, %v9146_v3  ;;  %v9276_v17 = vmax.f32 %v9023_v5, %v9146_v3  ;;  %v7283_v61 = vpop.permute.xlu0 %7282  ;;  %7686 = vrot.lane.b32.xlu1 %v7620_v26, %s12424_s5  ;;  %v8324_v5 = vsel %vm8274_vm12, %v8259_v56, %v7103_v34  ;;  %v8553_v34 = vsel %vm7982_vm6, %v7963_v2, 1065369472 }
 0x480   :  { %v9275_v19 = vmax.f32 %v9022_v28, %v9147_v37  ;;  %v8345_v11 = vsel %vm8339_vm14, %v8280_v60, %v7283_v61  ;;  %v10072_v26 = vcombine.low %v4953_v15, %v4954_v18  ;;  %v6627_v37 = vrot.slane %v10111_v40, 1  ;;  %v5125_v61 = vld [vmem:[#allocation2 + $0x1a4] sm:$0xc] }
 0x481   :  { %v9332_v36 = vmax.f32 %v9276_v17, 0.0  ;;  %5787 = vrot.lane.b32.xlu0 %v5700_v45, %s12418_s0  ;;  %v7327_v1 = vpop.permute.xlu1 %7326  ;;  %v12263_v45 = vld [vmem:[#allocation2 + $0x1ac] ss:$0 sps:$4 sm:$0x11]   ;;  %v6693_v29 = vrot.slane %v10155_v25, 1  ;;  %v10219_v58 = vcombine.low %v5125_v61, %v18329_v35  ;;  %v10271_v2 = vcombine.low %v5210_v21, %v18371_v47 }
 0x482   :  { %v9331_v28 = vmax.f32 %v9275_v19, 0.0  ;;  %v8389_v30 = vsel %vm8339_vm14, %v8324_v5, %v7327_v1  ;;  %v6694_v62 = vrot.slane %v12263_v45, 1  ;;  %v18374_v1 = vld [vmem:[#allocation2 + $0x1c0] sm:$0xf]  ;;  %v18384_v35 = vld [vmem:[#allocation2 + $0x19c] sm:$0xf] }
 0x483   :  { %9389 = vst.msk [vmem:[%s19084_s3 + $0xa8] sm:$0x3f] %vm9368_vm0, %v9332_v36  ;;  %v7635_v31 = vpop.permute.xlu0 %7634  ;;  %5831 = vrot.lane.b32.xlu1 %v5766_v24, %s12418_s0  ;;  %v18342_v42 = vpop.f32.mrf.mxu1  ;;  %v10175_v24 = vcombine.low %v5081_v13, %v4954_v18  ;;  %v18376_v18 = vld [vmem:[#allocation2 + $0x64] sm:$0xf]  ;;  %v10315_v40 = vcombine.low %v5254_v27, %v18374_v1  ;;  %v10254_v9 = vcombine.low %v18382_v33, %v18374_v1  ;;  %v7555_v61 = vrot.slane %v10271_v2, 1 }
 0x484   :  { %9388 = vst.msk [vmem:[%s19084_s3 + $0xa0] sm:$0xff] %vm2837_vm4, %v9331_v28  ;;  %v8412_v6 = vsel %vm8404_vm15, %v8345_v11, %v7635_v31  ;;  %v9024_v32 = vmax.f32 %v18226_v52, %v18342_v42  ;;  %v6629_v28 = vsel %vm3776_vm13, %v6627_v37, %v6628_v0  ;;  %v6695_v11 = vsel %vm3776_vm13, %v6693_v29, %v6694_v62  ;;  %v12272_v37 = vld [vmem:[#allocation2 + $0x68] ss:$0 sps:$4 sm:$0x11]   ;;  %v4891_v62 = vld [vmem:[#allocation2 + $0x60] sm:$0xc] }
 0x485   :  { %8762 = vmatmul.mubr.bf16.gmra.mxu0 %v8412_v6  ;;  %6140 = vrot.lane.b32.xlu0 %v6053_v4, %s12419_s18  ;;  %v7679_v49 = vpop.permute.xlu1 %7678  ;;  %v8853_v44 = vpop.f32.mrf.mxu1  ;;  %v6979_v63 = vrot.slane %v10175_v24, 2  ;;  %v6980_v31 = vrot.slane %v12264_v12, 2  ;;  %v7045_v4 = vrot.slane %v10219_v58, 2  ;;  %v7622_v12 = vrot.slane %v12270_v39, 1  ;;  %v5312_v33 = vld [vmem:[#allocation2 + $0x198] sm:$0xc] }
 0x486   :  { %10398 = vmatprep.mubr.msk.bf16.mxu0 %vm8642_vm8, %v8509_v10  ;;  %v8478_v38 = vsel %vm8404_vm15, %v8389_v30, %v7679_v49  ;;  %v9148_v43 = vrot.slane %v9024_v32, 2  ;;  %v9953_v30 = vcombine.low %v4827_v8, %v18376_v18  ;;  %v4871_v49 = vld [vmem:[#allocation2 + $0x198] sm:$0xe]  ;;  %v4753_v10 = vld [vmem:[#allocation2 + $0x24] sm:$0xf] }
 0x487   :  { %v18352_v3 = vpop.permute.xlu0 %5823  ;;  %8938 = vmatmul.mubr.bf16.gmra.mxu1 %v8478_v38  ;;  %6184 = vrot.lane.b32.xlu1 %v6119_v41, %s12419_s18  ;;  %v18359_v50 = vpop.f32.mrf.mxu1  ;;  %v6981_v25 = vsel %vm6029_vm7, %v6979_v63, %v6980_v31  ;;  %v7046_v38 = vrot.slane %v12265_v53, 2  ;;  %v5146_v41 = vld [vmem:[#allocation2 + $0x84] sm:$0xf]  ;;  %v9997_v15 = vcombine.low %v4871_v49, %v18384_v35  ;;  %v12391_v44 = vld [vmem:[#allocation2 + $0x28] sm:$0xf]  ;;  %v5702_v31 = vrot.slane %v12272_v37, 1 }
 0x488   :  { %10420 = vmatprep.mubr.msk.bf16.mxu1 %vm8642_vm8, %v8553_v34  ;;  %v9025_v16 = vmax.f32 %v18246_v51, %v18359_v50  ;;  %v9908_v13 = vcombine.low %v4753_v10, %v12391_v44  ;;  %v12269_v34 = vld [vmem:[#allocation2 + $0x8c] ss:$0 sps:$4 sm:$0x11]   ;;  %v10232_v24 = vcombine.low %v5146_v41, %v18371_v47  ;;  %v5701_v58 = vrot.slane %v9953_v30, 1  ;;  %v12393_v8 = vld [vmem:[#allocation2 + $0x19c] sm:$0xf] }
 0x489   :  { %6364 = vrot.lane.b32.xlu0 %v10072_v26, %s12420_s23  ;;  %v18362_v17 = vpop.permute.xlu1 %6132  ;;  %v8856_v19 = vpop.f32.mrf.mxu1  ;;  %v5268_v26 = vld [vmem:[#allocation2 + $0x60] sm:$0xc]  ;;  %v7047_v45 = vsel %vm6029_vm7, %v7045_v4, %v7046_v38  ;;  %v7556_v27 = vrot.slane %v12269_v34, 1  ;;  %v4935_v49 = vld [vmem:[#allocation2 + $0x198] sm:$0xc] }
 0x48a   :  { %v9149_v36 = vrot.slane %v9025_v16, 2  ;;  %v7621_v19 = vrot.slane %v10315_v40, 1  ;;  %v7994_v63 = vsel %vm7982_vm6, %v9908_v13, %v17809_v20  ;;  %v12394_v2 = vld [vmem:[#allocation2 + $0x160] sm:$0xf] }
 0x48b   :  { %v18368_v48 = vpop.permute.xlu0 %6176  ;;  %6408 = vrot.lane.b32.xlu1 %v10094_v23, %s12420_s23  ;;  %v12274_v23 = vld [vmem:[#allocation2 + $0x1a0] ss:$0 sps:$4 sm:$0x11]   ;;  %v7557_v30 = vsel %vm3776_vm13, %v7555_v61, %v7556_v27  ;;  %v8087_v44 = vsel %vm8079_vm9, %v7994_v63, %v18362_v17  ;;  %v18446_v27 = vld [vmem:[#allocation2 + $0x1b4] sm:$0xf] }
 0x48c   :  { %v9150_v54 = vsel %vm6029_vm7, %v9148_v43, %v9149_v36  ;;  %v9278_v60 = vmax.f32 %v9025_v16, %v9149_v36  ;;  %v12392_v16 = vld [vmem:[#allocation2 + $0x64] sm:$0xf]  ;;  %v5767_v43 = vrot.slane %v9997_v15, 1  ;;  %v12275_v36 = vld [vmem:[#allocation2 + $0x68] ss:$0 sps:$4 sm:$0x33]   ;;  %v10061_v15 = vcombine.low %v4935_v49, %v18384_v35 }
 0x48d   :  { %6716 = vrot.lane.b32.xlu0 %v6629_v28, %s12421_s24  ;;  %v18380_v14 = vpop.permute.xlu1 %6356  ;;  %v9277_v56 = vmax.f32 %v9024_v32, %v9150_v54  ;;  %v10329_v0 = vcombine.low %v5268_v26, %v12392_v16  ;;  %v10017_v54 = vcombine.low %v4891_v62, %v18376_v18  ;;  %v5768_v4 = vrot.slane %v12274_v23, 1  ;;  %v12278_v41 = vld [vmem:[#allocation2 + $0x1a0] ss:$0 sps:$4 sm:$0x33]   ;;  %v4955_v49 = vld [vmem:[#allocation2 + $0x78] sm:$0xf] }
 0x48e   :  { %v9334_v5 = vmax.f32 %v9278_v60, 0.0  ;;  %v18413_v60 = vld [vmem:[#allocation2 + $0x68] ss:$0 sps:$4 sm:$0x33]   ;;  %v7623_v18 = vsel %vm3776_vm13, %v7621_v19, %v7622_v12  ;;  %v7899_v38 = vrot.slane %v12275_v36, 2  ;;  %v7965_v19 = vrot.slane %v12278_v41, 2 }
 0x48f   :  { %v18387_v6 = vpop.permute.xlu0 %6400  ;;  %6760 = vrot.lane.b32.xlu1 %v6695_v11, %s12421_s24  ;;  %v9333_v57 = vmax.f32 %v9277_v56, 0.0  ;;  %v4797_v56 = vld [vmem:[#allocation2 + $0x15c] sm:$0xf]  ;;  %v7898_v21 = vrot.slane %v10329_v0, 2  ;;  %v6054_v34 = vrot.slane %v10017_v54, 2  ;;  %v6055_v26 = vrot.slane %v18413_v60, 2 }
 0x490   :  { %9391 = vst.msk [vmem:[%s19084_s3 + $0xb8] sm:$0x3f] %vm9368_vm0, %v9334_v5  ;;  %v10373_v5 = vcombine.low %v5312_v33, %v12393_v8  ;;  %v9930_v40 = vcombine.low %v4797_v56, %v12394_v2  ;;  %v12280_v61 = vld [vmem:[#allocation2 + $0x1a0] ss:$0 sps:$4 sm:$0x33]   ;;  %v6120_v12 = vrot.slane %v10061_v15, 2 }
 0x491   :  { %7068 = vrot.lane.b32.xlu0 %v6981_v25, %s12422_s27  ;;  %v6709_v32 = vpop.permute.xlu1 %6708  ;;  %9390 = vst.msk [vmem:[%s19084_s3 + $0xb0] sm:$0xff] %vm2837_vm4, %v9333_v57  ;;  %v5703_v57 = vsel %vm3776_vm13, %v5701_v58, %v5702_v31  ;;  %v5769_v25 = vsel %vm3776_vm13, %v5767_v43, %v5768_v4  ;;  %v7900_v35 = vsel %vm6029_vm7, %v7898_v21, %v7899_v38  ;;  %v4956_v36 = vld [vmem:[#allocation2 + $0x7c] sm:$0xf]  ;;  %v6121_v56 = vrot.slane %v12280_v61, 2  ;;  %v5063_v2 = vld [vmem:[#allocation2 + $0x1b0] sm:$0xe] }
 0x492   :  { %v7964_v37 = vrot.slane %v10373_v5, 2  ;;  %v8511_v33 = vsel %vm7982_vm6, %v7900_v35, 1065369472  ;;  %v6056_v4 = vsel %vm6029_vm7, %v6054_v34, %v6055_v26  ;;  %v12283_v5 = vld [vmem:[#allocation2 + $0x80] ss:$0 sps:$4 sm:$0x11]  }
 0x493   :  { %v6753_v29 = vpop.permute.xlu0 %6752  ;;  %7112 = vrot.lane.b32.xlu1 %v7047_v45, %s12422_s27  ;;  %v8060_v45 = vsel %vm7982_vm6, %v9930_v40, %v18352_v3  ;;  %v5083_v38 = vld [vmem:[#allocation2 + $0x78] sm:$0xc]  ;;  %v4999_v15 = vld [vmem:[#allocation2 + $0x1b0] sm:$0xf] }
 0x494   :  { %v8131_v17 = vsel %vm8079_vm9, %v8060_v45, %v18368_v48  ;;  %v10095_v45 = vcombine.low %v4999_v15, %v18446_v27  ;;  %v5127_v35 = vld [vmem:[#allocation2 + $0x1b0] sm:$0xc]  ;;  %v18505_v15 = vld [vmem:[#allocation2 + $0x1a8] sm:$0xf] }
 0x495   :  { %7292 = vrot.lane.b32.xlu0 %v10232_v24, %s12423_s29  ;;  %v7061_v28 = vpop.permute.xlu1 %7060  ;;  %v8152_v24 = vsel %vm8144_vm10, %v8087_v44, %v18380_v14  ;;  %v8196_v3 = vsel %vm8144_vm10, %v8131_v17, %v18387_v6  ;;  %v10221_v17 = vcombine.low %v5127_v35, %v18446_v27 }
 0x496   :  { %v8859_v53 = vpop.f32.mrf.mxu1  ;;  %v8217_v23 = vsel %vm8209_vm11, %v8152_v24, %v6709_v32  ;;  %v8261_v58 = vsel %vm8209_vm11, %v8196_v3, %v6753_v29 }
 0x497   :  { %v7105_v39 = vpop.permute.xlu0 %7104  ;;  %v9026_v20 = vmax.f32 %v18279_v7, %v8859_v53  ;;  %7336 = vrot.lane.b32.xlu1 %v10254_v9, %s12423_s29  ;;  %v8282_v14 = vsel %vm8274_vm12, %v8217_v23, %v7061_v28  ;;  %v7966_v28 = vsel %vm6029_vm7, %v7964_v37, %v7965_v19  ;;  %v18478_v23 = vld [vmem:[#allocation2 + $0x94] sm:$0xf] }
 0x498   :  { %v8861_v11 = vpop.f32.mrf.mxu1  ;;  %v8326_v62 = vsel %vm8274_vm12, %v8261_v58, %v7105_v39  ;;  %v8555_v39 = vsel %vm7982_vm6, %v7966_v28, 1065369472  ;;  %v5212_v58 = vld [vmem:[#allocation2 + $0x90] sm:$0xe] }
 0x499   :  { %7644 = vrot.lane.b32.xlu0 %v7557_v30, %s12424_s5  ;;  %v7285_v7 = vpop.permute.xlu1 %7284  ;;  %v9151_v16 = vrot.slane %v9026_v20, 2  ;;  %v5019_v11 = vld [vmem:[#allocation2 + $0x78] sm:$0xe]  ;;  %v6122_v30 = vsel %vm6029_vm7, %v6120_v12, %v6121_v56  ;;  %v12286_v12 = vld [vmem:[#allocation2 + $0x1b8] ss:$0 sps:$4 sm:$0x33]  }
 0x49a   :  { %v8862_v10 = vpop.f32.mrf.mxu1  ;;  %v8347_v53 = vsel %vm8339_vm14, %v8282_v14, %v7285_v7  ;;  %v10113_v8 = vcombine.low %v5019_v11, %v4956_v36  ;;  %v6631_v7 = vrot.slane %v12283_v5, 1  ;;  %v7049_v11 = vrot.slane %v12286_v12, 2 }
 0x49b   :  { %v9027_v13 = vmax.f32 %v18292_v46, %v8862_v10  ;;  %v7329_v46 = vpop.permute.xlu0 %7328  ;;  %7688 = vrot.lane.b32.xlu1 %v7623_v18, %s12424_s5 }
 0x49c   :  { %v8864_v9 = vpop.f32.mrf.mxu1  ;;  %v8391_v29 = vsel %vm8339_vm14, %v8326_v62, %v7329_v46  ;;  %v6630_v44 = vrot.slane %v10113_v8, 1  ;;  %v5256_v46 = vld [vmem:[#allocation2 + $0x1c8] sm:$0xe]  ;;  %v4755_v8 = vld [vmem:[#allocation2 + $0x30] sm:$0xf] }
 0x49d   :  { %v9152_v0 = vrot.slane %v9027_v13, 2  ;;  %5789 = vrot.lane.b32.xlu0 %v5703_v57, %s12418_s0  ;;  %v7637_v43 = vpop.permute.xlu1 %7636  ;;  %v10073_v57 = vcombine.low %v4955_v49, %v4956_v36  ;;  %v12285_v9 = vld [vmem:[#allocation2 + $0x80] ss:$0 sps:$4 sm:$0x33]  }
 0x49e   :  { %v8415_v6 = vsel %vm8404_vm15, %v8347_v53, %v7637_v43  ;;  %v6632_v3 = vsel %vm3776_vm13, %v6630_v44, %v6631_v7  ;;  %v10273_v43 = vcombine.low %v5212_v58, %v18478_v23  ;;  %v12398_v58 = vld [vmem:[#allocation2 + $0x16c] sm:$0xf] }
 0x49f   :  { %v9153_v48 = vsel %vm6029_vm7, %v9151_v16, %v9152_v0  ;;  %v9280_v32 = vmax.f32 %v9027_v13, %v9152_v0  ;;  %v7681_v60 = vpop.permute.xlu0 %7680  ;;  %8770 = vmatmul.mubr.bf16.gmra.mxu0 %v8415_v6  ;;  %5833 = vrot.lane.b32.xlu1 %v5769_v25, %s12418_s0  ;;  %v12284_v25 = vld [vmem:[#allocation2 + $0x1b8] ss:$0 sps:$4 sm:$0x11]   ;;  %v10177_v13 = vcombine.low %v5083_v38, %v4956_v36  ;;  %v18480_v16 = vld [vmem:[#allocation2 + $0x1cc] sm:$0xf] }
 0x4a0   :  { %v9279_v63 = vmax.f32 %v9026_v20, %v9153_v48  ;;  %10399 = vmatprep.mubr.msk.bf16.mxu0 %vm8642_vm8, %v8511_v33  ;;  %v8481_v21 = vsel %vm8404_vm15, %v8391_v29, %v7681_v60  ;;  %v10157_v20 = vcombine.low %v5063_v2, %v18446_v27  ;;  %v6697_v61 = vrot.slane %v12284_v25, 1  ;;  %v5192_v6 = vld [vmem:[#allocation2 + $0x1c8] sm:$0xf]  ;;  %v18497_v60 = vld [vmem:[#allocation2 + $0x70] sm:$0xf] }
 0x4a1   :  { %v9336_v54 = vmax.f32 %v9280_v32, 0.0  ;;  %6142 = vrot.lane.b32.xlu0 %v6056_v4, %s12419_s18  ;;  %8946 = vmatmul.mubr.bf16.gmra.mxu1 %v8481_v21  ;;  %v18459_v40 = vpop.permute.xlu1 %5825  ;;  %v6982_v19 = vrot.slane %v10177_v13, 2  ;;  %v10317_v36 = vcombine.low %v5256_v46, %v18480_v16  ;;  %v12290_v4 = vld [vmem:[#allocation2 + $0x98] ss:$0 sps:$4 sm:$0x11]   ;;  %v10255_v13 = vcombine.low %v5192_v6, %v18480_v16 }
 0x4a2   :  { %v9335_v31 = vmax.f32 %v9279_v63, 0.0  ;;  %10421 = vmatprep.mubr.msk.bf16.mxu1 %vm8642_vm8, %v8555_v39  ;;  %v6696_v24 = vrot.slane %v10157_v20, 1  ;;  %v7048_v63 = vrot.slane %v10221_v17, 2  ;;  %v5270_v21 = vld [vmem:[#allocation2 + $0x6c] sm:$0xc]  ;;  %v7558_v39 = vrot.slane %v10273_v43, 1 }
 0x4a3   :  { %9393 = vst.msk [vmem:[%s19084_s3 + $0xc8] sm:$0x3f] %vm9368_vm0, %v9336_v54  ;;  %v18469_v10 = vpop.permute.xlu0 %6134  ;;  %6186 = vrot.lane.b32.xlu1 %v6122_v30, %s12419_s18  ;;  %v12292_v54 = vld [vmem:[#allocation2 + $0x1d0] ss:$0 sps:$4 sm:$0x11]   ;;  %v7624_v20 = vrot.slane %v10317_v36, 1 }
 0x4a4   :  { %9392 = vst.msk [vmem:[%s19084_s3 + $0xc0] sm:$0xff] %vm2837_vm4, %v9335_v31  ;;  %v8867_v18 = vpop.f32.mrf.mxu1  ;;  %v6698_v62 = vsel %vm3776_vm13, %v6696_v24, %v6697_v61  ;;  %v5148_v31 = vld [vmem:[#allocation2 + $0x90] sm:$0xf]  ;;  %v4829_v30 = vld [vmem:[#allocation2 + $0x6c] sm:$0xe]  ;;  %v7050_v25 = vsel %vm6029_vm7, %v7048_v63, %v7049_v11 }
 0x4a5   :  { %v9028_v34 = vmax.f32 %v18342_v42, %v8867_v18  ;;  %6366 = vrot.lane.b32.xlu0 %v10073_v57, %s12420_s23  ;;  %v18474_v26 = vpop.permute.xlu1 %6178  ;;  %v12395_v18 = vld [vmem:[#allocation2 + $0x70] sm:$0xf]  ;;  %v9955_v38 = vcombine.low %v4829_v30, %v18497_v60  ;;  %v10233_v7 = vcombine.low %v5148_v31, %v18478_v23  ;;  %v5314_v24 = vld [vmem:[#allocation2 + $0x1a4] sm:$0xc]  ;;  %v12397_v17 = vld [vmem:[#allocation2 + $0x1a8] sm:$0xf] }
 0x4a6   :  { %v8869_v41 = vpop.f32.mrf.mxu1  ;;  %v10331_v49 = vcombine.low %v5270_v21, %v12395_v18  ;;  %v10375_v46 = vcombine.low %v5314_v24, %v12397_v17  ;;  %v12300_v36 = vld [vmem:[#allocation2 + $0x1ac] ss:$0 sps:$4 sm:$0x33]   ;;  %v12299_v30 = vld [vmem:[#allocation2 + $0x74] ss:$0 sps:$4 sm:$0x33]  }
 0x4a7   :  { %v18482_v0 = vpop.permute.xlu0 %6358  ;;  %6410 = vrot.lane.b32.xlu1 %v10095_v45, %s12420_s23  ;;  %v9154_v53 = vrot.slane %v9028_v34, 2  ;;  %v12294_v41 = vld [vmem:[#allocation2 + $0x74] ss:$0 sps:$4 sm:$0x11]   ;;  %v7968_v18 = vrot.slane %v12300_v36, 2 }
 0x4a8   :  { %v8870_v37 = vpop.f32.mrf.mxu1  ;;  %v12295_v45 = vld [vmem:[#allocation2 + $0x74] ss:$0 sps:$4 sm:$0x33]   ;;  %v5705_v43 = vrot.slane %v12294_v41, 1  ;;  %v7967_v11 = vrot.slane %v10375_v46, 2 }
 0x4a9   :  { %v9029_v42 = vmax.f32 %v18359_v50, %v8870_v37  ;;  %6718 = vrot.lane.b32.xlu0 %v6632_v3, %s12421_s24  ;;  %v18488_v32 = vpop.permute.xlu1 %6402  ;;  %v6983_v50 = vrot.slane %v12285_v9, 2  ;;  %v12396_v9 = vld [vmem:[#allocation2 + $0x34] sm:$0xf]  ;;  %v4873_v37 = vld [vmem:[#allocation2 + $0x1a4] sm:$0xe]  ;;  %v7559_v3 = vrot.slane %v12290_v4, 1 }
 0x4aa   :  { %v8872_v14 = vpop.f32.mrf.mxu1  ;;  %v9909_v35 = vcombine.low %v4755_v8, %v12396_v9  ;;  %v5065_v17 = vld [vmem:[#allocation2 + $0x1bc] sm:$0xe] }
 0x4ab   :  { %v9155_v48 = vrot.slane %v9029_v42, 2  ;;  %v18494_v29 = vpop.permute.xlu0 %6710  ;;  %6762 = vrot.lane.b32.xlu1 %v6698_v62, %s12421_s24  ;;  %v6984_v56 = vsel %vm6029_vm7, %v6982_v19, %v6983_v50  ;;  %v7901_v14 = vrot.slane %v10331_v49, 2  ;;  %v9999_v19 = vcombine.low %v4873_v37, %v18505_v15  ;;  %v5002_v37 = vld [vmem:[#allocation2 + $0x1c0] sm:$0xf] }
 0x4ac   :  { %v7997_v12 = vsel %vm7982_vm6, %v9909_v35, %v17807_v59  ;;  %v7560_v6 = vsel %vm3776_vm13, %v7558_v39, %v7559_v3  ;;  %v4893_v59 = vld [vmem:[#allocation2 + $0x6c] sm:$0xc]  ;;  %v10159_v36 = vcombine.low %v5065_v17, %v5002_v37 }
 0x4ad   :  { %v9156_v28 = vsel %vm6029_vm7, %v9154_v53, %v9155_v48  ;;  %v9282_v27 = vmax.f32 %v9029_v42, %v9155_v48  ;;  %7070 = vrot.lane.b32.xlu0 %v6984_v56, %s12422_s27  ;;  %v18501_v2 = vpop.permute.xlu1 %6754  ;;  %v4799_v42 = vld [vmem:[#allocation2 + $0x168] sm:$0xf]  ;;  %v5704_v48 = vrot.slane %v9955_v38, 1  ;;  %v8089_v62 = vsel %vm8079_vm9, %v7997_v12, %v18469_v10 }
 0x4ae   :  { %v9281_v33 = vmax.f32 %v9028_v34, %v9156_v28  ;;  %v7625_v34 = vrot.slane %v12292_v54, 1  ;;  %v9931_v53 = vcombine.low %v4799_v42, %v12398_v58  ;;  %v12297_v54 = vld [vmem:[#allocation2 + $0x1ac] ss:$0 sps:$4 sm:$0x11]   ;;  %v8154_v56 = vsel %vm8144_vm10, %v8089_v62, %v18482_v0 }
 0x4af   :  { %v9338_v5 = vmax.f32 %v9282_v27, 0.0  ;;  %v7063_v44 = vpop.permute.xlu0 %7062  ;;  %7114 = vrot.lane.b32.xlu1 %v7050_v25, %s12422_s27  ;;  %v7902_v27 = vrot.slane %v12295_v45, 2  ;;  %v10019_v10 = vcombine.low %v4893_v59, %v18497_v60  ;;  %v8219_v4 = vsel %vm8209_vm11, %v8154_v56, %v18494_v29  ;;  %v4958_v45 = vld [vmem:[#allocation2 + $0x88] sm:$0xf] }
 0x4b0   :  { %v9337_v57 = vmax.f32 %v9281_v33, 0.0  ;;  %v7626_v28 = vsel %vm3776_vm13, %v7624_v20, %v7625_v34  ;;  %v8063_v33 = vsel %vm7982_vm6, %v9931_v53, %v18459_v40  ;;  %v5770_v39 = vrot.slane %v9999_v19, 1  ;;  %v4937_v40 = vld [vmem:[#allocation2 + $0x1a4] sm:$0xc] }
 0x4b1   :  { %9395 = vst.msk [vmem:[%s19084_s3 + $0xd8] sm:$0x3f] %vm9368_vm0, %v9338_v5  ;;  %7294 = vrot.lane.b32.xlu0 %v10233_v7, %s12423_s29  ;;  %v7107_v61 = vpop.permute.xlu1 %7106  ;;  %v8133_v31 = vsel %vm8079_vm9, %v8063_v33, %v18474_v26  ;;  %v7903_v5 = vsel %vm6029_vm7, %v7901_v14, %v7902_v27  ;;  %v8284_v20 = vsel %vm8274_vm12, %v8219_v4, %v7063_v44  ;;  %v5771_v41 = vrot.slane %v12297_v54, 1  ;;  %v12302_v34 = vld [vmem:[#allocation2 + $0x1ac] ss:$0 sps:$4 sm:$0x33]  }
 0x4b2   :  { %9394 = vst.msk [vmem:[%s19084_s3 + $0xd0] sm:$0xff] %vm2837_vm4, %v9337_v57  ;;  %v8198_v0 = vsel %vm8144_vm10, %v8133_v31, %v18488_v32  ;;  %v10063_v26 = vcombine.low %v4937_v40, %v18505_v15  ;;  %v5706_v38 = vsel %vm3776_vm13, %v5704_v48, %v5705_v43  ;;  %v6057_v7 = vrot.slane %v10019_v10, 2  ;;  %v5021_v14 = vld [vmem:[#allocation2 + $0x84] sm:$0xe]  ;;  %v5001_v43 = vld [vmem:[#allocation2 + $0x1bc] sm:$0xf] }
 0x4b3   :  { %v7287_v50 = vpop.permute.xlu0 %7286  ;;  %v18524_v63 = vpop.f32.mrf.mxu1  ;;  %7338 = vrot.lane.b32.xlu1 %v10255_v13, %s12423_s29  ;;  %v8263_v29 = vsel %vm8209_vm11, %v8198_v0, %v18501_v2  ;;  %v7969_v13 = vsel %vm6029_vm7, %v7967_v11, %v7968_v18  ;;  %v8513_v35 = vsel %vm7982_vm6, %v7903_v5, 1065369472  ;;  %v5772_v42 = vsel %vm3776_vm13, %v5770_v39, %v5771_v41  ;;  %v12308_v62 = vld [vmem:[#allocation2 + $0x1c4] ss:$0 sps:$4 sm:$0x11]  }
 0x4b4   :  { %v8349_v49 = vsel %vm8339_vm14, %v8284_v20, %v7287_v50  ;;  %v8328_v32 = vsel %vm8274_vm12, %v8263_v29, %v7107_v61  ;;  %v6058_v61 = vrot.slane %v12299_v30, 2  ;;  %v6123_v3 = vrot.slane %v10063_v26, 2  ;;  %v4957_v54 = vld [vmem:[#allocation2 + $0x84] sm:$0xf]  ;;  %v18581_v41 = vld [vmem:[#allocation2 + $0xa0] sm:$0xf] }
 0x4b5   :  { %7646 = vrot.lane.b32.xlu0 %v7560_v6, %s12424_s5  ;;  %v8877_v21 = vpop.f32.mrf.mxu1  ;;  %v7331_v8 = vpop.permute.xlu1 %7330  ;;  %v8557_v12 = vsel %vm7982_vm6, %v7969_v13, 1065369472  ;;  %v10115_v58 = vcombine.low %v5021_v14, %v4958_v45  ;;  %v6124_v48 = vrot.slane %v12302_v34, 2  ;;  %v12306_v6 = vld [vmem:[#allocation2 + $0x8c] ss:$0 sps:$4 sm:$0x11]   ;;  %v10074_v33 = vcombine.low %v4957_v54, %v4958_v45 }
 0x4b6   :  { %v8393_v2 = vsel %vm8339_vm14, %v8328_v32, %v7331_v8  ;;  %v6059_v53 = vsel %vm6029_vm7, %v6057_v7, %v6058_v61  ;;  %v10096_v56 = vcombine.low %v5001_v43, %v5002_v37  ;;  %v5085_v11 = vld [vmem:[#allocation2 + $0x84] sm:$0xc]  ;;  %v6699_v31 = vrot.slane %v10159_v36, 1  ;;  %v12312_v5 = vld [vmem:[#allocation2 + $0x1c4] ss:$0 sps:$4 sm:$0x33]  }
 0x4b7   :  { %v7639_v57 = vpop.permute.xlu0 %7638  ;;  %v18547_v25 = vpop.f32.mrf.mxu1  ;;  %7690 = vrot.lane.b32.xlu1 %v7626_v28, %s12424_s5  ;;  %v5129_v28 = vld [vmem:[#allocation2 + $0x1bc] sm:$0xc]  ;;  %v6125_v27 = vsel %vm6029_vm7, %v6123_v3, %v6124_v48  ;;  %v6633_v10 = vrot.slane %v10115_v58, 1  ;;  %v6700_v4 = vrot.slane %v12308_v62, 1  ;;  %v10179_v21 = vcombine.low %v5085_v11, %v4958_v45  ;;  %v18586_v7 = vld [vmem:[#allocation2 + $0x1d8] sm:$0xf] }
 0x4b8   :  { %v8418_v44 = vsel %vm8404_vm15, %v8349_v49, %v7639_v57  ;;  %v10223_v8 = vcombine.low %v5129_v28, %v5002_v37  ;;  %v6634_v0 = vrot.slane %v12306_v6, 1  ;;  %v12310_v20 = vld [vmem:[#allocation2 + $0x8c] ss:$0 sps:$4 sm:$0x33]   ;;  %v5258_v13 = vld [vmem:[#allocation2 + $0x1d4] sm:$0xe] }
 0x4b9   :  { %5791 = vrot.lane.b32.xlu0 %v5706_v38, %s12418_s0  ;;  %8778 = vmatmul.mubr.bf16.gmra.mxu0 %v8418_v44  ;;  %v8880_v24 = vpop.f32.mrf.mxu1  ;;  %v7683_v9 = vpop.permute.xlu1 %7682  ;;  %v6701_v29 = vsel %vm3776_vm13, %v6699_v31, %v6700_v4  ;;  %v6985_v49 = vrot.slane %v10179_v21, 2  ;;  %v7052_v38 = vrot.slane %v12312_v5, 2  ;;  %v6986_v34 = vrot.slane %v12310_v20, 2  ;;  %v5214_v45 = vld [vmem:[#allocation2 + $0x9c] sm:$0xe] }
 0x4ba   :  { %10400 = vmatprep.mubr.msk.bf16.mxu0 %vm8642_vm8, %v8513_v35  ;;  %v8484_v46 = vsel %vm8404_vm15, %v8393_v2, %v7683_v9  ;;  %v6635_v26 = vsel %vm3776_vm13, %v6633_v10, %v6634_v0  ;;  %v7051_v57 = vrot.slane %v10223_v8, 2  ;;  %v5194_v9 = vld [vmem:[#allocation2 + $0x1d4] sm:$0xf]  ;;  %v10275_v35 = vcombine.low %v5214_v45, %v18581_v41  ;;  %v5272_v61 = vld [vmem:[#allocation2 + $0x78] sm:$0xc] }
 0x4bb   :  { %v18560_v19 = vpop.permute.xlu0 %5783  ;;  %8954 = vmatmul.mubr.bf16.gmra.mxu1 %v8484_v46  ;;  %5835 = vrot.lane.b32.xlu1 %v5772_v42, %s12418_s0  ;;  %v6987_v37 = vsel %vm6029_vm7, %v6985_v49, %v6986_v34  ;;  %v10319_v46 = vcombine.low %v5258_v13, %v18586_v7  ;;  %v12317_v42 = vld [vmem:[#allocation2 + $0x1dc] ss:$0 sps:$4 sm:$0x11]   ;;  %v12316_v14 = vld [vmem:[#allocation2 + $0xa4] ss:$0 sps:$4 sm:$0x11]   ;;  %v10256_v62 = vcombine.low %v5194_v9, %v18586_v7 }
 0x4bc   :  { %10422 = vmatprep.mubr.msk.bf16.mxu1 %vm8642_vm8, %v8557_v12  ;;  %v7053_v17 = vsel %vm6029_vm7, %v7051_v57, %v7052_v38  ;;  %v12399_v12 = vld [vmem:[#allocation2 + $0x7c] sm:$0xf]  ;;  %v7561_v6 = vrot.slane %v10275_v35, 1  ;;  %v12318_v28 = vld [vmem:[#allocation2 + $0x80] ss:$0 sps:$4 sm:$0x33]  }
 0x4bd   :  { %6144 = vrot.lane.b32.xlu0 %v6059_v53, %s12419_s18  ;;  %v18567_v50 = vpop.permute.xlu1 %5827  ;;  %v10333_v58 = vcombine.low %v5272_v61, %v12399_v12  ;;  %v4757_v53 = vld [vmem:[#allocation2 + $0x3c] sm:$0xf]  ;;  %v12400_v54 = vld [vmem:[#allocation2 + $0x40] sm:$0xf]  ;;  %v7628_v10 = vrot.slane %v12317_v42, 1  ;;  %v7562_v8 = vrot.slane %v12316_v14, 1 }
 0x4be   :  { %v5150_v48 = vld [vmem:[#allocation2 + $0x9c] sm:$0xf]  ;;  %v12401_v11 = vld [vmem:[#allocation2 + $0x1b4] sm:$0xf]  ;;  %v12402_v20 = vld [vmem:[#allocation2 + $0x178] sm:$0xf] }
 0x4bf   :  { %v18570_v59 = vpop.permute.xlu0 %6136  ;;  %6188 = vrot.lane.b32.xlu1 %v6125_v27, %s12419_s18  ;;  %v10234_v36 = vcombine.low %v5150_v48, %v18581_v41  ;;  %v5316_v27 = vld [vmem:[#allocation2 + $0x1b0] sm:$0xc]  ;;  %v4801_v4 = vld [vmem:[#allocation2 + $0x174] sm:$0xf]  ;;  %v7904_v5 = vrot.slane %v10333_v58, 2  ;;  %v7563_v38 = vsel %vm3776_vm13, %v7561_v6, %v7562_v8  ;;  %v7905_v13 = vrot.slane %v12318_v28, 2 }
 0x4c0   :  { %v10377_v31 = vcombine.low %v5316_v27, %v12401_v11 }
 0x4c1   :  { %v18573_v39 = vpop.f32.mrf.mxu1  ;;  %6368 = vrot.lane.b32.xlu0 %v10074_v33, %s12420_s23  ;;  %v18576_v40 = vpop.permute.xlu1 %6180  ;;  %v9910_v33 = vcombine.low %v4757_v53, %v12400_v54 }
 0x4c3   :  { %v8885_v30 = vpop.f32.mrf.mxu1  ;;  %v6361_v18 = vpop.permute.xlu0 %6360  ;;  %6412 = vrot.lane.b32.xlu1 %v10096_v56, %s12420_s23  ;;  %v7627_v56 = vrot.slane %v10319_v46, 1  ;;  %v8000_v0 = vsel %vm7982_vm6, %v9910_v33, %v18560_v19 }
 0x4c4   :  { %v9932_v30 = vcombine.low %v4801_v4, %v12402_v20 }
 0x4c5   :  { %v18583_v32 = vpop.f32.mrf.mxu1  ;;  %6720 = vrot.lane.b32.xlu0 %v6635_v26, %s12421_s24  ;;  %v6405_v44 = vpop.permute.xlu1 %6404  ;;  %v12319_v26 = vld [vmem:[#allocation2 + $0x1b8] ss:$0 sps:$4 sm:$0x33]   ;;  %v7629_v19 = vsel %vm3776_vm13, %v7627_v56, %v7628_v10 }
 0x4c6   :  { %v8066_v34 = vsel %vm7982_vm6, %v9932_v30, %v18567_v50  ;;  %v7971_v42 = vrot.slane %v12319_v26, 2 }
 0x4c7   :  { %v8888_v2 = vpop.f32.mrf.mxu1  ;;  %v6713_v24 = vpop.permute.xlu0 %6712  ;;  %6764 = vrot.lane.b32.xlu1 %v6701_v29, %s12421_s24  ;;  %v8091_v29 = vsel %vm8079_vm9, %v8000_v0, %v18570_v59  ;;  %v8135_v9 = vsel %vm8079_vm9, %v8066_v34, %v18576_v40 }
 0x4c8   :  { %v8156_v45 = vsel %vm8144_vm10, %v8091_v29, %v6361_v18  ;;  %v7970_v2 = vrot.slane %v10377_v31, 2  ;;  %v8200_v46 = vsel %vm8144_vm10, %v8135_v9, %v6405_v44 }
 0x4c9   :  { %7072 = vrot.lane.b32.xlu0 %v6987_v37, %s12422_s27  ;;  %v6757_v3 = vpop.permute.xlu1 %6756  ;;  %v8221_v59 = vsel %vm8209_vm11, %v8156_v45, %v6713_v24  ;;  %v5274_v45 = vld [vmem:[#allocation2 + $0x84] sm:$0xc] }
 0x4ca   :  { %v8265_v61 = vsel %vm8209_vm11, %v8200_v46, %v6757_v3  ;;  %v7972_v53 = vsel %vm6029_vm7, %v7970_v2, %v7971_v42  ;;  %v10335_v2 = vcombine.low %v5274_v45, %v18371_v47  ;;  %v12404_v47 = vld [vmem:[#allocation2 + $0x184] sm:$0xf] }
 0x4cb   :  { %v7065_v43 = vpop.permute.xlu0 %7064  ;;  %7116 = vrot.lane.b32.xlu1 %v7053_v17, %s12422_s27  ;;  %v7906_v17 = vsel %vm6029_vm7, %v7904_v5, %v7905_v13 }
 0x4cc   :  { %v8286_v50 = vsel %vm8274_vm12, %v8221_v59, %v7065_v43  ;;  %v8515_v3 = vsel %vm7982_vm6, %v7906_v17, 1065369472 }
 0x4cd   :  { %7296 = vrot.lane.b32.xlu0 %v10234_v36, %s12423_s29  ;;  %v7109_v21 = vpop.permute.xlu1 %7108 }
 0x4ce   :  { %v8330_v12 = vsel %vm8274_vm12, %v8265_v61, %v7109_v21  ;;  %v4803_v61 = vld [vmem:[#allocation2 + $0x180] sm:$0xf] }
 0x4cf   :  { %v7289_v49 = vpop.permute.xlu0 %7288  ;;  %v18602_v57 = vpop.f32.mrf.mxu1  ;;  %7340 = vrot.lane.b32.xlu1 %v10256_v62, %s12423_s29 }
 0x4d0   :  { %v9030_v18 = vmax.f32 %v18524_v63, %v18602_v57  ;;  %v8351_v40 = vsel %vm8339_vm14, %v8286_v50, %v7289_v49  ;;  %v12320_v50 = vld [vmem:[#allocation2 + $0x8c] ss:$0 sps:$4 sm:$0x33]  }
 0x4d1   :  { %7648 = vrot.lane.b32.xlu0 %v7563_v38, %s12424_s5  ;;  %v8893_v35 = vpop.f32.mrf.mxu1  ;;  %v7333_v37 = vpop.permute.xlu1 %7332  ;;  %v5318_v38 = vld [vmem:[#allocation2 + $0x1bc] sm:$0xc] }
 0x4d2   :  { %v8395_v63 = vsel %vm8339_vm14, %v8330_v12, %v7333_v37  ;;  %v9157_v36 = vrot.slane %v9030_v18, 2  ;;  %v12322_v35 = vld [vmem:[#allocation2 + $0x1c4] ss:$0 sps:$4 sm:$0x33]   ;;  %v4759_v37 = vld [vmem:[#allocation2 + $0x48] sm:$0xf] }
 0x4d3   :  { %v7641_v14 = vpop.permute.xlu0 %7640  ;;  %v18621_v24 = vpop.f32.mrf.mxu1  ;;  %7692 = vrot.lane.b32.xlu1 %v7629_v19, %s12424_s5  ;;  %v7907_v12 = vrot.slane %v10335_v2, 2 }
 0x4d4   :  { %v9031_v44 = vmax.f32 %v18547_v25, %v18621_v24  ;;  %v8421_v58 = vsel %vm8404_vm15, %v8351_v40, %v7641_v14  ;;  %v8559_v25 = vsel %vm7982_vm6, %v7972_v53, 1065369472  ;;  %v7974_v53 = vrot.slane %v12322_v35, 2 }
 0x4d5   :  { %8786 = vmatmul.mubr.bf16.gmra.mxu0 %v8421_v58  ;;  %v8896_v48 = vpop.f32.mrf.mxu1  ;;  %v7685_v43 = vpop.permute.xlu1 %7684  ;;  %v9933_v58 = vcombine.low %v4803_v61, %v12404_v47  ;;  %v5320_v47 = vld [vmem:[#allocation2 + $0x1c8] sm:$0xc] }
 0x4d6   :  { %v9158_v62 = vrot.slane %v9031_v44, 2  ;;  %10401 = vmatprep.mubr.msk.bf16.mxu0 %vm8642_vm8, %v8515_v3  ;;  %v8487_v6 = vsel %vm8404_vm15, %v8395_v63, %v7685_v43  ;;  %v7908_v43 = vrot.slane %v12320_v50, 2 }
 0x4d7   :  { %v5786_v28 = vpop.permute.xlu0 %5785  ;;  %8962 = vmatmul.mubr.bf16.gmra.mxu1 %v8487_v6 }
 0x4d8   :  { %v9159_v27 = vsel %vm6029_vm7, %v9157_v36, %v9158_v62  ;;  %v9284_v54 = vmax.f32 %v9031_v44, %v9158_v62  ;;  %10423 = vmatprep.mubr.msk.bf16.mxu1 %vm8642_vm8, %v8559_v25 }
 0x4d9   :  { %v9283_v33 = vmax.f32 %v9030_v18, %v9159_v27  ;;  %v5830_v56 = vpop.permute.xlu1 %5829 }
 0x4da   :  { %v9340_v10 = vmax.f32 %v9284_v54, 0.0  ;;  %v8069_v36 = vsel %vm7982_vm6, %v9933_v58, %v5830_v56  ;;  %v7909_v54 = vsel %vm6029_vm7, %v7907_v12, %v7908_v43 }
 0x4db   :  { %v9339_v11 = vmax.f32 %v9283_v33, 0.0  ;;  %v6139_v31 = vpop.permute.xlu0 %6138 }
 0x4dc   :  { %9397 = vst.msk [vmem:[%s19084_s3 + $0xe8] sm:$0x3f] %vm9368_vm0, %v9340_v10 }
 0x4dd   :  { %9396 = vst.msk [vmem:[%s19084_s3 + $0xe0] sm:$0xff] %vm2837_vm4, %v9339_v11  ;;  %v18644_v4 = vpop.f32.mrf.mxu1  ;;  %v6183_v21 = vpop.permute.xlu1 %6182 }
 0x4de   :  { %v9032_v0 = vmax.f32 %v18573_v39, %v18644_v4  ;;  %v10379_v39 = vcombine.low %v5318_v38, %v18374_v1  ;;  %v8137_v6 = vsel %vm8079_vm9, %v8069_v36, %v6183_v21 }
 0x4df   :  { %v8901_v8 = vpop.f32.mrf.mxu1  ;;  %v6363_v5 = vpop.permute.xlu0 %6362 }
 0x4e0   :  { %v9160_v13 = vrot.slane %v9032_v0, 2  ;;  %v7973_v1 = vrot.slane %v10379_v39, 2 }
 0x4e1   :  { %v18648_v20 = vpop.f32.mrf.mxu1  ;;  %v6407_v30 = vpop.permute.xlu1 %6406 }
 0x4e2   :  { %v9033_v26 = vmax.f32 %v18583_v32, %v18648_v20  ;;  %v12403_v32 = vld [vmem:[#allocation2 + $0x4c] sm:$0xf]  ;;  %v8202_v33 = vsel %vm8144_vm10, %v8137_v6, %v6407_v30  ;;  %v4761_v6 = vld [vmem:[#allocation2 + $0x54] sm:$0xf] }
 0x4e3   :  { %v8904_v29 = vpop.f32.mrf.mxu1  ;;  %v6715_v49 = vpop.permute.xlu0 %6714  ;;  %v9911_v18 = vcombine.low %v4759_v37, %v12403_v32 }
 0x4e4   :  { %v9161_v34 = vrot.slane %v9033_v26, 2 }
 0x4e5   :  { %v6759_v19 = vpop.permute.xlu1 %6758  ;;  %v8003_v44 = vsel %vm7982_vm6, %v9911_v18, %v5786_v28 }
 0x4e6   :  { %v9162_v9 = vsel %vm6029_vm7, %v9160_v13, %v9161_v34  ;;  %v9286_v59 = vmax.f32 %v9033_v26, %v9161_v34  ;;  %v8093_v63 = vsel %vm8079_vm9, %v8003_v44, %v6139_v31  ;;  %v7975_v31 = vsel %vm6029_vm7, %v7973_v1, %v7974_v53 }
 0x4e7   :  { %v9285_v17 = vmax.f32 %v9032_v0, %v9162_v9  ;;  %v7067_v46 = vpop.permute.xlu0 %7066  ;;  %v8158_v62 = vsel %vm8144_vm10, %v8093_v63, %v6363_v5  ;;  %v8267_v56 = vsel %vm8209_vm11, %v8202_v33, %v6759_v19  ;;  %v8561_v13 = vsel %vm7982_vm6, %v7975_v31, 1065369472  ;;  %v5276_v63 = vld [vmem:[#allocation2 + $0x90] sm:$0xc] }
 0x4e8   :  { %v9342_v42 = vmax.f32 %v9286_v59, 0.0  ;;  %v8223_v28 = vsel %vm8209_vm11, %v8158_v62, %v6715_v49  ;;  %v10337_v36 = vcombine.low %v5276_v63, %v18478_v23  ;;  %v12324_v62 = vld [vmem:[#allocation2 + $0x1d0] ss:$0 sps:$4 sm:$0x33]  }
 0x4e9   :  { %v9341_v40 = vmax.f32 %v9285_v17, 0.0  ;;  %v7111_v14 = vpop.permute.xlu1 %7110  ;;  %v8288_v10 = vsel %vm8274_vm12, %v8223_v28, %v7067_v46 }
 0x4ea   :  { %9399 = vst.msk [vmem:[%s19084_s3 + $0xf8] sm:$0x3f] %vm9368_vm0, %v9342_v42  ;;  %v8332_v0 = vsel %vm8274_vm12, %v8267_v56, %v7111_v14  ;;  %v7910_v23 = vrot.slane %v10337_v36, 2 }
 0x4eb   :  { %9398 = vst.msk [vmem:[%s19084_s3 + $0xf0] sm:$0xff] %vm2837_vm4, %v9341_v40  ;;  %v7291_v3 = vpop.permute.xlu0 %7290  ;;  %v18665_v48 = vpop.f32.mrf.mxu1 }
 0x4ec   :  { %v9034_v11 = vmax.f32 %v18602_v57, %v18665_v48  ;;  %v8353_v8 = vsel %vm8339_vm14, %v8288_v10, %v7291_v3  ;;  %v8517_v57 = vsel %vm7982_vm6, %v7909_v54, 1065369472  ;;  %v4805_v54 = vld [vmem:[#allocation2 + $0x18c] sm:$0xf] }
 0x4ed   :  { %v8909_v25 = vpop.f32.mrf.mxu1  ;;  %v7335_v27 = vpop.permute.xlu1 %7334  ;;  %v12321_v10 = vld [vmem:[#allocation2 + $0x98] ss:$0 sps:$4 sm:$0x33]  }
 0x4ee   :  { %v8397_v29 = vsel %vm8339_vm14, %v8332_v0, %v7335_v27  ;;  %v9163_v34 = vrot.slane %v9034_v11, 2  ;;  %v12405_v27 = vld [vmem:[#allocation2 + $0x58] sm:$0xf]  ;;  %v7977_v0 = vrot.slane %v12324_v62, 2 }
 0x4ef   :  { %v7643_v21 = vpop.permute.xlu0 %7642  ;;  %v18679_v5 = vpop.f32.mrf.mxu1 }
 0x4f0   :  { %v9035_v26 = vmax.f32 %v18621_v24, %v18679_v5  ;;  %v8424_v30 = vsel %vm8404_vm15, %v8353_v8, %v7643_v21 }
 0x4f1   :  { %8794 = vmatmul.mubr.bf16.gmra.mxu0 %v8424_v30  ;;  %v8912_v49 = vpop.f32.mrf.mxu1  ;;  %v7687_v38 = vpop.permute.xlu1 %7686 }
 0x4f2   :  { %v9164_v45 = vrot.slane %v9035_v26, 2  ;;  %10402 = vmatprep.mubr.msk.bf16.mxu0 %vm8642_vm8, %v8517_v57  ;;  %v8490_v19 = vsel %vm8404_vm15, %v8397_v29, %v7687_v38  ;;  %v7911_v49 = vrot.slane %v12321_v10, 2 }
 0x4f3   :  { %v5788_v2 = vpop.permute.xlu0 %5787  ;;  %8970 = vmatmul.mubr.bf16.gmra.mxu1 %v8490_v19 }
 0x4f4   :  { %v9165_v24 = vsel %vm6029_vm7, %v9163_v34, %v9164_v45  ;;  %v9288_v9 = vmax.f32 %v9035_v26, %v9164_v45  ;;  %10424 = vmatprep.mubr.msk.bf16.mxu1 %vm8642_vm8, %v8561_v13 }
 0x4f5   :  { %v9287_v59 = vmax.f32 %v9034_v11, %v9165_v24  ;;  %v5832_v39 = vpop.permute.xlu1 %5831  ;;  %v12406_v11 = vld [vmem:[#allocation2 + $0x190] sm:$0xf] }
 0x4f6   :  { %v9344_v35 = vmax.f32 %v9288_v9, 0.0  ;;  %v9934_v31 = vcombine.low %v4805_v54, %v12406_v11  ;;  %v5322_v54 = vld [vmem:[#allocation2 + $0x1d4] sm:$0xc] }
 0x4f7   :  { %v9343_v37 = vmax.f32 %v9287_v59, 0.0  ;;  %v6141_v17 = vpop.permute.xlu0 %6140 }
 0x4f8   :  { %9401 = vst.msk [vmem:[%s19084_s3 + $0x108] sm:$0x3f] %vm9368_vm0, %v9344_v35  ;;  %v8072_v29 = vsel %vm7982_vm6, %v9934_v31, %v5832_v39  ;;  %v5278_v31 = vld [vmem:[#allocation2 + $0x9c] sm:$0xc] }
 0x4f9   :  { %9400 = vst.msk [vmem:[%s19084_s3 + $0x100] sm:$0xff] %vm2837_vm4, %v9343_v37  ;;  %v18700_v46 = vpop.f32.mrf.mxu1  ;;  %v6185_v50 = vpop.permute.xlu1 %6184 }
 0x4fa   :  { %v9036_v42 = vmax.f32 %v18644_v4, %v18700_v46  ;;  %v10381_v4 = vcombine.low %v5320_v47, %v18480_v16  ;;  %v8139_v38 = vsel %vm8079_vm9, %v8072_v29, %v6185_v50 }
 0x4fb   :  { %v8917_v32 = vpop.f32.mrf.mxu1  ;;  %v6365_v18 = vpop.permute.xlu0 %6364 }
 0x4fc   :  { %v9166_v58 = vrot.slane %v9036_v42, 2  ;;  %v7976_v16 = vrot.slane %v10381_v4, 2 }
 0x4fd   :  { %v18704_v61 = vpop.f32.mrf.mxu1  ;;  %v6409_v40 = vpop.permute.xlu1 %6408 }
 0x4fe   :  { %v9037_v14 = vmax.f32 %v18648_v20, %v18704_v61  ;;  %v9912_v20 = vcombine.low %v4761_v6, %v12405_v27  ;;  %v8204_v45 = vsel %vm8144_vm10, %v8139_v38, %v6409_v40  ;;  %v7978_v24 = vsel %vm6029_vm7, %v7976_v16, %v7977_v0  ;;  %v12407_v0 = vld [vmem:[#allocation2 + $0x64] sm:$0xf] }
 0x4ff   :  { %v8920_v12 = vpop.f32.mrf.mxu1  ;;  %v6717_v44 = vpop.permute.xlu0 %6716 }
 0x500   :  { %v9167_v1 = vrot.slane %v9037_v14, 2  ;;  %v8006_v21 = vsel %vm7982_vm6, %v9912_v20, %v5788_v2  ;;  %v7912_v2 = vsel %vm6029_vm7, %v7910_v23, %v7911_v49  ;;  %v4763_v23 = vld [vmem:[#allocation2 + $0x60] sm:$0xf]  ;;  %v12408_v49 = vld [vmem:[#allocation2 + $0x19c] sm:$0xf] }
 0x501   :  { %v6761_v53 = vpop.permute.xlu1 %6760  ;;  %v8095_v26 = vsel %vm8079_vm9, %v8006_v21, %v6141_v17  ;;  %v8519_v50 = vsel %vm7982_vm6, %v7912_v2, 1065369472  ;;  %v12325_v21 = vld [vmem:[#allocation2 + $0x1dc] ss:$0 sps:$4 sm:$0x33]  }
 0x502   :  { %v9168_v3 = vsel %vm6029_vm7, %v9166_v58, %v9167_v1  ;;  %v9290_v43 = vmax.f32 %v9037_v14, %v9167_v1  ;;  %v8160_v57 = vsel %vm8144_vm10, %v8095_v26, %v6365_v18  ;;  %v8269_v9 = vsel %vm8209_vm11, %v8204_v45, %v6761_v53 }
 0x503   :  { %v9289_v28 = vmax.f32 %v9036_v42, %v9168_v3  ;;  %v7069_v25 = vpop.permute.xlu0 %7068  ;;  %v8225_v13 = vsel %vm8209_vm11, %v8160_v57, %v6717_v44  ;;  %v8563_v18 = vsel %vm7982_vm6, %v7978_v24, 1065369472  ;;  %v9913_v26 = vcombine.low %v4763_v23, %v12407_v0  ;;  %v12323_v57 = vld [vmem:[#allocation2 + $0xa4] ss:$0 sps:$4 sm:$0x33]  }
 0x504   :  { %v9346_v33 = vmax.f32 %v9290_v43, 0.0  ;;  %v8290_v19 = vsel %vm8274_vm12, %v8225_v13, %v7069_v25  ;;  %v7980_v45 = vrot.slane %v12325_v21, 2 }
 0x505   :  { %v9345_v56 = vmax.f32 %v9289_v28, 0.0  ;;  %v7113_v8 = vpop.permute.xlu1 %7112 }
 0x506   :  { %9403 = vst.msk [vmem:[%s19084_s3 + $0x118] sm:$0x3f] %vm9368_vm0, %v9346_v33  ;;  %v8334_v35 = vsel %vm8274_vm12, %v8269_v9, %v7113_v8  ;;  %v10383_v8 = vcombine.low %v5322_v54, %v18586_v7 }
 0x507   :  { %9402 = vst.msk [vmem:[%s19084_s3 + $0x110] sm:$0xff] %vm2837_vm4, %v9345_v56  ;;  %v7293_v30 = vpop.permute.xlu0 %7292 }
 0x508   :  { %v8355_v59 = vsel %vm8339_vm14, %v8290_v19, %v7293_v30  ;;  %v4807_v30 = vld [vmem:[#allocation2 + $0x198] sm:$0xf] }
 0x509   :  { %v7337_v34 = vpop.permute.xlu1 %7336  ;;  %v9935_v38 = vcombine.low %v4807_v30, %v12408_v49  ;;  %v4765_v49 = vld [vmem:[#allocation2 + $0x6c] sm:$0xf] }
 0x50a   :  { %v8399_v17 = vsel %vm8339_vm14, %v8334_v35, %v7337_v34  ;;  %v7979_v34 = vrot.slane %v10383_v8, 2 }
 0x50b   :  { %v7645_v39 = vpop.permute.xlu0 %7644 }
 0x50c   :  { %v8427_v37 = vsel %vm8404_vm15, %v8355_v59, %v7645_v39  ;;  %v7914_v59 = vrot.slane %v12323_v57, 2 }
 0x50d   :  { %8802 = vmatmul.mubr.bf16.gmra.mxu0 %v8427_v37  ;;  %v7689_v32 = vpop.permute.xlu1 %7688 }
 0x50e   :  { %10403 = vmatprep.mubr.msk.bf16.mxu0 %vm8642_vm8, %v8519_v50  ;;  %v8493_v42 = vsel %vm8404_vm15, %v8399_v17, %v7689_v32 }
 0x50f   :  { %v5790_v40 = vpop.permute.xlu0 %5789  ;;  %8978 = vmatmul.mubr.bf16.gmra.mxu1 %v8493_v42 }
 0x510   :  { %10425 = vmatprep.mubr.msk.bf16.mxu1 %vm8642_vm8, %v8563_v18  ;;  %v7981_v18 = vsel %vm6029_vm7, %v7979_v34, %v7980_v45 }
 0x511   :  { %v18739_v14 = vpop.f32.mrf.mxu0  ;;  %v5834_v12 = vpop.permute.xlu1 %5833 }
 0x512   :  { %v8075_v24 = vsel %vm7982_vm6, %v9935_v38, %v5834_v12 }
 0x513   :  { %v6143_v44 = vpop.permute.xlu0 %6142  ;;  %v8749_v47 = vpop.f32.mrf.mxu0 }
 0x514   :  { %v18741_v58 = vpop.f32.mrf.mxu1 }
 0x515   :  { %v18743_v1 = vpop.f32.mrf.mxu0  ;;  %v6187_v53 = vpop.permute.xlu1 %6186  ;;  %v9038_v3 = vmax.f32 %v18665_v48, %v18741_v58  ;;  %v10339_v48 = vcombine.low %v5278_v31, %v18581_v41  ;;  %v8009_v41 = vsel %vm7982_vm6, %v9913_v26, %v5790_v40 }
 0x516   :  { %v8925_v63 = vpop.f32.mrf.mxu1  ;;  %v8097_v19 = vsel %vm8079_vm9, %v8009_v41, %v6143_v44  ;;  %v8141_v39 = vsel %vm8079_vm9, %v8075_v24, %v6187_v53 }
 0x517   :  { %v6367_v43 = vpop.permute.xlu0 %6366  ;;  %v8752_v36 = vpop.f32.mrf.mxu0  ;;  %v9169_v25 = vrot.slane %v9038_v3, 2  ;;  %v7913_v7 = vrot.slane %v10339_v48, 2 }
 0x518   :  { %v18747_v4 = vpop.f32.mrf.mxu1  ;;  %v8162_v9 = vsel %vm8144_vm10, %v8097_v19, %v6367_v43  ;;  %v8565_v43 = vsel %vm7982_vm6, %v7981_v18, 1065369472 }
 0x519   :  { %v9039_v62 = vmax.f32 %v18679_v5, %v18747_v4  ;;  %v6411_v6 = vpop.permute.xlu1 %6410  ;;  %v7915_v32 = vsel %vm6029_vm7, %v7913_v7, %v7914_v59  ;;  %v4809_v7 = vld [vmem:[#allocation2 + $0x1a4] sm:$0xf] }
 0x51a   :  { %v8928_v28 = vpop.f32.mrf.mxu1  ;;  %v8206_v17 = vsel %vm8144_vm10, %v8141_v39, %v6411_v6  ;;  %v8521_v63 = vsel %vm7982_vm6, %v7915_v32, 1065369472  ;;  %v9936_v45 = vcombine.low %v4809_v7, %v18505_v15 }
 0x51b   :  { %v9170_v27 = vrot.slane %v9039_v62, 2  ;;  %v6719_v20 = vpop.permute.xlu0 %6718 }
 0x51c   :  { %v8227_v35 = vsel %vm8209_vm11, %v8162_v9, %v6719_v20 }
 0x51d   :  { %v9171_v33 = vsel %vm6029_vm7, %v9169_v25, %v9170_v27  ;;  %v9292_v10 = vmax.f32 %v9039_v62, %v9170_v27  ;;  %v6763_v11 = vpop.permute.xlu1 %6762 }
 0x51e   :  { %v9291_v56 = vmax.f32 %v9038_v3, %v9171_v33  ;;  %v8271_v42 = vsel %vm8209_vm11, %v8206_v17, %v6763_v11 }
 0x51f   :  { %v9348_v16 = vmax.f32 %v9292_v10, 0.0  ;;  %v7071_v5 = vpop.permute.xlu0 %7070 }
 0x520   :  { %v9347_v29 = vmax.f32 %v9291_v56, 0.0  ;;  %v8292_v50 = vsel %vm8274_vm12, %v8227_v35, %v7071_v5 }
 0x521   :  { %9405 = vst.msk [vmem:[%s19084_s3 + $0x128] sm:$0x3f] %vm9368_vm0, %v9348_v16  ;;  %v7115_v13 = vpop.permute.xlu1 %7114 }
 0x522   :  { %9404 = vst.msk [vmem:[%s19084_s3 + $0x120] sm:$0xff] %vm2837_vm4, %v9347_v29  ;;  %v8336_v44 = vsel %vm8274_vm12, %v8271_v42, %v7115_v13  ;;  %v9914_v13 = vcombine.low %v4765_v49, %v18497_v60 }
 0x523   :  { %v7295_v2 = vpop.permute.xlu0 %7294 }
 0x524   :  { %v8357_v40 = vsel %vm8339_vm14, %v8292_v50, %v7295_v2 }
 0x525   :  { %v7339_v37 = vpop.permute.xlu1 %7338 }
 0x526   :  { %v8401_v53 = vsel %vm8339_vm14, %v8336_v44, %v7339_v37 }
 0x527   :  { %v7647_v12 = vpop.permute.xlu0 %7646 }
 0x528   :  { %v8430_v47 = vsel %vm8404_vm15, %v8357_v40, %v7647_v12 }
 0x529   :  { %8810 = vmatmul.mubr.bf16.gmra.mxu0 %v8430_v47  ;;  %v7691_v3 = vpop.permute.xlu1 %7690 }
 0x52a   :  { %10404 = vmatprep.mubr.msk.bf16.mxu0 %vm8642_vm8, %v8521_v63  ;;  %v8496_v36 = vsel %vm8404_vm15, %v8401_v53, %v7691_v3 }
 0x52b   :  { %v5792_v62 = vpop.permute.xlu0 %5791  ;;  %v18781_v6 = vpop.f32.mrf.mxu0  ;;  %8986 = vmatmul.mubr.bf16.gmra.mxu1 %v8496_v36 }
 0x52c   :  { %10426 = vmatprep.mubr.msk.bf16.mxu1 %vm8642_vm8, %v8565_v43  ;;  %v8012_v41 = vsel %vm7982_vm6, %v9914_v13, %v5792_v62 }
 0x52d   :  { %v18784_v28 = vpop.f32.mrf.mxu1  ;;  %v8757_v25 = vpop.f32.mrf.mxu0 }
 0x52e   :  { %v5836_v27 = vpop.permute.xlu1 %5835  ;;  %v9040_v33 = vmax.f32 %v18700_v46, %v18784_v28 }
 0x52f   :  { %v8933_v20 = vpop.f32.mrf.mxu1  ;;  %v6145_v54 = vpop.permute.xlu0 %6144  ;;  %v8078_v9 = vsel %vm7982_vm6, %v9936_v45, %v5836_v27 }
 0x530   :  { %v18788_v10 = vpop.f32.mrf.mxu0  ;;  %v9172_v23 = vrot.slane %v9040_v33, 2  ;;  %v8099_v19 = vsel %vm8079_vm9, %v8012_v41, %v6145_v54 }
 0x531   :  { %v18790_v11 = vpop.f32.mrf.mxu1 }
 0x532   :  { %v9041_v31 = vmax.f32 %v18704_v61, %v18790_v11  ;;  %v8760_v56 = vpop.f32.mrf.mxu0  ;;  %v6189_v48 = vpop.permute.xlu1 %6188 }
 0x533   :  { %v8936_v8 = vpop.f32.mrf.mxu1  ;;  %v6369_v21 = vpop.permute.xlu0 %6368  ;;  %v8143_v39 = vsel %vm8079_vm9, %v8078_v9, %v6189_v48 }
 0x534   :  { %v9173_v16 = vrot.slane %v9041_v31, 2  ;;  %v8164_v24 = vsel %vm8144_vm10, %v8099_v19, %v6369_v21 }
 0x536   :  { %v9174_v5 = vsel %vm6029_vm7, %v9172_v23, %v9173_v16  ;;  %v9294_v0 = vmax.f32 %v9041_v31, %v9173_v16  ;;  %v6413_v26 = vpop.permute.xlu1 %6412 }
 0x537   :  { %v9293_v30 = vmax.f32 %v9040_v33, %v9174_v5  ;;  %v6721_v29 = vpop.permute.xlu0 %6720  ;;  %v8208_v37 = vsel %vm8144_vm10, %v8143_v39, %v6413_v26 }
 0x538   :  { %v9350_v46 = vmax.f32 %v9294_v0, 0.0  ;;  %v8229_v59 = vsel %vm8209_vm11, %v8164_v24, %v6721_v29 }
 0x539   :  { %v9349_v57 = vmax.f32 %v9293_v30, 0.0 }
 0x53a   :  { %9407 = vst.msk [vmem:[%s19084_s3 + $0x138] sm:$0x3f] %vm9368_vm0, %v9350_v46  ;;  %v6765_v61 = vpop.permute.xlu1 %6764 }
 0x53b   :  { %9406 = vst.msk [vmem:[%s19084_s3 + $0x130] sm:$0xff] %vm2837_vm4, %v9349_v57  ;;  %v7073_v38 = vpop.permute.xlu0 %7072  ;;  %v8273_v15 = vsel %vm8209_vm11, %v8208_v37, %v6765_v61 }
 0x53c   :  { %v8294_v35 = vsel %vm8274_vm12, %v8229_v59, %v7073_v38 }
 0x53e   :  { %v7117_v34 = vpop.permute.xlu1 %7116 }
 0x53f   :  { %v7297_v2 = vpop.permute.xlu0 %7296  ;;  %v8338_v18 = vsel %vm8274_vm12, %v8273_v15, %v7117_v34 }
 0x540   :  { %v8359_v17 = vsel %vm8339_vm14, %v8294_v35, %v7297_v2 }
 0x542   :  { %v7341_v60 = vpop.permute.xlu1 %7340 }
 0x543   :  { %v7649_v50 = vpop.permute.xlu0 %7648  ;;  %v8403_v40 = vsel %vm8339_vm14, %v8338_v18, %v7341_v60 }
 0x544   :  { %v8433_v32 = vsel %vm8404_vm15, %v8359_v17, %v7649_v50 }
 0x545   :  { %v18817_v42 = vpop.f32.mrf.mxu0  ;;  %8818 = vmatmul.mubr.bf16.gmra.mxu0 %v8433_v32 }
 0x546   :  { %v7693_v12 = vpop.permute.xlu1 %7692  ;;  %v9002_v63 = vmax.f32 %v18739_v14, %v18817_v42 }
 0x547   :  { %v8765_v44 = vpop.f32.mrf.mxu0  ;;  %v18820_v47 = vpop.f32.mrf.mxu1  ;;  %v8499_v53 = vsel %vm8404_vm15, %v8403_v40, %v7693_v12 }
 0x548   :  { %8994 = vmatmul.mubr.bf16.gmra.mxu1 %v8499_v53  ;;  %v9042_v36 = vmax.f32 %v18741_v58, %v18820_v47  ;;  %v9115_v20 = vrot.slane %v9002_v63, 2 }
 0x549   :  { %v18825_v3 = vpop.f32.mrf.mxu0  ;;  %v8941_v43 = vpop.f32.mrf.mxu1 }
 0x54a   :  { %v9003_v62 = vmax.f32 %v18743_v1, %v18825_v3  ;;  %v9175_v14 = vrot.slane %v9042_v36, 2 }
 0x54b   :  { %v8768_v25 = vpop.f32.mrf.mxu0  ;;  %v18831_v27 = vpop.f32.mrf.mxu1 }
 0x54c   :  { %v9116_v54 = vrot.slane %v9003_v62, 2  ;;  %v9043_v33 = vmax.f32 %v18747_v4, %v18831_v27 }
 0x54d   :  { %v8944_v31 = vpop.f32.mrf.mxu1 }
 0x54e   :  { %v9117_v56 = vsel %vm6029_vm7, %v9115_v20, %v9116_v54  ;;  %v9256_v48 = vmax.f32 %v9003_v62, %v9116_v54  ;;  %v9176_v8 = vrot.slane %v9043_v33, 2 }
 0x54f   :  { %v9255_v21 = vmax.f32 %v9002_v63, %v9117_v56 }
 0x550   :  { %v9312_v23 = vmax.f32 %v9256_v48, 0.0  ;;  %v9177_v58 = vsel %vm6029_vm7, %v9175_v14, %v9176_v8  ;;  %v9296_v16 = vmax.f32 %v9043_v33, %v9176_v8 }
 0x551   :  { %v9311_v1 = vmax.f32 %v9255_v21, 0.0  ;;  %v9295_v5 = vmax.f32 %v9042_v36, %v9177_v58 }
 0x552   :  { %9369 = vst.msk [vmem:[%s19084_s3 + $0x8] sm:$0x3f] %vm9368_vm0, %v9312_v23  ;;  %v9352_v0 = vmax.f32 %v9296_v16, 0.0 }
 0x553   :  { %9367 = vst.msk [vmem:[%s19084_s3] sm:$0xff] %vm2837_vm4, %v9311_v1  ;;  %v9351_v4 = vmax.f32 %v9295_v5, 0.0 }
 0x554   :  { %9409 = vst.msk [vmem:[%s19084_s3 + $0x148] sm:$0x3f] %vm9368_vm0, %v9352_v0 }
 0x555   :  { %9408 = vst.msk [vmem:[%s19084_s3 + $0x140] sm:$0xff] %vm2837_vm4, %v9351_v4 }
 0x55f   :  { %v18853_v26 = vpop.f32.mrf.mxu0 }
 0x560   :  { %v9004_v46 = vmax.f32 %v18781_v6, %v18853_v26 }
 0x561   :  { %v18855_v30 = vpop.f32.mrf.mxu1  ;;  %v8773_v29 = vpop.f32.mrf.mxu0 }
 0x562   :  { %v9044_v49 = vmax.f32 %v18784_v28, %v18855_v30  ;;  %v9118_v7 = vrot.slane %v9004_v46, 2 }
 0x563   :  { %v8949_v57 = vpop.f32.mrf.mxu1  ;;  %v8774_v61 = vpop.f32.mrf.mxu0 }
 0x564   :  { %v9005_v38 = vmax.f32 %v18788_v10, %v8774_v61  ;;  %v9178_v2 = vrot.slane %v9044_v49, 2 }
 0x565   :  { %v18862_v13 = vpop.f32.mrf.mxu1  ;;  %v8776_v41 = vpop.f32.mrf.mxu0 }
 0x566   :  { %v9119_v34 = vrot.slane %v9005_v38, 2  ;;  %v9045_v45 = vmax.f32 %v18790_v11, %v18862_v13 }
 0x567   :  { %v8952_v19 = vpop.f32.mrf.mxu1 }
 0x568   :  { %v9120_v24 = vsel %vm6029_vm7, %v9118_v7, %v9119_v34  ;;  %v9258_v6 = vmax.f32 %v9005_v38, %v9119_v34  ;;  %v9179_v9 = vrot.slane %v9045_v45, 2 }
 0x569   :  { %v9257_v59 = vmax.f32 %v9004_v46, %v9120_v24 }
 0x56a   :  { %v9314_v39 = vmax.f32 %v9258_v6, 0.0  ;;  %v9180_v28 = vsel %vm6029_vm7, %v9178_v2, %v9179_v9  ;;  %v9298_v35 = vmax.f32 %v9045_v45, %v9179_v9 }
 0x56b   :  { %v9313_v10 = vmax.f32 %v9257_v59, 0.0  ;;  %v9297_v60 = vmax.f32 %v9044_v49, %v9180_v28 }
 0x56c   :  { %9371 = vst.msk [vmem:[%s19084_s3 + $0x18] sm:$0x3f] %vm9368_vm0, %v9314_v39  ;;  %v9354_v37 = vmax.f32 %v9298_v35, 0.0 }
 0x56d   :  { %9370 = vst.msk [vmem:[%s19084_s3 + $0x10] sm:$0xff] %vm2837_vm4, %v9313_v10  ;;  %v9353_v11 = vmax.f32 %v9297_v60, 0.0 }
 0x56e   :  { %9411 = vst.msk [vmem:[%s19084_s3 + $0x158] sm:$0x3f] %vm9368_vm0, %v9354_v37 }
 0x56f   :  { %9410 = vst.msk [vmem:[%s19084_s3 + $0x150] sm:$0xff] %vm2837_vm4, %v9353_v11 }
 0x579   :  { %v18884_v17 = vpop.f32.mrf.mxu0 }
 0x57a   :  { %v9006_v32 = vmax.f32 %v18817_v42, %v18884_v17 }
 0x57b   :  { %v8781_v50 = vpop.f32.mrf.mxu0  ;;  %v18886_v15 = vpop.f32.mrf.mxu1 }
 0x57c   :  { %v9046_v12 = vmax.f32 %v18820_v47, %v18886_v15  ;;  %v9121_v43 = vrot.slane %v9006_v32, 2 }
 0x57d   :  { %v18890_v18 = vpop.f32.mrf.mxu0  ;;  %v8957_v40 = vpop.f32.mrf.mxu1 }
 0x57e   :  { %v9007_v44 = vmax.f32 %v18825_v3, %v18890_v18  ;;  %v9181_v20 = vrot.slane %v9046_v12, 2 }
 0x57f   :  { %v8784_v53 = vpop.f32.mrf.mxu0  ;;  %v18896_v63 = vpop.f32.mrf.mxu1 }
 0x580   :  { %v9122_v36 = vrot.slane %v9007_v44, 2  ;;  %v9047_v62 = vmax.f32 %v18831_v27, %v18896_v63 }
 0x581   :  { %v8960_v25 = vpop.f32.mrf.mxu1 }
 0x582   :  { %v9123_v42 = vsel %vm6029_vm7, %v9121_v43, %v9122_v36  ;;  %v9260_v54 = vmax.f32 %v9007_v44, %v9122_v36  ;;  %v9182_v33 = vrot.slane %v9047_v62, 2 }
 0x583   :  { %v9259_v31 = vmax.f32 %v9006_v32, %v9123_v42 }
 0x584   :  { %v9316_v14 = vmax.f32 %v9260_v54, 0.0  ;;  %v9183_v47 = vsel %vm6029_vm7, %v9181_v20, %v9182_v33  ;;  %v9300_v56 = vmax.f32 %v9047_v62, %v9182_v33 }
 0x585   :  { %v9315_v3 = vmax.f32 %v9259_v31, 0.0  ;;  %v9299_v48 = vmax.f32 %v9046_v12, %v9183_v47 }
 0x586   :  { %9373 = vst.msk [vmem:[%s19084_s3 + $0x28] sm:$0x3f] %vm9368_vm0, %v9316_v14  ;;  %v9356_v8 = vmax.f32 %v9300_v56, 0.0 }
 0x587   :  { %9372 = vst.msk [vmem:[%s19084_s3 + $0x20] sm:$0xff] %vm2837_vm4, %v9315_v3  ;;  %v9355_v27 = vmax.f32 %v9299_v48, 0.0 }
 0x588   :  { %9413 = vst.msk [vmem:[%s19084_s3 + $0x168] sm:$0x3f] %vm9368_vm0, %v9356_v8 }
 0x589   :  { %9412 = vst.msk [vmem:[%s19084_s3 + $0x160] sm:$0xff] %vm2837_vm4, %v9355_v27 }
 0x595   :  { %v18918_v21 = vpop.f32.mrf.mxu0 }
 0x596   :  { %v9008_v16 = vmax.f32 %v18853_v26, %v18918_v21 }
 0x597   :  { %v8789_v23 = vpop.f32.mrf.mxu0  ;;  %v18920_v58 = vpop.f32.mrf.mxu1 }
 0x598   :  { %v9048_v0 = vmax.f32 %v18855_v30, %v18920_v58  ;;  %v9124_v57 = vrot.slane %v9008_v16, 2 }
 0x599   :  { %v18924_v1 = vpop.f32.mrf.mxu0  ;;  %v8965_v5 = vpop.f32.mrf.mxu1 }
 0x59a   :  { %v9009_v4 = vmax.f32 %v8774_v61, %v18924_v1  ;;  %v9184_v7 = vrot.slane %v9048_v0, 2 }
 0x59b   :  { %v8792_v29 = vpop.f32.mrf.mxu0  ;;  %v18929_v46 = vpop.f32.mrf.mxu1 }
 0x59c   :  { %v9125_v49 = vrot.slane %v9009_v4, 2  ;;  %v9049_v38 = vmax.f32 %v18862_v13, %v18929_v46 }
 0x59d   :  { %v8968_v41 = vpop.f32.mrf.mxu1 }
 0x59e   :  { %v9126_v26 = vsel %vm6029_vm7, %v9124_v57, %v9125_v49  ;;  %v9262_v34 = vmax.f32 %v9009_v4, %v9125_v49  ;;  %v9185_v45 = vrot.slane %v9049_v38, 2 }
 0x59f   :  { %v9261_v19 = vmax.f32 %v9008_v16, %v9126_v26 }
 0x5a0   :  { %v9318_v2 = vmax.f32 %v9262_v34, 0.0  ;;  %v9186_v30 = vsel %vm6029_vm7, %v9184_v7, %v9185_v45  ;;  %v9302_v24 = vmax.f32 %v9049_v38, %v9185_v45 }
 0x5a1   :  { %v9317_v61 = vmax.f32 %v9261_v19, 0.0  ;;  %v9301_v6 = vmax.f32 %v9048_v0, %v9186_v30 }
 0x5a2   :  { %9375 = vst.msk [vmem:[%s19084_s3 + $0x38] sm:$0x3f] %vm9368_vm0, %v9318_v2  ;;  %v9358_v9 = vmax.f32 %v9302_v24, 0.0 }
 0x5a3   :  { %9374 = vst.msk [vmem:[%s19084_s3 + $0x30] sm:$0xff] %vm2837_vm4, %v9317_v61  ;;  %v9357_v13 = vmax.f32 %v9301_v6, 0.0 }
 0x5a4   :  { %9415 = vst.msk [vmem:[%s19084_s3 + $0x178] sm:$0x3f] %vm9368_vm0, %v9358_v9 }
 0x5a5   :  { %9414 = vst.msk [vmem:[%s19084_s3 + $0x170] sm:$0xff] %vm2837_vm4, %v9357_v13 }
 0x5b1   :  { %v8795_v59 = vpop.f32.mrf.mxu0 }
 0x5b2   :  { %v9010_v35 = vmax.f32 %v18884_v17, %v8795_v59 }
 0x5b3   :  { %v8797_v39 = vpop.f32.mrf.mxu0  ;;  %v18951_v28 = vpop.f32.mrf.mxu1 }
 0x5b4   :  { %v9050_v37 = vmax.f32 %v18886_v15, %v18951_v28  ;;  %v9127_v40 = vrot.slane %v9010_v35, 2 }
 0x5b5   :  { %v18954_v10 = vpop.f32.mrf.mxu0  ;;  %v8973_v60 = vpop.f32.mrf.mxu1 }
 0x5b6   :  { %v9011_v11 = vmax.f32 %v18890_v18, %v18954_v10  ;;  %v9187_v43 = vrot.slane %v9050_v37, 2 }
 0x5b7   :  { %v8800_v50 = vpop.f32.mrf.mxu0  ;;  %v18960_v32 = vpop.f32.mrf.mxu1 }
 0x5b8   :  { %v9128_v12 = vrot.slane %v9011_v11, 2  ;;  %v9051_v44 = vmax.f32 %v18896_v63, %v18960_v32 }
 0x5b9   :  { %v8976_v53 = vpop.f32.mrf.mxu1 }
 0x5ba   :  { %v9129_v17 = vsel %vm6029_vm7, %v9127_v40, %v9128_v12  ;;  %v9264_v36 = vmax.f32 %v9011_v11, %v9128_v12  ;;  %v9188_v62 = vrot.slane %v9051_v44, 2 }
 0x5bb   :  { %v9263_v25 = vmax.f32 %v9010_v35, %v9129_v17 }
 0x5bc   :  { %v9320_v20 = vmax.f32 %v9264_v36, 0.0  ;;  %v9189_v15 = vsel %vm6029_vm7, %v9187_v43, %v9188_v62  ;;  %v9304_v42 = vmax.f32 %v9051_v44, %v9188_v62 }
 0x5bd   :  { %v9319_v18 = vmax.f32 %v9263_v25, 0.0  ;;  %v9303_v54 = vmax.f32 %v9050_v37, %v9189_v15 }
 0x5be   :  { %9377 = vst.msk [vmem:[%s19084_s3 + $0x48] sm:$0x3f] %vm9368_vm0, %v9320_v20  ;;  %v9360_v33 = vmax.f32 %v9304_v42, 0.0 }
 0x5bf   :  { %9376 = vst.msk [vmem:[%s19084_s3 + $0x40] sm:$0xff] %vm2837_vm4, %v9319_v18  ;;  %v9359_v63 = vmax.f32 %v9303_v54, 0.0 }
 0x5c0   :  { %9417 = vst.msk [vmem:[%s19084_s3 + $0x188] sm:$0x3f] %vm9368_vm0, %v9360_v33 }
 0x5c1   :  { %9416 = vst.msk [vmem:[%s19084_s3 + $0x180] sm:$0xff] %vm2837_vm4, %v9359_v63 }
 0x5cd   :  { %v18982_v31 = vpop.f32.mrf.mxu0 }
 0x5ce   :  { %v9012_v56 = vmax.f32 %v18918_v21, %v18982_v31 }
 0x5cf   :  { %v8805_v14 = vpop.f32.mrf.mxu0  ;;  %v18984_v47 = vpop.f32.mrf.mxu1 }
 0x5d0   :  { %v9052_v8 = vmax.f32 %v18920_v58, %v18984_v47  ;;  %v9130_v5 = vrot.slane %v9012_v56, 2 }
 0x5d1   :  { %v18988_v3 = vpop.f32.mrf.mxu0  ;;  %v8981_v48 = vpop.f32.mrf.mxu1 }
 0x5d2   :  { %v9013_v27 = vmax.f32 %v18924_v1, %v18988_v3  ;;  %v9190_v57 = vrot.slane %v9052_v8, 2 }
 0x5d3   :  { %v8808_v23 = vpop.f32.mrf.mxu0  ;;  %v18994_v16 = vpop.f32.mrf.mxu1 }
 0x5d4   :  { %v9131_v0 = vrot.slane %v9013_v27, 2  ;;  %v9053_v4 = vmax.f32 %v18929_v46, %v18994_v16 }
 0x5d5   :  { %v8984_v29 = vpop.f32.mrf.mxu1 }
 0x5d6   :  { %v9132_v21 = vsel %vm6029_vm7, %v9130_v5, %v9131_v0  ;;  %v9266_v49 = vmax.f32 %v9013_v27, %v9131_v0  ;;  %v9191_v38 = vrot.slane %v9053_v4, 2 }
 0x5d7   :  { %v9265_v41 = vmax.f32 %v9012_v56, %v9132_v21 }
 0x5d8   :  { %v9322_v7 = vmax.f32 %v9266_v49, 0.0  ;;  %v9192_v58 = vsel %vm6029_vm7, %v9190_v57, %v9191_v38  ;;  %v9306_v26 = vmax.f32 %v9053_v4, %v9191_v38 }
 0x5d9   :  { %v9321_v1 = vmax.f32 %v9265_v41, 0.0  ;;  %v9305_v34 = vmax.f32 %v9052_v8, %v9192_v58 }
 0x5da   :  { %9379 = vst.msk [vmem:[%s19084_s3 + $0x58] sm:$0x3f] %vm9368_vm0, %v9322_v7  ;;  %v9362_v45 = vmax.f32 %v9306_v26, 0.0 }
 0x5db   :  { %9378 = vst.msk [vmem:[%s19084_s3 + $0x50] sm:$0xff] %vm2837_vm4, %v9321_v1  ;;  %v9361_v46 = vmax.f32 %v9305_v34, 0.0 }
 0x5dc   :  { %9419 = vst.msk [vmem:[%s19084_s3 + $0x198] sm:$0x3f] %vm9368_vm0, %v9362_v45 }
 0x5dd   :  { %9418 = vst.msk [vmem:[%s19084_s3 + $0x190] sm:$0xff] %vm2837_vm4, %v9361_v46 }
 0x5e9   :  { %v8811_v19 = vpop.f32.mrf.mxu0 }
 0x5ea   :  { %v9014_v2 = vmax.f32 %v8795_v59, %v8811_v19  ;;  %v9018_v61 = vmax.f32 %v8811_v19, %v18196_v22 }
 0x5eb   :  { %v8813_v30 = vpop.f32.mrf.mxu0  ;;  %v8987_v24 = vpop.f32.mrf.mxu1 }
 0x5ec   :  { %v9133_v35 = vrot.slane %v9014_v2, 2  ;;  %v9054_v60 = vmax.f32 %v18951_v28, %v8987_v24  ;;  %v9139_v50 = vrot.slane %v9018_v61, 2 }
 0x5ed   :  { %v8814_v6 = vpop.f32.mrf.mxu0  ;;  %v8989_v9 = vpop.f32.mrf.mxu1 }
 0x5ee   :  { %v9015_v13 = vmax.f32 %v18954_v10, %v8814_v6  ;;  %v9019_v39 = vmax.f32 %v8814_v6, %v18206_v55  ;;  %v9193_v10 = vrot.slane %v9054_v60, 2 }
 0x5ef   :  { %v8816_v37 = vpop.f32.mrf.mxu0  ;;  %v8990_v11 = vpop.f32.mrf.mxu1 }
 0x5f0   :  { %v9134_v40 = vrot.slane %v9015_v13, 2  ;;  %v9140_v12 = vrot.slane %v9019_v39, 2  ;;  %v9055_v59 = vmax.f32 %v18960_v32, %v8990_v11 }
 0x5f1   :  { %v8992_v44 = vpop.f32.mrf.mxu1 }
 0x5f2   :  { %v9135_v53 = vsel %vm6029_vm7, %v9133_v35, %v9134_v40  ;;  %v9141_v22 = vsel %vm6029_vm7, %v9139_v50, %v9140_v12  ;;  %v9268_v43 = vmax.f32 %v9015_v13, %v9134_v40  ;;  %v9272_v17 = vmax.f32 %v9019_v39, %v9140_v12 }
 0x5f3   :  { %v9267_v36 = vmax.f32 %v9014_v2, %v9135_v53  ;;  %v9271_v55 = vmax.f32 %v9018_v61, %v9141_v22  ;;  %v9194_v62 = vrot.slane %v9055_v59, 2 }
 0x5f4   :  { %v9324_v25 = vmax.f32 %v9268_v43, 0.0  ;;  %v9328_v28 = vmax.f32 %v9272_v17, 0.0 }
 0x5f5   :  { %v9323_v20 = vmax.f32 %v9267_v36, 0.0  ;;  %v9327_v15 = vmax.f32 %v9271_v55, 0.0  ;;  %v9195_v42 = vsel %vm6029_vm7, %v9193_v10, %v9194_v62  ;;  %v9308_v18 = vmax.f32 %v9055_v59, %v9194_v62 }
 0x5f6   :  { %9381 = vst.msk [vmem:[%s19084_s3 + $0x68] sm:$0x3f] %vm9368_vm0, %v9324_v25  ;;  %9385 = vst.msk [vmem:[%s19084_s3 + $0x88] sm:$0x3f] %vm9368_vm0, %v9328_v28  ;;  %v9307_v32 = vmax.f32 %v9054_v60, %v9195_v42 }
 0x5f7   :  { %9380 = vst.msk [vmem:[%s19084_s3 + $0x60] sm:$0xff] %vm2837_vm4, %v9323_v20  ;;  %9384 = vst.msk [vmem:[%s19084_s3 + $0x80] sm:$0xff] %vm2837_vm4, %v9327_v15  ;;  %v9364_v54 = vmax.f32 %v9308_v18, 0.0 }
 0x5f8   :  { %v9363_v33 = vmax.f32 %v9307_v32, 0.0 }
 0x5f9   :  { %9421 = vst.msk [vmem:[%s19084_s3 + $0x1a8] sm:$0x3f] %vm9368_vm0, %v9364_v54 }
 0x5fa   :  { %9420 = vst.msk [vmem:[%s19084_s3 + $0x1a0] sm:$0xff] %vm2837_vm4, %v9363_v33 }
 0x605   :  { %v8819_v63 = vpop.f32.mrf.mxu0 }
 0x606   :  { %v9016_v56 = vmax.f32 %v18982_v31, %v8819_v63  ;;  %v9020_v48 = vmax.f32 %v8819_v63, %v18226_v52 }
 0x607   :  { %v8821_v14 = vpop.f32.mrf.mxu0 }
 0x608   :  { %v8995_v8 = vpop.f32.mrf.mxu1  ;;  %v9136_v57 = vrot.slane %v9016_v56, 2  ;;  %v9142_v21 = vrot.slane %v9020_v48, 2 }
 0x609   :  { %v8822_v27 = vpop.f32.mrf.mxu0  ;;  %v9056_v4 = vmax.f32 %v18984_v47, %v8995_v8 }
 0x60a   :  { %v9017_v23 = vmax.f32 %v18988_v3, %v8822_v27  ;;  %v9021_v5 = vmax.f32 %v8822_v27, %v18246_v51  ;;  %v8997_v0 = vpop.f32.mrf.mxu1 }
 0x60b   :  { %v8824_v29 = vpop.f32.mrf.mxu0  ;;  %v9196_v1 = vrot.slane %v9056_v4, 2 }
 0x60c   :  { %v9137_v49 = vrot.slane %v9017_v23, 2  ;;  %v9143_v38 = vrot.slane %v9021_v5, 2  ;;  %v8998_v41 = vpop.f32.mrf.mxu1 }
 0x60d   :  { %v9057_v7 = vmax.f32 %v18994_v16, %v8998_v41 }
 0x60e   :  { %v9138_v31 = vsel %vm6029_vm7, %v9136_v57, %v9137_v49  ;;  %v9144_v52 = vsel %vm6029_vm7, %v9142_v21, %v9143_v38  ;;  %v9270_v58 = vmax.f32 %v9017_v23, %v9137_v49  ;;  %v9274_v26 = vmax.f32 %v9021_v5, %v9143_v38  ;;  %v9000_v3 = vpop.f32.mrf.mxu1 }
 0x60f   :  { %v9269_v51 = vmax.f32 %v9016_v56, %v9138_v31  ;;  %v9273_v34 = vmax.f32 %v9020_v48, %v9144_v52  ;;  %v9197_v45 = vrot.slane %v9057_v7, 2 }
 0x610   :  { %v9326_v47 = vmax.f32 %v9270_v58, 0.0  ;;  %v9330_v46 = vmax.f32 %v9274_v26, 0.0 }
 0x611   :  { %v9325_v19 = vmax.f32 %v9269_v51, 0.0  ;;  %v9329_v2 = vmax.f32 %v9273_v34, 0.0  ;;  %v9198_v30 = vsel %vm6029_vm7, %v9196_v1, %v9197_v45  ;;  %v9310_v24 = vmax.f32 %v9057_v7, %v9197_v45 }
 0x612   :  { %9383 = vst.msk [vmem:[%s19084_s3 + $0x78] sm:$0x3f] %vm9368_vm0, %v9326_v47  ;;  %9387 = vst.msk [vmem:[%s19084_s3 + $0x98] sm:$0x3f] %vm9368_vm0, %v9330_v46  ;;  %v9309_v16 = vmax.f32 %v9056_v4, %v9198_v30 }
 0x613   :  { %9382 = vst.msk [vmem:[%s19084_s3 + $0x70] sm:$0xff] %vm2837_vm4, %v9325_v19  ;;  %9386 = vst.msk [vmem:[%s19084_s3 + $0x90] sm:$0xff] %vm2837_vm4, %v9329_v2  ;;  %v9366_v61 = vmax.f32 %v9310_v24, 0.0 }
 0x614   :  { %v9365_v6 = vmax.f32 %v9309_v16, 0.0 }
 0x615   :  { %9423 = vst.msk [vmem:[%s19084_s3 + $0x1b8] sm:$0x3f] %vm9368_vm0, %v9366_v61 }
 0x616   :  { %9422 = vst.msk [vmem:[%s19084_s3 + $0x1b0] sm:$0xff] %vm2837_vm4, %v9365_v6 }

</bundles_post_ra>
